<compile_context>
chip_gen: v5e
topology: v5e:2x2
jax: 0.10.0
libtpu: 0.0.40
codegen_flags: <defaults>
</compile_context>

<pallas_src>
import numpy as np
import jax
import jax.numpy as jnp
from jax.experimental import pallas as pl
from jax.experimental.pallas import tpu as pltpu

IDEN = jnp.array([1, 0, 0, 0, 1, 0, 0, 0, 1], jnp.float32)  # flattened 3x3 identity


# ------------------------------- Pallas kernel --------------------------------
def pointnet_encoder_kernel(
    x_ref,                                   # (bblk, nchunk, 3) f32
    sw1, ss1, sw2, ss2, sw3, ss3,            # STN3d conv1..3   (bf16 W, f32 shift; BN folded)
    sf1w, sf1s, sf2w, sf2s, sf3w, sf3b,      # STN3d fc1..3     (fc3 padded to 128 cols, identity in bias)
    e1w, es1, ew2, es2, ew3, es3,            # encoder conv1..3 (conv1 given as E: (128,192), Teff = t @ E)
    gfeat_ref,                               # (bblk, 1024) f32 out
    trans_ref,                               # (bblk, 128)  f32 out (lane-dense; cols 0..8 = 3x3 transform)
    mx_ref,                                  # (bblk, 1024) f32 scratch: running max over points
    t_ref,                                   # (bblk, 128)  f32 scratch: transform carried phase 0 -> 1
):
    bblk, nchunk, _ = x_ref.shape
    rows = bblk * nchunk
    phase = pl.program_id(1)
    n = pl.program_id(2)
    n_last = pl.num_programs(2) - 1

    # Reset the running-max accumulator at the start of each pass over the points.
    @pl.when(n == 0)
    def _init():
        mx_ref[...] = jnp.full(mx_ref.shape, -jnp.inf, mx_ref.dtype)

    x3 = x_ref[...]                          # (bblk, nchunk, 3) f32

    def dot_act(h, w_ref, s_ref, act=True):
        # bf16 x bf16 MXU matmul, f32 accumulation; shift + ReLU stay in f32 on the VPU.
        y = jnp.dot(h.astype(jnp.bfloat16), w_ref[...],
                    preferred_element_type=jnp.float32) + s_ref[...]
        return jnp.maximum(y, 0.0) if act else y

    # ---------------- phase 0: STN3d -> 3x3 input transform -------------------
    @pl.when(phase == 0)
    def _stn():
        h = dot_act(x3.reshape(rows, 3), sw1, ss1)                # (rows, 64)
        h = dot_act(h, sw2, ss2)                                  # (rows, 128)
        h = dot_act(h, sw3, ss3)                                  # (rows, 1024)
        cmax = jnp.max(h.reshape(bblk, nchunk, 1024), axis=1)     # (bblk, 1024)
        mx_ref[...] = jnp.maximum(mx_ref[...], cmax)

        @pl.when(n == n_last)
        def _fc():                                                # once per batch block
            g = mx_ref[...]                                       # (bblk, 1024)
            g = dot_act(g, sf1w, sf1s)                            # (bblk, 512)
            g = dot_act(g, sf2w, sf2s)                            # (bblk, 256)
            t = dot_act(g, sf3w, sf3b, act=False)                 # (bblk, 128), identity folded in bias
            trans_ref[...] = t                                    # lane-dense store
            t_ref[...] = t                                        # carried into phase 1

    # ---------------- phase 1: encoder MLP (transform folded into conv1) ------
    @pl.when(phase == 1)
    def _enc():
        # Teff[b, j, :] = sum_i T[b, j, i] * W1[i, :]  ==  (t @ E)[b, 64*j : 64*(j+1)]
        teff = jnp.dot(t_ref[...].astype(jnp.bfloat16), e1w[...],
                       preferred_element_type=jnp.float32)        # (bblk, 192)
        h = (x3[:, :, 0:1] * teff[:, None, 0:64]
             + x3[:, :, 1:2] * teff[:, None, 64:128]
             + x3[:, :, 2:3] * teff[:, None, 128:192])            # (bblk, nchunk, 64)
        h = jnp.maximum(h + es1[...], 0.0)                        # conv1 + bn1 + relu
        h = dot_act(h.reshape(rows, 64), ew2, es2)                # (rows, 128)
        h = dot_act(h, ew3, es3, act=False)                       # (rows, 1024)  bn3, no relu
        cmax = jnp.max(h.reshape(bblk, nchunk, 1024), axis=1)
        mx_ref[...] = jnp.maximum(mx_ref[...], cmax)

        @pl.when(n == n_last)
        def _store():
            gfeat_ref[...] = mx_ref[...]


# --------------------------------- wrapper ------------------------------------
def _pick_bblk(B):
    """Largest divisor of B that keeps >=2 batch grid steps (v7x megacore) and blocks small."""
    if B <= 1:
        return 1
    cap = min(8, B // 2)
    best = 1
    for d in range(1, cap + 1):
        if B % d == 0:
            best = d
    return best


def _pick_nchunk(N, bblk):
    """Largest 128-multiple divisor of N with bblk*nchunk <= ~2048 rows per step."""
    if N % 128 == 0:
        target = max(128, 2048 // bblk)
        best = 128
        c = 128
        while c <= min(N, target):
            if N % c == 0:
                best = c
            c += 128
        return best
    return N        # fallback: single chunk (block == full dim is always legal)


def pointnet_encoder(x_bcn, weights, *, bblk=None, nchunk=None):
    """x_bcn: (B, 3, N) float32 (PyTorch layout). Returns (gfeat (B,1024), trans (B,3,3), None)."""
    B, C, N = x_bcn.shape
    assert C == 3
    x_bnc = jnp.transpose(x_bcn, (0, 2, 1)).astype(jnp.float32)   # (B, N, 3)

    if bblk is None:
        bblk = _pick_bblk(B)
    assert B % bblk == 0
    nb = B // bblk
    if nchunk is None:
        nchunk = _pick_nchunk(N, bblk)
    assert N % nchunk == 0

    grid = (nb, 2, N // nchunk)   # (batch blocks, phase: 0=STN / 1=encoder, point chunks)

    def const_spec(shape):
        nd = len(shape)
        # Constant index map -> the block is fetched once; single-buffering it
        # (pipeline_mode=pl.Buffered(1)) would also halve its VMEM (~1.9 MiB bf16 total),
        # kept default double-buffering for lowering robustness.
        return pl.BlockSpec(tuple(shape), lambda b, p, n, _nd=nd: (0,) * _nd)

    in_specs = ([pl.BlockSpec((bblk, nchunk, 3), lambda b, p, n: (b, n, 0))]
                + [const_spec(w.shape) for w in weights])
    # Outputs laid out as (nb, bblk, C) so the last-two block dims equal the full array dims
    # for any bblk (keeps the (8,128) block rule satisfied even when bblk == 1).
    out_specs = [
        pl.BlockSpec((None, bblk, 1024), lambda b, p, n: (b, 0, 0)),
        pl.BlockSpec((None, bblk, 128), lambda b, p, n: (b, 0, 0)),
    ]
    out_shape = [
        jax.ShapeDtypeStruct((nb, bblk, 1024), jnp.float32),
        jax.ShapeDtypeStruct((nb, bblk, 128), jnp.float32),
    ]

    gfeat3, trans3 = pl.pallas_call(
        pointnet_encoder_kernel,
        grid=grid,
        in_specs=in_specs,
        out_specs=out_specs,
        out_shape=out_shape,
        scratch_shapes=[
            pltpu.VMEM((bblk, 1024), jnp.float32),   # running max over points
            pltpu.VMEM((bblk, 128), jnp.float32),    # transform carried phase 0 -> phase 1
        ],
        compiler_params=pltpu.CompilerParams(
            dimension_semantics=("parallel", "arbitrary", "arbitrary"),
            vmem_limit_bytes=40 * 1024 * 1024,       # footprint by design ~<=20 MiB; fits v7x 64 MiB/TC
        ),
    )(x_bnc, *weights)

    gfeat = gfeat3.reshape(B, 1024)
    trans = trans3.reshape(B, 128)[:, :9].reshape(B, 3, 3)
    return gfeat, trans, None


# ----------------------- deterministic parameter setup ------------------------
def make_params(key):
    eps = 1e-5
    kit = iter(jax.random.split(key, 64))

    def folded(cin, cout):
        """Conv1d(k=1)/Linear weight + bias with eval-mode BatchNorm folded in. bf16 W, f32 shift."""
        w = jax.random.normal(next(kit), (cin, cout), jnp.float32) / np.sqrt(cin)
        b = 0.05 * jax.random.normal(next(kit), (cout,), jnp.float32)
        gamma = 1.0 + 0.1 * jax.random.normal(next(kit), (cout,), jnp.float32)
        beta = 0.1 * jax.random.normal(next(kit), (cout,), jnp.float32)
        mean = 0.1 * jax.random.normal(next(kit), (cout,), jnp.float32)
        var = jnp.abs(1.0 + 0.1 * jax.random.normal(next(kit), (cout,), jnp.float32))
        scale = gamma / jnp.sqrt(var + eps)
        w_eff = (w * scale[None, :]).astype(jnp.bfloat16)
        shift = ((b - mean) * scale + beta).reshape(1, cout).astype(jnp.float32)
        return w_eff, shift

    def plain_padded(cin, cout, pad_to, extra_bias=None):
        """Linear weight + bias zero-padded to `pad_to` output lanes (lane-dense store)."""
        w = jax.random.normal(next(kit), (cin, cout), jnp.float32) / np.sqrt(cin)
        b = 0.05 * jax.random.normal(next(kit), (cout,), jnp.float32)
        if extra_bias is not None:
            b = b + extra_bias
        w_pad = jnp.zeros((cin, pad_to), jnp.float32).at[:, :cout].set(w).astype(jnp.bfloat16)
        b_pad = jnp.zeros((1, pad_to), jnp.float32).at[:, :cout].set(b)
        return w_pad, b_pad

    sw1, ss1 = folded(3, 64)        # STN3d conv1 + bn1
    sw2, ss2 = folded(64, 128)      # STN3d conv2 + bn2
    sw3, ss3 = folded(128, 1024)    # STN3d conv3 + bn3
    sf1w, sf1s = folded(1024, 512)  # STN3d fc1 + bn4
    sf2w, sf2s = folded(512, 256)   # STN3d fc2 + bn5
    sf3w, sf3b = plain_padded(256, 9, 128, extra_bias=IDEN)  # STN3d fc3 (+identity), 128 lanes
    ew1, es1 = folded(3, 64)        # encoder conv1 + bn1
    ew2, es2 = folded(64, 128)      # encoder conv2 + bn2
    ew3, es3 = folded(128, 1024)    # encoder conv3 + bn3

    # E: (128, 192) with (t @ E)[:, 64*j + o] = sum_i t[:, 3*j + i] * ew1[i, o]
    # (rows 9..127 zero so the padded lanes of t never contribute).
    ew1_f32 = ew1.astype(jnp.float32)
    E = jnp.zeros((128, 192), jnp.float32)
    for j in range(3):
        E = E.at[3 * j:3 * j + 3, 64 * j:64 * (j + 1)].set(ew1_f32)
    e1w = E.astype(jnp.bfloat16)

    return [sw1, ss1, sw2, ss2, sw3, ss3,
            sf1w, sf1s, sf2w, sf2s, sf3w, sf3b,
            e1w, es1, ew2, es2, ew3, es3]


# ----------------------------- pure-JAX reference -----------------------------
def reference(x_bcn, weights):
    """Mirrors the kernel math (same bf16 weights, same fold of T into conv1)."""
    (sw1, ss1, sw2, ss2, sw3, ss3,
     sf1w, sf1s, sf2w, sf2s, sf3w, sf3b,
     e1w, es1, ew2, es2, ew3, es3) = weights
    x = jnp.transpose(x_bcn, (0, 2, 1)).astype(jnp.float32)      # (B, N, 3)
    B, N, _ = x.shape

    def dot_act(h, w, s, act=True):
        y = jnp.dot(h.astype(jnp.bfloat16), w, preferred_element_type=jnp.float32) + s
        return jnp.maximum(y, 0.0) if act else y

    h = dot_act(x.reshape(B * N, 3), sw1, ss1)
    h = dot_act(h, sw2, ss2)
    h = dot_act(h, sw3, ss3)
    g = jnp.max(h.reshape(B, N, 1024), axis=1)                   # (B, 1024)
    g = dot_act(g, sf1w, sf1s)
    g = dot_act(g, sf2w, sf2s)
    t = dot_act(g, sf3w, sf3b, act=False)                        # (B, 128)
    trans = t[:, :9].reshape(B, 3, 3)

    teff = jnp.dot(t.astype(jnp.bfloat16), e1w, preferred_element_type=jnp.float32)  # (B, 192)
    h = (x[:, :, 0:1] * teff[:, None, 0:64]
         + x[:, :, 1:2] * teff[:, None, 64:128]
         + x[:, :, 2:3] * teff[:, None, 128:192])
    h = jnp.maximum(h + es1, 0.0)
    h = dot_act(h.reshape(B * N, 64), ew2, es2)
    h = dot_act(h, ew3, es3, act=False)
    gfeat = jnp.max(h.reshape(B, N, 1024), axis=1)
    return gfeat, trans


# ----------------------------------- main -------------------------------------
if __name__ == "__main__":
    key = jax.random.PRNGKey(0)
    kx, kp = jax.random.split(key)

    B, C, N = 2, 3, 1024
    x = jax.random.normal(kx, (B, C, N), jnp.float32)    # PyTorch (B, D, N) layout
    weights = make_params(kp)

    # nchunk=256 -> 4 point chunks per phase: exercises the streaming max-pool path.
    gfeat, trans, trans_feat = pointnet_encoder(x, weights, nchunk=256)
    gfeat = jax.block_until_ready(gfeat)
    trans = jax.block_until_ready(trans)

    gfeat_exp, trans_exp = reference(x, weights)
    np.testing.assert_allclose(np.asarray(gfeat), np.asarray(gfeat_exp), rtol=5e-3, atol=5e-3)
    np.testing.assert_allclose(np.asarray(trans), np.asarray(trans_exp), rtol=5e-3, atol=5e-3)
    assert trans_feat is None and gfeat.shape == (B, 1024) and trans.shape == (B, 3, 3)

    print("KERNEL_OK")
</pallas_src>

<mosaic_0001>
module attributes {stable_mosaic.version = 11 : i64} {
  func.func @pointnet_encoder_kernel(%arg0: i32, %arg1: i32, %arg2: i32, %arg3: memref<1x256x3xf32, #tpu.memory_space<vmem>>, %arg4: memref<3x64xbf16, #tpu.memory_space<vmem>>, %arg5: memref<1x64xf32, #tpu.memory_space<vmem>>, %arg6: memref<64x128xbf16, #tpu.memory_space<vmem>>, %arg7: memref<1x128xf32, #tpu.memory_space<vmem>>, %arg8: memref<128x1024xbf16, #tpu.memory_space<vmem>>, %arg9: memref<1x1024xf32, #tpu.memory_space<vmem>>, %arg10: memref<1024x512xbf16, #tpu.memory_space<vmem>>, %arg11: memref<1x512xf32, #tpu.memory_space<vmem>>, %arg12: memref<512x256xbf16, #tpu.memory_space<vmem>>, %arg13: memref<1x256xf32, #tpu.memory_space<vmem>>, %arg14: memref<256x128xbf16, #tpu.memory_space<vmem>>, %arg15: memref<1x128xf32, #tpu.memory_space<vmem>>, %arg16: memref<128x192xbf16, #tpu.memory_space<vmem>>, %arg17: memref<1x64xf32, #tpu.memory_space<vmem>>, %arg18: memref<64x128xbf16, #tpu.memory_space<vmem>>, %arg19: memref<1x128xf32, #tpu.memory_space<vmem>>, %arg20: memref<128x1024xbf16, #tpu.memory_space<vmem>>, %arg21: memref<1x1024xf32, #tpu.memory_space<vmem>>, %arg22: memref<1x1x1024xf32, #tpu.memory_space<vmem>>, %arg23: memref<1x1x128xf32, #tpu.memory_space<vmem>>, %arg24: memref<1x1024xf32, #tpu.memory_space<vmem>>, %arg25: memref<1x128xf32, #tpu.memory_space<vmem>>) attributes {dimension_semantics = [#tpu.dimension_semantics<parallel>, #tpu.dimension_semantics<arbitrary>, #tpu.dimension_semantics<arbitrary>], iteration_bounds = array<i64: 2, 2, 4>, scalar_prefetch = 0 : i64, scratch_operands = 2 : i64, tpu.core_type = #tpu.core_type<tc>, window_params = [{transform_indices = @transform_0, window_bounds = array<i64: 1, 256, 3>}, {pipeline_mode = #tpu.pipeline_mode<synchronous>, transform_indices = @transform_1, window_bounds = array<i64: 3, 64>}, {pipeline_mode = #tpu.pipeline_mode<synchronous>, transform_indices = @transform_2, window_bounds = array<i64: 1, 64>}, {pipeline_mode = #tpu.pipeline_mode<synchronous>, transform_indices = @transform_3, window_bounds = array<i64: 64, 128>}, {pipeline_mode = #tpu.pipeline_mode<synchronous>, transform_indices = @transform_4, window_bounds = array<i64: 1, 128>}, {pipeline_mode = #tpu.pipeline_mode<synchronous>, transform_indices = @transform_5, window_bounds = array<i64: 128, 1024>}, {pipeline_mode = #tpu.pipeline_mode<synchronous>, transform_indices = @transform_6, window_bounds = array<i64: 1, 1024>}, {pipeline_mode = #tpu.pipeline_mode<synchronous>, transform_indices = @transform_7, window_bounds = array<i64: 1024, 512>}, {pipeline_mode = #tpu.pipeline_mode<synchronous>, transform_indices = @transform_8, window_bounds = array<i64: 1, 512>}, {pipeline_mode = #tpu.pipeline_mode<synchronous>, transform_indices = @transform_9, window_bounds = array<i64: 512, 256>}, {pipeline_mode = #tpu.pipeline_mode<synchronous>, transform_indices = @transform_10, window_bounds = array<i64: 1, 256>}, {pipeline_mode = #tpu.pipeline_mode<synchronous>, transform_indices = @transform_11, window_bounds = array<i64: 256, 128>}, {pipeline_mode = #tpu.pipeline_mode<synchronous>, transform_indices = @transform_12, window_bounds = array<i64: 1, 128>}, {pipeline_mode = #tpu.pipeline_mode<synchronous>, transform_indices = @transform_13, window_bounds = array<i64: 128, 192>}, {pipeline_mode = #tpu.pipeline_mode<synchronous>, transform_indices = @transform_14, window_bounds = array<i64: 1, 64>}, {pipeline_mode = #tpu.pipeline_mode<synchronous>, transform_indices = @transform_15, window_bounds = array<i64: 64, 128>}, {pipeline_mode = #tpu.pipeline_mode<synchronous>, transform_indices = @transform_16, window_bounds = array<i64: 1, 128>}, {pipeline_mode = #tpu.pipeline_mode<synchronous>, transform_indices = @transform_17, window_bounds = array<i64: 128, 1024>}, {pipeline_mode = #tpu.pipeline_mode<synchronous>, transform_indices = @transform_18, window_bounds = array<i64: 1, 1024>}, {transform_indices = @transform_19, window_bounds = array<i64: 1, 1, 1024>}, {transform_indices = @transform_20, window_bounds = array<i64: 1, 1, 128>}]} {
    %c0_i32 = arith.constant 0 : i32
    %0 = arith.cmpi eq, %arg2, %c0_i32 : i32
    %1 = arith.extui %0 : i1 to i32
    %c0_i32_0 = arith.constant 0 : i32
    %2 = arith.cmpi ne, %1, %c0_i32_0 : i32
    scf.if %2 {
      %cst = arith.constant 0xFF800000 : f32
      %10 = vector.broadcast %cst : f32 to vector<1x1024xf32>
      %c0_6 = arith.constant 0 : index
      %c0_7 = arith.constant 0 : index
      %11 = vector.load %arg24[%c0_6, %c0_7] : memref<1x1024xf32, #tpu.memory_space<vmem>>, vector<1x1024xf32>
      tpu.vector_store %arg24[%c0_6, %c0_7], %10 {strides = array<i32>} : memref<1x1024xf32, #tpu.memory_space<vmem>>, vector<1x1024xf32>,
    } else {
    }
    %c0 = arith.constant 0 : index
    %c0_1 = arith.constant 0 : index
    %c0_2 = arith.constant 0 : index
    %3 = vector.load %arg3[%c0, %c0_1, %c0_2] : memref<1x256x3xf32, #tpu.memory_space<vmem>>, vector<1x256x3xf32>
    %c0_i32_3 = arith.constant 0 : i32
    %4 = arith.cmpi eq, %arg1, %c0_i32_3 : i32
    %5 = arith.extui %4 : i1 to i32
    %c0_i32_4 = arith.constant 0 : i32
    %6 = arith.cmpi ne, %5, %c0_i32_4 : i32
    scf.if %6 {
      %10 = vector.shape_cast %3 : vector<1x256x3xf32> to vector<256x3xf32>
      %11 = arith.truncf %10 : vector<256x3xf32> to vector<256x3xbf16>
      %c0_6 = arith.constant 0 : index
      %c0_7 = arith.constant 0 : index
      %12 = vector.load %arg4[%c0_6, %c0_7] : memref<3x64xbf16, #tpu.memory_space<vmem>>, vector<3x64xbf16>
      %cst = arith.constant dense<0.000000e+00> : vector<256x64xf32>
      %13 = tpu.matmul %11, %12, %cst {dimension_numbers = #tpu.dot_dimension_numbers<[1], [0], [0], [1], [0, 0, 1, 1], [], []>} : vector<256x3xbf16>, vector<3x64xbf16>, vector<256x64xf32> -> vector<256x64xf32>
      %c0_8 = arith.constant 0 : index
      %c0_9 = arith.constant 0 : index
      %14 = vector.load %arg5[%c0_8, %c0_9] : memref<1x64xf32, #tpu.memory_space<vmem>>, vector<1x64xf32>
      %15 = vector.broadcast %14 : vector<1x64xf32> to vector<256x64xf32>
      %16 = arith.addf %13, %15 : vector<256x64xf32>
      %cst_10 = arith.constant 0.000000e+00 : f32
      %17 = vector.broadcast %cst_10 : f32 to vector<256x64xf32>
      %18 = arith.maximumf %16, %17 : vector<256x64xf32>
      %19 = arith.truncf %18 : vector<256x64xf32> to vector<256x64xbf16>
      %c0_11 = arith.constant 0 : index
      %c0_12 = arith.constant 0 : index
      %20 = vector.load %arg6[%c0_11, %c0_12] : memref<64x128xbf16, #tpu.memory_space<vmem>>, vector<64x128xbf16>
      %cst_13 = arith.constant dense<0.000000e+00> : vector<256x128xf32>
      %21 = tpu.matmul %19, %20, %cst_13 {dimension_numbers = #tpu.dot_dimension_numbers<[1], [0], [0], [1], [0, 0, 1, 1], [], []>} : vector<256x64xbf16>, vector<64x128xbf16>, vector<256x128xf32> -> vector<256x128xf32>
      %c0_14 = arith.constant 0 : index
      %c0_15 = arith.constant 0 : index
      %22 = vector.load %arg7[%c0_14, %c0_15] : memref<1x128xf32, #tpu.memory_space<vmem>>, vector<1x128xf32>
      %23 = vector.broadcast %22 : vector<1x128xf32> to vector<256x128xf32>
      %24 = arith.addf %21, %23 : vector<256x128xf32>
      %cst_16 = arith.constant 0.000000e+00 : f32
      %25 = vector.broadcast %cst_16 : f32 to vector<256x128xf32>
      %26 = arith.maximumf %24, %25 : vector<256x128xf32>
      %27 = arith.truncf %26 : vector<256x128xf32> to vector<256x128xbf16>
      %c0_17 = arith.constant 0 : index
      %c0_18 = arith.constant 0 : index
      %28 = vector.load %arg8[%c0_17, %c0_18] : memref<128x1024xbf16, #tpu.memory_space<vmem>>, vector<128x1024xbf16>
      %cst_19 = arith.constant dense<0.000000e+00> : vector<256x1024xf32>
      %29 = tpu.matmul %27, %28, %cst_19 {dimension_numbers = #tpu.dot_dimension_numbers<[1], [0], [0], [1], [0, 0, 1, 1], [], []>} : vector<256x128xbf16>, vector<128x1024xbf16>, vector<256x1024xf32> -> vector<256x1024xf32>
      %c0_20 = arith.constant 0 : index
      %c0_21 = arith.constant 0 : index
      %30 = vector.load %arg9[%c0_20, %c0_21] : memref<1x1024xf32, #tpu.memory_space<vmem>>, vector<1x1024xf32>
      %31 = vector.broadcast %30 : vector<1x1024xf32> to vector<256x1024xf32>
      %32 = arith.addf %29, %31 : vector<256x1024xf32>
      %cst_22 = arith.constant 0.000000e+00 : f32
      %33 = vector.broadcast %cst_22 : f32 to vector<256x1024xf32>
      %34 = arith.maximumf %32, %33 : vector<256x1024xf32>
      %35 = vector.shape_cast %34 : vector<256x1024xf32> to vector<1x256x1024xf32>
      %cst_23 = arith.constant dense<0xFF800000> : vector<1x1024xf32>
      %36 = vector.multi_reduction <maximumf>, %35, %cst_23 [1] : vector<1x256x1024xf32> to vector<1x1024xf32>
      %c0_24 = arith.constant 0 : index
      %c0_25 = arith.constant 0 : index
      %37 = vector.load %arg24[%c0_24, %c0_25] : memref<1x1024xf32, #tpu.memory_space<vmem>>, vector<1x1024xf32>
      %38 = arith.maximumf %37, %36 : vector<1x1024xf32>
      %c0_26 = arith.constant 0 : index
      %c0_27 = arith.constant 0 : index
      %39 = vector.load %arg24[%c0_26, %c0_27] : memref<1x1024xf32, #tpu.memory_space<vmem>>, vector<1x1024xf32>
      tpu.vector_store %arg24[%c0_26, %c0_27], %38 {strides = array<i32>} : memref<1x1024xf32, #tpu.memory_space<vmem>>, vector<1x1024xf32>,
      %c3_i32 = arith.constant 3 : i32
      %40 = arith.cmpi eq, %arg2, %c3_i32 : i32
      %41 = arith.extui %40 : i1 to i32
      %c0_i32_28 = arith.constant 0 : i32
      %42 = arith.cmpi ne, %41, %c0_i32_28 : i32
      scf.if %42 {
        %c0_29 = arith.constant 0 : index
        %c0_30 = arith.constant 0 : index
        %43 = vector.load %arg24[%c0_29, %c0_30] : memref<1x1024xf32, #tpu.memory_space<vmem>>, vector<1x1024xf32>
        %44 = arith.truncf %43 : vector<1x1024xf32> to vector<1x1024xbf16>
        %c0_31 = arith.constant 0 : index
        %c0_32 = arith.constant 0 : index
        %45 = vector.load %arg10[%c0_31, %c0_32] : memref<1024x512xbf16, #tpu.memory_space<vmem>>, vector<1024x512xbf16>
        %cst_33 = arith.constant dense<0.000000e+00> : vector<1x512xf32>
        %46 = tpu.matmul %44, %45, %cst_33 {dimension_numbers = #tpu.dot_dimension_numbers<[1], [0], [0], [1], [0, 0, 1, 1], [], []>} : vector<1x1024xbf16>, vector<1024x512xbf16>, vector<1x512xf32> -> vector<1x512xf32>
        %c0_34 = arith.constant 0 : index
        %c0_35 = arith.constant 0 : index
        %47 = vector.load %arg11[%c0_34, %c0_35] : memref<1x512xf32, #tpu.memory_space<vmem>>, vector<1x512xf32>
        %48 = arith.addf %46, %47 : vector<1x512xf32>
        %cst_36 = arith.constant 0.000000e+00 : f32
        %49 = vector.broadcast %cst_36 : f32 to vector<1x512xf32>
        %50 = arith.maximumf %48, %49 : vector<1x512xf32>
        %51 = arith.truncf %50 : vector<1x512xf32> to vector<1x512xbf16>
        %c0_37 = arith.constant 0 : index
        %c0_38 = arith.constant 0 : index
        %52 = vector.load %arg12[%c0_37, %c0_38] : memref<512x256xbf16, #tpu.memory_space<vmem>>, vector<512x256xbf16>
        %cst_39 = arith.constant dense<0.000000e+00> : vector<1x256xf32>
        %53 = tpu.matmul %51, %52, %cst_39 {dimension_numbers = #tpu.dot_dimension_numbers<[1], [0], [0], [1], [0, 0, 1, 1], [], []>} : vector<1x512xbf16>, vector<512x256xbf16>, vector<1x256xf32> -> vector<1x256xf32>
        %c0_40 = arith.constant 0 : index
        %c0_41 = arith.constant 0 : index
        %54 = vector.load %arg13[%c0_40, %c0_41] : memref<1x256xf32, #tpu.memory_space<vmem>>, vector<1x256xf32>
        %55 = arith.addf %53, %54 : vector<1x256xf32>
        %cst_42 = arith.constant 0.000000e+00 : f32
        %56 = vector.broadcast %cst_42 : f32 to vector<1x256xf32>
        %57 = arith.maximumf %55, %56 : vector<1x256xf32>
        %58 = arith.truncf %57 : vector<1x256xf32> to vector<1x256xbf16>
        %c0_43 = arith.constant 0 : index
        %c0_44 = arith.constant 0 : index
        %59 = vector.load %arg14[%c0_43, %c0_44] : memref<256x128xbf16, #tpu.memory_space<vmem>>, vector<256x128xbf16>
        %cst_45 = arith.constant dense<0.000000e+00> : vector<1x128xf32>
        %60 = tpu.matmul %58, %59, %cst_45 {dimension_numbers = #tpu.dot_dimension_numbers<[1], [0], [0], [1], [0, 0, 1, 1], [], []>} : vector<1x256xbf16>, vector<256x128xbf16>, vector<1x128xf32> -> vector<1x128xf32>
        %c0_46 = arith.constant 0 : index
        %c0_47 = arith.constant 0 : index
        %61 = vector.load %arg15[%c0_46, %c0_47] : memref<1x128xf32, #tpu.memory_space<vmem>>, vector<1x128xf32>
        %62 = arith.addf %60, %61 : vector<1x128xf32>
        %c0_48 = arith.constant 0 : index
        %c0_49 = arith.constant 0 : index
        %c0_50 = arith.constant 0 : index
        %63 = vector.load %arg23[%c0_48, %c0_49, %c0_50] : memref<1x1x128xf32, #tpu.memory_space<vmem>>, vector<1x1x128xf32>
        %64 = vector.shape_cast %63 : vector<1x1x128xf32> to vector<1x128xf32>
        %65 = vector.shape_cast %62 : vector<1x128xf32> to vector<1x1x128xf32>
        tpu.vector_store %arg23[%c0_48, %c0_49, %c0_50], %65 {strides = array<i32>} : memref<1x1x128xf32, #tpu.memory_space<vmem>>, vector<1x1x128xf32>,
        %c0_51 = arith.constant 0 : index
        %c0_52 = arith.constant 0 : index
        %66 = vector.load %arg25[%c0_51, %c0_52] : memref<1x128xf32, #tpu.memory_space<vmem>>, vector<1x128xf32>
        tpu.vector_store %arg25[%c0_51, %c0_52], %62 {strides = array<i32>} : memref<1x128xf32, #tpu.memory_space<vmem>>, vector<1x128xf32>,
      } else {
      }
    } else {
    }
    %c1_i32 = arith.constant 1 : i32
    %7 = arith.cmpi eq, %arg1, %c1_i32 : i32
    %8 = arith.extui %7 : i1 to i32
    %c0_i32_5 = arith.constant 0 : i32
    %9 = arith.cmpi ne, %8, %c0_i32_5 : i32
    scf.if %9 {
      %c0_6 = arith.constant 0 : index
      %c0_7 = arith.constant 0 : index
      %10 = vector.load %arg25[%c0_6, %c0_7] : memref<1x128xf32, #tpu.memory_space<vmem>>, vector<1x128xf32>
      %11 = arith.truncf %10 : vector<1x128xf32> to vector<1x128xbf16>
      %c0_8 = arith.constant 0 : index
      %c0_9 = arith.constant 0 : index
      %12 = vector.load %arg16[%c0_8, %c0_9] : memref<128x192xbf16, #tpu.memory_space<vmem>>, vector<128x192xbf16>
      %cst = arith.constant dense<0.000000e+00> : vector<1x192xf32>
      %13 = tpu.matmul %11, %12, %cst {dimension_numbers = #tpu.dot_dimension_numbers<[1], [0], [0], [1], [0, 0, 1, 1], [], []>} : vector<1x128xbf16>, vector<128x192xbf16>, vector<1x192xf32> -> vector<1x192xf32>
      %14 = vector.extract_strided_slice %3 {offsets = [0, 0, 0], sizes = [1, 256, 1], strides = [1, 1, 1]} : vector<1x256x3xf32> to vector<1x256x1xf32>
      %15 = vector.extract_strided_slice %13 {offsets = [0, 0], sizes = [1, 64], strides = [1, 1]} : vector<1x192xf32> to vector<1x64xf32>
      %16 = vector.shape_cast %15 : vector<1x64xf32> to vector<1x1x64xf32>
      %17 = vector.broadcast %14 : vector<1x256x1xf32> to vector<1x256x64xf32>
      %18 = vector.broadcast %16 : vector<1x1x64xf32> to vector<1x256x64xf32>
      %19 = arith.mulf %17, %18 : vector<1x256x64xf32>
      %20 = vector.extract_strided_slice %3 {offsets = [0, 0, 1], sizes = [1, 256, 1], strides = [1, 1, 1]} : vector<1x256x3xf32> to vector<1x256x1xf32>
      %21 = vector.extract_strided_slice %13 {offsets = [0, 64], sizes = [1, 64], strides = [1, 1]} : vector<1x192xf32> to vector<1x64xf32>
      %22 = vector.shape_cast %21 : vector<1x64xf32> to vector<1x1x64xf32>
      %23 = vector.broadcast %20 : vector<1x256x1xf32> to vector<1x256x64xf32>
      %24 = vector.broadcast %22 : vector<1x1x64xf32> to vector<1x256x64xf32>
      %25 = arith.mulf %23, %24 : vector<1x256x64xf32>
      %26 = arith.addf %19, %25 : vector<1x256x64xf32>
      %27 = vector.extract_strided_slice %3 {offsets = [0, 0, 2], sizes = [1, 256, 1], strides = [1, 1, 1]} : vector<1x256x3xf32> to vector<1x256x1xf32>
      %28 = vector.extract_strided_slice %13 {offsets = [0, 128], sizes = [1, 64], strides = [1, 1]} : vector<1x192xf32> to vector<1x64xf32>
      %29 = vector.shape_cast %28 : vector<1x64xf32> to vector<1x1x64xf32>
      %30 = vector.broadcast %27 : vector<1x256x1xf32> to vector<1x256x64xf32>
      %31 = vector.broadcast %29 : vector<1x1x64xf32> to vector<1x256x64xf32>
      %32 = arith.mulf %30, %31 : vector<1x256x64xf32>
      %33 = arith.addf %26, %32 : vector<1x256x64xf32>
      %c0_10 = arith.constant 0 : index
      %c0_11 = arith.constant 0 : index
      %34 = vector.load %arg17[%c0_10, %c0_11] : memref<1x64xf32, #tpu.memory_space<vmem>>, vector<1x64xf32>
      %35 = vector.shape_cast %34 : vector<1x64xf32> to vector<1x1x64xf32>
      %36 = vector.broadcast %35 : vector<1x1x64xf32> to vector<1x256x64xf32>
      %37 = arith.addf %33, %36 : vector<1x256x64xf32>
      %cst_12 = arith.constant 0.000000e+00 : f32
      %38 = vector.broadcast %cst_12 : f32 to vector<1x256x64xf32>
      %39 = arith.maximumf %37, %38 : vector<1x256x64xf32>
      %40 = vector.shape_cast %39 : vector<1x256x64xf32> to vector<256x64xf32>
      %41 = arith.truncf %40 : vector<256x64xf32> to vector<256x64xbf16>
      %c0_13 = arith.constant 0 : index
      %c0_14 = arith.constant 0 : index
      %42 = vector.load %arg18[%c0_13, %c0_14] : memref<64x128xbf16, #tpu.memory_space<vmem>>, vector<64x128xbf16>
      %cst_15 = arith.constant dense<0.000000e+00> : vector<256x128xf32>
      %43 = tpu.matmul %41, %42, %cst_15 {dimension_numbers = #tpu.dot_dimension_numbers<[1], [0], [0], [1], [0, 0, 1, 1], [], []>} : vector<256x64xbf16>, vector<64x128xbf16>, vector<256x128xf32> -> vector<256x128xf32>
      %c0_16 = arith.constant 0 : index
      %c0_17 = arith.constant 0 : index
      %44 = vector.load %arg19[%c0_16, %c0_17] : memref<1x128xf32, #tpu.memory_space<vmem>>, vector<1x128xf32>
      %45 = vector.broadcast %44 : vector<1x128xf32> to vector<256x128xf32>
      %46 = arith.addf %43, %45 : vector<256x128xf32>
      %cst_18 = arith.constant 0.000000e+00 : f32
      %47 = vector.broadcast %cst_18 : f32 to vector<256x128xf32>
      %48 = arith.maximumf %46, %47 : vector<256x128xf32>
      %49 = arith.truncf %48 : vector<256x128xf32> to vector<256x128xbf16>
      %c0_19 = arith.constant 0 : index
      %c0_20 = arith.constant 0 : index
      %50 = vector.load %arg20[%c0_19, %c0_20] : memref<128x1024xbf16, #tpu.memory_space<vmem>>, vector<128x1024xbf16>
      %cst_21 = arith.constant dense<0.000000e+00> : vector<256x1024xf32>
      %51 = tpu.matmul %49, %50, %cst_21 {dimension_numbers = #tpu.dot_dimension_numbers<[1], [0], [0], [1], [0, 0, 1, 1], [], []>} : vector<256x128xbf16>, vector<128x1024xbf16>, vector<256x1024xf32> -> vector<256x1024xf32>
      %c0_22 = arith.constant 0 : index
      %c0_23 = arith.constant 0 : index
      %52 = vector.load %arg21[%c0_22, %c0_23] : memref<1x1024xf32, #tpu.memory_space<vmem>>, vector<1x1024xf32>
      %53 = vector.broadcast %52 : vector<1x1024xf32> to vector<256x1024xf32>
      %54 = arith.addf %51, %53 : vector<256x1024xf32>
      %55 = vector.shape_cast %54 : vector<256x1024xf32> to vector<1x256x1024xf32>
      %cst_24 = arith.constant dense<0xFF800000> : vector<1x1024xf32>
      %56 = vector.multi_reduction <maximumf>, %55, %cst_24 [1] : vector<1x256x1024xf32> to vector<1x1024xf32>
      %c0_25 = arith.constant 0 : index
      %c0_26 = arith.constant 0 : index
      %57 = vector.load %arg24[%c0_25, %c0_26] : memref<1x1024xf32, #tpu.memory_space<vmem>>, vector<1x1024xf32>
      %58 = arith.maximumf %57, %56 : vector<1x1024xf32>
      %c0_27 = arith.constant 0 : index
      %c0_28 = arith.constant 0 : index
      %59 = vector.load %arg24[%c0_27, %c0_28] : memref<1x1024xf32, #tpu.memory_space<vmem>>, vector<1x1024xf32>
      tpu.vector_store %arg24[%c0_27, %c0_28], %58 {strides = array<i32>} : memref<1x1024xf32, #tpu.memory_space<vmem>>, vector<1x1024xf32>,
      %c3_i32 = arith.constant 3 : i32
      %60 = arith.cmpi eq, %arg2, %c3_i32 : i32
      %61 = arith.extui %60 : i1 to i32
      %c0_i32_29 = arith.constant 0 : i32
      %62 = arith.cmpi ne, %61, %c0_i32_29 : i32
      scf.if %62 {
        %c0_30 = arith.constant 0 : index
        %c0_31 = arith.constant 0 : index
        %63 = vector.load %arg24[%c0_30, %c0_31] : memref<1x1024xf32, #tpu.memory_space<vmem>>, vector<1x1024xf32>
        %c0_32 = arith.constant 0 : index
        %c0_33 = arith.constant 0 : index
        %c0_34 = arith.constant 0 : index
        %64 = vector.load %arg22[%c0_32, %c0_33, %c0_34] : memref<1x1x1024xf32, #tpu.memory_space<vmem>>, vector<1x1x1024xf32>
        %65 = vector.shape_cast %64 : vector<1x1x1024xf32> to vector<1x1024xf32>
        %66 = vector.shape_cast %63 : vector<1x1024xf32> to vector<1x1x1024xf32>
        tpu.vector_store %arg22[%c0_32, %c0_33, %c0_34], %66 {strides = array<i32>} : memref<1x1x1024xf32, #tpu.memory_space<vmem>>, vector<1x1x1024xf32>,
      } else {
      }
    } else {
    }
    return
  }
  func.func @transform_0(%arg0: i32, %arg1: i32, %arg2: i32) -> (i32, i32, i32) {
    %c0_i32 = arith.constant 0 : i32
    %c0_i32_0 = arith.constant 0 : i32
    return %arg0, %arg2, %c0_i32 : i32, i32, i32
  }
  func.func @transform_1(%arg0: i32, %arg1: i32, %arg2: i32) -> (i32, i32) {
    %c0_i32 = arith.constant 0 : i32
    %c0_i32_0 = arith.constant 0 : i32
    %c0_i32_1 = arith.constant 0 : i32
    return %c0_i32, %c0_i32_0 : i32, i32
  }
  func.func @transform_2(%arg0: i32, %arg1: i32, %arg2: i32) -> (i32, i32) {
    %c0_i32 = arith.constant 0 : i32
    %c0_i32_0 = arith.constant 0 : i32
    %c0_i32_1 = arith.constant 0 : i32
    return %c0_i32, %c0_i32_0 : i32, i32
  }
  func.func @transform_3(%arg0: i32, %arg1: i32, %arg2: i32) -> (i32, i32) {
    %c0_i32 = arith.constant 0 : i32
    %c0_i32_0 = arith.constant 0 : i32
    %c0_i32_1 = arith.constant 0 : i32
    return %c0_i32, %c0_i32_0 : i32, i32
  }
  func.func @transform_4(%arg0: i32, %arg1: i32, %arg2: i32) -> (i32, i32) {
    %c0_i32 = arith.constant 0 : i32
    %c0_i32_0 = arith.constant 0 : i32
    %c0_i32_1 = arith.constant 0 : i32
    return %c0_i32, %c0_i32_0 : i32, i32
  }
  func.func @transform_5(%arg0: i32, %arg1: i32, %arg2: i32) -> (i32, i32) {
    %c0_i32 = arith.constant 0 : i32
    %c0_i32_0 = arith.constant 0 : i32
    %c0_i32_1 = arith.constant 0 : i32
    return %c0_i32, %c0_i32_0 : i32, i32
  }
  func.func @transform_6(%arg0: i32, %arg1: i32, %arg2: i32) -> (i32, i32) {
    %c0_i32 = arith.constant 0 : i32
    %c0_i32_0 = arith.constant 0 : i32
    %c0_i32_1 = arith.constant 0 : i32
    return %c0_i32, %c0_i32_0 : i32, i32
  }
  func.func @transform_7(%arg0: i32, %arg1: i32, %arg2: i32) -> (i32, i32) {
    %c0_i32 = arith.constant 0 : i32
    %c0_i32_0 = arith.constant 0 : i32
    %c0_i32_1 = arith.constant 0 : i32
    return %c0_i32, %c0_i32_0 : i32, i32
  }
  func.func @transform_8(%arg0: i32, %arg1: i32, %arg2: i32) -> (i32, i32) {
    %c0_i32 = arith.constant 0 : i32
    %c0_i32_0 = arith.constant 0 : i32
    %c0_i32_1 = arith.constant 0 : i32
    return %c0_i32, %c0_i32_0 : i32, i32
  }
  func.func @transform_9(%arg0: i32, %arg1: i32, %arg2: i32) -> (i32, i32) {
    %c0_i32 = arith.constant 0 : i32
    %c0_i32_0 = arith.constant 0 : i32
    %c0_i32_1 = arith.constant 0 : i32
    return %c0_i32, %c0_i32_0 : i32, i32
  }
  func.func @transform_10(%arg0: i32, %arg1: i32, %arg2: i32) -> (i32, i32) {
    %c0_i32 = arith.constant 0 : i32
    %c0_i32_0 = arith.constant 0 : i32
    %c0_i32_1 = arith.constant 0 : i32
    return %c0_i32, %c0_i32_0 : i32, i32
  }
  func.func @transform_11(%arg0: i32, %arg1: i32, %arg2: i32) -> (i32, i32) {
    %c0_i32 = arith.constant 0 : i32
    %c0_i32_0 = arith.constant 0 : i32
    %c0_i32_1 = arith.constant 0 : i32
    return %c0_i32, %c0_i32_0 : i32, i32
  }
  func.func @transform_12(%arg0: i32, %arg1: i32, %arg2: i32) -> (i32, i32) {
    %c0_i32 = arith.constant 0 : i32
    %c0_i32_0 = arith.constant 0 : i32
    %c0_i32_1 = arith.constant 0 : i32
    return %c0_i32, %c0_i32_0 : i32, i32
  }
  func.func @transform_13(%arg0: i32, %arg1: i32, %arg2: i32) -> (i32, i32) {
    %c0_i32 = arith.constant 0 : i32
    %c0_i32_0 = arith.constant 0 : i32
    %c0_i32_1 = arith.constant 0 : i32
    return %c0_i32, %c0_i32_0 : i32, i32
  }
  func.func @transform_14(%arg0: i32, %arg1: i32, %arg2: i32) -> (i32, i32) {
    %c0_i32 = arith.constant 0 : i32
    %c0_i32_0 = arith.constant 0 : i32
    %c0_i32_1 = arith.constant 0 : i32
    return %c0_i32, %c0_i32_0 : i32, i32
  }
  func.func @transform_15(%arg0: i32, %arg1: i32, %arg2: i32) -> (i32, i32) {
    %c0_i32 = arith.constant 0 : i32
    %c0_i32_0 = arith.constant 0 : i32
    %c0_i32_1 = arith.constant 0 : i32
    return %c0_i32, %c0_i32_0 : i32, i32
  }
  func.func @transform_16(%arg0: i32, %arg1: i32, %arg2: i32) -> (i32, i32) {
    %c0_i32 = arith.constant 0 : i32
    %c0_i32_0 = arith.constant 0 : i32
    %c0_i32_1 = arith.constant 0 : i32
    return %c0_i32, %c0_i32_0 : i32, i32
  }
  func.func @transform_17(%arg0: i32, %arg1: i32, %arg2: i32) -> (i32, i32) {
    %c0_i32 = arith.constant 0 : i32
    %c0_i32_0 = arith.constant 0 : i32
    %c0_i32_1 = arith.constant 0 : i32
    return %c0_i32, %c0_i32_0 : i32, i32
  }
  func.func @transform_18(%arg0: i32, %arg1: i32, %arg2: i32) -> (i32, i32) {
    %c0_i32 = arith.constant 0 : i32
    %c0_i32_0 = arith.constant 0 : i32
    %c0_i32_1 = arith.constant 0 : i32
    return %c0_i32, %c0_i32_0 : i32, i32
  }
  func.func @transform_19(%arg0: i32, %arg1: i32, %arg2: i32) -> (i32, i32, i32) {
    %c0_i32 = arith.constant 0 : i32
    %c0_i32_0 = arith.constant 0 : i32
    %c0_i32_1 = arith.constant 0 : i32
    return %arg0, %c0_i32, %c0_i32_0 : i32, i32, i32
  }
  func.func @transform_20(%arg0: i32, %arg1: i32, %arg2: i32) -> (i32, i32, i32) {
    %c0_i32 = arith.constant 0 : i32
    %c0_i32_0 = arith.constant 0 : i32
    %c0_i32_1 = arith.constant 0 : i32
    return %arg0, %c0_i32, %c0_i32_0 : i32, i32, i32
  }
}

</mosaic_0001>

<bundles_post_ra>
// kernel: tpu_custom_call.1
= control target key start
LH: loop header
LB: loop body
LE: loop exit
PB: predicated region body
PF: predicated region fallthrough
CT: control target
= control target key end

     0   :  { %s15322_s0 = inlined_call_operand.vmem [shape: f32[2,1024,3], index: 0, kind: input, shape index: {}]   ;;  %s15323_s1 = inlined_call_operand.vmem [shape: bf16[3,64], index: 1, kind: input, shape index: {}]   ;;  %s15324_s2 = inlined_call_operand.vmem [shape: f32[1,64], index: 2, kind: input, shape index: {}]   ;;  %s15325_s3 = inlined_call_operand.vmem [shape: bf16[64,128], index: 3, kind: input, shape index: {}]   ;;  %s15326_s4 = inlined_call_operand.vmem [shape: f32[1,128], index: 4, kind: input, shape index: {}]   ;;  %s15327_s5 = inlined_call_operand.hbm [shape: bf16[128,1024], index: 5, kind: input, shape index: {}]   ;;  %s15328_s6 = inlined_call_operand.vmem [shape: f32[1,1024], index: 6, kind: input, shape index: {}]   ;;  %s15329_s7 = inlined_call_operand.vmem [shape: bf16[1024,512], index: 7, kind: input, shape index: {}]   ;;  %s15330_s8 = inlined_call_operand.vmem [shape: f32[1,512], index: 8, kind: input, shape index: {}]   ;;  %s15331_s9 = inlined_call_operand.hbm [shape: bf16[512,256], index: 9, kind: input, shape index: {}]   ;;  %s15332_s10 = inlined_call_operand.vmem [shape: f32[1,256], index: 10, kind: input, shape index: {}]   ;;  %s15333_s11 = inlined_call_operand.vmem [shape: bf16[256,128], index: 11, kind: input, shape index: {}]   ;;  %s15334_s12 = inlined_call_operand.vmem [shape: f32[1,128], index: 12, kind: input, shape index: {}]   ;;  %s15335_s13 = inlined_call_operand.vmem [shape: bf16[128,192], index: 13, kind: input, shape index: {}]   ;;  %s15336_s14 = inlined_call_operand.vmem [shape: f32[1,64], index: 14, kind: input, shape index: {}]   ;;  %s15337_s15 = inlined_call_operand.vmem [shape: bf16[64,128], index: 15, kind: input, shape index: {}]   ;;  %s15338_s16 = inlined_call_operand.vmem [shape: f32[1,128], index: 16, kind: input, shape index: {}]   ;;  %s15339_s17 = inlined_call_operand.hbm [shape: bf16[128,1024], index: 17, kind: input, shape index: {}]   ;;  %s15340_s18 = inlined_call_operand.vmem [shape: f32[1,1024], index: 18, kind: input, shape index: {}]   ;;  %s15341_s19 = inlined_call_operand.hbm [shape: f32[2,1,1024], index: 19, kind: output, shape index: {0}]   ;;  %s15342_s20 = inlined_call_operand.hbm [shape: f32[2,1,128], index: 20, kind: output, shape index: {1}]  }
   0x1   :  { %15415 = sst [smem:[#allocation54_spill]] %s15322_s0 }
   0x2   :  { %15416 = sst [smem:[#allocation55_spill]] %s15323_s1 }
   0x3   :  { %15417 = sst [smem:[#allocation56_spill]] %s15324_s2 }
   0x4   :  { %15418 = sst [smem:[#allocation57_spill]] %s15325_s3 }
   0x5   :  { %15419 = sst [smem:[#allocation58_spill]] %s15326_s4 }
   0x6   :  { %15420 = sst [smem:[#allocation59_spill]] %s15327_s5 }
   0x7   :  { %15421 = sst [smem:[#allocation60_spill]] %s15328_s6 }
   0x8   :  { %15422 = sst [smem:[#allocation61_spill]] %s15329_s7 }
   0x9   :  { %15423 = sst [smem:[#allocation62_spill]] %s15331_s9 }
   0xa   :  { %15424 = sst [smem:[#allocation63_spill]] %s15335_s13 }
   0xb   :  { %15425 = sst [smem:[#allocation64_spill]] %s15336_s14 }
   0xc   :  { %15426 = sst [smem:[#allocation65_spill]] %s15337_s15 }
   0xd   :  { %15427 = sst [smem:[#allocation66_spill]] %s15338_s16 }
   0xe   :  { %15428 = sst [smem:[#allocation67_spill]] %s15340_s18 }
   0xf   :  { %15429 = sst [smem:[#allocation68_spill]] %s15341_s19 }
  0x10   :  { %15430 = sst [smem:[#allocation69_spill]] %s15342_s20 }
  0x11   :  { %26 = vsyncpa [#allocation5], 0 }
  0x12   :  { %27 = vsyncpa [#allocation8], 0 }
  0x13   :  { %28 = vsyncpa [#allocation6], 0 }
  0x14   :  { %30 = vsyncpa [#allocation6 + $0x1], 0 }
  0x15   :  { %31 = vsyncpa [#allocation12], 0 }
  0x16   :  { %33 = vsyncpa [#allocation12 + $0x1], 0  ;;  %s11433_s1 = smov 0   ;;  %s11435_s22 = smov 0  }
  0x17   :  { %s11437_s23 = smov 0   ;;  %s11439_s24 = smov 0  }
  0x18   :  { %s11441_s2 = smov 0   ;;  %s11443_s25 = smov 0  }
  0x19   :  { %s11445_s3 = smov 0   ;;  %s11447_s26 = smov 0  }
  0x1a   :  { %s11449_s27 = smov 0   ;;  %s11451_s28 = smov 0  }
  0x1b LB: > { %15431 = sst [smem:[#allocation17_spill]] %s11277_s1  ;;  %s8316_s4 = sadd.s32 4294967295, %s11313_s28   ;;  %s11313_s28 = sphi %s11451_s28, %s39_s28   ;;  %s11309_s27 = sphi %s11449_s27, %s15530_s27   ;;  %s11305_s26 = sphi %s11447_s26, %s15529_s26   ;;  %s11301_s3 = sphi %s11445_s3, %s15528_s3   ;;  %s11297_s25 = sphi %s11443_s25, %s15527_s25   ;;  %s11293_s2 = sphi %s11441_s2, %s15526_s2   ;;  %s11289_s24 = sphi %s11439_s24, %s15525_s24   ;;  %s11285_s23 = sphi %s11437_s23, %s15524_s23   ;;  %s11281_s22 = sphi %s11435_s22, %s15532_s22   ;;  %s11277_s1 = sphi %s11433_s1, %s15531_s1  }
  0x1c   : > { %15432 = sst [smem:[#allocation18_spill]] %s11285_s23  ;;  %s8317_s29 = sadd.s32 4294967294, %s11313_s28  }
  0x1d   : > { %15433 = sst [smem:[#allocation19_spill]] %s11301_s3  ;;  %s51_s30 = sadd.s32 1, %s11301_s3 }
  0x1e   : > { %15434 = sst [smem:[#allocation20_spill]] %s11305_s26  ;;  %s54_s0 = sadd.s32 1, %s11305_s26 }
  0x1f   : > { %15435 = sst [smem:[#allocation21_spill]] %s11309_s27  ;;  %p52_p0 = scmp.ge.s32.totalorder %s51_s30, 4 }
  0x20   : > { %15436 = sst [smem:[#allocation22_spill]] %s11313_s28  ;;  %s58_s21 = sadd.s32 1, %s11309_s27 }
  0x21   : > { %s471_s20 = sadd.s32 1, %s11285_s23  ;;  %p481_p1 = scmp.ne.s32.totalorder %s11285_s23, %s11281_s22 }
  0x22   : > { %s15534_s30 = smov (%p52_p0, %s51_s30), 0  ;;  %s15536_s0 = smov (!%p52_p0, %s54_s0), %s11305_s26 }
  0x23   : > { %15437 = sst [smem:[#allocation23_spill]] %s15534_s30  ;;  %p482_p2 = scmp.eq.s32.totalorder %s8316_s4, 15 }
  0x24   : > { %p487_p3 = scmp.ne.s32.totalorder %s11281_s22, %s11277_s1  ;;  %p56_p4 = scmp.ge.s32.totalorder %s15536_s0, 2 }
  0x25   : > { %p488_p5 = scmp.eq.s32.totalorder %s8317_s29, 15  ;;  %p11496_p6 = por %p482_p2, %p481_p1 }
  0x26   : > { %p8318_p7 = scmp.ge.s32.totalorder %s11313_s28, 1  ;;  %s15538_s0 = smov (%p56_p4, %s15536_s0), 0 }
  0x27   : > { %s15438_s19 = scalar_select %p11496_p6, 1, 0 }
  0x28   : > { %15440 = sst [smem:[#allocation25_spill]] %s15538_s0  ;;  %s15540_s21 = smov (!%p56_p4, %s58_s21), %s11309_s27 }
  0x29   : > { %15439 = sst [smem:[#allocation24_spill]] %s15438_s19  ;;  %p11504_p8 = por %p488_p5, %p487_p3 }
  0x2a   : > { %p521_p9 = scmp.lt.s32.totalorder %s11313_s28, 17  ;;  %p60_p10 = scmp.ge.s32.totalorder %s15540_s21, 2 }
  0x2b   : > { %s15441_s3 = scalar_select %p11504_p8, 1, 0 }
  0x2c   : > { %p11509_p11 = pnand %p8318_p7, %p521_p9  ;;  %p11513_p12 = scmp.eq.s32.totalorder %s8316_s4, 0 }
  0x2d   : > { %15442 = sst [smem:[#allocation26_spill]] %s15441_s3  ;;  %s15542_s21 = smov (%p60_p10, %s15540_s21), 0 }
  0x2e   : > { %15445 = sst [smem:[#allocation27_spill]] %s15542_s21  ;;  %p10877_p13 = pneg %p11509_p11 }
  0x2f   : > { %s15446_s9 = sld [smem:[#allocation62_spill]]  ;;  %s468_s1 = ssub.s32 %s11309_s27, %s15542_s21 }
  0x30   : > { %p469_p0 = scmp.eq.s32.totalorder %s468_s1, 0  ;;  %p11528_p1 = pnand %p11513_p12, %p10877_p13 }
  0x31   : > { %s11315_s19 = smov [#allocation7]   ;;  %s11316_s16 = smov 128  }
  0x32   : > { %s11533_s4 = scalar_select %p469_p0, %s11285_s23, %s471_s20  }
  0x33   : > { %s569_s18 = sshll.u32 %s11315_s19, 4  ;;  %s11317_s14 = smov 8   ;;  %s570_s18 = int_to_ptr.vmem [resolvable:$true] %s569_s18 }
  0x34   : > { %15448 = sst [smem:[#allocation28_spill]] %s11533_s4  ;;  %s602_s20 = sshll.u32 %s15339_s17, 4  ;;  %s603_s20 = int_to_ptr.hbm [resolvable:$true] %s602_s20 }
  0x35   : > { %s567_s3 = sshll.u32 %s15446_s9, 4  ;;  %s15449_s5 = sld [smem:[#allocation59_spill]]  ;;  %s568_s3 = int_to_ptr.hbm [resolvable:$true] %s567_s3 }
  0x36   : > { %10883 = dma.hbm_to_vmem [thread:$0]  (!%p11528_p1), %s568_s3, 8192, %s570_s18, [#allocation8], %s11316_s16, %s11316_s16, %s11317_s14  }
  0x37   : > { %s11318_s9 = smov [#allocation4]   ;;  %s11319_s4 = smov 512  }
  0x38   : > { %s546_s21 = sshll.u32 %s11318_s9, 4  ;;  %s11320_s19 = smov 32   ;;  %s547_s21 = int_to_ptr.vmem [resolvable:$true] %s546_s21 }
  0x39   : > { %s11321_s23 = smov [#allocation9]   ;;  %636 = sbr.rel (%p11509_p11) target bundleno = 3128 (0xc38), region = 96 }
  0x3a   : > { %s604_s13 = sshll.u32 %s11321_s23, 4  ;;  %s605_s13 = int_to_ptr.vmem [resolvable:$true] %s604_s13 }
  0x3b   : > { %s544_s1 = sshll.u32 %s15449_s5, 4  ;;  %s545_s1 = int_to_ptr.hbm [resolvable:$true] %s544_s1 }
  0x3c   : > { %10880 = dma.hbm_to_vmem [thread:$0]  (!%p11528_p1), %s545_s1, 8192, %s547_s21, [#allocation5], %s11319_s4, %s11319_s4, %s11320_s19  }
  0x3d   : > { %10886 = dma.hbm_to_vmem [thread:$0]  (!%p11528_p1), %s603_s20, 8192, %s605_s13, [#allocation8], %s11319_s4, %s11319_s4, %s11320_s19  }
  0x3e   : > { %11260 = dma.done.wait (%p11513_p12), [#allocation5], 8192  }
  0x3f   : > { %11262 = vsyncadd (%p11513_p12), [#allocation5], 4294959104 }
  0x40   : > { %11264 = dma.done.wait (%p11513_p12), [#allocation8], 16384  }
  0x41   : > { %11266 = vsyncadd (%p11513_p12), [#allocation8], 4294950912  ;;  %s11558_s9 = sand.u32 1, %s11281_s22   ;;  %s8328_s13 = sshll.u32 %s11289_s24, 5 }
  0x42   : > { %s8327_s14 = sshll.u32 %s11558_s9, 3  ;;  %p714_p2 = scmp.lt.s32.totalorder %s11297_s25, 1 }
  0x43   : > { %p716_p3 = scmp.lt.s32.totalorder %s8328_s13, 127  ;;  %s15450_s28 = sld [smem:[#allocation54_spill]] }
  0x44   : > { %s715_s15 = scalar_select %p714_p2, %s11297_s25, 1 }
  0x45   : > { %s15544_s13 = smov (!%p716_p3, %s8328_s13), 127  ;;  %s11569_s21 = scalar_lea.vmem [#allocation10], %s8327_s14 }
  0x46   : > { %s8329_s16 = sshll.u32 %s715_s15, 7  ;;  %s15412_s29 = scalar_lea.vmem [#allocation11], %s11558_s9 }
  0x47   : > { %s719_s18 = sadd.s32 %s8329_s16, %s15544_s13  ;;  %p8331_p4 = scmp.ne.s32.totalorder %s11289_s24, 0 }
  0x48   : > { %s8330_s23 = sshll.u32 %s719_s18, 3 }
  0x49   : > { %s11567_s30 = scalar_lea.vmem %s15450_s28, %s8330_s23  ;;  %727 = sbr.rel (%p8331_p4) target bundleno = 80 (0x50), region = 112 }
  0x4e   : > { %v11322_v0 = vmov -inf  }
  0x4f   : > { %728 = vst [vmem:[#allocation2] sm:$0xff] %v11322_v0 }
  0x50 PF: > { %v11574_v1 = vld [vmem:[%s11567_s30] sm:$0xff]  ;;  %v11577_v2 = vld [vmem:[%s11567_s30 + $0x8] sm:$0xff]  ;;  %v11580_v3 = vld [vmem:[%s11567_s30 + $0x10] sm:$0xff]  ;;  %p8332_p5 = scmp.ne.s32.totalorder %s11293_s2, 0 }
  0x51   : > { %v11583_v4 = vld [vmem:[%s11567_s30 + $0x18] sm:$0xff]  ;;  %v11586_v5 = vld [vmem:[%s11567_s30 + $0x20] sm:$0xff]  ;;  %v11589_v6 = vld [vmem:[%s11567_s30 + $0x28] sm:$0xff]  ;;  %s15476_s0 = sld [smem:[#allocation55_spill]] (!%p8332_p5)  ;;  %p8637_p7 = scmp.ne.s32.totalorder (!%p8332_p5), %s11289_s24, 3 }
  0x52   : > { %v11592_v7 = vld [vmem:[%s11567_s30 + $0x30] sm:$0xff]  ;;  %v11595_v8 = vld [vmem:[%s11567_s30 + $0x38] sm:$0xff]  ;;  %v11598_v9 = vld [vmem:[%s11567_s30 + $0x40] sm:$0xff]  ;;  %s15477_s19 = sld [smem:[#allocation57_spill]] (!%p8332_p5) }
  0x53   : > { %15451 = vst [vmem:[#allocation29_spill] sm:$0xff] %v11592_v7  ;;  %v11601_v10 = vld [vmem:[%s11567_s30 + $0x48] sm:$0xff]  ;;  %v11604_v11 = vld [vmem:[%s11567_s30 + $0x50] sm:$0xff]  ;;  %v11607_v12 = vld [vmem:[%s11567_s30 + $0x58] sm:$0xff]  ;;  %s15478_s28 = sld [smem:[#allocation56_spill]] (!%p8332_p5) }
  0x54   : > { %15452 = vst [vmem:[#allocation30_spill] sm:$0xff] %v11595_v8  ;;  %v11610_v13 = vld [vmem:[%s11567_s30 + $0x60] sm:$0xff]  ;;  %v11613_v14 = vld [vmem:[%s11567_s30 + $0x68] sm:$0xff]  ;;  %v11616_v15 = vld [vmem:[%s11567_s30 + $0x70] sm:$0xff]  ;;  %s15479_s26 = sld [smem:[#allocation58_spill]] (!%p8332_p5) }
  0x55   : > { %15453 = vst [vmem:[#allocation31_spill] sm:$0xff] %v11601_v10  ;;  %v11619_v16 = vld [vmem:[%s11567_s30 + $0x78] sm:$0xff]  ;;  %v11622_v17 = vld [vmem:[%s11567_s30 + $0x80] sm:$0xff]  ;;  %v11625_v18 = vld [vmem:[%s11567_s30 + $0x88] sm:$0xff]  ;;  %s15480_s6 = sld [smem:[#allocation60_spill]] (!%p8332_p5) }
  0x56   : > { %15454 = vst [vmem:[#allocation32_spill] sm:$0xff] %v11604_v11  ;;  %v11628_v19 = vld [vmem:[%s11567_s30 + $0x90] sm:$0xff]  ;;  %v11631_v20 = vld [vmem:[%s11567_s30 + $0x98] sm:$0xff]  ;;  %v11634_v21 = vld [vmem:[%s11567_s30 + $0xa0] sm:$0xff] }
  0x57   : > { %15455 = vst [vmem:[#allocation33_spill] sm:$0xff] %v11607_v12  ;;  %v11637_v22 = vld [vmem:[%s11567_s30 + $0xa8] sm:$0xff]  ;;  %v11640_v23 = vld [vmem:[%s11567_s30 + $0xb0] sm:$0xff]  ;;  %v11643_v24 = vld [vmem:[%s11567_s30 + $0xb8] sm:$0xff] }
  0x58   : > { %15456 = vst [vmem:[#allocation34_spill] sm:$0xff] %v11610_v13  ;;  %v11646_v25 = vld [vmem:[%s11567_s30 + $0xc0] sm:$0xff]  ;;  %v11649_v26 = vld [vmem:[%s11567_s30 + $0xc8] sm:$0xff]  ;;  %v11652_v27 = vld [vmem:[%s11567_s30 + $0xd0] sm:$0xff] }
  0x59   : > { %15457 = vst [vmem:[#allocation35_spill] sm:$0xff] %v11613_v14  ;;  %v11655_v28 = vld [vmem:[%s11567_s30 + $0xd8] sm:$0xff]  ;;  %v11658_v29 = vld [vmem:[%s11567_s30 + $0xe0] sm:$0xff]  ;;  %v11661_v30 = vld [vmem:[%s11567_s30 + $0xe8] sm:$0xff] }
  0x5a   : > { %15458 = vst [vmem:[#allocation36_spill] sm:$0xff] %v11616_v15  ;;  %v11664_v31 = vld [vmem:[%s11567_s30 + $0xf0] sm:$0xff]  ;;  %v11667_v32 = vld [vmem:[%s11567_s30 + $0xf8] sm:$0xff] }
  0x5b   : > { %15459 = vst [vmem:[#allocation37_spill] sm:$0xff] %v11619_v16 }
  0x5c   : > { %15460 = vst [vmem:[#allocation38_spill] sm:$0xff] %v11622_v17 }
  0x5d   : > { %15461 = vst [vmem:[#allocation39_spill] sm:$0xff] %v11625_v18 }
  0x5e   : > { %15462 = vst [vmem:[#allocation40_spill] sm:$0xff] %v11628_v19 }
  0x5f   : > { %15463 = vst [vmem:[#allocation41_spill] sm:$0xff] %v11631_v20 }
  0x60   : > { %15464 = vst [vmem:[#allocation42_spill] sm:$0xff] %v11634_v21 }
  0x61   : > { %15465 = vst [vmem:[#allocation43_spill] sm:$0xff] %v11637_v22 }
  0x62   : > { %15466 = vst [vmem:[#allocation44_spill] sm:$0xff] %v11640_v23 }
  0x63   : > { %15467 = vst [vmem:[#allocation45_spill] sm:$0xff] %v11643_v24 }
  0x64   : > { %15468 = vst [vmem:[#allocation46_spill] sm:$0xff] %v11646_v25 }
  0x65   : > { %15469 = vst [vmem:[#allocation47_spill] sm:$0xff] %v11649_v26 }
  0x66   : > { %15470 = vst [vmem:[#allocation48_spill] sm:$0xff] %v11652_v27 }
  0x67   : > { %15471 = vst [vmem:[#allocation49_spill] sm:$0xff] %v11655_v28  ;;  %764 = sbr.rel (%p8332_p5) target bundleno = 1765 (0x6e5), region = 116 }
  0x68   : > { %15472 = vst [vmem:[#allocation50_spill] sm:$0xff] %v11658_v29 }
  0x69   : > { %15473 = vst [vmem:[#allocation51_spill] sm:$0xff] %v11661_v30 }
  0x6a   : > { %15474 = vst [vmem:[#allocation52_spill] sm:$0xff] %v11664_v31 }
  0x6b   : > { %15475 = vst [vmem:[#allocation53_spill] sm:$0xff] %v11667_v32 }
  0x6c   : > { %v781_v33 = vld [vmem:[%s15476_s0] sm:$0x3]  ;;  %vm835_vm0 = vcmask 1040384   ;;  %vm836_vm1 = vcmask 1041408   ;;  %v11323_v34 = vmov 65535   ;;  %v765_v38 = vpack.c.bf16 %v11577_v2, %v11574_v1  ;;  %v10343_v50 = vld [vmem:[%s15477_s19 + $0x18] sm:$0xff] }
  0x6d   : > { %v837_v35 = vsel %vm835_vm0, 4294967295, %v11323_v34  ;;  %v774_v39 = vpack.c.bf16 %v11631_v20, %v11628_v19  ;;  %vm786_vm2 = vcmask 23552   ;;  %v766_v40 = vpack.c.bf16 %v11583_v4, %v11580_v3  ;;  %1068 = vmatpush.bf16.msra.mxu1 %v10343_v50  ;;  %10829 = vmatpush.bf16.msra.mxu2 %v10343_v50  ;;  %v10342_v53 = vld [vmem:[%s15477_s19 + $0x10] sm:$0xff]  ;;  %v10341_v54 = vld [vmem:[%s15477_s19 + $0x8] sm:$0xff]  ;;  %v10340_v55 = vld [vmem:[%s15477_s19] sm:$0xff]  ;;  %s15481_s7 = sld [smem:[#allocation61_spill]] (!%p8637_p7) }
  0x6e   : > { %v838_v36 = vsel %vm836_vm1, %v837_v35, 0  ;;  %v775_v41 = vpack.c.bf16 %v11637_v22, %v11634_v21  ;;  %v767_v42 = vpack.c.bf16 %v11589_v6, %v11586_v5  ;;  %v776_v43 = vpack.c.bf16 %v11643_v24, %v11640_v23  ;;  %v11737_v59 = vld [vmem:[%s15478_s28] ss:$0 sm:$0xff]  ;;  %v8615_v60 = vld [vmem:[#allocation4 + $0x1c8] sm:$0xf] }
  0x6f   : > { %v840_v37 = vand.u32 %v838_v36, %v781_v33  ;;  %v768_v44 = vpack.c.bf16 %v11595_v8, %v11592_v7  ;;  %v777_v45 = vpack.c.bf16 %v11649_v26, %v11646_v25  ;;  %v769_v46 = vpack.c.bf16 %v11601_v10, %v11598_v9  ;;  %v10405_v61 = vld [vmem:[#allocation4 + $0x1e4] sm:$0xf0]  ;;  %v1265_v20 = vld [vmem:[%s15480_s6] sm:$0xff] }
  0x70   : > { %v778_v47 = vpack.c.bf16 %v11655_v28, %v11652_v27  ;;  %v770_v48 = vpack.c.bf16 %v11607_v12, %v11604_v11  ;;  %v779_v49 = vpack.c.bf16 %v11661_v30, %v11658_v29  ;;  %v771_v51 = vpack.c.bf16 %v11613_v14, %v11610_v13  ;;  %v8471_v8 = vld [vmem:[#allocation4 + $0x98] sm:$0xf] }
  0x71   : > { %849 = vmatpush.bf16.msra.mxu0 %v840_v37  ;;  %10828 = vmatpush.bf16.msra.mxu3 %v840_v37  ;;  %v780_v52 = vpack.c.bf16 %v11667_v32, %v11664_v31  ;;  %v772_v56 = vpack.c.bf16 %v11619_v16, %v11616_v15  ;;  %v773_v57 = vpack.c.bf16 %v11625_v18, %v11622_v17  ;;  %vm1015_vm3 = vcmask 523264   ;;  %v10371_v18 = vld [vmem:[#allocation4 + $0xdc] sm:$0xf] }
  0x72   : > { %1069 = vmatpush.bf16.msra.mxu1 %v10342_v53  ;;  %10830 = vmatpush.bf16.msra.mxu2 %v10342_v53  ;;  %v8616_v62 = vor.u32 %v10405_v61, %v8615_v60  ;;  %v11917_v24 = vperm.slane %v1265_v20, 0  ;;  %v11919_v25 = vperm.slane %v1265_v20, 1  ;;  %v8505_v17 = vld [vmem:[#allocation4 + $0xf8] sm:$0xf0]  ;;  %vm2884_vm4 = vcmask 1042434  }
  0x73   : > { %v11922_v22 = vor.u32 %v10371_v18, %v8505_v17  ;;  %vm2887_vm5 = vcmask 1044484   ;;  %vm2889_vm6 = vcmask 1046534   ;;  %vm2891_vm7 = vcmask 1045508  }
  0x74   : > { %8333 = vmatmul.msk.bf16.vlgmr.msra.gmra.mxu0 %vm786_vm2, %v765_v38  ;;  %8342 = vmatmul.msk.bf16.vlgmr.msra.gmra.mxu3 %vm786_vm2, %v774_v39  ;;  %v10400_v38 = vld [vmem:[#allocation4 + $0x1c4] sm:$0xf]  ;;  %vm2893_vm8 = vcmask 1043456  }
  0x75   : > { %1781 = vmatpush.bf16.msrb.mxu0 %v8616_v62  ;;  %v8609_v39 = vld [vmem:[#allocation4 + $0x1e0] sm:$0xf0] }
  0x76   : > { %1070 = vmatpush.bf16.msra.mxu1 %v10341_v54  ;;  %10831 = vmatpush.bf16.msra.mxu2 %v10341_v54  ;;  %v10392_v62 = vld [vmem:[#allocation4 + $0x184] sm:$0xf] }
  0x7a   : > { %1071 = vmatpush.bf16.msra.mxu1 %v10340_v55  ;;  %10832 = vmatpush.bf16.msra.mxu2 %v10340_v55 }
  0x84   : > { %8334 = vmatmul.msk.bf16.gmra.mxu0 %vm786_vm2, %v766_v40  ;;  %8343 = vmatmul.msk.bf16.gmra.mxu3 %vm786_vm2, %v775_v41  ;;  %v8612_v40 = vor.u32 %v10400_v38, %v8609_v39  ;;  %v10401_v41 = vld [vmem:[#allocation4 + $0x1cc] sm:$0xf] }
  0x86   : > { %1692 = vmatpush.bf16.msrb.mxu3 %v8612_v40  ;;  %v10393_v40 = vld [vmem:[#allocation4 + $0x18c] sm:$0xf] }
  0x94   : > { %8335 = vmatmul.msk.bf16.gmra.mxu0 %vm786_vm2, %v767_v42  ;;  %8344 = vmatmul.msk.bf16.gmra.mxu3 %vm786_vm2, %v776_v43  ;;  %v8617_v42 = vld [vmem:[#allocation4 + $0x1e8] sm:$0xf0] }
  0xa4   : > { %8336 = vmatmul.msk.bf16.gmra.mxu0 %vm786_vm2, %v768_v44  ;;  %8345 = vmatmul.msk.bf16.gmra.mxu3 %vm786_vm2, %v777_v45  ;;  %v8620_v44 = vor.u32 %v10401_v41, %v8617_v42  ;;  %v8585_v41 = vld [vmem:[#allocation4 + $0x1a8] sm:$0xf0] }
  0xa6   : > { %1870 = vmatpush.bf16.msrb.mxu1 %v8620_v44 }
  0xb4   : > { %8337 = vmatmul.msk.bf16.gmra.mxu0 %vm786_vm2, %v769_v46  ;;  %8346 = vmatmul.msk.bf16.gmra.mxu3 %vm786_vm2, %v778_v47 }
  0xc4   : > { %8338 = vmatmul.msk.bf16.gmra.mxu0 %vm786_vm2, %v770_v48  ;;  %8347 = vmatmul.msk.bf16.gmra.mxu3 %vm786_vm2, %v779_v49 }
  0xd4   : > { %8339 = vmatmul.msk.bf16.gmra.mxu0 %vm786_vm2, %v771_v51  ;;  %8348 = vmatmul.msk.bf16.gmra.mxu3 %vm786_vm2, %v780_v52  ;;  %v8583_v51 = vld [vmem:[#allocation4 + $0x188] sm:$0xf] }
  0xd5   : > { %v10397_v52 = vld [vmem:[#allocation4 + $0x1a4] sm:$0xf0] }
  0xd6   : > { %v8584_v53 = vor.u32 %v10397_v52, %v8583_v51 }
  0xd8   : > { %1782 = vmatpush.bf16.msrb.mxu0 %v8584_v53 }
  0xe4   : > { %8340 = vmatmul.msk.bf16.gmra.mxu0 %vm786_vm2, %v772_v56 }
  0xf1   : > { %v851_v58 = vpop.f32.mrf.mxu0 }
  0xf2   : > { %v852_v0 = vadd.f32 %v11737_v59, %v851_v58 }
  0xf4   : > { %8341 = vmatmul.msk.bf16.gmra.mxu0 %vm786_vm2, %v773_v57  ;;  %v931_v35 = vmax.f32 %v852_v0, 0.0 }
  0xf7   : > { %v896_v63 = vpop.f32.mrf.mxu3 }
  0xf8   : > { %v897_v37 = vadd.f32 %v11737_v59, %v896_v63  ;;  %v8577_v63 = vld [vmem:[#allocation4 + $0x1a0] sm:$0xf0] }
  0xf9   : > { %v853_v33 = vpop.f32.mrf.mxu0  ;;  %v8580_v0 = vor.u32 %v10392_v62, %v8577_v63 }
  0xfa   : > { %v854_v34 = vadd.f32 %v11737_v59, %v853_v33  ;;  %v949_v46 = vmax.f32 %v897_v37, 0.0  ;;  %v8607_v33 = vld [vmem:[#allocation4 + $0x1c0] sm:$0xf] }
  0xfb   : > { %1693 = vmatpush.bf16.msrb.mxu3 %v8580_v0 }
  0xfc   : > { %v932_v36 = vmax.f32 %v854_v34, 0.0  ;;  %v10404_v34 = vld [vmem:[#allocation4 + $0x1dc] sm:$0xf0] }
  0xfe   : > { %v963_v43 = vpack.c.bf16 %v932_v36, %v931_v35  ;;  %v8608_v36 = vor.u32 %v10404_v34, %v8607_v33 }
  0xff   : > { %v898_v45 = vpop.f32.mrf.mxu3 }
 0x100   : > { %8365 = vmatmul.msk.bf16.vlgmr.msra.gmra.mxu1 %vm1015_vm3, %v963_v43  ;;  %v899_v47 = vadd.f32 %v11737_v59, %v898_v45  ;;  %1603 = vmatpush.bf16.msrb.mxu2 %v8608_v36  ;;  %v8588_v43 = vor.u32 %v10393_v40, %v8585_v41  ;;  %v10376_v41 = vld [vmem:[#allocation4 + $0x104] sm:$0xf] }
 0x101   : > { %v856_v48 = vpop.f32.mrf.mxu0 }
 0x102   : > { %v950_v49 = vmax.f32 %v899_v47, 0.0  ;;  %v857_v55 = vadd.f32 %v11737_v59, %v856_v48  ;;  %1871 = vmatpush.bf16.msrb.mxu1 %v8588_v43  ;;  %v10389_v47 = vld [vmem:[#allocation4 + $0x164] sm:$0xf0]  ;;  %v8543_v43 = vld [vmem:[#allocation4 + $0x140] sm:$0xf] }
 0x104   : > { %v972_v50 = vpack.c.bf16 %v950_v49, %v949_v46  ;;  %v933_v58 = vmax.f32 %v857_v55, 0.0  ;;  %v8551_v46 = vld [vmem:[#allocation4 + $0x148] sm:$0xf]  ;;  %v10384_v49 = vld [vmem:[#allocation4 + $0x144] sm:$0xf] }
 0x105   : > { %v8552_v48 = vor.u32 %v10389_v47, %v8551_v46  ;;  %v8519_v46 = vld [vmem:[#allocation4 + $0x108] sm:$0xf] }
 0x106   : > { %8374 = vmatmul.msk.bf16.vlgmr.msra.gmra.mxu2 %vm1015_vm3, %v972_v50  ;;  %v8545_v50 = vld [vmem:[#allocation4 + $0x160] sm:$0xf0]  ;;  %v10381_v47 = vld [vmem:[#allocation4 + $0x124] sm:$0xf0] }
 0x107   : > { %v901_v54 = vpop.f32.mrf.mxu3  ;;  %v8548_v51 = vor.u32 %v10384_v49, %v8545_v50  ;;  %1783 = vmatpush.bf16.msrb.mxu0 %v8552_v48  ;;  %v8520_v50 = vor.u32 %v10381_v47, %v8519_v46 }
 0x108   : > { %v902_v61 = vadd.f32 %v11737_v59, %v901_v54 }
 0x109   : > { %v858_v56 = vpop.f32.mrf.mxu0  ;;  %1694 = vmatpush.bf16.msrb.mxu3 %v8548_v51 }
 0x10a   : > { %v859_v57 = vadd.f32 %v11737_v59, %v858_v56  ;;  %v951_v38 = vmax.f32 %v902_v61, 0.0  ;;  %v10396_v61 = vld [vmem:[#allocation4 + $0x19c] sm:$0xf0] }
 0x10b   : > { %1784 = vmatpush.bf16.msrb.mxu0 %v8520_v50  ;;  %v10373_v50 = vld [vmem:[#allocation4 + $0xe4] sm:$0xf0] }
 0x10c   : > { %v934_v60 = vmax.f32 %v859_v57, 0.0 }
 0x10e   : > { %v964_v35 = vpack.c.bf16 %v934_v60, %v933_v58  ;;  %v8575_v60 = vld [vmem:[#allocation4 + $0x180] sm:$0xf] }
 0x10f   : > { %v903_v37 = vpop.f32.mrf.mxu3  ;;  %v8576_v62 = vor.u32 %v10396_v61, %v8575_v60 }
 0x110   : > { %8366 = vmatmul.msk.bf16.gmra.mxu1 %vm1015_vm3, %v964_v35  ;;  %v904_v39 = vadd.f32 %v11737_v59, %v903_v37 }
 0x111   : > { %v861_v42 = vpop.f32.mrf.mxu0  ;;  %1604 = vmatpush.bf16.msrb.mxu2 %v8576_v62 }
 0x112   : > { %v952_v44 = vmax.f32 %v904_v39, 0.0  ;;  %v862_v53 = vadd.f32 %v11737_v59, %v861_v42  ;;  %v8553_v39 = vld [vmem:[#allocation4 + $0x168] sm:$0xf0]  ;;  %v8513_v42 = vld [vmem:[#allocation4 + $0x120] sm:$0xf0] }
 0x114   : > { %v973_v45 = vpack.c.bf16 %v952_v44, %v951_v38  ;;  %v935_v56 = vmax.f32 %v862_v53, 0.0  ;;  %v10385_v38 = vld [vmem:[#allocation4 + $0x14c] sm:$0xf]  ;;  %v8516_v44 = vor.u32 %v10376_v41, %v8513_v42 }
 0x115   : > { %v8556_v40 = vor.u32 %v10385_v38, %v8553_v39  ;;  %v8511_v38 = vld [vmem:[#allocation4 + $0x100] sm:$0xf] }
 0x116   : > { %8375 = vmatmul.msk.bf16.gmra.mxu2 %vm1015_vm3, %v973_v45  ;;  %v10388_v45 = vld [vmem:[#allocation4 + $0x15c] sm:$0xf0]  ;;  %1695 = vmatpush.bf16.msrb.mxu3 %v8516_v44 }
 0x117   : > { %v906_v52 = vpop.f32.mrf.mxu3  ;;  %1872 = vmatpush.bf16.msrb.mxu1 %v8556_v40  ;;  %v8544_v49 = vor.u32 %v10388_v45, %v8543_v43  ;;  %v10380_v40 = vld [vmem:[#allocation4 + $0x11c] sm:$0xf0] }
 0x118   : > { %v907_v58 = vadd.f32 %v11737_v59, %v906_v52  ;;  %v8512_v42 = vor.u32 %v10380_v40, %v8511_v38 }
 0x119   : > { %v863_v54 = vpop.f32.mrf.mxu0  ;;  %1605 = vmatpush.bf16.msrb.mxu2 %v8544_v49  ;;  %v8487_v49 = vld [vmem:[#allocation4 + $0xc8] sm:$0xf] }
 0x11a   : > { %v864_v55 = vadd.f32 %v11737_v59, %v863_v54  ;;  %v953_v33 = vmax.f32 %v907_v58, 0.0 }
 0x11c   : > { %v936_v57 = vmax.f32 %v864_v55, 0.0 }
 0x11d   : > { %1606 = vmatpush.bf16.msrb.mxu2 %v8512_v42 }
 0x11e   : > { %v965_v63 = vpack.c.bf16 %v936_v57, %v935_v56 }
 0x11f   : > { %v908_v0 = vpop.f32.mrf.mxu3 }
 0x120   : > { %8367 = vmatmul.msk.bf16.gmra.mxu1 %vm1015_vm3, %v965_v63  ;;  %v909_v34 = vadd.f32 %v11737_v59, %v908_v0 }
 0x121   : > { %v866_v35 = vpop.f32.mrf.mxu0 }
 0x122   : > { %v954_v36 = vmax.f32 %v909_v34, 0.0  ;;  %v867_v51 = vadd.f32 %v11737_v59, %v866_v35  ;;  %v8481_v34 = vld [vmem:[#allocation4 + $0xe0] sm:$0xf0] }
 0x124   : > { %v974_v37 = vpack.c.bf16 %v954_v36, %v953_v33  ;;  %v937_v54 = vmax.f32 %v867_v51, 0.0  ;;  %v10368_v33 = vld [vmem:[#allocation4 + $0xc4] sm:$0xf]  ;;  %v10377_v36 = vld [vmem:[#allocation4 + $0x10c] sm:$0xf]  ;;  %v8488_v51 = vor.u32 %v10373_v50, %v8487_v49 }
 0x125   : > { %v8484_v35 = vor.u32 %v10368_v33, %v8481_v34  ;;  %v10369_v33 = vld [vmem:[#allocation4 + $0xcc] sm:$0xf] }
 0x126   : > { %8376 = vmatmul.msk.bf16.gmra.mxu2 %vm1015_vm3, %v974_v37  ;;  %v8521_v37 = vld [vmem:[#allocation4 + $0x128] sm:$0xf0]  ;;  %1785 = vmatpush.bf16.msrb.mxu0 %v8488_v51  ;;  %v10352_v51 = vld [vmem:[#allocation4 + $0x44] sm:$0xf] }
 0x127   : > { %v911_v48 = vpop.f32.mrf.mxu3  ;;  %v8524_v39 = vor.u32 %v10377_v36, %v8521_v37  ;;  %1696 = vmatpush.bf16.msrb.mxu3 %v8484_v35  ;;  %v8489_v35 = vld [vmem:[#allocation4 + $0xe8] sm:$0xf0] }
 0x128   : > { %v912_v56 = vadd.f32 %v11737_v59, %v911_v48  ;;  %v8492_v37 = vor.u32 %v10369_v33, %v8489_v35 }
 0x129   : > { %v868_v52 = vpop.f32.mrf.mxu0  ;;  %1873 = vmatpush.bf16.msrb.mxu1 %v8524_v39 }
 0x12a   : > { %v869_v53 = vadd.f32 %v11737_v59, %v868_v52  ;;  %v955_v60 = vmax.f32 %v912_v56, 0.0 }
 0x12c   : > { %v938_v55 = vmax.f32 %v869_v53, 0.0 }
 0x12d   : > { %1874 = vmatpush.bf16.msrb.mxu1 %v8492_v37 }
 0x12e   : > { %v966_v57 = vpack.c.bf16 %v938_v55, %v937_v54 }
 0x12f   : > { %v913_v58 = vpop.f32.mrf.mxu3 }
 0x130   : > { %8368 = vmatmul.msk.bf16.gmra.mxu1 %vm1015_vm3, %v966_v57  ;;  %v914_v61 = vadd.f32 %v11737_v59, %v913_v58 }
 0x131   : > { %v871_v62 = vpop.f32.mrf.mxu0 }
 0x132   : > { %v956_v63 = vmax.f32 %v914_v61, 0.0  ;;  %v872_v43 = vadd.f32 %v11737_v59, %v871_v62  ;;  %v8449_v61 = vld [vmem:[#allocation4 + $0xa0] sm:$0xf0] }
 0x134   : > { %v975_v0 = vpack.c.bf16 %v956_v63, %v955_v60  ;;  %v939_v46 = vmax.f32 %v872_v43, 0.0  ;;  %v10360_v60 = vld [vmem:[#allocation4 + $0x84] sm:$0xf]  ;;  %v8479_v63 = vld [vmem:[#allocation4 + $0xc0] sm:$0xf] }
 0x135   : > { %v8452_v62 = vor.u32 %v10360_v60, %v8449_v61  ;;  %v10361_v61 = vld [vmem:[#allocation4 + $0x8c] sm:$0xf] }
 0x136   : > { %8377 = vmatmul.msk.bf16.gmra.mxu2 %vm1015_vm3, %v975_v0  ;;  %v10372_v0 = vld [vmem:[#allocation4 + $0xdc] sm:$0xf0] }
 0x137   : > { %v916_v41 = vpop.f32.mrf.mxu3  ;;  %v8480_v34 = vor.u32 %v10372_v0, %v8479_v63  ;;  %1697 = vmatpush.bf16.msrb.mxu3 %v8452_v62  ;;  %v8457_v62 = vld [vmem:[#allocation4 + $0xa8] sm:$0xf0] }
 0x138   : > { %v917_v48 = vadd.f32 %v11737_v59, %v916_v41  ;;  %v8460_v63 = vor.u32 %v10361_v61, %v8457_v62  ;;  %v10353_v61 = vld [vmem:[#allocation4 + $0x4c] sm:$0xf] }
 0x139   : > { %v873_v44 = vpop.f32.mrf.mxu0  ;;  %1607 = vmatpush.bf16.msrb.mxu2 %v8480_v34  ;;  %v8425_v62 = vld [vmem:[#allocation4 + $0x68] sm:$0xf0] }
 0x13a   : > { %v874_v45 = vadd.f32 %v11737_v59, %v873_v44  ;;  %v957_v54 = vmax.f32 %v917_v48, 0.0  ;;  %v8455_v44 = vld [vmem:[#allocation4 + $0x88] sm:$0xf]  ;;  %1875 = vmatpush.bf16.msrb.mxu1 %v8460_v63 }
 0x13c   : > { %v940_v47 = vmax.f32 %v874_v45, 0.0  ;;  %v10365_v45 = vld [vmem:[#allocation4 + $0xa4] sm:$0xf0] }
 0x13e   : > { %v967_v52 = vpack.c.bf16 %v940_v47, %v939_v46  ;;  %v8456_v46 = vor.u32 %v10365_v45, %v8455_v44  ;;  %v8385_v44 = vld [vmem:[#allocation4 + $0x20] sm:$0xf0]  ;;  %v8423_v45 = vld [vmem:[#allocation4 + $0x48] sm:$0xf] }
 0x13f   : > { %v918_v53 = vpop.f32.mrf.mxu3 }
 0x140   : > { %8369 = vmatmul.msk.bf16.gmra.mxu1 %vm1015_vm3, %v967_v52  ;;  %v919_v55 = vadd.f32 %v11737_v59, %v918_v53  ;;  %1786 = vmatpush.bf16.msrb.mxu0 %v8456_v46  ;;  %v8417_v52 = vld [vmem:[#allocation4 + $0x60] sm:$0xf0] }
 0x141   : > { %v876_v56 = vpop.f32.mrf.mxu0 }
 0x142   : > { %v958_v57 = vmax.f32 %v919_v55, 0.0  ;;  %v877_v38 = vadd.f32 %v11737_v59, %v876_v56 }
 0x144   : > { %v976_v58 = vpack.c.bf16 %v958_v57, %v957_v54  ;;  %v941_v41 = vmax.f32 %v877_v38, 0.0  ;;  %v8420_v54 = vor.u32 %v10352_v51, %v8417_v52  ;;  %v8447_v57 = vld [vmem:[#allocation4 + $0x80] sm:$0xf] }
 0x146   : > { %8378 = vmatmul.msk.bf16.gmra.mxu2 %vm1015_vm3, %v976_v58  ;;  %1698 = vmatpush.bf16.msrb.mxu3 %v8420_v54  ;;  %v10364_v58 = vld [vmem:[#allocation4 + $0x9c] sm:$0xf0] }
 0x147   : > { %v921_v36 = vpop.f32.mrf.mxu3  ;;  %v8448_v60 = vor.u32 %v10364_v58, %v8447_v57  ;;  %v8391_v57 = vld [vmem:[#allocation4 + $0x8] sm:$0xf] }
 0x148   : > { %v922_v43 = vadd.f32 %v11737_v59, %v921_v36 }
 0x149   : > { %v878_v39 = vpop.f32.mrf.mxu0  ;;  %1608 = vmatpush.bf16.msrb.mxu2 %v8448_v60  ;;  %v10349_v60 = vld [vmem:[#allocation4 + $0x24] sm:$0xf0] }
 0x14a   : > { %v879_v40 = vadd.f32 %v11737_v59, %v878_v39  ;;  %v959_v49 = vmax.f32 %v922_v43, 0.0  ;;  %v10344_v43 = vld [vmem:[#allocation4 + $0x4] sm:$0xf] }
 0x14c   : > { %v942_v42 = vmax.f32 %v879_v40, 0.0 }
 0x14e   : > { %v968_v47 = vpack.c.bf16 %v942_v42, %v941_v41 }
 0x14f   : > { %v923_v48 = vpop.f32.mrf.mxu3 }
 0x150   : > { %8370 = vmatmul.msk.bf16.gmra.mxu1 %vm1015_vm3, %v968_v47  ;;  %v924_v50 = vadd.f32 %v11737_v59, %v923_v48  ;;  %v8388_v47 = vor.u32 %v10344_v43, %v8385_v44  ;;  %v10357_v48 = vld [vmem:[#allocation4 + $0x64] sm:$0xf0] }
 0x151   : > { %v881_v53 = vpop.f32.mrf.mxu0  ;;  %v8424_v52 = vor.u32 %v10357_v48, %v8423_v45 }
 0x152   : > { %v960_v55 = vmax.f32 %v924_v50, 0.0  ;;  %v882_v33 = vadd.f32 %v11737_v59, %v881_v53  ;;  %v10356_v50 = vld [vmem:[#allocation4 + $0x5c] sm:$0xf0]  ;;  %1699 = vmatpush.bf16.msrb.mxu3 %v8388_v47 }
 0x153   : > { %1787 = vmatpush.bf16.msrb.mxu0 %v8424_v52  ;;  %v8623_v52 = vld [vmem:[#allocation4 + $0x1d0] sm:$0xf] }
 0x154   : > { %v977_v56 = vpack.c.bf16 %v960_v55, %v959_v49  ;;  %v943_v37 = vmax.f32 %v882_v33, 0.0  ;;  %v8415_v49 = vld [vmem:[#allocation4 + $0x40] sm:$0xf]  ;;  %v8428_v33 = vor.u32 %v10353_v61, %v8425_v62 }
 0x155   : > { %v8416_v53 = vor.u32 %v10356_v50, %v8415_v49  ;;  %v8383_v55 = vld [vmem:[#allocation4] sm:$0xf] }
 0x156   : > { %8379 = vmatmul.msk.bf16.gmra.mxu2 %vm1015_vm3, %v977_v56  ;;  %v10348_v56 = vld [vmem:[#allocation4 + $0x1c] sm:$0xf0]  ;;  %1876 = vmatpush.bf16.msrb.mxu1 %v8428_v33 }
 0x157   : > { %v926_v0 = vpop.f32.mrf.mxu3  ;;  %1609 = vmatpush.bf16.msrb.mxu2 %v8416_v53  ;;  %v8384_v58 = vor.u32 %v10348_v56, %v8383_v55  ;;  %v10406_v53 = vld [vmem:[#allocation4 + $0x1ec] sm:$0xf0]  ;;  %v11790_v56 = vld [vmem:[%s15479_s26] ss:$0 sm:$0xff] }
 0x158   : > { %v927_v36 = vadd.f32 %v11737_v59, %v926_v0  ;;  %v8392_v0 = vor.u32 %v10349_v60, %v8391_v57  ;;  %v8624_v55 = vor.u32 %v10406_v53, %v8623_v52  ;;  %v8631_v57 = vld [vmem:[#allocation4 + $0x1d8] sm:$0xf]  ;;  %v10398_v52 = vld [vmem:[#allocation4 + $0x1ac] sm:$0xf0] }
 0x159   : > { %v883_v34 = vpop.f32.mrf.mxu0 }
 0x15a   : > { %v884_v35 = vadd.f32 %v11737_v59, %v883_v34  ;;  %v961_v40 = vmax.f32 %v927_v36, 0.0  ;;  %1788 = vmatpush.bf16.msrb.mxu0 %v8392_v0  ;;  %v10345_v36 = vld [vmem:[#allocation4 + $0xc] sm:$0xf] }
 0x15b   : > { %1610 = vmatpush.bf16.msrb.mxu2 %v8384_v58  ;;  %v10407_v58 = vld [vmem:[#allocation4 + $0x1f4] sm:$0xf0] }
 0x15c   : > { %v944_v38 = vmax.f32 %v884_v35, 0.0  ;;  %v8632_v60 = vor.u32 %v10407_v58, %v8631_v57 }
 0x15e   : > { %v969_v39 = vpack.c.bf16 %v944_v38, %v943_v37  ;;  %v8393_v37 = vld [vmem:[#allocation4 + $0x28] sm:$0xf0]  ;;  %2137 = vmatpush.bf16.msra.mxu0 %v8632_v60 }
 0x15f   : > { %v928_v41 = vpop.f32.mrf.mxu3  ;;  %1959 = vmatpush.bf16.msra.mxu2 %v8624_v55  ;;  %v10399_v55 = vld [vmem:[#allocation4 + $0x1b4] sm:$0xf0] }
 0x160   : > { %8371 = vmatmul.msk.bf16.gmra.mxu1 %vm1015_vm3, %v969_v39  ;;  %v929_v42 = vadd.f32 %v11737_v59, %v928_v41  ;;  %v10402_v41 = vld [vmem:[#allocation4 + $0x1d4] sm:$0xf] }
 0x161   : > { %v886_v46 = vpop.f32.mrf.mxu0 }
 0x162   : > { %v962_v51 = vmax.f32 %v929_v42, 0.0  ;;  %v887_v63 = vadd.f32 %v11737_v59, %v886_v46  ;;  %v8625_v42 = vld [vmem:[#allocation4 + $0x1f0] sm:$0xf0] }
 0x163   : > { %v8628_v44 = vor.u32 %v10402_v41, %v8625_v42 }
 0x164   : > { %v978_v54 = vpack.c.bf16 %v962_v51, %v961_v40  ;;  %v945_v38 = vmax.f32 %v887_v63, 0.0  ;;  %v8396_v40 = vor.u32 %v10345_v36, %v8393_v37  ;;  %v10394_v36 = vld [vmem:[#allocation4 + $0x194] sm:$0xf] }
 0x165   : > { %2048 = vmatpush.bf16.msra.mxu3 %v8628_v44  ;;  %v8593_v37 = vld [vmem:[#allocation4 + $0x1b0] sm:$0xf0] }
 0x166   : > { %8380 = vmatmul.msk.bf16.gmra.mxu2 %vm1015_vm3, %v978_v54  ;;  %1877 = vmatpush.bf16.msrb.mxu1 %v8396_v40  ;;  %v8633_v40 = vld [vmem:[#allocation4 + $0x1f8] sm:$0xf0] }
 0x169   : > { %v888_v34 = vpop.f32.mrf.mxu0 }
 0x16a   : > { %v889_v35 = vadd.f32 %v11737_v59, %v888_v34 }
 0x16c   : > { %v946_v39 = vmax.f32 %v889_v35, 0.0 }
 0x16e   : > { %v970_v43 = vpack.c.bf16 %v946_v39, %v945_v38  ;;  %v8596_v38 = vor.u32 %v10394_v36, %v8593_v37  ;;  %v10403_v39 = vld [vmem:[#allocation4 + $0x1dc] sm:$0xf]  ;;  %v10386_v37 = vld [vmem:[#allocation4 + $0x154] sm:$0xf] }
 0x16f   : > { %v11805_v42 = vor.u32 %v10403_v39, %v8633_v40  ;;  %v10395_v40 = vld [vmem:[#allocation4 + $0x19c] sm:$0xf] }
 0x170   : > { %8372 = vmatmul.msk.bf16.gmra.mxu1 %vm1015_vm3, %v970_v43  ;;  %2049 = vmatpush.bf16.msra.mxu3 %v8596_v38  ;;  %v8561_v38 = vld [vmem:[#allocation4 + $0x170] sm:$0xf0] }
 0x171   : > { %v891_v45 = vpop.f32.mrf.mxu0  ;;  %2226 = vmatpush.bf16.msra.mxu1 %v11805_v42  ;;  %v8564_v39 = vor.u32 %v10386_v37, %v8561_v38 }
 0x172   : > { %v892_v46 = vadd.f32 %v11737_v59, %v891_v45 }
 0x174   : > { %v947_v49 = vmax.f32 %v892_v46, 0.0  ;;  %2050 = vmatpush.bf16.msra.mxu3 %v8564_v39 }
 0x179   : > { %v893_v47 = vpop.f32.mrf.mxu0 }
 0x17a   : > { %v894_v48 = vadd.f32 %v11737_v59, %v893_v47 }
 0x17c   : > { %v948_v50 = vmax.f32 %v894_v48, 0.0 }
 0x17d   : > { %v1073_v51 = vpop.f32.mrf.mxu1 }
 0x17e   : > { %v971_v54 = vpack.c.bf16 %v948_v50, %v947_v49  ;;  %v1074_v59 = vadd.f32 %v11790_v56, %v1073_v51  ;;  %v8591_v51 = vld [vmem:[#allocation4 + $0x190] sm:$0xf] }
 0x17f   : > { %v8592_v53 = vor.u32 %v10398_v52, %v8591_v51 }
 0x180   : > { %8373 = vmatmul.msk.bf16.gmra.mxu1 %vm1015_vm3, %v971_v54  ;;  %v1153_v63 = vmax.f32 %v1074_v59, 0.0  ;;  %v8599_v54 = vld [vmem:[#allocation4 + $0x198] sm:$0xf] }
 0x181   : > { %1960 = vmatpush.bf16.msra.mxu2 %v8592_v53  ;;  %v8600_v58 = vor.u32 %v10399_v55, %v8599_v54  ;;  %v8559_v55 = vld [vmem:[#allocation4 + $0x150] sm:$0xf] }
 0x183   : > { %2138 = vmatpush.bf16.msra.mxu0 %v8600_v58  ;;  %v10390_v58 = vld [vmem:[#allocation4 + $0x16c] sm:$0xf0] }
 0x185   : > { %v1075_v61 = vpop.f32.mrf.mxu1 }
 0x186   : > { %v1076_v62 = vadd.f32 %v11790_v56, %v1075_v61 }
 0x188   : > { %v1154_v0 = vmax.f32 %v1076_v62, 0.0 }
 0x189   : > { %v11795_v33 = vpop.f32.mrf.mxu2 }
 0x18a   : > { %v11797_v34 = vpack.c.bf16 %v1154_v0, %v1153_v63 }
 0x18c   : > { %1611 = vmatmul.bf16.vlgmr.msrb.gmra.mxu2 %v11797_v34  ;;  %1700 = vmatmul.bf16.vlgmr.msrb.gmra.mxu3 %v11797_v34 }
 0x18d   : > { %1789 = vmatmul.bf16.vlgmr.msrb.gmra.mxu0 %v11797_v34  ;;  %v1078_v35 = vpop.f32.mrf.mxu1 }
 0x18e   : > { %v1079_v43 = vadd.f32 %v11790_v56, %v1078_v35 }
 0x190   : > { %1878 = vmatmul.bf16.vlgmr.msrb.gmra.mxu1 %v11797_v34  ;;  %v1155_v46 = vmax.f32 %v1079_v43, 0.0  ;;  %v8601_v43 = vld [vmem:[#allocation4 + $0x1b8] sm:$0xf0] }
 0x191   : > { %v11803_v41 = vpop.f32.mrf.mxu2 }
 0x195   : > { %v1080_v44 = vpop.f32.mrf.mxu1 }
 0x196   : > { %v1081_v45 = vadd.f32 %v11790_v56, %v1080_v44  ;;  %v11830_v44 = vor.u32 %v10395_v40, %v8601_v43 }
 0x198   : > { %v1156_v47 = vmax.f32 %v1081_v45, 0.0  ;;  %2227 = vmatpush.bf16.msra.mxu1 %v11830_v44 }
 0x199   : > { %v11810_v48 = vpop.f32.mrf.mxu2 }
 0x19a   : > { %v11812_v49 = vpack.c.bf16 %v1156_v47, %v1155_v46 }
 0x19c   : > { %1616 = vmatmul.bf16.gmra.mxu2 %v11812_v49  ;;  %1705 = vmatmul.bf16.gmra.mxu3 %v11812_v49 }
 0x19d   : > { %1794 = vmatmul.bf16.gmra.mxu0 %v11812_v49  ;;  %v1083_v50 = vpop.f32.mrf.mxu1 }
 0x19e   : > { %v1084_v60 = vadd.f32 %v11790_v56, %v1083_v50 }
 0x1a0   : > { %1883 = vmatmul.bf16.gmra.mxu1 %v11812_v49  ;;  %v1157_v62 = vmax.f32 %v1084_v60, 0.0  ;;  %v8560_v60 = vor.u32 %v10390_v58, %v8559_v55  ;;  %v8569_v55 = vld [vmem:[#allocation4 + $0x178] sm:$0xf0] }
 0x1a1   : > { %v11818_v57 = vpop.f32.mrf.mxu2 }
 0x1a2   : > { %1961 = vmatpush.bf16.msra.mxu2 %v8560_v60 }
 0x1a5   : > { %v1085_v59 = vpop.f32.mrf.mxu1 }
 0x1a6   : > { %v1086_v61 = vadd.f32 %v11790_v56, %v1085_v59 }
 0x1a8   : > { %v1158_v63 = vmax.f32 %v1086_v61, 0.0  ;;  %v8567_v61 = vld [vmem:[#allocation4 + $0x158] sm:$0xf] }
 0x1a9   : > { %v11824_v35 = vpop.f32.mrf.mxu2 }
 0x1aa   : > { %v11822_v0 = vpack.c.bf16 %v1158_v63, %v1157_v62  ;;  %v10391_v62 = vld [vmem:[#allocation4 + $0x174] sm:$0xf0] }
 0x1ab   : > { %v8568_v63 = vor.u32 %v10391_v62, %v8567_v61 }
 0x1ac   : > { %1621 = vmatmul.bf16.gmra.mxu2 %v11822_v0  ;;  %1710 = vmatmul.bf16.gmra.mxu3 %v11822_v0 }
 0x1ad   : > { %1799 = vmatmul.bf16.gmra.mxu0 %v11822_v0  ;;  %v1088_v36 = vpop.f32.mrf.mxu1 }
 0x1ae   : > { %v1089_v45 = vadd.f32 %v11790_v56, %v1088_v36  ;;  %2139 = vmatpush.bf16.msra.mxu0 %v8568_v63 }
 0x1b0   : > { %1888 = vmatmul.bf16.gmra.mxu1 %v11822_v0  ;;  %v1159_v51 = vmax.f32 %v1089_v45, 0.0 }
 0x1b1   : > { %v11834_v47 = vpop.f32.mrf.mxu2 }
 0x1b5   : > { %v1090_v46 = vpop.f32.mrf.mxu1 }
 0x1b6   : > { %v1091_v50 = vadd.f32 %v11790_v56, %v1090_v46 }
 0x1b8   : > { %v1160_v52 = vmax.f32 %v1091_v50, 0.0  ;;  %v10378_v50 = vld [vmem:[#allocation4 + $0x114] sm:$0xf] }
 0x1b9   : > { %v11842_v59 = vpop.f32.mrf.mxu2 }
 0x1ba   : > { %v11837_v53 = vpack.c.bf16 %v1160_v52, %v1159_v51  ;;  %v8529_v51 = vld [vmem:[#allocation4 + $0x130] sm:$0xf0] }
 0x1bb   : > { %v8532_v52 = vor.u32 %v10378_v50, %v8529_v51  ;;  %v8527_v50 = vld [vmem:[#allocation4 + $0x110] sm:$0xf] }
 0x1bc   : > { %1626 = vmatmul.bf16.gmra.mxu2 %v11837_v53  ;;  %1715 = vmatmul.bf16.gmra.mxu3 %v11837_v53  ;;  %v10382_v51 = vld [vmem:[#allocation4 + $0x12c] sm:$0xf0] }
 0x1bd   : > { %1804 = vmatmul.bf16.gmra.mxu0 %v11837_v53  ;;  %v1093_v54 = vpop.f32.mrf.mxu1  ;;  %2051 = vmatpush.bf16.msra.mxu3 %v8532_v52  ;;  %v8528_v52 = vor.u32 %v10382_v51, %v8527_v50  ;;  %v10370_v51 = vld [vmem:[#allocation4 + $0xd4] sm:$0xf] }
 0x1be   : > { %v1094_v36 = vadd.f32 %v11790_v56, %v1093_v54  ;;  %v10387_v54 = vld [vmem:[#allocation4 + $0x15c] sm:$0xf] }
 0x1bf   : > { %v11855_v58 = vor.u32 %v10387_v54, %v8569_v55  ;;  %1962 = vmatpush.bf16.msra.mxu2 %v8528_v52  ;;  %v10383_v54 = vld [vmem:[#allocation4 + $0x134] sm:$0xf0]  ;;  %v8497_v52 = vld [vmem:[#allocation4 + $0xf0] sm:$0xf0] }
 0x1c0   : > { %1893 = vmatmul.bf16.gmra.mxu1 %v11837_v53  ;;  %v1161_v39 = vmax.f32 %v1094_v36, 0.0 }
 0x1c1   : > { %v11847_v43 = vpop.f32.mrf.mxu2  ;;  %2228 = vmatpush.bf16.msra.mxu1 %v11855_v58 }
 0x1c5   : > { %v1095_v37 = vpop.f32.mrf.mxu1 }
 0x1c6   : > { %v1096_v38 = vadd.f32 %v11790_v56, %v1095_v37 }
 0x1c8   : > { %v1162_v40 = vmax.f32 %v1096_v38, 0.0 }
 0x1c9   : > { %v11857_v60 = vpop.f32.mrf.mxu2 }
 0x1ca   : > { %v11849_v45 = vpack.c.bf16 %v1162_v40, %v1161_v39 }
 0x1cc   : > { %1631 = vmatmul.bf16.gmra.mxu2 %v11849_v45  ;;  %1720 = vmatmul.bf16.gmra.mxu3 %v11849_v45 }
 0x1cd   : > { %1809 = vmatmul.bf16.gmra.mxu0 %v11849_v45  ;;  %v1098_v46 = vpop.f32.mrf.mxu1 }
 0x1ce   : > { %v1099_v61 = vadd.f32 %v11790_v56, %v1098_v46  ;;  %v8535_v46 = vld [vmem:[#allocation4 + $0x118] sm:$0xf] }
 0x1cf   : > { %v8536_v55 = vor.u32 %v10383_v54, %v8535_v46  ;;  %v8500_v46 = vor.u32 %v10370_v51, %v8497_v52  ;;  %v8537_v54 = vld [vmem:[#allocation4 + $0x138] sm:$0xf0] }
 0x1d0   : > { %1898 = vmatmul.bf16.gmra.mxu1 %v11849_v45  ;;  %v1163_v36 = vmax.f32 %v1099_v61, 0.0 }
 0x1d1   : > { %v11867_v40 = vpop.f32.mrf.mxu2  ;;  %2140 = vmatpush.bf16.msra.mxu0 %v8536_v55  ;;  %2052 = vmatpush.bf16.msra.mxu3 %v8500_v46  ;;  %v8495_v46 = vld [vmem:[#allocation4 + $0xd0] sm:$0xf] }
 0x1d5   : > { %v1100_v62 = vpop.f32.mrf.mxu1 }
 0x1d6   : > { %v1101_v63 = vadd.f32 %v11790_v56, %v1100_v62 }
 0x1d8   : > { %v1164_v37 = vmax.f32 %v1101_v63, 0.0 }
 0x1da   : > { %v11862_v38 = vpack.c.bf16 %v1164_v37, %v1163_v36  ;;  %v11872_v36 = vpop.f32.mrf.mxu2 }
 0x1dc   : > { %1636 = vmatmul.bf16.gmra.mxu2 %v11862_v38  ;;  %1725 = vmatmul.bf16.gmra.mxu3 %v11862_v38 }
 0x1dd   : > { %1814 = vmatmul.bf16.gmra.mxu0 %v11862_v38  ;;  %v1103_v39 = vpop.f32.mrf.mxu1 }
 0x1de   : > { %v1104_v61 = vadd.f32 %v11790_v56, %v1103_v39  ;;  %v10379_v39 = vld [vmem:[#allocation4 + $0x11c] sm:$0xf] }
 0x1e0   : > { %1903 = vmatmul.bf16.gmra.mxu1 %v11862_v38  ;;  %v1165_v37 = vmax.f32 %v1104_v61, 0.0  ;;  %v11882_v61 = vor.u32 %v10379_v39, %v8537_v54  ;;  %v10374_v39 = vld [vmem:[#allocation4 + $0xec] sm:$0xf0] }
 0x1e2   : > { %v11880_v55 = vpop.f32.mrf.mxu2  ;;  %2229 = vmatpush.bf16.msra.mxu1 %v11882_v61 }
 0x1e5   : > { %v1105_v62 = vpop.f32.mrf.mxu1 }
 0x1e6   : > { %v1106_v63 = vadd.f32 %v11790_v56, %v1105_v62  ;;  %2230 = vmatpush.bf16.msra.mxu1 %v11922_v22 }
 0x1e8   : > { %v1166_v32 = vmax.f32 %v1106_v63, 0.0 }
 0x1ea   : > { %v11874_v31 = vpack.c.bf16 %v1166_v32, %v1165_v37  ;;  %v11889_v51 = vpop.f32.mrf.mxu2 }
 0x1ec   : > { %1641 = vmatmul.bf16.gmra.mxu2 %v11874_v31  ;;  %1730 = vmatmul.bf16.gmra.mxu3 %v11874_v31 }
 0x1ed   : > { %1819 = vmatmul.bf16.gmra.mxu0 %v11874_v31  ;;  %v1108_v50 = vpop.f32.mrf.mxu1 }
 0x1ee   : > { %v1109_v32 = vadd.f32 %v11790_v56, %v1108_v50  ;;  %v8496_v50 = vor.u32 %v10374_v39, %v8495_v46 }
 0x1f0   : > { %1908 = vmatmul.bf16.gmra.mxu1 %v11874_v31  ;;  %v1167_v37 = vmax.f32 %v1109_v32, 0.0  ;;  %1963 = vmatpush.bf16.msra.mxu2 %v8496_v50 }
 0x1f5   : > { %v1110_v62 = vpop.f32.mrf.mxu1 }
 0x1f6   : > { %v1111_v63 = vadd.f32 %v11790_v56, %v1110_v62 }
 0x1f8   : > { %v1168_v30 = vmax.f32 %v1111_v63, 0.0  ;;  %v8503_v63 = vld [vmem:[#allocation4 + $0xd8] sm:$0xf] }
 0x1fa   : > { %v11887_v29 = vpack.c.bf16 %v1168_v30, %v1167_v37  ;;  %v11896_v30 = vpop.f32.mrf.mxu2  ;;  %v10375_v37 = vld [vmem:[#allocation4 + $0xf4] sm:$0xf0] }
 0x1fb   : > { %v8504_v26 = vor.u32 %v10375_v37, %v8503_v63  ;;  %v1121_v63 = vadd.f32 %v11790_v56, %v11803_v41 }
 0x1fc   : > { %1646 = vmatmul.bf16.gmra.mxu2 %v11887_v29  ;;  %1735 = vmatmul.bf16.gmra.mxu3 %v11887_v29 }
 0x1fd   : > { %1824 = vmatmul.bf16.gmra.mxu0 %v11887_v29  ;;  %v1113_v52 = vpop.f32.mrf.mxu1 }
 0x1fe   : > { %v1114_v54 = vadd.f32 %v11790_v56, %v1113_v52  ;;  %2141 = vmatpush.bf16.msra.mxu0 %v8504_v26  ;;  %v11906_v52 = vperm.slane %v1265_v20, 2 }
 0x200   : > { %1913 = vmatmul.bf16.gmra.mxu1 %v11887_v29  ;;  %v1169_v27 = vmax.f32 %v1114_v54, 0.0 }
 0x205   : > { %v1115_v32 = vpop.f32.mrf.mxu1 }
 0x206   : > { %v1116_v62 = vadd.f32 %v11790_v56, %v1115_v32  ;;  %v10362_v32 = vld [vmem:[#allocation4 + $0x94] sm:$0xf] }
 0x208   : > { %v1170_v28 = vmax.f32 %v1116_v62, 0.0  ;;  %v11911_v62 = vperm.slane %v1265_v20, 3 }
 0x20a   : > { %v11899_v19 = vpack.c.bf16 %v1170_v28, %v1169_v27  ;;  %v1790_v46 = vpop.f32.mrf.mxu0  ;;  %v8465_v27 = vld [vmem:[#allocation4 + $0xb0] sm:$0xf0]  ;;  %v1119_v28 = vadd.f32 %v11790_v56, %v11795_v33 }
 0x20b   : > { %v8468_v26 = vor.u32 %v10362_v32, %v8465_v27  ;;  %v1791_v37 = vadd.f32 %v1790_v46, %v11906_v52  ;;  %v1172_v27 = vmax.f32 %v1121_v63, 0.0 }
 0x20c   : > { %1651 = vmatmul.bf16.gmra.mxu2 %v11899_v19  ;;  %1740 = vmatmul.bf16.gmra.mxu3 %v11899_v19  ;;  %v1171_v16 = vmax.f32 %v1119_v28, 0.0 }
 0x20d   : > { %1829 = vmatmul.bf16.gmra.mxu0 %v11899_v19  ;;  %v1879_v39 = vpop.f32.mrf.mxu1  ;;  %2053 = vmatpush.bf16.msra.mxu3 %v8468_v26  ;;  %v2317_v15 = vmax.f32 %v1791_v37, 0.0 }
 0x20e   : > { %v1880_v32 = vadd.f32 %v1879_v39, %v11911_v62  ;;  %v11931_v63 = vpack.c.bf16 %v1172_v27, %v1171_v16 }
 0x20f   : > { %v1612_v50 = vpop.f32.mrf.mxu2  ;;  %v1701_v54 = vpop.f32.mrf.mxu3 }
 0x210   : > { %1918 = vmatmul.bf16.gmra.mxu1 %v11899_v19  ;;  %v1613_v41 = vadd.f32 %v1612_v50, %v11917_v24  ;;  %v1702_v20 = vadd.f32 %v1701_v54, %v11919_v25  ;;  %v2318_v17 = vmax.f32 %v1880_v32, 0.0 }
 0x212   : > { %v1792_v23 = vpop.f32.mrf.mxu0  ;;  %v2315_v50 = vmax.f32 %v1613_v41, 0.0  ;;  %v2316_v37 = vmax.f32 %v1702_v20, 0.0  ;;  %v8463_v20 = vld [vmem:[#allocation4 + $0x90] sm:$0xf] }
 0x213   : > { %v1793_v33 = vadd.f32 %v1792_v23, %v11906_v52 }
 0x215   : > { %v2325_v46 = vmax.f32 %v1793_v33, 0.0  ;;  %v1881_v14 = vpop.f32.mrf.mxu1 }
 0x216   : > { %v1882_v26 = vadd.f32 %v1881_v14, %v11911_v62 }
 0x217   : > { %v2645_v13 = vmax.f32 %v2317_v15, %v2325_v46  ;;  %v1614_v12 = vpop.f32.mrf.mxu2  ;;  %v1703_v23 = vpop.f32.mrf.mxu3 }
 0x218   : > { %v2326_v18 = vmax.f32 %v1882_v26, 0.0  ;;  %v1615_v28 = vadd.f32 %v1614_v12, %v11917_v24  ;;  %v1704_v39 = vadd.f32 %v1703_v23, %v11919_v25  ;;  %v10366_v26 = vld [vmem:[#allocation4 + $0xac] sm:$0xf0] }
 0x21a   : > { %v2682_v33 = vmax.f32 %v2318_v17, %v2326_v18  ;;  %v2323_v11 = vmax.f32 %v1615_v28, 0.0  ;;  %v2324_v10 = vmax.f32 %v1704_v39, 0.0  ;;  %v1795_v21 = vpop.f32.mrf.mxu0  ;;  %v1124_v17 = vadd.f32 %v11790_v56, %v11810_v48 }
 0x21b   : > { %v1796_v54 = vadd.f32 %v1795_v21, %v11906_v52  ;;  %v1126_v18 = vadd.f32 %v11790_v56, %v11818_v57  ;;  %v10367_v57 = vld [vmem:[#allocation4 + $0xb4] sm:$0xf0] }
 0x21c   : > { %v2571_v14 = vmax.f32 %v2315_v50, %v2323_v11  ;;  %v2608_v15 = vmax.f32 %v2316_v37, %v2324_v10  ;;  %1656 = vmatmul.bf16.gmra.mxu2 %v11931_v63  ;;  %1745 = vmatmul.bf16.gmra.mxu3 %v11931_v63  ;;  %v8464_v11 = vor.u32 %v10366_v26, %v8463_v20 }
 0x21d   : > { %v2333_v32 = vmax.f32 %v1796_v54, 0.0  ;;  %1834 = vmatmul.bf16.gmra.mxu0 %v11931_v63  ;;  %v1884_v12 = vpop.f32.mrf.mxu1 }
 0x21e   : > { %v1885_v16 = vadd.f32 %v1884_v12, %v11911_v62  ;;  %1964 = vmatpush.bf16.msra.mxu2 %v8464_v11 }
 0x21f   : > { %v2646_v27 = vmax.f32 %v2645_v13, %v2333_v32  ;;  %v1617_v41 = vpop.f32.mrf.mxu2  ;;  %v1706_v46 = vpop.f32.mrf.mxu3 }
 0x220   : > { %v2334_v23 = vmax.f32 %v1885_v16, 0.0  ;;  %v1618_v21 = vadd.f32 %v1617_v41, %v11917_v24  ;;  %v1707_v10 = vadd.f32 %v1706_v46, %v11919_v25  ;;  %1923 = vmatmul.bf16.gmra.mxu1 %v11931_v63  ;;  %v1173_v41 = vmax.f32 %v1124_v17, 0.0 }
 0x221   : > { %v1174_v46 = vmax.f32 %v1126_v18, 0.0 }
 0x222   : > { %v2683_v28 = vmax.f32 %v2682_v33, %v2334_v23  ;;  %v2331_v13 = vmax.f32 %v1618_v21, 0.0  ;;  %v2332_v39 = vmax.f32 %v1707_v10, 0.0  ;;  %v1797_v50 = vpop.f32.mrf.mxu0  ;;  %v8472_v10 = vor.u32 %v10367_v57, %v8471_v8 }
 0x223   : > { %v1798_v37 = vadd.f32 %v1797_v50, %v11906_v52  ;;  %v11949_v11 = vpack.c.bf16 %v1174_v46, %v1173_v41  ;;  %v8433_v41 = vld [vmem:[#allocation4 + $0x70] sm:$0xf0]  ;;  %v1131_v57 = vadd.f32 %v11790_v56, %v11834_v47 }
 0x224   : > { %v2572_v54 = vmax.f32 %v2571_v14, %v2331_v13  ;;  %v2609_v32 = vmax.f32 %v2608_v15, %v2332_v39  ;;  %2142 = vmatpush.bf16.msra.mxu0 %v8472_v10  ;;  %v10363_v10 = vld [vmem:[#allocation4 + $0x9c] sm:$0xf] }
 0x225   : > { %v2341_v12 = vmax.f32 %v1798_v37, 0.0  ;;  %v1886_v16 = vpop.f32.mrf.mxu1 }
 0x226   : > { %v1887_v20 = vadd.f32 %v1886_v16, %v11911_v62  ;;  %v10354_v16 = vld [vmem:[#allocation4 + $0x54] sm:$0xf] }
 0x227   : > { %v2647_v26 = vmax.f32 %v2646_v27, %v2341_v12  ;;  %v1619_v48 = vpop.f32.mrf.mxu2  ;;  %v1708_v7 = vpop.f32.mrf.mxu3 }
 0x228   : > { %v2342_v33 = vmax.f32 %v1887_v20, 0.0  ;;  %v1620_v23 = vadd.f32 %v1619_v48, %v11917_v24  ;;  %v1709_v21 = vadd.f32 %v1708_v7, %v11919_v25  ;;  %v1129_v48 = vadd.f32 %v11790_v56, %v11824_v35 }
 0x22a   : > { %v2684_v14 = vmax.f32 %v2683_v28, %v2342_v33  ;;  %v2339_v15 = vmax.f32 %v1620_v23, 0.0  ;;  %v2340_v13 = vmax.f32 %v1709_v21, 0.0  ;;  %v1800_v17 = vpop.f32.mrf.mxu0  ;;  %v1175_v35 = vmax.f32 %v1129_v48, 0.0 }
 0x22b   : > { %v1801_v18 = vadd.f32 %v1800_v17, %v11906_v52 }
 0x22c   : > { %v2573_v27 = vmax.f32 %v2572_v54, %v2339_v15  ;;  %v2610_v39 = vmax.f32 %v2609_v32, %v2340_v13  ;;  %1661 = vmatmul.bf16.gmra.mxu2 %v11949_v11  ;;  %1750 = vmatmul.bf16.gmra.mxu3 %v11949_v11  ;;  %v8436_v32 = vor.u32 %v10354_v16, %v8433_v41  ;;  %v8473_v15 = vld [vmem:[#allocation4 + $0xb8] sm:$0xf0] }
 0x22d   : > { %v2349_v50 = vmax.f32 %v1801_v18, 0.0  ;;  %1839 = vmatmul.bf16.gmra.mxu0 %v11949_v11  ;;  %v1889_v7 = vpop.f32.mrf.mxu1  ;;  %v11964_v17 = vor.u32 %v10363_v10, %v8473_v15 }
 0x22e   : > { %v1890_v8 = vadd.f32 %v1889_v7, %v11911_v62  ;;  %2054 = vmatpush.bf16.msra.mxu3 %v8436_v32 }
 0x22f   : > { %v2648_v37 = vmax.f32 %v2647_v26, %v2349_v50  ;;  %v1622_v28 = vpop.f32.mrf.mxu2  ;;  %v1711_v12 = vpop.f32.mrf.mxu3  ;;  %2231 = vmatpush.bf16.msra.mxu1 %v11964_v17 }
 0x230   : > { %v2350_v46 = vmax.f32 %v1890_v8, 0.0  ;;  %v1623_v20 = vadd.f32 %v1622_v28, %v11917_v24  ;;  %v1712_v54 = vadd.f32 %v1711_v12, %v11919_v25  ;;  %1928 = vmatmul.bf16.gmra.mxu1 %v11949_v11  ;;  %v1176_v28 = vmax.f32 %v1131_v57, 0.0 }
 0x232   : > { %v2685_v33 = vmax.f32 %v2684_v14, %v2350_v46  ;;  %v2347_v26 = vmax.f32 %v1623_v20, 0.0  ;;  %v2348_v23 = vmax.f32 %v1712_v54, 0.0  ;;  %v1802_v21 = vpop.f32.mrf.mxu0  ;;  %v11970_v54 = vpack.c.bf16 %v1176_v28, %v1175_v35 }
 0x233   : > { %v1803_v13 = vadd.f32 %v1802_v21, %v11906_v52 }
 0x234   : > { %v2574_v18 = vmax.f32 %v2573_v27, %v2347_v26  ;;  %v2611_v50 = vmax.f32 %v2610_v39, %v2348_v23 }
 0x235   : > { %v2357_v7 = vmax.f32 %v1803_v13, 0.0  ;;  %v1891_v8 = vpop.f32.mrf.mxu1 }
 0x236   : > { %v1892_v47 = vadd.f32 %v1891_v8, %v11911_v62  ;;  %v10358_v8 = vld [vmem:[#allocation4 + $0x6c] sm:$0xf0] }
 0x237   : > { %v2649_v14 = vmax.f32 %v2648_v37, %v2357_v7  ;;  %v1624_v12 = vpop.f32.mrf.mxu2  ;;  %v1713_v16 = vpop.f32.mrf.mxu3  ;;  %v8431_v7 = vld [vmem:[#allocation4 + $0x50] sm:$0xf] }
 0x238   : > { %v2358_v41 = vmax.f32 %v1892_v47, 0.0  ;;  %v1625_v46 = vadd.f32 %v1624_v12, %v11917_v24  ;;  %v1714_v20 = vadd.f32 %v1713_v16, %v11919_v25  ;;  %v1134_v47 = vadd.f32 %v11790_v56, %v11842_v59 }
 0x239   : > { %v1136_v12 = vadd.f32 %v11790_v56, %v11847_v43  ;;  %v10359_v43 = vld [vmem:[#allocation4 + $0x74] sm:$0xf0] }
 0x23a   : > { %v2686_v27 = vmax.f32 %v2685_v33, %v2358_v41  ;;  %v2355_v39 = vmax.f32 %v1625_v46, 0.0  ;;  %v2356_v32 = vmax.f32 %v1714_v20, 0.0  ;;  %v1805_v26 = vpop.f32.mrf.mxu0 }
 0x23b   : > { %v1806_v23 = vadd.f32 %v1805_v26, %v11906_v52 }
 0x23c   : > { %v2575_v48 = vmax.f32 %v2574_v18, %v2355_v39  ;;  %v2612_v57 = vmax.f32 %v2611_v50, %v2356_v32  ;;  %1666 = vmatmul.bf16.gmra.mxu2 %v11970_v54  ;;  %1755 = vmatmul.bf16.gmra.mxu3 %v11970_v54  ;;  %v8432_v50 = vor.u32 %v10358_v8, %v8431_v7  ;;  %v8439_v7 = vld [vmem:[#allocation4 + $0x58] sm:$0xf] }
 0x23d   : > { %v2365_v37 = vmax.f32 %v1806_v23, 0.0  ;;  %1844 = vmatmul.bf16.gmra.mxu0 %v11970_v54  ;;  %v1894_v21 = vpop.f32.mrf.mxu1 }
 0x23e   : > { %v1895_v10 = vadd.f32 %v1894_v21, %v11911_v62  ;;  %1965 = vmatpush.bf16.msra.mxu2 %v8432_v50  ;;  %v1178_v21 = vmax.f32 %v1136_v12, 0.0 }
 0x23f   : > { %v2650_v15 = vmax.f32 %v2649_v14, %v2365_v37  ;;  %v1627_v13 = vpop.f32.mrf.mxu2  ;;  %v1716_v33 = vpop.f32.mrf.mxu3  ;;  %v1177_v37 = vmax.f32 %v1134_v47, 0.0 }
 0x240   : > { %v2366_v35 = vmax.f32 %v1895_v10, 0.0  ;;  %v1628_v28 = vadd.f32 %v1627_v13, %v11917_v24  ;;  %v1717_v18 = vadd.f32 %v1716_v33, %v11919_v25  ;;  %1933 = vmatmul.bf16.gmra.mxu1 %v11970_v54 }
 0x242   : > { %v2687_v16 = vmax.f32 %v2686_v27, %v2366_v35  ;;  %v2363_v14 = vmax.f32 %v1628_v28, 0.0  ;;  %v2364_v41 = vmax.f32 %v1717_v18, 0.0  ;;  %v1807_v46 = vpop.f32.mrf.mxu0  ;;  %v8440_v28 = vor.u32 %v10359_v43, %v8439_v7 }
 0x243   : > { %v1808_v20 = vadd.f32 %v1807_v46, %v11906_v52  ;;  %v11988_v18 = vpack.c.bf16 %v1178_v21, %v1177_v37  ;;  %v10346_v37 = vld [vmem:[#allocation4 + $0x14] sm:$0xf]  ;;  %v1141_v7 = vadd.f32 %v11790_v56, %v11867_v40 }
 0x244   : > { %v2576_v39 = vmax.f32 %v2575_v48, %v2363_v14  ;;  %v2613_v32 = vmax.f32 %v2612_v57, %v2364_v41  ;;  %2143 = vmatpush.bf16.msra.mxu0 %v8440_v28  ;;  %v8401_v21 = vld [vmem:[#allocation4 + $0x30] sm:$0xf0]  ;;  %v8441_v28 = vld [vmem:[#allocation4 + $0x78] sm:$0xf0] }
 0x245   : > { %v2373_v26 = vmax.f32 %v1808_v20, 0.0  ;;  %v1896_v23 = vpop.f32.mrf.mxu1 }
 0x246   : > { %v1897_v10 = vadd.f32 %v1896_v23, %v11911_v62 }
 0x247   : > { %v2651_v13 = vmax.f32 %v2650_v15, %v2373_v26  ;;  %v1629_v59 = vpop.f32.mrf.mxu2  ;;  %v1718_v33 = vpop.f32.mrf.mxu3 }
 0x248   : > { %v2374_v27 = vmax.f32 %v1897_v10, 0.0  ;;  %v1630_v8 = vadd.f32 %v1629_v59, %v11917_v24  ;;  %v1719_v35 = vadd.f32 %v1718_v33, %v11919_v25  ;;  %v1139_v33 = vadd.f32 %v11790_v56, %v11857_v60 }
 0x24a   : > { %v2688_v48 = vmax.f32 %v2687_v16, %v2374_v27  ;;  %v2371_v57 = vmax.f32 %v1630_v8, 0.0  ;;  %v2372_v50 = vmax.f32 %v1719_v35, 0.0  ;;  %v1810_v47 = vpop.f32.mrf.mxu0  ;;  %v10355_v35 = vld [vmem:[#allocation4 + $0x5c] sm:$0xf]  ;;  %v1179_v40 = vmax.f32 %v1139_v33, 0.0 }
 0x24b   : > { %v1811_v12 = vadd.f32 %v1810_v47, %v11906_v52 }
 0x24c   : > { %v2577_v15 = vmax.f32 %v2576_v39, %v2371_v57  ;;  %v2614_v14 = vmax.f32 %v2613_v32, %v2372_v50  ;;  %1671 = vmatmul.bf16.gmra.mxu2 %v11988_v18  ;;  %1760 = vmatmul.bf16.gmra.mxu3 %v11988_v18  ;;  %v8404_v32 = vor.u32 %v10346_v37, %v8401_v21 }
 0x24d   : > { %v2381_v41 = vmax.f32 %v1811_v12, 0.0  ;;  %1849 = vmatmul.bf16.gmra.mxu0 %v11988_v18  ;;  %v1899_v46 = vpop.f32.mrf.mxu1  ;;  %v12003_v50 = vor.u32 %v10355_v35, %v8441_v28  ;;  %v8399_v35 = vld [vmem:[#allocation4 + $0x10] sm:$0xf] }
 0x24e   : > { %v1900_v20 = vadd.f32 %v1899_v46, %v11911_v62  ;;  %2055 = vmatpush.bf16.msra.mxu3 %v8404_v32  ;;  %v10350_v28 = vld [vmem:[#allocation4 + $0x2c] sm:$0xf0] }
 0x24f   : > { %v2652_v26 = vmax.f32 %v2651_v13, %v2381_v41  ;;  %v1632_v16 = vpop.f32.mrf.mxu2  ;;  %v1721_v23 = vpop.f32.mrf.mxu3  ;;  %2232 = vmatpush.bf16.msra.mxu1 %v12003_v50 }
 0x250   : > { %v2382_v10 = vmax.f32 %v1900_v20, 0.0  ;;  %v1633_v59 = vadd.f32 %v1632_v16, %v11917_v24  ;;  %v1722_v39 = vadd.f32 %v1721_v23, %v11919_v25  ;;  %1938 = vmatmul.bf16.gmra.mxu1 %v11988_v18 }
 0x252   : > { %v2689_v43 = vmax.f32 %v2688_v48, %v2382_v10  ;;  %v2379_v13 = vmax.f32 %v1633_v59, 0.0  ;;  %v2380_v27 = vmax.f32 %v1722_v39, 0.0  ;;  %v1812_v8 = vpop.f32.mrf.mxu0  ;;  %10833 = vmatpush.bf16.msrb.mxu3 %v11805_v42  ;;  %v1180_v48 = vmax.f32 %v1141_v7, 0.0 }
 0x253   : > { %v1813_v57 = vadd.f32 %v1812_v8, %v11906_v52 }
 0x254   : > { %v2578_v47 = vmax.f32 %v2577_v15, %v2379_v13  ;;  %v2615_v12 = vmax.f32 %v2614_v14, %v2380_v27  ;;  %v12011_v15 = vpack.c.bf16 %v1180_v48, %v1179_v40 }
 0x255   : > { %v2389_v41 = vmax.f32 %v1813_v57, 0.0  ;;  %v1901_v60 = vpop.f32.mrf.mxu1 }
 0x256   : > { %v1902_v46 = vadd.f32 %v1901_v60, %v11911_v62  ;;  %10834 = vmatpush.bf16.msrb.mxu3 %v11830_v44  ;;  %v1146_v60 = vadd.f32 %v11790_v56, %v11880_v55 }
 0x257   : > { %v2653_v20 = vmax.f32 %v2652_v26, %v2389_v41  ;;  %v1634_v16 = vpop.f32.mrf.mxu2  ;;  %v1723_v23 = vpop.f32.mrf.mxu3  ;;  %v1144_v41 = vadd.f32 %v11790_v56, %v11872_v36 }
 0x258   : > { %v2390_v37 = vmax.f32 %v1902_v46, 0.0  ;;  %v1635_v21 = vadd.f32 %v1634_v16, %v11917_v24  ;;  %v1724_v42 = vadd.f32 %v1723_v23, %v11919_v25 }
 0x25a   : > { %v2690_v14 = vmax.f32 %v2689_v43, %v2390_v37  ;;  %v2387_v10 = vmax.f32 %v1635_v21, 0.0  ;;  %v2388_v59 = vmax.f32 %v1724_v42, 0.0  ;;  %v1815_v39 = vpop.f32.mrf.mxu0  ;;  %10835 = vmatpush.bf16.msrb.mxu3 %v11855_v58  ;;  %v1181_v42 = vmax.f32 %v1144_v41, 0.0 }
 0x25b   : > { %v1816_v32 = vadd.f32 %v1815_v39, %v11906_v52 }
 0x25c   : > { %v2579_v26 = vmax.f32 %v2578_v47, %v2387_v10  ;;  %v2616_v33 = vmax.f32 %v2615_v12, %v2388_v59  ;;  %1676 = vmatmul.bf16.gmra.mxu2 %v12011_v15  ;;  %1765 = vmatmul.bf16.gmra.mxu3 %v12011_v15  ;;  %v8400_v12 = vor.u32 %v10350_v28, %v8399_v35  ;;  %v1182_v10 = vmax.f32 %v1146_v60, 0.0  ;;  %v10347_v28 = vld [vmem:[#allocation4 + $0x1c] sm:$0xf] }
 0x25d   : > { %v2397_v44 = vmax.f32 %v1816_v32, 0.0  ;;  %1854 = vmatmul.bf16.gmra.mxu0 %v12011_v15  ;;  %v1904_v7 = vpop.f32.mrf.mxu1  ;;  %v10351_v32 = vld [vmem:[#allocation4 + $0x34] sm:$0xf0] }
 0x25e   : > { %v1905_v13 = vadd.f32 %v1904_v7, %v11911_v62  ;;  %10836 = vmatpush.bf16.msrb.mxu3 %v11882_v61  ;;  %1966 = vmatpush.bf16.msra.mxu2 %v8400_v12 }
 0x25f   : > { %v2654_v43 = vmax.f32 %v2653_v20, %v2397_v44  ;;  %v1637_v27 = vpop.f32.mrf.mxu2  ;;  %v1726_v8 = vpop.f32.mrf.mxu3 }
 0x260   : > { %v2398_v58 = vmax.f32 %v1905_v13, 0.0  ;;  %v1638_v57 = vadd.f32 %v1637_v27, %v11917_v24  ;;  %v1727_v47 = vadd.f32 %v1726_v8, %v11919_v25  ;;  %1943 = vmatmul.bf16.gmra.mxu1 %v12011_v15 }
 0x262   : > { %v2691_v40 = vmax.f32 %v2690_v14, %v2398_v58  ;;  %v2395_v48 = vmax.f32 %v1638_v57, 0.0  ;;  %v2396_v46 = vmax.f32 %v1727_v47, 0.0  ;;  %v1817_v20 = vpop.f32.mrf.mxu0  ;;  %10837 = vmatpush.bf16.msrb.mxu3 %v11922_v22  ;;  %v8407_v14 = vld [vmem:[#allocation4 + $0x18] sm:$0xf]  ;;  %v8409_v58 = vld [vmem:[#allocation4 + $0x38] sm:$0xf0] }
 0x263   : > { %v1818_v61 = vadd.f32 %v1817_v20, %v11906_v52  ;;  %v8412_v47 = vor.u32 %v10347_v28, %v8409_v58 }
 0x264   : > { %v2580_v16 = vmax.f32 %v2579_v26, %v2395_v48  ;;  %v2617_v23 = vmax.f32 %v2616_v33, %v2396_v46  ;;  %v8408_v26 = vor.u32 %v10351_v32, %v8407_v14  ;;  %v12033_v33 = vpack.c.bf16 %v1182_v10, %v1181_v42 }
 0x265   : > { %v2405_v37 = vmax.f32 %v1818_v61, 0.0  ;;  %v1906_v21 = vpop.f32.mrf.mxu1  ;;  %2233 = vmatpush.bf16.msra.mxu1 %v8412_v47 }
 0x266   : > { %v1907_v36 = vadd.f32 %v1906_v21, %v11911_v62  ;;  %10838 = vmatpush.bf16.msrb.mxu3 %v11964_v17  ;;  %2144 = vmatpush.bf16.msra.mxu0 %v8408_v26 }
 0x267   : > { %v2655_v59 = vmax.f32 %v2654_v43, %v2405_v37  ;;  %v1639_v39 = vpop.f32.mrf.mxu2  ;;  %v1728_v55 = vpop.f32.mrf.mxu3 }
 0x268   : > { %v2406_v44 = vmax.f32 %v1907_v36, 0.0  ;;  %v1640_v7 = vadd.f32 %v1639_v39, %v11917_v24  ;;  %v1729_v22 = vadd.f32 %v1728_v55, %v11919_v25 }
 0x26a   : > { %v2692_v13 = vmax.f32 %v2691_v40, %v2406_v44  ;;  %v2403_v27 = vmax.f32 %v1640_v7, 0.0  ;;  %v2404_v8 = vmax.f32 %v1729_v22, 0.0  ;;  %v1820_v35 = vpop.f32.mrf.mxu0  ;;  %10839 = vmatpush.bf16.msrb.mxu3 %v12003_v50 }
 0x26b   : > { %v1821_v43 = vadd.f32 %v1820_v35, %v11906_v52 }
 0x26c   : > { %v2581_v17 = vmax.f32 %v2580_v16, %v2403_v27  ;;  %v2618_v57 = vmax.f32 %v2617_v23, %v2404_v8  ;;  %1681 = vmatmul.bf16.gmra.mxu2 %v12033_v33  ;;  %1770 = vmatmul.bf16.gmra.mxu3 %v12033_v33  ;;  %v1149_v16 = vadd.f32 %v11790_v56, %v11889_v51 }
 0x26d   : > { %v2413_v12 = vmax.f32 %v1821_v43, 0.0  ;;  %1859 = vmatmul.bf16.gmra.mxu0 %v12033_v33  ;;  %v1909_v41 = vpop.f32.mrf.mxu1  ;;  %v1151_v23 = vadd.f32 %v11790_v56, %v11896_v30 }
 0x26e   : > { %v1910_v60 = vadd.f32 %v1909_v41, %v11911_v62  ;;  %10840 = vmatpush.bf16.msrb.mxu3 %v8412_v47  ;;  %v1183_v32 = vmax.f32 %v1149_v16, 0.0 }
 0x26f   : > { %v2656_v40 = vmax.f32 %v2655_v59, %v2413_v12  ;;  %v1642_v48 = vpop.f32.mrf.mxu2  ;;  %v1731_v46 = vpop.f32.mrf.mxu3  ;;  %v1184_v44 = vmax.f32 %v1151_v23, 0.0 }
 0x270   : > { %v2414_v20 = vmax.f32 %v1910_v60, 0.0  ;;  %v1643_v50 = vadd.f32 %v1642_v48, %v11917_v24  ;;  %v1732_v61 = vadd.f32 %v1731_v46, %v11919_v25  ;;  %1948 = vmatmul.bf16.gmra.mxu1 %v12033_v33 }
 0x272   : > { %v2693_v37 = vmax.f32 %v2692_v13, %v2414_v20  ;;  %v2411_v21 = vmax.f32 %v1643_v50, 0.0  ;;  %v2412_v42 = vmax.f32 %v1732_v61, 0.0  ;;  %v1822_v10 = vpop.f32.mrf.mxu0  ;;  %v12052_v13 = vpack.c.bf16 %v1184_v44, %v1183_v32 }
 0x273   : > { %v1823_v36 = vadd.f32 %v1822_v10, %v11906_v52 }
 0x274   : > { %v2582_v59 = vmax.f32 %v2581_v17, %v2411_v21  ;;  %v2619_v39 = vmax.f32 %v2618_v57, %v2412_v42 }
 0x275   : > { %v2421_v55 = vmax.f32 %v1823_v36, 0.0  ;;  %v1911_v14 = vpop.f32.mrf.mxu1 }
 0x276   : > { %v1912_v7 = vadd.f32 %v1911_v14, %v11911_v62 }
 0x277   : > { %v2657_v22 = vmax.f32 %v2656_v40, %v2421_v55  ;;  %v1644_v26 = vpop.f32.mrf.mxu2  ;;  %v1733_v51 = vpop.f32.mrf.mxu3 }
 0x278   : > { %v2422_v27 = vmax.f32 %v1912_v7, 0.0  ;;  %v1645_v56 = vadd.f32 %v1644_v26, %v11917_v24  ;;  %v1734_v30 = vadd.f32 %v1733_v51, %v11919_v25 }
 0x27a   : > { %v2694_v8 = vmax.f32 %v2693_v37, %v2422_v27  ;;  %v2419_v35 = vmax.f32 %v1645_v56, 0.0  ;;  %v2420_v43 = vmax.f32 %v1734_v30, 0.0  ;;  %v1825_v28 = vpop.f32.mrf.mxu0 }
 0x27b   : > { %v1826_v58 = vadd.f32 %v1825_v28, %v11906_v52 }
 0x27c   : > { %v2583_v17 = vmax.f32 %v2582_v59, %v2419_v35  ;;  %v2620_v57 = vmax.f32 %v2619_v39, %v2420_v43  ;;  %1686 = vmatmul.bf16.gmra.mxu2 %v12052_v13  ;;  %1775 = vmatmul.bf16.gmra.mxu3 %v12052_v13 }
 0x27d   : > { %v2429_v47 = vmax.f32 %v1826_v58, 0.0  ;;  %1864 = vmatmul.bf16.gmra.mxu0 %v12052_v13  ;;  %v1914_v12 = vpop.f32.mrf.mxu1 }
 0x27e   : > { %v1915_v41 = vadd.f32 %v1914_v12, %v11911_v62 }
 0x27f   : > { %v2658_v60 = vmax.f32 %v2657_v22, %v2429_v47  ;;  %v1647_v40 = vpop.f32.mrf.mxu2  ;;  %v1736_v48 = vpop.f32.mrf.mxu3 }
 0x280   : > { %v2430_v46 = vmax.f32 %v1915_v41, 0.0  ;;  %v1648_v20 = vadd.f32 %v1647_v40, %v11917_v24  ;;  %v1737_v50 = vadd.f32 %v1736_v48, %v11919_v25  ;;  %1953 = vmatmul.bf16.gmra.mxu1 %v12052_v13 }
 0x282   : > { %v2695_v61 = vmax.f32 %v2694_v8, %v2430_v46  ;;  %v2427_v16 = vmax.f32 %v1648_v20, 0.0  ;;  %v2428_v23 = vmax.f32 %v1737_v50, 0.0  ;;  %v1827_v37 = vpop.f32.mrf.mxu0 }
 0x283   : > { %v1828_v21 = vadd.f32 %v1827_v37, %v11906_v52 }
 0x284   : > { %v2584_v42 = vmax.f32 %v2583_v17, %v2427_v16  ;;  %v2621_v10 = vmax.f32 %v2620_v57, %v2428_v23 }
 0x285   : > { %v2437_v36 = vmax.f32 %v1828_v21, 0.0  ;;  %v1916_v59 = vpop.f32.mrf.mxu1 }
 0x286   : > { %v1917_v39 = vadd.f32 %v1916_v59, %v11911_v62 }
 0x287   : > { %v2659_v55 = vmax.f32 %v2658_v60, %v2437_v36  ;;  %v1649_v14 = vpop.f32.mrf.mxu2  ;;  %v1738_v32 = vpop.f32.mrf.mxu3 }
 0x288   : > { %v2438_v44 = vmax.f32 %v1917_v39, 0.0  ;;  %v1650_v7 = vadd.f32 %v1649_v14, %v11917_v24  ;;  %v1739_v22 = vadd.f32 %v1738_v32, %v11919_v25 }
 0x28a   : > { %v2696_v26 = vmax.f32 %v2695_v61, %v2438_v44  ;;  %v2435_v51 = vmax.f32 %v1650_v7, 0.0  ;;  %v2436_v27 = vmax.f32 %v1739_v22, 0.0  ;;  %v1830_v56 = vpop.f32.mrf.mxu0 }
 0x28b   : > { %v1831_v30 = vadd.f32 %v1830_v56, %v11906_v52 }
 0x28c   : > { %v2585_v8 = vmax.f32 %v2584_v42, %v2435_v51  ;;  %v2622_v35 = vmax.f32 %v2621_v10, %v2436_v27  ;;  %1967 = vmatmul.bf16.vlgmr.msra.gmra.mxu2 %v11797_v34  ;;  %2056 = vmatmul.bf16.vlgmr.msra.gmra.mxu3 %v11797_v34 }
 0x28d   : > { %v2445_v43 = vmax.f32 %v1831_v30, 0.0  ;;  %2145 = vmatmul.bf16.vlgmr.msra.gmra.mxu0 %v11797_v34  ;;  %v1919_v28 = vpop.f32.mrf.mxu1 }
 0x28e   : > { %v1920_v58 = vadd.f32 %v1919_v28, %v11911_v62 }
 0x28f   : > { %v2660_v17 = vmax.f32 %v2659_v55, %v2445_v43  ;;  %v1652_v57 = vpop.f32.mrf.mxu2  ;;  %v1741_v47 = vpop.f32.mrf.mxu3 }
 0x290   : > { %v2446_v12 = vmax.f32 %v1920_v58, 0.0  ;;  %v1653_v41 = vadd.f32 %v1652_v57, %v11917_v24  ;;  %v1742_v60 = vadd.f32 %v1741_v47, %v11919_v25  ;;  %2234 = vmatmul.bf16.vlgmr.msra.gmra.mxu1 %v11797_v34 }
 0x292   : > { %v2697_v40 = vmax.f32 %v2696_v26, %v2446_v12  ;;  %v2443_v48 = vmax.f32 %v1653_v41, 0.0  ;;  %v2444_v46 = vmax.f32 %v1742_v60, 0.0  ;;  %v1832_v20 = vpop.f32.mrf.mxu0 }
 0x293   : > { %v1833_v50 = vadd.f32 %v1832_v20, %v11906_v52 }
 0x294   : > { %v2586_v61 = vmax.f32 %v2585_v8, %v2443_v48  ;;  %v2623_v16 = vmax.f32 %v2622_v35, %v2444_v46 }
 0x295   : > { %v2453_v23 = vmax.f32 %v1833_v50, 0.0  ;;  %v1921_v37 = vpop.f32.mrf.mxu1 }
 0x296   : > { %v1922_v21 = vadd.f32 %v1921_v37, %v11911_v62 }
 0x297   : > { %v2661_v42 = vmax.f32 %v2660_v17, %v2453_v23  ;;  %v1654_v10 = vpop.f32.mrf.mxu2  ;;  %v1743_v36 = vpop.f32.mrf.mxu3 }
 0x298   : > { %v2454_v59 = vmax.f32 %v1922_v21, 0.0  ;;  %v1655_v39 = vadd.f32 %v1654_v10, %v11917_v24  ;;  %v1744_v34 = vadd.f32 %v1743_v36, %v11919_v25 }
 0x29a   : > { %v2698_v55 = vmax.f32 %v2697_v40, %v2454_v59  ;;  %v2451_v14 = vmax.f32 %v1655_v39, 0.0  ;;  %v2452_v32 = vmax.f32 %v1744_v34, 0.0  ;;  %v1835_v44 = vpop.f32.mrf.mxu0 }
 0x29b   : > { %v1836_v7 = vadd.f32 %v1835_v44, %v11906_v52 }
 0x29c   : > { %v2587_v22 = vmax.f32 %v2586_v61, %v2451_v14  ;;  %v2624_v26 = vmax.f32 %v2623_v16, %v2452_v32  ;;  %1972 = vmatmul.bf16.gmra.mxu2 %v11812_v49  ;;  %2061 = vmatmul.bf16.gmra.mxu3 %v11812_v49 }
 0x29d   : > { %v2461_v51 = vmax.f32 %v1836_v7, 0.0  ;;  %2150 = vmatmul.bf16.gmra.mxu0 %v11812_v49  ;;  %v1924_v27 = vpop.f32.mrf.mxu1 }
 0x29e   : > { %v1925_v56 = vadd.f32 %v1924_v27, %v11911_v62 }
 0x29f   : > { %v2662_v30 = vmax.f32 %v2661_v42, %v2461_v51  ;;  %v1657_v8 = vpop.f32.mrf.mxu2  ;;  %v1746_v35 = vpop.f32.mrf.mxu3 }
 0x2a0   : > { %v2462_v43 = vmax.f32 %v1925_v56, 0.0  ;;  %v1658_v28 = vadd.f32 %v1657_v8, %v11917_v24  ;;  %v1747_v58 = vadd.f32 %v1746_v35, %v11919_v25  ;;  %2239 = vmatmul.bf16.gmra.mxu1 %v11812_v49 }
 0x2a2   : > { %v2699_v17 = vmax.f32 %v2698_v55, %v2462_v43  ;;  %v2459_v57 = vmax.f32 %v1658_v28, 0.0  ;;  %v2460_v47 = vmax.f32 %v1747_v58, 0.0  ;;  %v1837_v12 = vpop.f32.mrf.mxu0 }
 0x2a3   : > { %v1838_v41 = vadd.f32 %v1837_v12, %v11906_v52 }
 0x2a4   : > { %v2588_v60 = vmax.f32 %v2587_v22, %v2459_v57  ;;  %v2625_v40 = vmax.f32 %v2624_v26, %v2460_v47 }
 0x2a5   : > { %v2469_v48 = vmax.f32 %v1838_v41, 0.0  ;;  %v1926_v46 = vpop.f32.mrf.mxu1 }
 0x2a6   : > { %v1927_v20 = vadd.f32 %v1926_v46, %v11911_v62 }
 0x2a7   : > { %v2663_v50 = vmax.f32 %v2662_v30, %v2469_v48  ;;  %v1659_v61 = vpop.f32.mrf.mxu2  ;;  %v1748_v16 = vpop.f32.mrf.mxu3 }
 0x2a8   : > { %v2470_v23 = vmax.f32 %v1927_v20, 0.0  ;;  %v1660_v37 = vadd.f32 %v1659_v61, %v11917_v24  ;;  %v1749_v49 = vadd.f32 %v1748_v16, %v11919_v25 }
 0x2aa   : > { %v2700_v21 = vmax.f32 %v2699_v17, %v2470_v23  ;;  %v2467_v42 = vmax.f32 %v1660_v37, 0.0  ;;  %v2468_v10 = vmax.f32 %v1749_v49, 0.0  ;;  %v1840_v36 = vpop.f32.mrf.mxu0 }
 0x2ab   : > { %v1841_v59 = vadd.f32 %v1840_v36, %v11906_v52 }
 0x2ac   : > { %v2589_v39 = vmax.f32 %v2588_v60, %v2467_v42  ;;  %v2626_v34 = vmax.f32 %v2625_v40, %v2468_v10  ;;  %1977 = vmatmul.bf16.gmra.mxu2 %v11822_v0  ;;  %2066 = vmatmul.bf16.gmra.mxu3 %v11822_v0 }
 0x2ad   : > { %v2477_v55 = vmax.f32 %v1841_v59, 0.0  ;;  %2155 = vmatmul.bf16.gmra.mxu0 %v11822_v0  ;;  %v1929_v14 = vpop.f32.mrf.mxu1 }
 0x2ae   : > { %v1930_v32 = vadd.f32 %v1929_v14, %v11911_v62 }
 0x2af   : > { %v2664_v44 = vmax.f32 %v2663_v50, %v2477_v55  ;;  %v1662_v7 = vpop.f32.mrf.mxu2  ;;  %v1751_v22 = vpop.f32.mrf.mxu3 }
 0x2b0   : > { %v2478_v26 = vmax.f32 %v1930_v32, 0.0  ;;  %v1663_v51 = vadd.f32 %v1662_v7, %v11917_v24  ;;  %v1752_v27 = vadd.f32 %v1751_v22, %v11919_v25  ;;  %2244 = vmatmul.bf16.gmra.mxu1 %v11822_v0 }
 0x2b2   : > { %v2701_v56 = vmax.f32 %v2700_v21, %v2478_v26  ;;  %v2475_v30 = vmax.f32 %v1663_v51, 0.0  ;;  %v2476_v8 = vmax.f32 %v1752_v27, 0.0  ;;  %v1842_v35 = vpop.f32.mrf.mxu0 }
 0x2b3   : > { %v1843_v43 = vadd.f32 %v1842_v35, %v11906_v52 }
 0x2b4   : > { %v2590_v28 = vmax.f32 %v2589_v39, %v2475_v30  ;;  %v2627_v58 = vmax.f32 %v2626_v34, %v2476_v8 }
 0x2b5   : > { %v2485_v17 = vmax.f32 %v1843_v43, 0.0  ;;  %v1931_v57 = vpop.f32.mrf.mxu1 }
 0x2b6   : > { %v1932_v47 = vadd.f32 %v1931_v57, %v11911_v62 }
 0x2b7   : > { %v2665_v12 = vmax.f32 %v2664_v44, %v2485_v17  ;;  %v1664_v41 = vpop.f32.mrf.mxu2  ;;  %v1753_v60 = vpop.f32.mrf.mxu3 }
 0x2b8   : > { %v2486_v40 = vmax.f32 %v1932_v47, 0.0  ;;  %v1665_v48 = vadd.f32 %v1664_v41, %v11917_v24  ;;  %v1754_v0 = vadd.f32 %v1753_v60, %v11919_v25 }
 0x2ba   : > { %v2702_v46 = vmax.f32 %v2701_v56, %v2486_v40  ;;  %v2483_v20 = vmax.f32 %v1665_v48, 0.0  ;;  %v2484_v50 = vmax.f32 %v1754_v0, 0.0  ;;  %v1845_v61 = vpop.f32.mrf.mxu0 }
 0x2bb   : > { %v1846_v16 = vadd.f32 %v1845_v61, %v11906_v52 }
 0x2bc   : > { %v2591_v23 = vmax.f32 %v2590_v28, %v2483_v20  ;;  %v2628_v37 = vmax.f32 %v2627_v58, %v2484_v50  ;;  %1982 = vmatmul.bf16.gmra.mxu2 %v11837_v53  ;;  %2071 = vmatmul.bf16.gmra.mxu3 %v11837_v53 }
 0x2bd   : > { %v2493_v49 = vmax.f32 %v1846_v16, 0.0  ;;  %2160 = vmatmul.bf16.gmra.mxu0 %v11837_v53  ;;  %v1934_v21 = vpop.f32.mrf.mxu1 }
 0x2be   : > { %v1935_v42 = vadd.f32 %v1934_v21, %v11911_v62 }
 0x2bf   : > { %v2666_v10 = vmax.f32 %v2665_v12, %v2493_v49  ;;  %v1667_v36 = vpop.f32.mrf.mxu2  ;;  %v1756_v59 = vpop.f32.mrf.mxu3 }
 0x2c0   : > { %v2494_v39 = vmax.f32 %v1935_v42, 0.0  ;;  %v1668_v34 = vadd.f32 %v1667_v36, %v11917_v24  ;;  %v1757_v55 = vadd.f32 %v1756_v59, %v11919_v25  ;;  %2249 = vmatmul.bf16.gmra.mxu1 %v11837_v53 }
 0x2c2   : > { %v2703_v14 = vmax.f32 %v2702_v46, %v2494_v39  ;;  %v2491_v32 = vmax.f32 %v1668_v34, 0.0  ;;  %v2492_v44 = vmax.f32 %v1757_v55, 0.0  ;;  %v1847_v7 = vpop.f32.mrf.mxu0 }
 0x2c3   : > { %v1848_v22 = vadd.f32 %v1847_v7, %v11906_v52 }
 0x2c4   : > { %v2592_v26 = vmax.f32 %v2591_v23, %v2491_v32  ;;  %v2629_v51 = vmax.f32 %v2628_v37, %v2492_v44 }
 0x2c5   : > { %v2501_v27 = vmax.f32 %v1848_v22, 0.0  ;;  %v1936_v56 = vpop.f32.mrf.mxu1 }
 0x2c6   : > { %v1937_v30 = vadd.f32 %v1936_v56, %v11911_v62 }
 0x2c7   : > { %v2667_v8 = vmax.f32 %v2666_v10, %v2501_v27  ;;  %v1669_v35 = vpop.f32.mrf.mxu2  ;;  %v1758_v43 = vpop.f32.mrf.mxu3 }
 0x2c8   : > { %v2502_v28 = vmax.f32 %v1937_v30, 0.0  ;;  %v1670_v58 = vadd.f32 %v1669_v35, %v11917_v24  ;;  %v1759_v53 = vadd.f32 %v1758_v43, %v11919_v25 }
 0x2ca   : > { %v2704_v17 = vmax.f32 %v2703_v14, %v2502_v28  ;;  %v2499_v57 = vmax.f32 %v1670_v58, 0.0  ;;  %v2500_v47 = vmax.f32 %v1759_v53, 0.0  ;;  %v1850_v12 = vpop.f32.mrf.mxu0 }
 0x2cb   : > { %v1851_v41 = vadd.f32 %v1850_v12, %v11906_v52 }
 0x2cc   : > { %v2593_v60 = vmax.f32 %v2592_v26, %v2499_v57  ;;  %v2630_v40 = vmax.f32 %v2629_v51, %v2500_v47  ;;  %1987 = vmatmul.bf16.gmra.mxu2 %v11849_v45  ;;  %2076 = vmatmul.bf16.gmra.mxu3 %v11849_v45 }
 0x2cd   : > { %v2509_v48 = vmax.f32 %v1851_v41, 0.0  ;;  %2165 = vmatmul.bf16.gmra.mxu0 %v11849_v45  ;;  %v1939_v0 = vpop.f32.mrf.mxu1 }
 0x2ce   : > { %v1940_v46 = vadd.f32 %v1939_v0, %v11911_v62 }
 0x2cf   : > { %v2668_v20 = vmax.f32 %v2667_v8, %v2509_v48  ;;  %v1672_v50 = vpop.f32.mrf.mxu2  ;;  %v1761_v61 = vpop.f32.mrf.mxu3 }
 0x2d0   : > { %v2510_v16 = vmax.f32 %v1940_v46, 0.0  ;;  %v1673_v23 = vadd.f32 %v1672_v50, %v11917_v24  ;;  %v1762_v37 = vadd.f32 %v1761_v61, %v11919_v25  ;;  %2254 = vmatmul.bf16.gmra.mxu1 %v11849_v45 }
 0x2d2   : > { %v2705_v49 = vmax.f32 %v2704_v17, %v2510_v16  ;;  %v2507_v21 = vmax.f32 %v1673_v23, 0.0  ;;  %v2508_v42 = vmax.f32 %v1762_v37, 0.0  ;;  %v1852_v10 = vpop.f32.mrf.mxu0 }
 0x2d3   : > { %v1853_v36 = vadd.f32 %v1852_v10, %v11906_v52 }
 0x2d4   : > { %v2594_v59 = vmax.f32 %v2593_v60, %v2507_v21  ;;  %v2631_v39 = vmax.f32 %v2630_v40, %v2508_v42 }
 0x2d5   : > { %v2517_v34 = vmax.f32 %v1853_v36, 0.0  ;;  %v1941_v55 = vpop.f32.mrf.mxu1 }
 0x2d6   : > { %v1942_v14 = vadd.f32 %v1941_v55, %v11911_v62 }
 0x2d7   : > { %v2669_v32 = vmax.f32 %v2668_v20, %v2517_v34  ;;  %v1674_v44 = vpop.f32.mrf.mxu2  ;;  %v1763_v7 = vpop.f32.mrf.mxu3 }
 0x2d8   : > { %v2518_v22 = vmax.f32 %v1942_v14, 0.0  ;;  %v1675_v26 = vadd.f32 %v1674_v44, %v11917_v24  ;;  %v1764_v45 = vadd.f32 %v1763_v7, %v11919_v25 }
 0x2da   : > { %v2706_v51 = vmax.f32 %v2705_v49, %v2518_v22  ;;  %v2515_v27 = vmax.f32 %v1675_v26, 0.0  ;;  %v2516_v56 = vmax.f32 %v1764_v45, 0.0  ;;  %v1855_v30 = vpop.f32.mrf.mxu0 }
 0x2db   : > { %v1856_v8 = vadd.f32 %v1855_v30, %v11906_v52 }
 0x2dc   : > { %v2595_v35 = vmax.f32 %v2594_v59, %v2515_v27  ;;  %v2632_v43 = vmax.f32 %v2631_v39, %v2516_v56  ;;  %1992 = vmatmul.bf16.gmra.mxu2 %v11862_v38  ;;  %2081 = vmatmul.bf16.gmra.mxu3 %v11862_v38 }
 0x2dd   : > { %v2525_v28 = vmax.f32 %v1856_v8, 0.0  ;;  %2170 = vmatmul.bf16.gmra.mxu0 %v11862_v38  ;;  %v1944_v58 = vpop.f32.mrf.mxu1 }
 0x2de   : > { %v1945_v53 = vadd.f32 %v1944_v58, %v11911_v62 }
 0x2df   : > { %v2670_v17 = vmax.f32 %v2669_v32, %v2525_v28  ;;  %v1677_v57 = vpop.f32.mrf.mxu2  ;;  %v1766_v47 = vpop.f32.mrf.mxu3 }
 0x2e0   : > { %v2526_v12 = vmax.f32 %v1945_v53, 0.0  ;;  %v1678_v41 = vadd.f32 %v1677_v57, %v11917_v24  ;;  %v1767_v60 = vadd.f32 %v1766_v47, %v11919_v25  ;;  %2259 = vmatmul.bf16.gmra.mxu1 %v11862_v38 }
 0x2e2   : > { %v2707_v40 = vmax.f32 %v2706_v51, %v2526_v12  ;;  %v2523_v48 = vmax.f32 %v1678_v41, 0.0  ;;  %v2524_v0 = vmax.f32 %v1767_v60, 0.0  ;;  %v1857_v46 = vpop.f32.mrf.mxu0 }
 0x2e3   : > { %v1858_v20 = vadd.f32 %v1857_v46, %v11906_v52 }
 0x2e4   : > { %v2596_v50 = vmax.f32 %v2595_v35, %v2523_v48  ;;  %v2633_v61 = vmax.f32 %v2632_v43, %v2524_v0 }
 0x2e5   : > { %v2533_v16 = vmax.f32 %v1858_v20, 0.0  ;;  %v1946_v23 = vpop.f32.mrf.mxu1 }
 0x2e6   : > { %v1947_v37 = vadd.f32 %v1946_v23, %v11911_v62 }
 0x2e7   : > { %v2671_v49 = vmax.f32 %v2670_v17, %v2533_v16  ;;  %v1679_v21 = vpop.f32.mrf.mxu2  ;;  %v1768_v42 = vpop.f32.mrf.mxu3 }
 0x2e8   : > { %v2534_v10 = vmax.f32 %v1947_v37, 0.0  ;;  %v1680_v36 = vadd.f32 %v1679_v21, %v11917_v24  ;;  %v1769_v38 = vadd.f32 %v1768_v42, %v11919_v25 }
 0x2ea   : > { %v2708_v59 = vmax.f32 %v2707_v40, %v2534_v10  ;;  %v2531_v39 = vmax.f32 %v1680_v36, 0.0  ;;  %v2532_v34 = vmax.f32 %v1769_v38, 0.0  ;;  %v1860_v55 = vpop.f32.mrf.mxu0 }
 0x2eb   : > { %v1861_v14 = vadd.f32 %v1860_v55, %v11906_v52 }
 0x2ec   : > { %v2597_v32 = vmax.f32 %v2596_v50, %v2531_v39  ;;  %v2634_v44 = vmax.f32 %v2633_v61, %v2532_v34  ;;  %1997 = vmatmul.bf16.gmra.mxu2 %v11874_v31  ;;  %2086 = vmatmul.bf16.gmra.mxu3 %v11874_v31 }
 0x2ed   : > { %v2541_v7 = vmax.f32 %v1861_v14, 0.0  ;;  %2175 = vmatmul.bf16.gmra.mxu0 %v11874_v31  ;;  %v1949_v22 = vpop.f32.mrf.mxu1 }
 0x2ee   : > { %v1950_v26 = vadd.f32 %v1949_v22, %v11911_v62 }
 0x2ef   : > { %v2672_v45 = vmax.f32 %v2671_v49, %v2541_v7  ;;  %v1682_v51 = vpop.f32.mrf.mxu2  ;;  %v1771_v27 = vpop.f32.mrf.mxu3 }
 0x2f0   : > { %v2542_v56 = vmax.f32 %v1950_v26, 0.0  ;;  %v1683_v30 = vadd.f32 %v1682_v51, %v11917_v24  ;;  %v1772_v8 = vadd.f32 %v1771_v27, %v11919_v25  ;;  %2264 = vmatmul.bf16.gmra.mxu1 %v11874_v31 }
 0x2f2   : > { %v2709_v35 = vmax.f32 %v2708_v59, %v2542_v56  ;;  %v2539_v43 = vmax.f32 %v1683_v30, 0.0  ;;  %v2540_v28 = vmax.f32 %v1772_v8, 0.0  ;;  %v1862_v58 = vpop.f32.mrf.mxu0 }
 0x2f3   : > { %v1863_v53 = vadd.f32 %v1862_v58, %v11906_v52 }
 0x2f4   : > { %v2598_v17 = vmax.f32 %v2597_v32, %v2539_v43  ;;  %v2635_v57 = vmax.f32 %v2634_v44, %v2540_v28 }
 0x2f5   : > { %v2549_v47 = vmax.f32 %v1863_v53, 0.0  ;;  %v1951_v12 = vpop.f32.mrf.mxu1 }
 0x2f6   : > { %v1952_v41 = vadd.f32 %v1951_v12, %v11911_v62 }
 0x2f7   : > { %v2673_v60 = vmax.f32 %v2672_v45, %v2549_v47  ;;  %v1684_v40 = vpop.f32.mrf.mxu2  ;;  %v1773_v48 = vpop.f32.mrf.mxu3 }
 0x2f8   : > { %v2550_v0 = vmax.f32 %v1952_v41, 0.0  ;;  %v1685_v46 = vadd.f32 %v1684_v40, %v11917_v24  ;;  %v1774_v31 = vadd.f32 %v1773_v48, %v11919_v25 }
 0x2fa   : > { %v2710_v20 = vmax.f32 %v2709_v35, %v2550_v0  ;;  %v2547_v50 = vmax.f32 %v1685_v46, 0.0  ;;  %v2548_v61 = vmax.f32 %v1774_v31, 0.0  ;;  %v1865_v16 = vpop.f32.mrf.mxu0 }
 0x2fb   : > { %v1866_v23 = vadd.f32 %v1865_v16, %v11906_v52 }
 0x2fc   : > { %v2599_v37 = vmax.f32 %v2598_v17, %v2547_v50  ;;  %v2636_v49 = vmax.f32 %v2635_v57, %v2548_v61  ;;  %2002 = vmatmul.bf16.gmra.mxu2 %v11887_v29  ;;  %2091 = vmatmul.bf16.gmra.mxu3 %v11887_v29 }
 0x2fd   : > { %v2557_v21 = vmax.f32 %v1866_v23, 0.0  ;;  %2180 = vmatmul.bf16.gmra.mxu0 %v11887_v29  ;;  %v1954_v42 = vpop.f32.mrf.mxu1 }
 0x2fe   : > { %v1955_v10 = vadd.f32 %v1954_v42, %v11911_v62 }
 0x2ff   : > { %v2674_v36 = vmax.f32 %v2673_v60, %v2557_v21  ;;  %v1687_v38 = vpop.f32.mrf.mxu2  ;;  %v1776_v59 = vpop.f32.mrf.mxu3 }
 0x300   : > { %v2558_v39 = vmax.f32 %v1955_v10, 0.0  ;;  %v1688_v34 = vadd.f32 %v1687_v38, %v11917_v24  ;;  %v1777_v55 = vadd.f32 %v1776_v59, %v11919_v25  ;;  %2269 = vmatmul.bf16.gmra.mxu1 %v11887_v29 }
 0x302   : > { %v2711_v14 = vmax.f32 %v2710_v20, %v2558_v39  ;;  %v2555_v32 = vmax.f32 %v1688_v34, 0.0  ;;  %v2556_v44 = vmax.f32 %v1777_v55, 0.0  ;;  %v1867_v7 = vpop.f32.mrf.mxu0 }
 0x303   : > { %v1868_v22 = vadd.f32 %v1867_v7, %v11906_v52 }
 0x304   : > { %v2600_v26 = vmax.f32 %v2599_v37, %v2555_v32  ;;  %v2637_v45 = vmax.f32 %v2636_v49, %v2556_v44 }
 0x305   : > { %v2565_v51 = vmax.f32 %v1868_v22, 0.0  ;;  %v1956_v27 = vpop.f32.mrf.mxu1 }
 0x306   : > { %v1957_v56 = vadd.f32 %v1956_v27, %v11911_v62 }
 0x307   : > { %v2675_v30 = vmax.f32 %v2674_v36, %v2565_v51  ;;  %v1689_v8 = vpop.f32.mrf.mxu2  ;;  %v1778_v35 = vpop.f32.mrf.mxu3 }
 0x308   : > { %v2566_v43 = vmax.f32 %v1957_v56, 0.0  ;;  %v1690_v28 = vadd.f32 %v1689_v8, %v11917_v24  ;;  %v1779_v29 = vadd.f32 %v1778_v35, %v11919_v25  ;;  %v10996_v24 = vld [vmem:[%s15480_s6] sm:$0xff] }
 0x309   : > { %v2676_v58 = vrot.slane %v2675_v30, 4  ;;  %v12167_v40 = vperm.slane %v10996_v24, 6  ;;  %v12170_v20 = vperm.slane %v10996_v24, 7  ;;  %v12174_v42 = vperm.slane %v10996_v24, 4 }
 0x30a   : > { %v2712_v53 = vmax.f32 %v2711_v14, %v2566_v43  ;;  %v2563_v17 = vmax.f32 %v1690_v28, 0.0  ;;  %v2564_v57 = vmax.f32 %v1779_v29, 0.0  ;;  %v2146_v47 = vpop.f32.mrf.mxu0  ;;  %v12177_v34 = vperm.slane %v10996_v24, 5 }
 0x30b   : > { %v2677_v52 = vmax.f32 %v2675_v30, %v2676_v58  ;;  %v2147_v21 = vadd.f32 %v2146_v47, %v12167_v40 }
 0x30c   : > { %v2713_v12 = vrot.slane %v2712_v53, 4  ;;  %v2601_v41 = vmax.f32 %v2600_v26, %v2563_v17  ;;  %v2638_v60 = vmax.f32 %v2637_v45, %v2564_v57  ;;  %2007 = vmatmul.bf16.gmra.mxu2 %v11899_v19  ;;  %2096 = vmatmul.bf16.gmra.mxu3 %v11899_v19 }
 0x30d   : > { %v2678_v62 = vrot.slane %v2677_v52, 2  ;;  %2185 = vmatmul.bf16.gmra.mxu0 %v11899_v19  ;;  %v2235_v25 = vpop.f32.mrf.mxu1 }
 0x30e   : > { %v2714_v48 = vmax.f32 %v2712_v53, %v2713_v12  ;;  %v2602_v0 = vrot.slane %v2601_v41, 4  ;;  %v2639_v46 = vrot.slane %v2638_v60, 4  ;;  %v2236_v39 = vadd.f32 %v2235_v25, %v12170_v20 }
 0x30f   : > { %v2679_v31 = vmax.f32 %v2677_v52, %v2678_v62  ;;  %v1968_v50 = vpop.f32.mrf.mxu2  ;;  %v2057_v61 = vpop.f32.mrf.mxu3 }
 0x310   : > { %v2715_v16 = vrot.slane %v2714_v48, 2  ;;  %v2603_v23 = vmax.f32 %v2601_v41, %v2602_v0  ;;  %v2640_v37 = vmax.f32 %v2638_v60, %v2639_v46  ;;  %2274 = vmatmul.bf16.gmra.mxu1 %v11899_v19  ;;  %v2321_v19 = vmax.f32 %v2147_v21, 0.0 }
 0x311   : > { %v2680_v49 = vrot.slane %v2679_v31, 1  ;;  %v1969_v22 = vadd.f32 %v1968_v50, %v12174_v42  ;;  %v2322_v8 = vmax.f32 %v2236_v39, 0.0  ;;  %v2058_v35 = vadd.f32 %v2057_v61, %v12177_v34 }
 0x312   : > { %v2716_v10 = vmax.f32 %v2714_v48, %v2715_v16  ;;  %v2604_v36 = vrot.slane %v2603_v23, 2  ;;  %v2641_v38 = vrot.slane %v2640_v37, 2  ;;  %v2148_v59 = vpop.f32.mrf.mxu0 }
 0x313   : > { %v2149_v55 = vadd.f32 %v2148_v59, %v12167_v40  ;;  %v2681_v14 = vmax.f32 %v2679_v31, %v2680_v49  ;;  %v2319_v47 = vmax.f32 %v1969_v22, 0.0  ;;  %v2320_v48 = vmax.f32 %v2058_v35, 0.0 }
 0x314   : > { %v2717_v32 = vrot.slane %v2716_v10, 1  ;;  %v2605_v44 = vmax.f32 %v2603_v23, %v2604_v36  ;;  %v2642_v7 = vmax.f32 %v2640_v37, %v2641_v38 }
 0x315   : > { %v2329_v26 = vmax.f32 %v2149_v55, 0.0  ;;  %v2237_v45 = vpop.f32.mrf.mxu1  ;;  %v2877_v58 = vrot.slane %v2681_v14, 6 }
 0x316   : > { %v2718_v51 = vmax.f32 %v2716_v10, %v2717_v32  ;;  %v2606_v27 = vrot.slane %v2605_v44, 1  ;;  %v2643_v56 = vrot.slane %v2642_v7, 1  ;;  %v2238_v30 = vadd.f32 %v2237_v45, %v12170_v20 }
 0x317   : > { %v2793_v43 = vmax.f32 %v2321_v19, %v2329_v26  ;;  %v1970_v28 = vpop.f32.mrf.mxu2  ;;  %v2059_v29 = vpop.f32.mrf.mxu3 }
 0x318   : > { %v2878_v53 = vrot.slane %v2718_v51, 5  ;;  %v2644_v17 = vmax.f32 %v2642_v7, %v2643_v56  ;;  %v2330_v57 = vmax.f32 %v2238_v30, 0.0  ;;  %v1971_v52 = vadd.f32 %v1970_v28, %v12174_v42 }
 0x319   : > { %v2060_v12 = vadd.f32 %v2059_v29, %v12177_v34  ;;  %v2607_v60 = vmax.f32 %v2605_v44, %v2606_v27 }
 0x31a   : > { %v2885_v41 = vsel %vm2884_vm4, %v2877_v58, %v2878_v53  ;;  %v2876_v62 = vrot.slane %v2644_v17, 7  ;;  %v2830_v24 = vmax.f32 %v2322_v8, %v2330_v57  ;;  %v2151_v25 = vpop.f32.mrf.mxu0  ;;  %v2327_v0 = vmax.f32 %v1971_v52, 0.0 }
 0x31b   : > { %v2328_v46 = vmax.f32 %v2060_v12, 0.0  ;;  %v2152_v31 = vadd.f32 %v2151_v25, %v12167_v40 }
 0x31c   : > { %v2883_v50 = vsel %vm835_vm0, %v2607_v60, %v2876_v62  ;;  %2012 = vmatmul.bf16.gmra.mxu2 %v11931_v63  ;;  %2101 = vmatmul.bf16.gmra.mxu3 %v11931_v63  ;;  %v2719_v16 = vmax.f32 %v2319_v47, %v2327_v0 }
 0x31d   : > { %v12190_v61 = vsel %vm836_vm1, %v2883_v50, %v2885_v41  ;;  %v2756_v23 = vmax.f32 %v2320_v48, %v2328_v46  ;;  %v2337_v37 = vmax.f32 %v2152_v31, 0.0  ;;  %2190 = vmatmul.bf16.gmra.mxu0 %v11931_v63  ;;  %v2240_v49 = vpop.f32.mrf.mxu1 }
 0x31e   : > { %v2241_v21 = vadd.f32 %v2240_v49, %v12170_v20 }
 0x31f   : > { %v2794_v10 = vmax.f32 %v2793_v43, %v2337_v37  ;;  %v1973_v36 = vpop.f32.mrf.mxu2  ;;  %v2062_v38 = vpop.f32.mrf.mxu3 }
 0x320   : > { %v2338_v59 = vmax.f32 %v2241_v21, 0.0  ;;  %v1974_v39 = vadd.f32 %v1973_v36, %v12174_v42  ;;  %v2063_v55 = vadd.f32 %v2062_v38, %v12177_v34  ;;  %2279 = vmatmul.bf16.gmra.mxu1 %v11931_v63 }
 0x322   : > { %v2831_v14 = vmax.f32 %v2830_v24, %v2338_v59  ;;  %v2335_v32 = vmax.f32 %v1974_v39, 0.0  ;;  %v2336_v44 = vmax.f32 %v2063_v55, 0.0  ;;  %v2153_v7 = vpop.f32.mrf.mxu0 }
 0x323   : > { %v2154_v19 = vadd.f32 %v2153_v7, %v12167_v40 }
 0x324   : > { %v2720_v22 = vmax.f32 %v2719_v16, %v2335_v32  ;;  %v2757_v26 = vmax.f32 %v2756_v23, %v2336_v44 }
 0x325   : > { %v2345_v45 = vmax.f32 %v2154_v19, 0.0  ;;  %v2242_v51 = vpop.f32.mrf.mxu1 }
 0x326   : > { %v2243_v27 = vadd.f32 %v2242_v51, %v12170_v20 }
 0x327   : > { %v2795_v56 = vmax.f32 %v2794_v10, %v2345_v45  ;;  %v1975_v30 = vpop.f32.mrf.mxu2  ;;  %v2064_v8 = vpop.f32.mrf.mxu3 }
 0x328   : > { %v2346_v35 = vmax.f32 %v2243_v27, 0.0  ;;  %v1976_v43 = vadd.f32 %v1975_v30, %v12174_v42  ;;  %v2065_v63 = vadd.f32 %v2064_v8, %v12177_v34 }
 0x32a   : > { %v2832_v28 = vmax.f32 %v2831_v14, %v2346_v35  ;;  %v2343_v29 = vmax.f32 %v1976_v43, 0.0  ;;  %v2344_v58 = vmax.f32 %v2065_v63, 0.0  ;;  %v2156_v53 = vpop.f32.mrf.mxu0 }
 0x32b   : > { %v2157_v17 = vadd.f32 %v2156_v53, %v12167_v40 }
 0x32c   : > { %v2721_v57 = vmax.f32 %v2720_v22, %v2343_v29  ;;  %v2758_v47 = vmax.f32 %v2757_v26, %v2344_v58  ;;  %2017 = vmatmul.bf16.gmra.mxu2 %v11949_v11  ;;  %2106 = vmatmul.bf16.gmra.mxu3 %v11949_v11 }
 0x32d   : > { %v2353_v52 = vmax.f32 %v2157_v17, 0.0  ;;  %2195 = vmatmul.bf16.gmra.mxu0 %v11949_v11  ;;  %v2245_v12 = vpop.f32.mrf.mxu1 }
 0x32e   : > { %v2246_v41 = vadd.f32 %v2245_v12, %v12170_v20 }
 0x32f   : > { %v2796_v60 = vmax.f32 %v2795_v56, %v2353_v52  ;;  %v1978_v62 = vpop.f32.mrf.mxu2  ;;  %v2067_v24 = vpop.f32.mrf.mxu3 }
 0x330   : > { %v2354_v25 = vmax.f32 %v2246_v41, 0.0  ;;  %v1979_v48 = vadd.f32 %v1978_v62, %v12174_v42  ;;  %v2068_v0 = vadd.f32 %v2067_v24, %v12177_v34  ;;  %2284 = vmatmul.bf16.gmra.mxu1 %v11949_v11 }
 0x332   : > { %v2833_v46 = vmax.f32 %v2832_v28, %v2354_v25  ;;  %v2351_v31 = vmax.f32 %v1979_v48, 0.0  ;;  %v2352_v50 = vmax.f32 %v2068_v0, 0.0  ;;  %v2158_v16 = vpop.f32.mrf.mxu0 }
 0x333   : > { %v2159_v23 = vadd.f32 %v2158_v16, %v12167_v40 }
 0x334   : > { %v2722_v37 = vmax.f32 %v2721_v57, %v2351_v31  ;;  %v2759_v49 = vmax.f32 %v2758_v47, %v2352_v50 }
 0x335   : > { %v2361_v21 = vmax.f32 %v2159_v23, 0.0  ;;  %v2247_v10 = vpop.f32.mrf.mxu1 }
 0x336   : > { %v2248_v36 = vadd.f32 %v2247_v10, %v12170_v20 }
 0x337   : > { %v2797_v38 = vmax.f32 %v2796_v60, %v2361_v21  ;;  %v1980_v59 = vpop.f32.mrf.mxu2  ;;  %v2069_v39 = vpop.f32.mrf.mxu3 }
 0x338   : > { %v2362_v55 = vmax.f32 %v2248_v36, 0.0  ;;  %v1981_v14 = vadd.f32 %v1980_v59, %v12174_v42  ;;  %v2070_v11 = vadd.f32 %v2069_v39, %v12177_v34 }
 0x33a   : > { %v2834_v32 = vmax.f32 %v2833_v46, %v2362_v55  ;;  %v2359_v44 = vmax.f32 %v1981_v14, 0.0  ;;  %v2360_v7 = vmax.f32 %v2070_v11, 0.0  ;;  %v2161_v19 = vpop.f32.mrf.mxu0 }
 0x33b   : > { %v2162_v22 = vadd.f32 %v2161_v19, %v12167_v40 }
 0x33c   : > { %v2723_v26 = vmax.f32 %v2722_v37, %v2359_v44  ;;  %v2760_v45 = vmax.f32 %v2759_v49, %v2360_v7  ;;  %2022 = vmatmul.bf16.gmra.mxu2 %v11970_v54  ;;  %2111 = vmatmul.bf16.gmra.mxu3 %v11970_v54 }
 0x33d   : > { %v2369_v51 = vmax.f32 %v2162_v22, 0.0  ;;  %2200 = vmatmul.bf16.gmra.mxu0 %v11970_v54  ;;  %v2250_v27 = vpop.f32.mrf.mxu1 }
 0x33e   : > { %v2251_v56 = vadd.f32 %v2250_v27, %v12170_v20 }
 0x33f   : > { %v2798_v30 = vmax.f32 %v2797_v38, %v2369_v51  ;;  %v1983_v8 = vpop.f32.mrf.mxu2  ;;  %v2072_v35 = vpop.f32.mrf.mxu3 }
 0x340   : > { %v2370_v43 = vmax.f32 %v2251_v56, 0.0  ;;  %v1984_v63 = vadd.f32 %v1983_v8, %v12174_v42  ;;  %v2073_v28 = vadd.f32 %v2072_v35, %v12177_v34  ;;  %2289 = vmatmul.bf16.gmra.mxu1 %v11970_v54 }
 0x342   : > { %v2835_v29 = vmax.f32 %v2834_v32, %v2370_v43  ;;  %v2367_v58 = vmax.f32 %v1984_v63, 0.0  ;;  %v2368_v53 = vmax.f32 %v2073_v28, 0.0  ;;  %v2163_v17 = vpop.f32.mrf.mxu0 }
 0x343   : > { %v2164_v57 = vadd.f32 %v2163_v17, %v12167_v40 }
 0x344   : > { %v2724_v47 = vmax.f32 %v2723_v26, %v2367_v58  ;;  %v2761_v52 = vmax.f32 %v2760_v45, %v2368_v53 }
 0x345   : > { %v2377_v12 = vmax.f32 %v2164_v57, 0.0  ;;  %v2252_v41 = vpop.f32.mrf.mxu1 }
 0x346   : > { %v2253_v60 = vadd.f32 %v2252_v41, %v12170_v20 }
 0x347   : > { %v2799_v62 = vmax.f32 %v2798_v30, %v2377_v12  ;;  %v1985_v24 = vpop.f32.mrf.mxu2  ;;  %v2074_v25 = vpop.f32.mrf.mxu3 }
 0x348   : > { %v2378_v48 = vmax.f32 %v2253_v60, 0.0  ;;  %v1986_v0 = vadd.f32 %v1985_v24, %v12174_v42  ;;  %v2075_v54 = vadd.f32 %v2074_v25, %v12177_v34 }
 0x34a   : > { %v2836_v46 = vmax.f32 %v2835_v29, %v2378_v48  ;;  %v2375_v31 = vmax.f32 %v1986_v0, 0.0  ;;  %v2376_v50 = vmax.f32 %v2075_v54, 0.0  ;;  %v2166_v16 = vpop.f32.mrf.mxu0 }
 0x34b   : > { %v2167_v23 = vadd.f32 %v2166_v16, %v12167_v40 }
 0x34c   : > { %v2725_v37 = vmax.f32 %v2724_v47, %v2375_v31  ;;  %v2762_v49 = vmax.f32 %v2761_v52, %v2376_v50  ;;  %2027 = vmatmul.bf16.gmra.mxu2 %v11988_v18  ;;  %2116 = vmatmul.bf16.gmra.mxu3 %v11988_v18 }
 0x34d   : > { %v2385_v21 = vmax.f32 %v2167_v23, 0.0  ;;  %2205 = vmatmul.bf16.gmra.mxu0 %v11988_v18  ;;  %v2255_v10 = vpop.f32.mrf.mxu1 }
 0x34e   : > { %v2256_v36 = vadd.f32 %v2255_v10, %v12170_v20 }
 0x34f   : > { %v2800_v38 = vmax.f32 %v2799_v62, %v2385_v21  ;;  %v1988_v59 = vpop.f32.mrf.mxu2  ;;  %v2077_v39 = vpop.f32.mrf.mxu3 }
 0x350   : > { %v2386_v55 = vmax.f32 %v2256_v36, 0.0  ;;  %v1989_v14 = vadd.f32 %v1988_v59, %v12174_v42  ;;  %v2078_v11 = vadd.f32 %v2077_v39, %v12177_v34  ;;  %2294 = vmatmul.bf16.gmra.mxu1 %v11988_v18 }
 0x352   : > { %v2837_v32 = vmax.f32 %v2836_v46, %v2386_v55  ;;  %v2383_v44 = vmax.f32 %v1989_v14, 0.0  ;;  %v2384_v7 = vmax.f32 %v2078_v11, 0.0  ;;  %v2168_v19 = vpop.f32.mrf.mxu0 }
 0x353   : > { %v2169_v22 = vadd.f32 %v2168_v19, %v12167_v40 }
 0x354   : > { %v2726_v26 = vmax.f32 %v2725_v37, %v2383_v44  ;;  %v2763_v45 = vmax.f32 %v2762_v49, %v2384_v7 }
 0x355   : > { %v2393_v51 = vmax.f32 %v2169_v22, 0.0  ;;  %v2257_v27 = vpop.f32.mrf.mxu1 }
 0x356   : > { %v2258_v56 = vadd.f32 %v2257_v27, %v12170_v20 }
 0x357   : > { %v2801_v30 = vmax.f32 %v2800_v38, %v2393_v51  ;;  %v1990_v8 = vpop.f32.mrf.mxu2  ;;  %v2079_v35 = vpop.f32.mrf.mxu3 }
 0x358   : > { %v2394_v43 = vmax.f32 %v2258_v56, 0.0  ;;  %v1991_v63 = vadd.f32 %v1990_v8, %v12174_v42  ;;  %v2080_v18 = vadd.f32 %v2079_v35, %v12177_v34 }
 0x35a   : > { %v2838_v28 = vmax.f32 %v2837_v32, %v2394_v43  ;;  %v2391_v29 = vmax.f32 %v1991_v63, 0.0  ;;  %v2392_v58 = vmax.f32 %v2080_v18, 0.0  ;;  %v2171_v53 = vpop.f32.mrf.mxu0 }
 0x35b   : > { %v2172_v17 = vadd.f32 %v2171_v53, %v12167_v40 }
 0x35c   : > { %v2727_v57 = vmax.f32 %v2726_v26, %v2391_v29  ;;  %v2764_v47 = vmax.f32 %v2763_v45, %v2392_v58  ;;  %2032 = vmatmul.bf16.gmra.mxu2 %v12011_v15  ;;  %2121 = vmatmul.bf16.gmra.mxu3 %v12011_v15 }
 0x35d   : > { %v2401_v52 = vmax.f32 %v2172_v17, 0.0  ;;  %2210 = vmatmul.bf16.gmra.mxu0 %v12011_v15  ;;  %v2260_v12 = vpop.f32.mrf.mxu1 }
 0x35e   : > { %v2261_v41 = vadd.f32 %v2260_v12, %v12170_v20 }
 0x35f   : > { %v2802_v60 = vmax.f32 %v2801_v30, %v2401_v52  ;;  %v1993_v62 = vpop.f32.mrf.mxu2  ;;  %v2082_v24 = vpop.f32.mrf.mxu3 }
 0x360   : > { %v2402_v25 = vmax.f32 %v2261_v41, 0.0  ;;  %v1994_v48 = vadd.f32 %v1993_v62, %v12174_v42  ;;  %v2083_v0 = vadd.f32 %v2082_v24, %v12177_v34  ;;  %2299 = vmatmul.bf16.gmra.mxu1 %v12011_v15 }
 0x362   : > { %v2839_v54 = vmax.f32 %v2838_v28, %v2402_v25  ;;  %v2399_v46 = vmax.f32 %v1994_v48, 0.0  ;;  %v2400_v31 = vmax.f32 %v2083_v0, 0.0  ;;  %v2173_v50 = vpop.f32.mrf.mxu0 }
 0x363   : > { %v2174_v16 = vadd.f32 %v2173_v50, %v12167_v40 }
 0x364   : > { %v2728_v23 = vmax.f32 %v2727_v57, %v2399_v46  ;;  %v2765_v37 = vmax.f32 %v2764_v47, %v2400_v31 }
 0x365   : > { %v2409_v49 = vmax.f32 %v2174_v16, 0.0  ;;  %v2262_v21 = vpop.f32.mrf.mxu1 }
 0x366   : > { %v2263_v10 = vadd.f32 %v2262_v21, %v12170_v20 }
 0x367   : > { %v2803_v36 = vmax.f32 %v2802_v60, %v2409_v49  ;;  %v1995_v38 = vpop.f32.mrf.mxu2  ;;  %v2084_v59 = vpop.f32.mrf.mxu3 }
 0x368   : > { %v2410_v39 = vmax.f32 %v2263_v10, 0.0  ;;  %v1996_v55 = vadd.f32 %v1995_v38, %v12174_v42  ;;  %v2085_v15 = vadd.f32 %v2084_v59, %v12177_v34 }
 0x36a   : > { %v2840_v14 = vmax.f32 %v2839_v54, %v2410_v39  ;;  %v2407_v11 = vmax.f32 %v1996_v55, 0.0  ;;  %v2408_v32 = vmax.f32 %v2085_v15, 0.0  ;;  %v2176_v44 = vpop.f32.mrf.mxu0 }
 0x36b   : > { %v2177_v7 = vadd.f32 %v2176_v44, %v12167_v40 }
 0x36c   : > { %v2729_v19 = vmax.f32 %v2728_v23, %v2407_v11  ;;  %v2766_v22 = vmax.f32 %v2765_v37, %v2408_v32  ;;  %2037 = vmatmul.bf16.gmra.mxu2 %v12033_v33  ;;  %2126 = vmatmul.bf16.gmra.mxu3 %v12033_v33 }
 0x36d   : > { %v2417_v26 = vmax.f32 %v2177_v7, 0.0  ;;  %2215 = vmatmul.bf16.gmra.mxu0 %v12033_v33  ;;  %v2265_v45 = vpop.f32.mrf.mxu1 }
 0x36e   : > { %v2266_v51 = vadd.f32 %v2265_v45, %v12170_v20 }
 0x36f   : > { %v2804_v27 = vmax.f32 %v2803_v36, %v2417_v26  ;;  %v1998_v56 = vpop.f32.mrf.mxu2  ;;  %v2087_v30 = vpop.f32.mrf.mxu3 }
 0x370   : > { %v2418_v8 = vmax.f32 %v2266_v51, 0.0  ;;  %v1999_v35 = vadd.f32 %v1998_v56, %v12174_v42  ;;  %v2088_v43 = vadd.f32 %v2087_v30, %v12177_v34  ;;  %2304 = vmatmul.bf16.gmra.mxu1 %v12033_v33 }
 0x372   : > { %v2841_v63 = vmax.f32 %v2840_v14, %v2418_v8  ;;  %v2415_v18 = vmax.f32 %v1999_v35, 0.0  ;;  %v2416_v28 = vmax.f32 %v2088_v43, 0.0  ;;  %v2178_v29 = vpop.f32.mrf.mxu0 }
 0x373   : > { %v2179_v58 = vadd.f32 %v2178_v29, %v12167_v40 }
 0x374   : > { %v2730_v53 = vmax.f32 %v2729_v19, %v2415_v18  ;;  %v2767_v17 = vmax.f32 %v2766_v22, %v2416_v28 }
 0x375   : > { %v2425_v57 = vmax.f32 %v2179_v58, 0.0  ;;  %v2267_v47 = vpop.f32.mrf.mxu1 }
 0x376   : > { %v2268_v52 = vadd.f32 %v2267_v47, %v12170_v20 }
 0x377   : > { %v2805_v12 = vmax.f32 %v2804_v27, %v2425_v57  ;;  %v2000_v41 = vpop.f32.mrf.mxu2  ;;  %v2089_v60 = vpop.f32.mrf.mxu3 }
 0x378   : > { %v2426_v62 = vmax.f32 %v2268_v52, 0.0  ;;  %v2001_v24 = vadd.f32 %v2000_v41, %v12174_v42  ;;  %v2090_v33 = vadd.f32 %v2089_v60, %v12177_v34 }
 0x37a   : > { %v2842_v25 = vmax.f32 %v2841_v63, %v2426_v62  ;;  %v2423_v48 = vmax.f32 %v2001_v24, 0.0  ;;  %v2424_v0 = vmax.f32 %v2090_v33, 0.0  ;;  %v2181_v54 = vpop.f32.mrf.mxu0 }
 0x37b   : > { %v2182_v46 = vadd.f32 %v2181_v54, %v12167_v40 }
 0x37c   : > { %v2731_v31 = vmax.f32 %v2730_v53, %v2423_v48  ;;  %v2768_v50 = vmax.f32 %v2767_v17, %v2424_v0  ;;  %2042 = vmatmul.bf16.gmra.mxu2 %v12052_v13  ;;  %2131 = vmatmul.bf16.gmra.mxu3 %v12052_v13 }
 0x37d   : > { %v2433_v16 = vmax.f32 %v2182_v46, 0.0  ;;  %2220 = vmatmul.bf16.gmra.mxu0 %v12052_v13  ;;  %v2270_v23 = vpop.f32.mrf.mxu1 }
 0x37e   : > { %v2271_v37 = vadd.f32 %v2270_v23, %v12170_v20 }
 0x37f   : > { %v2806_v49 = vmax.f32 %v2805_v12, %v2433_v16  ;;  %v2003_v21 = vpop.f32.mrf.mxu2  ;;  %v2092_v10 = vpop.f32.mrf.mxu3 }
 0x380   : > { %v2434_v36 = vmax.f32 %v2271_v37, 0.0  ;;  %v2004_v38 = vadd.f32 %v2003_v21, %v12174_v42  ;;  %v2093_v59 = vadd.f32 %v2092_v10, %v12177_v34 }
 0x382   : > { %v2843_v39 = vmax.f32 %v2842_v25, %v2434_v36  ;;  %v2431_v55 = vmax.f32 %v2004_v38, 0.0  ;;  %v2432_v15 = vmax.f32 %v2093_v59, 0.0  ;;  %v2183_v14 = vpop.f32.mrf.mxu0 }
 0x383   : > { %v2184_v11 = vadd.f32 %v2183_v14, %v12167_v40 }
 0x384   : > { %v2732_v32 = vmax.f32 %v2731_v31, %v2431_v55  ;;  %v2769_v44 = vmax.f32 %v2768_v50, %v2432_v15 }
 0x385   : > { %v2441_v7 = vmax.f32 %v2184_v11, 0.0  ;;  %v2272_v19 = vpop.f32.mrf.mxu1 }
 0x386   : > { %v2273_v22 = vadd.f32 %v2272_v19, %v12170_v20 }
 0x387   : > { %v2807_v26 = vmax.f32 %v2806_v49, %v2441_v7  ;;  %v2005_v45 = vpop.f32.mrf.mxu2  ;;  %v2094_v51 = vpop.f32.mrf.mxu3 }
 0x388   : > { %v2442_v27 = vmax.f32 %v2273_v22, 0.0  ;;  %v2006_v56 = vadd.f32 %v2005_v45, %v12174_v42  ;;  %v2095_v30 = vadd.f32 %v2094_v51, %v12177_v34 }
 0x38a   : > { %v2844_v8 = vmax.f32 %v2843_v39, %v2442_v27  ;;  %v2439_v35 = vmax.f32 %v2006_v56, 0.0  ;;  %v2440_v43 = vmax.f32 %v2095_v30, 0.0  ;;  %v2186_v63 = vpop.f32.mrf.mxu0 }
 0x38b   : > { %v2187_v18 = vadd.f32 %v2186_v63, %v12167_v40 }
 0x38c   : > { %v2733_v28 = vmax.f32 %v2732_v32, %v2439_v35  ;;  %v2770_v29 = vmax.f32 %v2769_v44, %v2440_v43  ;;  %2309 = vmatmul.bf16.vlgmr.msrb.gmra.mxu3 %v12052_v13 }
 0x38d   : > { %v2449_v58 = vmax.f32 %v2187_v18, 0.0  ;;  %v2275_v53 = vpop.f32.mrf.mxu1 }
 0x38e   : > { %v2276_v17 = vadd.f32 %v2275_v53, %v12170_v20 }
 0x38f   : > { %v2808_v57 = vmax.f32 %v2807_v26, %v2449_v58  ;;  %v2008_v47 = vpop.f32.mrf.mxu2  ;;  %v2097_v52 = vpop.f32.mrf.mxu3 }
 0x390   : > { %v2450_v12 = vmax.f32 %v2276_v17, 0.0  ;;  %v2009_v41 = vadd.f32 %v2008_v47, %v12174_v42  ;;  %v2098_v60 = vadd.f32 %v2097_v52, %v12177_v34 }
 0x392   : > { %v2845_v62 = vmax.f32 %v2844_v8, %v2450_v12  ;;  %v2447_v24 = vmax.f32 %v2009_v41, 0.0  ;;  %v2448_v33 = vmax.f32 %v2098_v60, 0.0  ;;  %v2188_v25 = vpop.f32.mrf.mxu0 }
 0x393   : > { %v2189_v48 = vadd.f32 %v2188_v25, %v12167_v40 }
 0x394   : > { %v2734_v0 = vmax.f32 %v2733_v28, %v2447_v24  ;;  %v2771_v13 = vmax.f32 %v2770_v29, %v2448_v33 }
 0x395   : > { %v2457_v54 = vmax.f32 %v2189_v48, 0.0  ;;  %v2277_v46 = vpop.f32.mrf.mxu1 }
 0x396   : > { %v2278_v31 = vadd.f32 %v2277_v46, %v12170_v20 }
 0x397   : > { %v2809_v50 = vmax.f32 %v2808_v57, %v2457_v54  ;;  %v2010_v16 = vpop.f32.mrf.mxu2  ;;  %v2099_v23 = vpop.f32.mrf.mxu3 }
 0x398   : > { %v2458_v37 = vmax.f32 %v2278_v31, 0.0  ;;  %v2011_v49 = vadd.f32 %v2010_v16, %v12174_v42  ;;  %v2100_v21 = vadd.f32 %v2099_v23, %v12177_v34 }
 0x39a   : > { %v2846_v10 = vmax.f32 %v2845_v62, %v2458_v37  ;;  %v2455_v36 = vmax.f32 %v2011_v49, 0.0  ;;  %v2456_v38 = vmax.f32 %v2100_v21, 0.0  ;;  %v2191_v59 = vpop.f32.mrf.mxu0 }
 0x39b   : > { %v2192_v39 = vadd.f32 %v2191_v59, %v12167_v40 }
 0x39c   : > { %v2735_v55 = vmax.f32 %v2734_v0, %v2455_v36  ;;  %v2772_v15 = vmax.f32 %v2771_v13, %v2456_v38 }
 0x39d   : > { %v2465_v14 = vmax.f32 %v2192_v39, 0.0  ;;  %v2280_v11 = vpop.f32.mrf.mxu1 }
 0x39e   : > { %v2281_v32 = vadd.f32 %v2280_v11, %v12170_v20 }
 0x39f   : > { %v2810_v44 = vmax.f32 %v2809_v50, %v2465_v14  ;;  %v2013_v7 = vpop.f32.mrf.mxu2  ;;  %v2102_v19 = vpop.f32.mrf.mxu3 }
 0x3a0   : > { %v2466_v22 = vmax.f32 %v2281_v32, 0.0  ;;  %v2014_v26 = vadd.f32 %v2013_v7, %v12174_v42  ;;  %v2103_v45 = vadd.f32 %v2102_v19, %v12177_v34 }
 0x3a2   : > { %v12285_v51 = vmax.f32 %v2846_v10, %v2466_v22  ;;  %v2463_v27 = vmax.f32 %v2014_v26, 0.0  ;;  %v2464_v56 = vmax.f32 %v2103_v45, 0.0  ;;  %v2193_v30 = vpop.f32.mrf.mxu0 }
 0x3a3   : > { %v2194_v8 = vadd.f32 %v2193_v30, %v12167_v40 }
 0x3a4   : > { %v2736_v35 = vmax.f32 %v2735_v55, %v2463_v27  ;;  %v2773_v43 = vmax.f32 %v2772_v15, %v2464_v56 }
 0x3a5   : > { %v2473_v63 = vmax.f32 %v2194_v8, 0.0  ;;  %v2282_v58 = vpop.f32.mrf.mxu1 }
 0x3a7   : > { %v2811_v18 = vmax.f32 %v2810_v44, %v2473_v63  ;;  %v2015_v28 = vpop.f32.mrf.mxu2  ;;  %v2104_v29 = vpop.f32.mrf.mxu3 }
 0x3a8   : > { %v2016_v53 = vadd.f32 %v2015_v28, %v12174_v42  ;;  %v2105_v17 = vadd.f32 %v2104_v29, %v12177_v34 }
 0x3aa   : > { %v2471_v57 = vmax.f32 %v2016_v53, 0.0  ;;  %v2472_v47 = vmax.f32 %v2105_v17, 0.0  ;;  %v2196_v52 = vpop.f32.mrf.mxu0 }
 0x3ab   : > { %v2197_v12 = vadd.f32 %v2196_v52, %v12167_v40 }
 0x3ac   : > { %v2737_v41 = vmax.f32 %v2736_v35, %v2471_v57  ;;  %v2774_v60 = vmax.f32 %v2773_v43, %v2472_v47 }
 0x3ad   : > { %v2481_v62 = vmax.f32 %v2197_v12, 0.0  ;;  %v2285_v13 = vpop.f32.mrf.mxu1 }
 0x3af   : > { %v12291_v24 = vmax.f32 %v2811_v18, %v2481_v62  ;;  %v2018_v33 = vpop.f32.mrf.mxu2  ;;  %v2107_v25 = vpop.f32.mrf.mxu3  ;;  %v2283_v62 = vadd.f32 %v2282_v58, %v12170_v20 }
 0x3b0   : > { %v2019_v48 = vadd.f32 %v2018_v33, %v12174_v42  ;;  %v2108_v0 = vadd.f32 %v2107_v25, %v12177_v34 }
 0x3b2   : > { %v2479_v54 = vmax.f32 %v2019_v48, 0.0  ;;  %v2480_v46 = vmax.f32 %v2108_v0, 0.0  ;;  %v2198_v31 = vpop.f32.mrf.mxu0 }
 0x3b3   : > { %v2199_v12 = vadd.f32 %v2198_v31, %v12167_v40 }
 0x3b4   : > { %v2738_v50 = vmax.f32 %v2737_v41, %v2479_v54  ;;  %v2775_v16 = vmax.f32 %v2774_v60, %v2480_v46  ;;  %v2286_v54 = vadd.f32 %v2285_v13, %v12170_v20 }
 0x3b5   : > { %v2287_v36 = vpop.f32.mrf.mxu1  ;;  %v2489_v46 = vmax.f32 %v2199_v12, 0.0 }
 0x3b7   : > { %v2020_v23 = vpop.f32.mrf.mxu2  ;;  %v2109_v37 = vpop.f32.mrf.mxu3  ;;  %v2813_v13 = vmax.f32 %v12291_v24, %v2489_v46 }
 0x3b8   : > { %v2110_v49 = vadd.f32 %v2109_v37, %v12177_v34  ;;  %v2021_v41 = vadd.f32 %v2020_v23, %v12174_v42  ;;  %v2474_v23 = vmax.f32 %v2283_v62, 0.0 }
 0x3ba   : > { %v2488_v21 = vmax.f32 %v2110_v49, 0.0  ;;  %v2201_v10 = vpop.f32.mrf.mxu0 }
 0x3bb   : > { %v2202_v48 = vadd.f32 %v2201_v10, %v12167_v40 }
 0x3bc   : > { %v2776_v38 = vmax.f32 %v2775_v16, %v2488_v21  ;;  %v2487_v16 = vmax.f32 %v2021_v41, 0.0  ;;  %v2288_v21 = vadd.f32 %v2287_v36, %v12170_v20  ;;  %v2848_v36 = vmax.f32 %v12285_v51, %v2474_v23 }
 0x3bd   : > { %v2290_v32 = vpop.f32.mrf.mxu1  ;;  %v2497_v58 = vmax.f32 %v2202_v48, 0.0 }
 0x3bf   : > { %v2023_v59 = vpop.f32.mrf.mxu2  ;;  %v2112_v39 = vpop.f32.mrf.mxu3  ;;  %v2814_v41 = vmax.f32 %v2813_v13, %v2497_v58 }
 0x3c0   : > { %v2113_v55 = vadd.f32 %v2112_v39, %v12177_v34  ;;  %v2024_v0 = vadd.f32 %v2023_v59, %v12174_v42  ;;  %v2482_v59 = vmax.f32 %v2286_v54, 0.0 }
 0x3c2   : > { %v2496_v15 = vmax.f32 %v2113_v55, 0.0  ;;  %v2203_v14 = vpop.f32.mrf.mxu0  ;;  %v2739_v55 = vmax.f32 %v2738_v50, %v2487_v16 }
 0x3c3   : > { %v2204_v37 = vadd.f32 %v2203_v14, %v12167_v40  ;;  %v2291_v14 = vadd.f32 %v2290_v32, %v12170_v20 }
 0x3c4   : > { %v2777_v11 = vmax.f32 %v2776_v38, %v2496_v15  ;;  %v2495_v38 = vmax.f32 %v2024_v0, 0.0 }
 0x3c5   : > { %v12300_v30 = vpop.f32.mrf.mxu1  ;;  %v2498_v51 = vmax.f32 %v2291_v14, 0.0 }
 0x3c6   : > { %v2740_v24 = vmax.f32 %v2739_v55, %v2495_v38 }
 0x3c7   : > { %v2025_v44 = vpop.f32.mrf.mxu2  ;;  %v2114_v7 = vpop.f32.mrf.mxu3 }
 0x3c8   : > { %v2115_v19 = vadd.f32 %v2114_v7, %v12177_v34  ;;  %v2026_v31 = vadd.f32 %v2025_v44, %v12174_v42 }
 0x3ca   : > { %v2504_v22 = vmax.f32 %v2115_v19, 0.0  ;;  %v2206_v26 = vpop.f32.mrf.mxu0  ;;  %v2503_v44 = vmax.f32 %v2026_v31, 0.0  ;;  %v2490_v19 = vmax.f32 %v2288_v21, 0.0 }
 0x3cb   : > { %v2207_v39 = vadd.f32 %v2206_v26, %v12167_v40 }
 0x3cc   : > { %v12298_v45 = vmax.f32 %v2777_v11, %v2504_v22  ;;  %v2505_v11 = vmax.f32 %v2204_v37, 0.0  ;;  %v2741_v46 = vmax.f32 %v2740_v24, %v2503_v44 }
 0x3cd   : > { %v12302_v63 = vpop.f32.mrf.mxu1  ;;  %v2513_v50 = vmax.f32 %v2207_v39, 0.0 }
 0x3ce   : > { %v2815_v54 = vmax.f32 %v2814_v41, %v2505_v11 }
 0x3cf   : > { %v2028_v27 = vpop.f32.mrf.mxu2  ;;  %v2117_v56 = vpop.f32.mrf.mxu3 }
 0x3d0   : > { %v2029_v10 = vadd.f32 %v2028_v27, %v12174_v42  ;;  %v2118_v15 = vadd.f32 %v2117_v56, %v12177_v34  ;;  %v2849_v56 = vmax.f32 %v2848_v36, %v2482_v59  ;;  %v2816_v21 = vmax.f32 %v2815_v54, %v2513_v50 }
 0x3d2   : > { %v2208_v8 = vpop.f32.mrf.mxu0  ;;  %v2511_v62 = vmax.f32 %v2029_v10, 0.0  ;;  %v2512_v48 = vmax.f32 %v2118_v15, 0.0 }
 0x3d3   : > { %v2209_v7 = vadd.f32 %v2208_v8, %v12167_v40 }
 0x3d4   : > { %v2742_v58 = vmax.f32 %v2741_v46, %v2511_v62 }
 0x3d5   : > { %v12306_v17 = vpop.f32.mrf.mxu1 }
 0x3d7   : > { %v2030_v35 = vpop.f32.mrf.mxu2  ;;  %v2119_v43 = vpop.f32.mrf.mxu3 }
 0x3d8   : > { %v2031_v22 = vadd.f32 %v2030_v35, %v12174_v42  ;;  %v2120_v26 = vadd.f32 %v2119_v43, %v12177_v34  ;;  %v2521_v35 = vmax.f32 %v2209_v7, 0.0  ;;  %v2850_v43 = vmax.f32 %v2849_v56, %v2490_v19 }
 0x3d9   : > { %v2293_v56 = vadd.f32 %v12300_v30, %v12170_v20 }
 0x3da   : > { %v2211_v18 = vpop.f32.mrf.mxu0  ;;  %v2519_v37 = vmax.f32 %v2031_v22, 0.0  ;;  %v2520_v31 = vmax.f32 %v2120_v26, 0.0  ;;  %v2851_v13 = vmax.f32 %v2850_v43, %v2498_v51  ;;  %v2817_v55 = vmax.f32 %v2816_v21, %v2521_v35 }
 0x3db   : > { %v2212_v23 = vadd.f32 %v2211_v18, %v12167_v40 }
 0x3dc   : > { %v2743_v18 = vmax.f32 %v2742_v58, %v2519_v37  ;;  %v2506_v58 = vmax.f32 %v2293_v56, 0.0 }
 0x3dd   : > { %v12312_v60 = vpop.f32.mrf.mxu1  ;;  %v2529_v44 = vmax.f32 %v2212_v23, 0.0 }
 0x3df   : > { %v2033_v28 = vpop.f32.mrf.mxu2  ;;  %v2122_v29 = vpop.f32.mrf.mxu3 }
 0x3e0   : > { %v2034_v32 = vadd.f32 %v2033_v28, %v12174_v42  ;;  %v2123_v0 = vadd.f32 %v2122_v29, %v12177_v34  ;;  %v2779_v29 = vmax.f32 %v12298_v45, %v2512_v48  ;;  %v2818_v48 = vmax.f32 %v2817_v55, %v2529_v44 }
 0x3e2   : > { %v12304_v53 = vpop.f32.mrf.mxu0  ;;  %v2527_v39 = vmax.f32 %v2034_v32, 0.0  ;;  %v2528_v10 = vmax.f32 %v2123_v0, 0.0  ;;  %v2780_v11 = vmax.f32 %v2779_v29, %v2520_v31 }
 0x3e3   : > { %v2214_v59 = vadd.f32 %v12304_v53, %v12167_v40 }
 0x3e4   : > { %v2744_v22 = vmax.f32 %v2743_v18, %v2527_v39  ;;  %v2781_v26 = vmax.f32 %v2780_v11, %v2528_v10 }
 0x3e5   : > { %v12334_v8 = vpop.f32.mrf.mxu1  ;;  %v2537_v41 = vmax.f32 %v2214_v59, 0.0 }
 0x3e7   : > { %v2035_v57 = vpop.f32.mrf.mxu2  ;;  %v2124_v47 = vpop.f32.mrf.mxu3  ;;  %v2819_v35 = vmax.f32 %v2818_v48, %v2537_v41 }
 0x3e8   : > { %v2036_v38 = vadd.f32 %v2035_v57, %v12174_v42  ;;  %v2125_v28 = vadd.f32 %v2124_v47, %v12177_v34 }
 0x3ea   : > { %v12308_v52 = vpop.f32.mrf.mxu0  ;;  %v2535_v45 = vmax.f32 %v2036_v38, 0.0  ;;  %v2536_v36 = vmax.f32 %v2125_v28, 0.0  ;;  %v2298_v38 = vadd.f32 %v12306_v17, %v12170_v20 }
 0x3eb   : > { %v2217_v57 = vadd.f32 %v12308_v52, %v12167_v40 }
 0x3ec   : > { %v2745_v0 = vmax.f32 %v2744_v22, %v2535_v45  ;;  %v2782_v51 = vmax.f32 %v2781_v26, %v2536_v36  ;;  %v2303_v36 = vadd.f32 %v12334_v8, %v12170_v20 }
 0x3ed   : > { %v2305_v32 = vpop.f32.mrf.mxu1 }
 0x3ef   : > { %v2038_v33 = vpop.f32.mrf.mxu2  ;;  %v2127_v25 = vpop.f32.mrf.mxu3 }
 0x3f0   : > { %v2039_v15 = vadd.f32 %v2038_v33, %v12174_v42  ;;  %v2128_v14 = vadd.f32 %v2127_v25, %v12177_v34 }
 0x3f2   : > { %v12320_v49 = vpop.f32.mrf.mxu0  ;;  %v2543_v25 = vmax.f32 %v2039_v15, 0.0  ;;  %v2544_v24 = vmax.f32 %v2128_v14, 0.0 }
 0x3f3   : > { %v2219_v33 = vadd.f32 %v12320_v49, %v12167_v40  ;;  %v2296_v49 = vadd.f32 %v12302_v63, %v12170_v20 }
 0x3f4   : > { %v2746_v31 = vmax.f32 %v2745_v0, %v2543_v25  ;;  %v2783_v23 = vmax.f32 %v2782_v51, %v2544_v24 }
 0x3f5   : > { %v2553_v43 = vmax.f32 %v2219_v33, 0.0  ;;  %v2514_v15 = vmax.f32 %v2296_v49, 0.0  ;;  %v2307_v22 = vpop.f32.mrf.mxu1 }
 0x3f7   : > { %v2040_v27 = vpop.f32.mrf.mxu2  ;;  %v2129_v12 = vpop.f32.mrf.mxu3 }
 0x3f8   : > { %v2041_v19 = vadd.f32 %v2040_v27, %v12174_v42  ;;  %v2130_v53 = vadd.f32 %v2129_v12, %v12177_v34  ;;  %v2545_v27 = vmax.f32 %v2217_v57, 0.0 }
 0x3fa   : > { %v2221_v16 = vpop.f32.mrf.mxu0  ;;  %v2551_v54 = vmax.f32 %v2041_v19, 0.0  ;;  %v2552_v46 = vmax.f32 %v2130_v53, 0.0 }
 0x3fb   : > { %v2222_v12 = vadd.f32 %v2221_v16, %v12167_v40  ;;  %v2820_v16 = vmax.f32 %v2819_v35, %v2545_v27 }
 0x3fc   : > { %v2747_v10 = vmax.f32 %v2746_v31, %v2551_v54  ;;  %v2784_v59 = vmax.f32 %v2783_v23, %v2552_v46 }
 0x3fd   : > { %v2561_v28 = vmax.f32 %v2222_v12, 0.0  ;;  %v2821_v14 = vmax.f32 %v2820_v16, %v2553_v43 }
 0x3ff   : > { %v2043_v47 = vpop.f32.mrf.mxu2  ;;  %v2132_v7 = vpop.f32.mrf.mxu3  ;;  %v2822_v45 = vmax.f32 %v2821_v14, %v2561_v28 }
 0x400   : > { %v2044_v50 = vadd.f32 %v2043_v47, %v12174_v42  ;;  %v2133_v52 = vadd.f32 %v2132_v7, %v12177_v34  ;;  %v2852_v47 = vmax.f32 %v2851_v13, %v2506_v58  ;;  %v2522_v7 = vmax.f32 %v2298_v38, 0.0 }
 0x401   : > { %v2308_v13 = vadd.f32 %v2307_v22, %v12170_v20 }
 0x402   : > { %v2223_v62 = vpop.f32.mrf.mxu0  ;;  %v2559_v21 = vmax.f32 %v2044_v50, 0.0  ;;  %v2560_v30 = vmax.f32 %v2133_v52, 0.0  ;;  %v2853_v53 = vmax.f32 %v2852_v47, %v2514_v15  ;;  %v2538_v50 = vmax.f32 %v2303_v36, 0.0 }
 0x403   : > { %v2224_v37 = vadd.f32 %v2223_v62, %v12167_v40  ;;  %v2301_v40 = vadd.f32 %v12312_v60, %v12170_v20  ;;  %v2306_v60 = vadd.f32 %v2305_v32, %v12170_v20  ;;  %v2554_v54 = vmax.f32 %v2308_v13, 0.0 }
 0x404   : > { %v2748_v11 = vmax.f32 %v2747_v10, %v2559_v21  ;;  %v2785_v44 = vmax.f32 %v2784_v59, %v2560_v30  ;;  %v2854_v25 = vmax.f32 %v2853_v53, %v2522_v7  ;;  %v2867_v7 = vld [vmem:[#allocation2] sm:$0xff] }
 0x405   : > { %v2569_v18 = vmax.f32 %v2224_v37, 0.0  ;;  %v2546_v8 = vmax.f32 %v2306_v60, 0.0 }
 0x407   : > { %v2045_v29 = vpop.f32.mrf.mxu2  ;;  %v2134_v39 = vpop.f32.mrf.mxu3  ;;  %v2823_v26 = vmax.f32 %v2822_v45, %v2569_v18 }
 0x408   : > { %v2046_v63 = vadd.f32 %v2045_v29, %v12174_v42  ;;  %v2135_v55 = vadd.f32 %v2134_v39, %v12177_v34  ;;  %v2530_v34 = vmax.f32 %v2301_v40, 0.0 }
 0x409   : > { %v2824_v48 = vrot.slane %v2823_v26, 4 }
 0x40a   : > { %v2567_v57 = vmax.f32 %v2046_v63, 0.0  ;;  %v2568_v17 = vmax.f32 %v2135_v55, 0.0  ;;  %v2855_v56 = vmax.f32 %v2854_v25, %v2530_v34 }
 0x40b   : > { %v2825_v49 = vmax.f32 %v2823_v26, %v2824_v48 }
 0x40c   : > { %v2749_v19 = vmax.f32 %v2748_v11, %v2567_v57  ;;  %v2786_v42 = vmax.f32 %v2785_v44, %v2568_v17  ;;  %v2856_v51 = vmax.f32 %v2855_v56, %v2538_v50 }
 0x40d   : > { %v2826_v16 = vrot.slane %v2825_v49, 2 }
 0x40e   : > { %v2750_v41 = vrot.slane %v2749_v19, 4  ;;  %v2787_v33 = vrot.slane %v2786_v42, 4  ;;  %v2857_v35 = vmax.f32 %v2856_v51, %v2546_v8 }
 0x40f   : > { %v2310_v24 = vpop.f32.mrf.mxu3  ;;  %v2827_v55 = vmax.f32 %v2825_v49, %v2826_v16 }
 0x410   : > { %v2751_v52 = vmax.f32 %v2749_v19, %v2750_v41  ;;  %v2788_v62 = vmax.f32 %v2786_v42, %v2787_v33  ;;  %v2311_v0 = vadd.f32 %v2310_v24, %v12170_v20  ;;  %v2858_v21 = vmax.f32 %v2857_v35, %v2554_v54 }
 0x411   : > { %v2828_v14 = vrot.slane %v2827_v55, 1 }
 0x412   : > { %v2752_v27 = vrot.slane %v2751_v52, 2  ;;  %v2789_v12 = vrot.slane %v2788_v62, 2  ;;  %v2562_v31 = vmax.f32 %v2311_v0, 0.0 }
 0x413   : > { %v2829_v44 = vmax.f32 %v2827_v55, %v2828_v14 }
 0x414   : > { %v2753_v46 = vmax.f32 %v2751_v52, %v2752_v27  ;;  %v2790_v32 = vmax.f32 %v2788_v62, %v2789_v12  ;;  %v2859_v39 = vmax.f32 %v2858_v21, %v2562_v31 }
 0x415   : > { %v2881_v47 = vrot.slane %v2829_v44, 2 }
 0x416   : > { %v2754_v43 = vrot.slane %v2753_v46, 1  ;;  %v2791_v37 = vrot.slane %v2790_v32, 1 }
 0x417   : > { %v2312_v23 = vpop.f32.mrf.mxu3 }
 0x418   : > { %v2755_v30 = vmax.f32 %v2753_v46, %v2754_v43  ;;  %v2792_v58 = vmax.f32 %v2790_v32, %v2791_v37  ;;  %v2313_v38 = vadd.f32 %v2312_v23, %v12170_v20 }
 0x41a   : > { %v2879_v28 = vrot.slane %v2755_v30, 4  ;;  %v2880_v29 = vrot.slane %v2792_v58, 3  ;;  %v2570_v10 = vmax.f32 %v2313_v38, 0.0 }
 0x41c   : > { %v2888_v59 = vsel %vm2887_vm5, %v2879_v28, %v2880_v29  ;;  %v2860_v63 = vmax.f32 %v2859_v39, %v2570_v10 }
 0x41e   : > { %v2861_v15 = vrot.slane %v2860_v63, 4 }
 0x420   : > { %v2862_v40 = vmax.f32 %v2860_v63, %v2861_v15 }
 0x422   : > { %v2863_v18 = vrot.slane %v2862_v40, 2 }
 0x424   : > { %v2864_v11 = vmax.f32 %v2862_v40, %v2863_v18 }
 0x426   : > { %v2865_v57 = vrot.slane %v2864_v11, 1 }
 0x428   : > { %v2866_v17 = vmax.f32 %v2864_v11, %v2865_v57 }
 0x42a   : > { %v2882_v20 = vrot.slane %v2866_v17, 1 }
 0x42c   : > { %v2890_v45 = vsel %vm2889_vm6, %v2881_v47, %v2882_v20 }
 0x42d   : > { %v2892_v36 = vsel %vm2891_vm7, %v2888_v59, %v2890_v45  ;;  %2901 = sbr.rel (%p8637_p7) target bundleno = 1765 (0x6e5), region = 120 }
 0x42e   : > { %v2894_v19 = vsel %vm2893_vm8, %v12190_v61, %v2892_v36 }
 0x42f   : > { %v2896_v42 = vmax.f32 %v2867_v7, %v2894_v19 }
 0x431   : > { %2897 = vst [vmem:[#allocation2] sm:$0xff] %v2896_v42 }
 0x432   : > { %v8752_v53 = vld [vmem:[%s15481_s7 + $0xe0] sm:$0xf]  ;;  %v10438_v34 = vld [vmem:[%s15481_s7 + $0xec] sm:$0xf0] }
 0x433   : > { %v8880_v22 = vld [vmem:[%s15481_s7 + $0x1e0] sm:$0xf]  ;;  %v8753_v26 = vor.u32 %v10438_v34, %v8752_v53  ;;  %v10470_v61 = vld [vmem:[%s15481_s7 + $0x1ec] sm:$0xf0] }
 0x434   : > { %v9008_v60 = vld [vmem:[%s15481_s7 + $0x2e0] sm:$0xf]  ;;  %v10502_v41 = vld [vmem:[%s15481_s7 + $0x2ec] sm:$0xf0]  ;;  %v8881_v33 = vor.u32 %v10470_v61, %v8880_v22 }
 0x435   : > { %v9009_v25 = vor.u32 %v10502_v41, %v9008_v60  ;;  %v9136_v24 = vld [vmem:[%s15481_s7 + $0x3e0] sm:$0xf]  ;;  %v10534_v50 = vld [vmem:[%s15481_s7 + $0x3ec] sm:$0xf0]  ;;  %4474 = vmatpush.bf16.msra.mxu0 %v8753_v26 }
 0x436   : > { %v8736_v13 = vld [vmem:[%s15481_s7 + $0xc0] sm:$0xf]  ;;  %v9137_v52 = vor.u32 %v10534_v50, %v9136_v24  ;;  %v10434_v62 = vld [vmem:[%s15481_s7 + $0xcc] sm:$0xf0]  ;;  %4487 = vmatpush.bf16.msra.mxu1 %v8881_v33 }
 0x437   : > { %v8864_v56 = vld [vmem:[%s15481_s7 + $0x1c0] sm:$0xf]  ;;  %v10466_v48 = vld [vmem:[%s15481_s7 + $0x1cc] sm:$0xf0]  ;;  %4500 = vmatpush.bf16.msra.mxu2 %v9009_v25  ;;  %v8737_v8 = vor.u32 %v10434_v62, %v8736_v13 }
 0x438   : > { %v8865_v27 = vor.u32 %v10466_v48, %v8864_v56  ;;  %v8992_v12 = vld [vmem:[%s15481_s7 + $0x2c0] sm:$0xf]  ;;  %v10498_v0 = vld [vmem:[%s15481_s7 + $0x2cc] sm:$0xf0]  ;;  %4513 = vmatpush.bf16.msra.mxu3 %v9137_v52 }
 0x439   : > { %v9120_v51 = vld [vmem:[%s15481_s7 + $0x3c0] sm:$0xf]  ;;  %v8993_v54 = vor.u32 %v10498_v0, %v8992_v12  ;;  %v10530_v46 = vld [vmem:[%s15481_s7 + $0x3cc] sm:$0xf0]  ;;  %4475 = vmatpush.bf16.msra.mxu0 %v8737_v8 }
 0x43a   : > { %v8720_v32 = vld [vmem:[%s15481_s7 + $0xa0] sm:$0xf]  ;;  %v10430_v49 = vld [vmem:[%s15481_s7 + $0xac] sm:$0xf0]  ;;  %v9121_v35 = vor.u32 %v10530_v46, %v9120_v51  ;;  %4488 = vmatpush.bf16.msra.mxu1 %v8865_v27 }
 0x43b   : > { %v8848_v43 = vld [vmem:[%s15481_s7 + $0x1a0] sm:$0xf]  ;;  %v10462_v37 = vld [vmem:[%s15481_s7 + $0x1ac] sm:$0xf0]  ;;  %v8721_v23 = vor.u32 %v10430_v49, %v8720_v32  ;;  %4501 = vmatpush.bf16.msra.mxu2 %v8993_v54 }
 0x43c   : > { %v8976_v31 = vld [vmem:[%s15481_s7 + $0x2a0] sm:$0xf]  ;;  %v10494_v21 = vld [vmem:[%s15481_s7 + $0x2ac] sm:$0xf0]  ;;  %v8849_v38 = vor.u32 %v10462_v37, %v8848_v43  ;;  %4514 = vmatpush.bf16.msra.mxu3 %v9121_v35 }
 0x43d   : > { %v9104_v30 = vld [vmem:[%s15481_s7 + $0x3a0] sm:$0xf]  ;;  %v10526_v58 = vld [vmem:[%s15481_s7 + $0x3ac] sm:$0xf0]  ;;  %v8977_v16 = vor.u32 %v10494_v21, %v8976_v31  ;;  %4476 = vmatpush.bf16.msra.mxu0 %v8721_v23 }
 0x43e   : > { %v8704_v28 = vld [vmem:[%s15481_s7 + $0x80] sm:$0xf]  ;;  %v10426_v29 = vld [vmem:[%s15481_s7 + $0x8c] sm:$0xf0]  ;;  %v9105_v10 = vor.u32 %v10526_v58, %v9104_v30  ;;  %4489 = vmatpush.bf16.msra.mxu1 %v8849_v38 }
 0x43f   : > { %v8832_v39 = vld [vmem:[%s15481_s7 + $0x180] sm:$0xf]  ;;  %v10458_v59 = vld [vmem:[%s15481_s7 + $0x18c] sm:$0xf0]  ;;  %v8705_v14 = vor.u32 %v10426_v29, %v8704_v28  ;;  %4502 = vmatpush.bf16.msra.mxu2 %v8977_v16 }
 0x440   : > { %v8960_v63 = vld [vmem:[%s15481_s7 + $0x280] sm:$0xf]  ;;  %v10490_v55 = vld [vmem:[%s15481_s7 + $0x28c] sm:$0xf0]  ;;  %v8833_v18 = vor.u32 %v10458_v59, %v8832_v39  ;;  %4515 = vmatpush.bf16.msra.mxu3 %v9105_v10 }
 0x441   : > { %v9088_v15 = vld [vmem:[%s15481_s7 + $0x380] sm:$0xf]  ;;  %v10522_v40 = vld [vmem:[%s15481_s7 + $0x38c] sm:$0xf0]  ;;  %v8961_v11 = vor.u32 %v10490_v55, %v8960_v63  ;;  %4477 = vmatpush.bf16.msra.mxu0 %v8705_v14 }
 0x442   : > { %v8688_v44 = vld [vmem:[%s15481_s7 + $0x60] sm:$0xf]  ;;  %v10422_v57 = vld [vmem:[%s15481_s7 + $0x6c] sm:$0xf0]  ;;  %v9089_v47 = vor.u32 %v10522_v40, %v9088_v15  ;;  %4490 = vmatpush.bf16.msra.mxu1 %v8833_v18 }
 0x443   : > { %v8816_v17 = vld [vmem:[%s15481_s7 + $0x160] sm:$0xf]  ;;  %v10454_v20 = vld [vmem:[%s15481_s7 + $0x16c] sm:$0xf0]  ;;  %v8689_v42 = vor.u32 %v10422_v57, %v8688_v44  ;;  %4503 = vmatpush.bf16.msra.mxu2 %v8961_v11 }
 0x444   : > { %v8944_v7 = vld [vmem:[%s15481_s7 + $0x260] sm:$0xf]  ;;  %v10486_v45 = vld [vmem:[%s15481_s7 + $0x26c] sm:$0xf0]  ;;  %v8817_v53 = vor.u32 %v10454_v20, %v8816_v17  ;;  %4516 = vmatpush.bf16.msra.mxu3 %v9089_v47 }
 0x445   : > { %v9072_v36 = vld [vmem:[%s15481_s7 + $0x360] sm:$0xf]  ;;  %v10518_v19 = vld [vmem:[%s15481_s7 + $0x36c] sm:$0xf0]  ;;  %v8945_v34 = vor.u32 %v10486_v45, %v8944_v7  ;;  %4478 = vmatpush.bf16.msra.mxu0 %v8689_v42 }
 0x446   : > { %v8672_v22 = vld [vmem:[%s15481_s7 + $0x40] sm:$0xf]  ;;  %v10418_v26 = vld [vmem:[%s15481_s7 + $0x4c] sm:$0xf0]  ;;  %v9073_v60 = vor.u32 %v10518_v19, %v9072_v36  ;;  %4491 = vmatpush.bf16.msra.mxu1 %v8817_v53 }
 0x447   : > { %v8800_v61 = vld [vmem:[%s15481_s7 + $0x140] sm:$0xf]  ;;  %v10450_v41 = vld [vmem:[%s15481_s7 + $0x14c] sm:$0xf0]  ;;  %v8673_v13 = vor.u32 %v10418_v26, %v8672_v22  ;;  %4504 = vmatpush.bf16.msra.mxu2 %v8945_v34 }
 0x448   : > { %v8928_v33 = vld [vmem:[%s15481_s7 + $0x240] sm:$0xf]  ;;  %v10482_v25 = vld [vmem:[%s15481_s7 + $0x24c] sm:$0xf0]  ;;  %v8801_v52 = vor.u32 %v10450_v41, %v8800_v61  ;;  %4517 = vmatpush.bf16.msra.mxu3 %v9073_v60 }
 0x449   : > { %v9056_v24 = vld [vmem:[%s15481_s7 + $0x340] sm:$0xf]  ;;  %v10514_v50 = vld [vmem:[%s15481_s7 + $0x34c] sm:$0xf0]  ;;  %v8929_v62 = vor.u32 %v10482_v25, %v8928_v33  ;;  %4479 = vmatpush.bf16.msra.mxu0 %v8673_v13 }
 0x44a   : > { %v8656_v56 = vld [vmem:[%s15481_s7 + $0x20] sm:$0xf]  ;;  %v10414_v48 = vld [vmem:[%s15481_s7 + $0x2c] sm:$0xf0]  ;;  %v9057_v27 = vor.u32 %v10514_v50, %v9056_v24  ;;  %4492 = vmatpush.bf16.msra.mxu1 %v8801_v52 }
 0x44b   : > { %v8784_v8 = vld [vmem:[%s15481_s7 + $0x120] sm:$0xf]  ;;  %v10446_v12 = vld [vmem:[%s15481_s7 + $0x12c] sm:$0xf0]  ;;  %v8657_v32 = vor.u32 %v10414_v48, %v8656_v56  ;;  %4505 = vmatpush.bf16.msra.mxu2 %v8929_v62 }
 0x44c   : > { %v8912_v0 = vld [vmem:[%s15481_s7 + $0x220] sm:$0xf]  ;;  %v10478_v51 = vld [vmem:[%s15481_s7 + $0x22c] sm:$0xf0]  ;;  %v8785_v43 = vor.u32 %v10446_v12, %v8784_v8  ;;  %4518 = vmatpush.bf16.msra.mxu3 %v9057_v27 }
 0x44d   : > { %v9040_v54 = vld [vmem:[%s15481_s7 + $0x320] sm:$0xf]  ;;  %v10510_v46 = vld [vmem:[%s15481_s7 + $0x32c] sm:$0xf0]  ;;  %v8913_v37 = vor.u32 %v10478_v51, %v8912_v0  ;;  %4480 = vmatpush.bf16.msra.mxu0 %v8657_v32 }
 0x44e   : > { %v8640_v49 = vld [vmem:[%s15481_s7] sm:$0xf]  ;;  %v10410_v35 = vld [vmem:[%s15481_s7 + $0xc] sm:$0xf0]  ;;  %v9041_v30 = vor.u32 %v10510_v46, %v9040_v54  ;;  %4493 = vmatpush.bf16.msra.mxu1 %v8785_v43 }
 0x44f   : > { %v8768_v31 = vld [vmem:[%s15481_s7 + $0x100] sm:$0xf]  ;;  %v10442_v23 = vld [vmem:[%s15481_s7 + $0x10c] sm:$0xf0]  ;;  %v8641_v10 = vor.u32 %v10410_v35, %v8640_v49  ;;  %4506 = vmatpush.bf16.msra.mxu2 %v8913_v37 }
 0x450   : > { %v8896_v21 = vld [vmem:[%s15481_s7 + $0x200] sm:$0xf]  ;;  %v10474_v58 = vld [vmem:[%s15481_s7 + $0x20c] sm:$0xf0]  ;;  %v8769_v15 = vor.u32 %v10442_v23, %v8768_v31  ;;  %4519 = vmatpush.bf16.msra.mxu3 %v9041_v30 }
 0x451   : > { %v9024_v38 = vld [vmem:[%s15481_s7 + $0x300] sm:$0xf]  ;;  %v10506_v16 = vld [vmem:[%s15481_s7 + $0x30c] sm:$0xf0]  ;;  %v8897_v40 = vor.u32 %v10474_v58, %v8896_v21  ;;  %4481 = vmatpush.bf16.msra.mxu0 %v8641_v10 }
 0x452   : > { %v9264_v28 = vld [vmem:[%s15481_s7 + $0x4e0] sm:$0xf]  ;;  %v10566_v29 = vld [vmem:[%s15481_s7 + $0x4ec] sm:$0xf0]  ;;  %v9025_v11 = vor.u32 %v10506_v16, %v9024_v38  ;;  %4494 = vmatpush.bf16.msra.mxu1 %v8769_v15 }
 0x453   : > { %v9392_v39 = vld [vmem:[%s15481_s7 + $0x5e0] sm:$0xf]  ;;  %v10598_v59 = vld [vmem:[%s15481_s7 + $0x5ec] sm:$0xf0]  ;;  %v9265_v44 = vor.u32 %v10566_v29, %v9264_v28  ;;  %4507 = vmatpush.bf16.msra.mxu2 %v8897_v40 }
 0x454   : > { %v9520_v63 = vld [vmem:[%s15481_s7 + $0x6e0] sm:$0xf]  ;;  %v10630_v55 = vld [vmem:[%s15481_s7 + $0x6ec] sm:$0xf0]  ;;  %v9393_v57 = vor.u32 %v10598_v59, %v9392_v39  ;;  %4520 = vmatpush.bf16.msra.mxu3 %v9025_v11 }
 0x455   : > { %v9648_v14 = vld [vmem:[%s15481_s7 + $0x7e0] sm:$0xf]  ;;  %v10662_v18 = vld [vmem:[%s15481_s7 + $0x7ec] sm:$0xf0]  ;;  %v9521_v17 = vor.u32 %v10630_v55, %v9520_v63  ;;  %4526 = vmatpush.bf16.msrb.mxu0 %v9265_v44 }
 0x456   : > { %v9248_v47 = vld [vmem:[%s15481_s7 + $0x4c0] sm:$0xf]  ;;  %v10562_v20 = vld [vmem:[%s15481_s7 + $0x4cc] sm:$0xf0]  ;;  %v9649_v45 = vor.u32 %v10662_v18, %v9648_v14  ;;  %4539 = vmatpush.bf16.msrb.mxu1 %v9393_v57 }
 0x457   : > { %v9376_v7 = vld [vmem:[%s15481_s7 + $0x5c0] sm:$0xf]  ;;  %v10594_v36 = vld [vmem:[%s15481_s7 + $0x5cc] sm:$0xf0]  ;;  %v9249_v22 = vor.u32 %v10562_v20, %v9248_v47  ;;  %4552 = vmatpush.bf16.msrb.mxu2 %v9521_v17 }
 0x458   : > { %v9504_v19 = vld [vmem:[%s15481_s7 + $0x6c0] sm:$0xf]  ;;  %v10626_v42 = vld [vmem:[%s15481_s7 + $0x6cc] sm:$0xf0]  ;;  %v9377_v61 = vor.u32 %v10594_v36, %v9376_v7  ;;  %4565 = vmatpush.bf16.msrb.mxu3 %v9649_v45 }
 0x459   : > { %v9632_v53 = vld [vmem:[%s15481_s7 + $0x7c0] sm:$0xf]  ;;  %v10658_v34 = vld [vmem:[%s15481_s7 + $0x7cc] sm:$0xf0]  ;;  %v9505_v60 = vor.u32 %v10626_v42, %v9504_v19  ;;  %4527 = vmatpush.bf16.msrb.mxu0 %v9249_v22 }
 0x45a   : > { %v9232_v26 = vld [vmem:[%s15481_s7 + $0x4a0] sm:$0xf]  ;;  %v10558_v41 = vld [vmem:[%s15481_s7 + $0x4ac] sm:$0xf0]  ;;  %v9633_v24 = vor.u32 %v10658_v34, %v9632_v53  ;;  %4540 = vmatpush.bf16.msrb.mxu1 %v9377_v61 }
 0x45b   : > { %v9360_v33 = vld [vmem:[%s15481_s7 + $0x5a0] sm:$0xf]  ;;  %v10590_v25 = vld [vmem:[%s15481_s7 + $0x5ac] sm:$0xf0]  ;;  %v9233_v56 = vor.u32 %v10558_v41, %v9232_v26  ;;  %4553 = vmatpush.bf16.msrb.mxu2 %v9505_v60 }
 0x45c   : > { %v9488_v50 = vld [vmem:[%s15481_s7 + $0x6a0] sm:$0xf]  ;;  %v10622_v13 = vld [vmem:[%s15481_s7 + $0x6ac] sm:$0xf0]  ;;  %v9361_v48 = vor.u32 %v10590_v25, %v9360_v33  ;;  %4566 = vmatpush.bf16.msrb.mxu3 %v9633_v24 }
 0x45d   : > { %v9616_v52 = vld [vmem:[%s15481_s7 + $0x7a0] sm:$0xf]  ;;  %v10654_v62 = vld [vmem:[%s15481_s7 + $0x7ac] sm:$0xf0]  ;;  %v9489_v0 = vor.u32 %v10622_v13, %v9488_v50  ;;  %4528 = vmatpush.bf16.msrb.mxu0 %v9233_v56 }
 0x45e   : > { %v9216_v8 = vld [vmem:[%s15481_s7 + $0x480] sm:$0xf]  ;;  %v10554_v27 = vld [vmem:[%s15481_s7 + $0x48c] sm:$0xf0]  ;;  %v9617_v49 = vor.u32 %v10654_v62, %v9616_v52  ;;  %4541 = vmatpush.bf16.msrb.mxu1 %v9361_v48 }
 0x45f   : > { %v12642_v12 = vld [vmem:[#allocation2] sm:$0xff]  ;;  %v10586_v35 = vld [vmem:[%s15481_s7 + $0x58c] sm:$0xf0]  ;;  %v9217_v38 = vor.u32 %v10554_v27, %v9216_v8  ;;  %4554 = vmatpush.bf16.msrb.mxu2 %v9489_v0 }
 0x460   : > { %v9344_v51 = vld [vmem:[%s15481_s7 + $0x580] sm:$0xf]  ;;  %v2906_v54 = vperm.slane %v12642_v12, 2  ;;  %v2904_v46 = vperm.slane %v12642_v12, 0  ;;  %v2907_v32 = vperm.slane %v12642_v12, 3  ;;  %v2905_v16 = vperm.slane %v12642_v12, 1  ;;  %4567 = vmatpush.bf16.msrb.mxu3 %v9617_v49 }
 0x461   : > { %v9472_v43 = vld [vmem:[%s15481_s7 + $0x680] sm:$0xf]  ;;  %v10618_v37 = vld [vmem:[%s15481_s7 + $0x68c] sm:$0xf0]  ;;  %v9345_v28 = vor.u32 %v10586_v35, %v9344_v51  ;;  %4529 = vmatpush.bf16.msrb.mxu0 %v9217_v38  ;;  %v2910_v27 = vperm.slane %v12642_v12, 6 }
 0x462   : > { %v9600_v31 = vld [vmem:[%s15481_s7 + $0x780] sm:$0xf]  ;;  %v10650_v23 = vld [vmem:[%s15481_s7 + $0x78c] sm:$0xf0]  ;;  %v12665_v21 = vpack.c.bf16 %v2906_v54, %v2906_v54  ;;  %v12667_v30 = vpack.c.bf16 %v2904_v46, %v2904_v46  ;;  %v12669_v58 = vpack.c.bf16 %v2907_v32, %v2907_v32  ;;  %v9473_v29 = vor.u32 %v10618_v37, %v9472_v43  ;;  %v10468_v38 = vld [vmem:[%s15481_s7 + $0x1e4] sm:$0xf] }
 0x463   : > { %v9200_v39 = vld [vmem:[%s15481_s7 + $0x460] sm:$0xf]  ;;  %v10550_v10 = vld [vmem:[%s15481_s7 + $0x46c] sm:$0xf0]  ;;  %v9601_v63 = vor.u32 %v10650_v23, %v9600_v31  ;;  %v12691_v14 = vpack.c.bf16 %v2905_v16, %v2905_v16  ;;  %4542 = vmatpush.bf16.msrb.mxu1 %v9345_v28  ;;  %v10436_v31 = vld [vmem:[%s15481_s7 + $0xe4] sm:$0xf] }
 0x464   : > { %v9328_v59 = vld [vmem:[%s15481_s7 + $0x560] sm:$0xf]  ;;  %v10582_v55 = vld [vmem:[%s15481_s7 + $0x56c] sm:$0xf0]  ;;  %4508 = vmatmul.bf16.vlgmr.msra.gmra.mxu2 %v12665_v21  ;;  %4482 = vmatmul.bf16.vlgmr.msra.gmra.mxu0 %v12667_v30  ;;  %v9201_v44 = vor.u32 %v10550_v10, %v9200_v39  ;;  %v8754_v23 = vld [vmem:[%s15481_s7 + $0xf0] sm:$0xf0] }
 0x465   : > { %v9456_v15 = vld [vmem:[%s15481_s7 + $0x660] sm:$0xf]  ;;  %v10614_v40 = vld [vmem:[%s15481_s7 + $0x66c] sm:$0xf0]  ;;  %4521 = vmatmul.bf16.vlgmr.msra.gmra.mxu3 %v12669_v58  ;;  %4495 = vmatmul.bf16.vlgmr.msra.gmra.mxu1 %v12691_v14  ;;  %v9329_v57 = vor.u32 %v10582_v55, %v9328_v59  ;;  %v8882_v28 = vld [vmem:[%s15481_s7 + $0x1f0] sm:$0xf0] }
 0x466   : > { %v9584_v18 = vld [vmem:[%s15481_s7 + $0x760] sm:$0xf]  ;;  %v10646_v11 = vld [vmem:[%s15481_s7 + $0x76c] sm:$0xf0]  ;;  %4555 = vmatpush.bf16.msrb.mxu2 %v9473_v29  ;;  %v9457_v17 = vor.u32 %v10614_v40, %v9456_v15  ;;  %4568 = vmatpush.bf16.msrb.mxu3 %v9601_v63  ;;  %v10500_v29 = vld [vmem:[%s15481_s7 + $0x2e4] sm:$0xf] }
 0x467   : > { %v9184_v47 = vld [vmem:[%s15481_s7 + $0x440] sm:$0xf]  ;;  %v10546_v20 = vld [vmem:[%s15481_s7 + $0x44c] sm:$0xf0]  ;;  %v9585_v45 = vor.u32 %v10646_v11, %v9584_v18  ;;  %4530 = vmatpush.bf16.msrb.mxu0 %v9201_v44  ;;  %4543 = vmatpush.bf16.msrb.mxu1 %v9329_v57  ;;  %v9010_v39 = vld [vmem:[%s15481_s7 + $0x2f0] sm:$0xf0]  ;;  %v8757_v11 = vor.u32 %v10436_v31, %v8754_v23  ;;  %v8885_v57 = vor.u32 %v10468_v38, %v8882_v28 }
 0x468   : > { %v9312_v7 = vld [vmem:[%s15481_s7 + $0x540] sm:$0xf]  ;;  %v10578_v36 = vld [vmem:[%s15481_s7 + $0x54c] sm:$0xf0]  ;;  %v9185_v22 = vor.u32 %v10546_v20, %v9184_v47  ;;  %v10532_v63 = vld [vmem:[%s15481_s7 + $0x3e4] sm:$0xf] }
 0x469   : > { %v9440_v19 = vld [vmem:[%s15481_s7 + $0x640] sm:$0xf]  ;;  %v10610_v42 = vld [vmem:[%s15481_s7 + $0x64c] sm:$0xf0]  ;;  %v9313_v26 = vor.u32 %v10578_v36, %v9312_v7  ;;  %v9138_v55 = vld [vmem:[%s15481_s7 + $0x3f0] sm:$0xf0] }
 0x46a   : > { %v9568_v53 = vld [vmem:[%s15481_s7 + $0x740] sm:$0xf]  ;;  %v10642_v34 = vld [vmem:[%s15481_s7 + $0x74c] sm:$0xf0]  ;;  %4556 = vmatpush.bf16.msrb.mxu2 %v9457_v17  ;;  %v9441_v61 = vor.u32 %v10610_v42, %v9440_v19  ;;  %4569 = vmatpush.bf16.msrb.mxu3 %v9585_v45  ;;  %v2908_v15 = vperm.slane %v12642_v12, 4  ;;  %v2911_v40 = vperm.slane %v12642_v12, 7  ;;  %v9013_v17 = vor.u32 %v10500_v29, %v9010_v39 }
 0x46b   : > { %v9168_v60 = vld [vmem:[%s15481_s7 + $0x420] sm:$0xf]  ;;  %v10542_v41 = vld [vmem:[%s15481_s7 + $0x42c] sm:$0xf0]  ;;  %v9569_v25 = vor.u32 %v10642_v34, %v9568_v53  ;;  %4531 = vmatpush.bf16.msrb.mxu0 %v9185_v22  ;;  %4544 = vmatpush.bf16.msrb.mxu1 %v9313_v26  ;;  %v2909_v44 = vperm.slane %v12642_v12, 5  ;;  %v9141_v45 = vor.u32 %v10532_v63, %v9138_v55  ;;  %v12820_v42 = vpack.c.bf16 %v2910_v27, %v2910_v27 }
 0x46c   : > { %v9296_v33 = vld [vmem:[%s15481_s7 + $0x520] sm:$0xf]  ;;  %v10574_v24 = vld [vmem:[%s15481_s7 + $0x52c] sm:$0xf0]  ;;  %v9169_v56 = vor.u32 %v10542_v41, %v9168_v60  ;;  %v10432_v47 = vld [vmem:[%s15481_s7 + $0xc4] sm:$0xf]  ;;  %v12828_v22 = vpack.c.bf16 %v2908_v15, %v2908_v15  ;;  %v12830_v26 = vpack.c.bf16 %v2911_v40, %v2911_v40 }
 0x46d   : > { %v9424_v50 = vld [vmem:[%s15481_s7 + $0x620] sm:$0xf]  ;;  %v10606_v13 = vld [vmem:[%s15481_s7 + $0x62c] sm:$0xf0]  ;;  %v9297_v0 = vor.u32 %v10574_v24, %v9296_v33  ;;  %v8738_v20 = vld [vmem:[%s15481_s7 + $0xd0] sm:$0xf0]  ;;  %v12832_v60 = vpack.c.bf16 %v2909_v44, %v2909_v44 }
 0x46e   : > { %v9552_v52 = vld [vmem:[%s15481_s7 + $0x720] sm:$0xf]  ;;  %v10638_v62 = vld [vmem:[%s15481_s7 + $0x72c] sm:$0xf0]  ;;  %4557 = vmatpush.bf16.msrb.mxu2 %v9441_v61  ;;  %v9425_v51 = vor.u32 %v10606_v13, %v9424_v50  ;;  %4570 = vmatpush.bf16.msrb.mxu3 %v9569_v25  ;;  %v10464_v7 = vld [vmem:[%s15481_s7 + $0x1c4] sm:$0xf]  ;;  %v8741_v61 = vor.u32 %v10432_v47, %v8738_v20 }
 0x46f   : > { %v9152_v48 = vld [vmem:[%s15481_s7 + $0x400] sm:$0xf]  ;;  %v10538_v8 = vld [vmem:[%s15481_s7 + $0x40c] sm:$0xf0]  ;;  %v9553_v49 = vor.u32 %v10638_v62, %v9552_v52  ;;  %4532 = vmatpush.bf16.msrb.mxu0 %v9169_v56  ;;  %4545 = vmatpush.bf16.msrb.mxu1 %v9297_v0  ;;  %v8866_v12 = vld [vmem:[%s15481_s7 + $0x1d0] sm:$0xf0] }
 0x470   : > { %v9280_v54 = vld [vmem:[%s15481_s7 + $0x500] sm:$0xf]  ;;  %v10570_v46 = vld [vmem:[%s15481_s7 + $0x50c] sm:$0xf0]  ;;  %v9153_v16 = vor.u32 %v10538_v8, %v9152_v48  ;;  %v10496_v36 = vld [vmem:[%s15481_s7 + $0x2c4] sm:$0xf]  ;;  %v8869_v41 = vor.u32 %v10464_v7, %v8866_v12 }
 0x471   : > { %v9408_v32 = vld [vmem:[%s15481_s7 + $0x600] sm:$0xf]  ;;  %v10602_v35 = vld [vmem:[%s15481_s7 + $0x60c] sm:$0xf0]  ;;  %v9281_v10 = vor.u32 %v10570_v46, %v9280_v54  ;;  %v8994_v19 = vld [vmem:[%s15481_s7 + $0x2d0] sm:$0xf0] }
 0x472   : > { %v9536_v43 = vld [vmem:[%s15481_s7 + $0x700] sm:$0xf]  ;;  %v10634_v37 = vld [vmem:[%s15481_s7 + $0x70c] sm:$0xf0]  ;;  %4558 = vmatpush.bf16.msrb.mxu2 %v9425_v51  ;;  %v9409_v59 = vor.u32 %v10602_v35, %v9408_v32  ;;  %4571 = vmatpush.bf16.msrb.mxu3 %v9553_v49  ;;  %v10528_v53 = vld [vmem:[%s15481_s7 + $0x3c4] sm:$0xf]  ;;  %v8997_v33 = vor.u32 %v10496_v36, %v8994_v19 }
 0x473   : > { %v9537_v18 = vor.u32 %v10634_v37, %v9536_v43  ;;  %4533 = vmatpush.bf16.msrb.mxu0 %v9153_v16  ;;  %4546 = vmatpush.bf16.msrb.mxu1 %v9281_v10  ;;  %v9122_v34 = vld [vmem:[%s15481_s7 + $0x3d0] sm:$0xf0]  ;;  %v10428_v25 = vld [vmem:[%s15481_s7 + $0xa4] sm:$0xf] }
 0x474   : > { %v8722_v24 = vld [vmem:[%s15481_s7 + $0xb0] sm:$0xf0]  ;;  %v10460_v50 = vld [vmem:[%s15481_s7 + $0x1a4] sm:$0xf]  ;;  %v9125_v13 = vor.u32 %v10528_v53, %v9122_v34 }
 0x475   : > { %v8850_v52 = vld [vmem:[%s15481_s7 + $0x1b0] sm:$0xf0]  ;;  %v10492_v62 = vld [vmem:[%s15481_s7 + $0x2a4] sm:$0xf]  ;;  %v8725_v27 = vor.u32 %v10428_v25, %v8722_v24 }
 0x476   : > { %4559 = vmatpush.bf16.msrb.mxu2 %v9409_v59  ;;  %4572 = vmatpush.bf16.msrb.mxu3 %v9537_v18  ;;  %v8978_v56 = vld [vmem:[%s15481_s7 + $0x2b0] sm:$0xf0]  ;;  %v10524_v48 = vld [vmem:[%s15481_s7 + $0x3a4] sm:$0xf]  ;;  %v8853_v0 = vor.u32 %v10460_v50, %v8850_v52 }
 0x477   : > { %4578 = vmatpush.bf16.msra.mxu0 %v8757_v11  ;;  %4591 = vmatpush.bf16.msra.mxu1 %v8885_v57  ;;  %v9106_v8 = vld [vmem:[%s15481_s7 + $0x3b0] sm:$0xf0]  ;;  %v8981_v51 = vor.u32 %v10492_v62, %v8978_v56  ;;  %v10424_v54 = vld [vmem:[%s15481_s7 + $0x84] sm:$0xf] }
 0x478   : > { %4534 = vmatmul.bf16.vlgmr.msrb.gmra.mxu0 %v12828_v22  ;;  %4547 = vmatmul.bf16.vlgmr.msrb.gmra.mxu1 %v12832_v60  ;;  %v8706_v46 = vld [vmem:[%s15481_s7 + $0x90] sm:$0xf0]  ;;  %v10456_v32 = vld [vmem:[%s15481_s7 + $0x184] sm:$0xf]  ;;  %v9109_v49 = vor.u32 %v10524_v48, %v9106_v8 }
 0x479   : > { %4560 = vmatmul.bf16.vlgmr.msrb.gmra.mxu2 %v12820_v42  ;;  %4573 = vmatmul.bf16.vlgmr.msrb.gmra.mxu3 %v12830_v26  ;;  %v8834_v35 = vld [vmem:[%s15481_s7 + $0x190] sm:$0xf0]  ;;  %v10488_v43 = vld [vmem:[%s15481_s7 + $0x284] sm:$0xf]  ;;  %v8709_v38 = vor.u32 %v10424_v54, %v8706_v46 }
 0x47a   : > { %4604 = vmatpush.bf16.msra.mxu2 %v9013_v17  ;;  %4617 = vmatpush.bf16.msra.mxu3 %v9141_v45  ;;  %v8962_v37 = vld [vmem:[%s15481_s7 + $0x290] sm:$0xf0]  ;;  %v10520_v31 = vld [vmem:[%s15481_s7 + $0x384] sm:$0xf]  ;;  %v8837_v16 = vor.u32 %v10456_v32, %v8834_v35 }
 0x47b   : > { %4579 = vmatpush.bf16.msra.mxu0 %v8741_v61  ;;  %4592 = vmatpush.bf16.msra.mxu1 %v8869_v41  ;;  %v9090_v23 = vld [vmem:[%s15481_s7 + $0x390] sm:$0xf0]  ;;  %v8965_v28 = vor.u32 %v10488_v43, %v8962_v37  ;;  %v10420_v29 = vld [vmem:[%s15481_s7 + $0x64] sm:$0xf] }
 0x47c   : > { %v8690_v39 = vld [vmem:[%s15481_s7 + $0x70] sm:$0xf0]  ;;  %v10452_v10 = vld [vmem:[%s15481_s7 + $0x164] sm:$0xf]  ;;  %v9093_v59 = vor.u32 %v10520_v31, %v9090_v23 }
 0x47d   : > { %v8818_v63 = vld [vmem:[%s15481_s7 + $0x170] sm:$0xf0]  ;;  %v10484_v55 = vld [vmem:[%s15481_s7 + $0x264] sm:$0xf]  ;;  %v8693_v11 = vor.u32 %v10420_v29, %v8690_v39 }
 0x47e   : > { %4605 = vmatpush.bf16.msra.mxu2 %v8997_v33  ;;  %4618 = vmatpush.bf16.msra.mxu3 %v9125_v13  ;;  %v8946_v15 = vld [vmem:[%s15481_s7 + $0x270] sm:$0xf0]  ;;  %v10516_v40 = vld [vmem:[%s15481_s7 + $0x364] sm:$0xf]  ;;  %v8821_v44 = vor.u32 %v10452_v10, %v8818_v63 }
 0x47f   : > { %4580 = vmatpush.bf16.msra.mxu0 %v8725_v27  ;;  %4593 = vmatpush.bf16.msra.mxu1 %v8853_v0  ;;  %v9074_v18 = vld [vmem:[%s15481_s7 + $0x370] sm:$0xf0]  ;;  %v8949_v57 = vor.u32 %v10484_v55, %v8946_v15  ;;  %v10416_v17 = vld [vmem:[%s15481_s7 + $0x44] sm:$0xf] }
 0x480   : > { %v8674_v47 = vld [vmem:[%s15481_s7 + $0x50] sm:$0xf0]  ;;  %v10448_v20 = vld [vmem:[%s15481_s7 + $0x144] sm:$0xf]  ;;  %v9077_v7 = vor.u32 %v10516_v40, %v9074_v18 }
 0x481   : > { %v8802_v45 = vld [vmem:[%s15481_s7 + $0x150] sm:$0xf0]  ;;  %v10480_v12 = vld [vmem:[%s15481_s7 + $0x244] sm:$0xf]  ;;  %v8677_v34 = vor.u32 %v10416_v17, %v8674_v47 }
 0x482   : > { %4606 = vmatpush.bf16.msra.mxu2 %v8981_v51  ;;  %4619 = vmatpush.bf16.msra.mxu3 %v9109_v49  ;;  %v8930_v36 = vld [vmem:[%s15481_s7 + $0x250] sm:$0xf0]  ;;  %v10512_v19 = vld [vmem:[%s15481_s7 + $0x344] sm:$0xf]  ;;  %v8805_v61 = vor.u32 %v10448_v20, %v8802_v45 }
 0x483   : > { %4581 = vmatpush.bf16.msra.mxu0 %v8709_v38  ;;  %4594 = vmatpush.bf16.msra.mxu1 %v8837_v16  ;;  %v9058_v53 = vld [vmem:[%s15481_s7 + $0x350] sm:$0xf0]  ;;  %v8933_v41 = vor.u32 %v10480_v12, %v8930_v36  ;;  %v10412_v33 = vld [vmem:[%s15481_s7 + $0x24] sm:$0xf] }
 0x484   : > { %v8658_v25 = vld [vmem:[%s15481_s7 + $0x30] sm:$0xf0]  ;;  %v10444_v24 = vld [vmem:[%s15481_s7 + $0x124] sm:$0xf]  ;;  %v9061_v50 = vor.u32 %v10512_v19, %v9058_v53 }
 0x485   : > { %v8786_v13 = vld [vmem:[%s15481_s7 + $0x130] sm:$0xf0]  ;;  %v10476_v52 = vld [vmem:[%s15481_s7 + $0x224] sm:$0xf]  ;;  %v8661_v8 = vor.u32 %v10412_v33, %v8658_v25 }
 0x486   : > { %4607 = vmatpush.bf16.msra.mxu2 %v8965_v28  ;;  %4620 = vmatpush.bf16.msra.mxu3 %v9093_v59  ;;  %v8914_v62 = vld [vmem:[%s15481_s7 + $0x230] sm:$0xf0]  ;;  %v10508_v56 = vld [vmem:[%s15481_s7 + $0x324] sm:$0xf]  ;;  %v8789_v51 = vor.u32 %v10444_v24, %v8786_v13 }
 0x487   : > { %4582 = vmatpush.bf16.msra.mxu0 %v8693_v11  ;;  %4595 = vmatpush.bf16.msra.mxu1 %v8821_v44  ;;  %v9042_v48 = vld [vmem:[%s15481_s7 + $0x330] sm:$0xf0]  ;;  %v10408_v27 = vld [vmem:[%s15481_s7 + $0x4] sm:$0xf]  ;;  %v8917_v54 = vor.u32 %v10476_v52, %v8914_v62 }
 0x488   : > { %v8642_v0 = vld [vmem:[%s15481_s7 + $0x10] sm:$0xf0]  ;;  %v10440_v46 = vld [vmem:[%s15481_s7 + $0x104] sm:$0xf]  ;;  %v9045_v35 = vor.u32 %v10508_v56, %v9042_v48 }
 0x489   : > { %v8770_v32 = vld [vmem:[%s15481_s7 + $0x110] sm:$0xf0]  ;;  %v10472_v49 = vld [vmem:[%s15481_s7 + $0x204] sm:$0xf]  ;;  %v8645_v28 = vor.u32 %v10408_v27, %v8642_v0 }
 0x48a   : > { %4608 = vmatpush.bf16.msra.mxu2 %v8949_v57  ;;  %4621 = vmatpush.bf16.msra.mxu3 %v9077_v7  ;;  %v8898_v43 = vld [vmem:[%s15481_s7 + $0x210] sm:$0xf0]  ;;  %v10504_v37 = vld [vmem:[%s15481_s7 + $0x304] sm:$0xf]  ;;  %v8773_v59 = vor.u32 %v10440_v46, %v8770_v32 }
 0x48b   : > { %4583 = vmatpush.bf16.msra.mxu0 %v8677_v34  ;;  %4596 = vmatpush.bf16.msra.mxu1 %v8805_v61  ;;  %v9026_v31 = vld [vmem:[%s15481_s7 + $0x310] sm:$0xf0]  ;;  %v10564_v23 = vld [vmem:[%s15481_s7 + $0x4e4] sm:$0xf]  ;;  %v8901_v63 = vor.u32 %v10472_v49, %v8898_v43 }
 0x48c   : > { %v9266_v38 = vld [vmem:[%s15481_s7 + $0x4f0] sm:$0xf0]  ;;  %v10596_v16 = vld [vmem:[%s15481_s7 + $0x5e4] sm:$0xf]  ;;  %v9029_v40 = vor.u32 %v10504_v37, %v9026_v31 }
 0x48d   : > { %v9394_v29 = vld [vmem:[%s15481_s7 + $0x5f0] sm:$0xf0]  ;;  %v10628_v39 = vld [vmem:[%s15481_s7 + $0x6e4] sm:$0xf]  ;;  %v9269_v18 = vor.u32 %v10564_v23, %v9266_v38 }
 0x48e   : > { %4609 = vmatpush.bf16.msra.mxu2 %v8933_v41  ;;  %4622 = vmatpush.bf16.msra.mxu3 %v9061_v50  ;;  %v9522_v10 = vld [vmem:[%s15481_s7 + $0x6f0] sm:$0xf0]  ;;  %v10660_v55 = vld [vmem:[%s15481_s7 + $0x7e4] sm:$0xf]  ;;  %v9397_v11 = vor.u32 %v10596_v16, %v9394_v29 }
 0x48f   : > { %4584 = vmatpush.bf16.msra.mxu0 %v8661_v8  ;;  %4597 = vmatpush.bf16.msra.mxu1 %v8789_v51  ;;  %v9650_v15 = vld [vmem:[%s15481_s7 + $0x7f0] sm:$0xf0]  ;;  %v9525_v44 = vor.u32 %v10628_v39, %v9522_v10  ;;  %v10560_v57 = vld [vmem:[%s15481_s7 + $0x4c4] sm:$0xf] }
 0x490   : > { %v9250_v17 = vld [vmem:[%s15481_s7 + $0x4d0] sm:$0xf0]  ;;  %v10592_v47 = vld [vmem:[%s15481_s7 + $0x5c4] sm:$0xf]  ;;  %v9653_v20 = vor.u32 %v10660_v55, %v9650_v15 }
 0x491   : > { %v9378_v7 = vld [vmem:[%s15481_s7 + $0x5d0] sm:$0xf0]  ;;  %v10624_v45 = vld [vmem:[%s15481_s7 + $0x6c4] sm:$0xf]  ;;  %v9253_v53 = vor.u32 %v10560_v57, %v9250_v17 }
 0x492   : > { %4610 = vmatpush.bf16.msra.mxu2 %v8917_v54  ;;  %4623 = vmatpush.bf16.msra.mxu3 %v9045_v35  ;;  %v9506_v12 = vld [vmem:[%s15481_s7 + $0x6d0] sm:$0xf0]  ;;  %v10656_v36 = vld [vmem:[%s15481_s7 + $0x7c4] sm:$0xf]  ;;  %v9381_v34 = vor.u32 %v10592_v47, %v9378_v7 }
 0x493   : > { %4585 = vmatpush.bf16.msra.mxu0 %v8645_v28  ;;  %4598 = vmatpush.bf16.msra.mxu1 %v8773_v59  ;;  %v9634_v19 = vld [vmem:[%s15481_s7 + $0x7d0] sm:$0xf0]  ;;  %v9509_v61 = vor.u32 %v10624_v45, %v9506_v12  ;;  %v10556_v41 = vld [vmem:[%s15481_s7 + $0x4a4] sm:$0xf] }
 0x494   : > { %v9234_v33 = vld [vmem:[%s15481_s7 + $0x4b0] sm:$0xf0]  ;;  %v10588_v25 = vld [vmem:[%s15481_s7 + $0x5a4] sm:$0xf]  ;;  %v9637_v24 = vor.u32 %v10656_v36, %v9634_v19 }
 0x495   : > { %v9362_v50 = vld [vmem:[%s15481_s7 + $0x5b0] sm:$0xf0]  ;;  %v10620_v13 = vld [vmem:[%s15481_s7 + $0x6a4] sm:$0xf]  ;;  %v9237_v48 = vor.u32 %v10556_v41, %v9234_v33 }
 0x496   : > { %4611 = vmatpush.bf16.msra.mxu2 %v8901_v63  ;;  %4624 = vmatpush.bf16.msra.mxu3 %v9029_v40  ;;  %v9490_v52 = vld [vmem:[%s15481_s7 + $0x6b0] sm:$0xf0]  ;;  %v10652_v62 = vld [vmem:[%s15481_s7 + $0x7a4] sm:$0xf]  ;;  %v9365_v8 = vor.u32 %v10588_v25, %v9362_v50 }
 0x497   : > { %4630 = vmatpush.bf16.msrb.mxu0 %v9269_v18  ;;  %4643 = vmatpush.bf16.msrb.mxu1 %v9397_v11  ;;  %v9618_v56 = vld [vmem:[%s15481_s7 + $0x7b0] sm:$0xf0]  ;;  %v9493_v27 = vor.u32 %v10620_v13, %v9490_v52  ;;  %v10552_v0 = vld [vmem:[%s15481_s7 + $0x484] sm:$0xf] }
 0x498   : > { %4586 = vmatmul.bf16.vlgmr.msra.gmra.mxu0 %v12667_v30  ;;  %4599 = vmatmul.bf16.vlgmr.msra.gmra.mxu1 %v12691_v14  ;;  %v9218_v51 = vld [vmem:[%s15481_s7 + $0x490] sm:$0xf0]  ;;  %v10584_v54 = vld [vmem:[%s15481_s7 + $0x584] sm:$0xf]  ;;  %v9621_v46 = vor.u32 %v10652_v62, %v9618_v56 }
 0x499   : > { %4612 = vmatmul.bf16.vlgmr.msra.gmra.mxu2 %v12665_v21  ;;  %4625 = vmatmul.bf16.vlgmr.msra.gmra.mxu3 %v12669_v58  ;;  %v9346_v32 = vld [vmem:[%s15481_s7 + $0x590] sm:$0xf0]  ;;  %v10616_v49 = vld [vmem:[%s15481_s7 + $0x684] sm:$0xf]  ;;  %v9221_v31 = vor.u32 %v10552_v0, %v9218_v51 }
 0x49a   : > { %4656 = vmatpush.bf16.msrb.mxu2 %v9525_v44  ;;  %4669 = vmatpush.bf16.msrb.mxu3 %v9653_v20  ;;  %v9474_v35 = vld [vmem:[%s15481_s7 + $0x690] sm:$0xf0]  ;;  %v10648_v43 = vld [vmem:[%s15481_s7 + $0x784] sm:$0xf]  ;;  %v9349_v23 = vor.u32 %v10584_v54, %v9346_v32 }
 0x49b   : > { %4631 = vmatpush.bf16.msrb.mxu0 %v9253_v53  ;;  %4644 = vmatpush.bf16.msrb.mxu1 %v9381_v34  ;;  %v9602_v37 = vld [vmem:[%s15481_s7 + $0x790] sm:$0xf0]  ;;  %v9477_v38 = vor.u32 %v10616_v49, %v9474_v35  ;;  %v10548_v16 = vld [vmem:[%s15481_s7 + $0x464] sm:$0xf] }
 0x49c   : > { %v9202_v28 = vld [vmem:[%s15481_s7 + $0x470] sm:$0xf0]  ;;  %v10580_v29 = vld [vmem:[%s15481_s7 + $0x564] sm:$0xf]  ;;  %v9605_v39 = vor.u32 %v10648_v43, %v9602_v37  ;;  %v8760_v37 = vld [vmem:[%s15481_s7 + $0xe8] sm:$0xf] }
 0x49d   : > { %v9330_v10 = vld [vmem:[%s15481_s7 + $0x570] sm:$0xf0]  ;;  %v10612_v59 = vld [vmem:[%s15481_s7 + $0x664] sm:$0xf]  ;;  %v9205_v40 = vor.u32 %v10548_v16, %v9202_v28  ;;  %v10471_v16 = vld [vmem:[%s15481_s7 + $0x1f4] sm:$0xf0] }
 0x49e   : > { %4657 = vmatpush.bf16.msrb.mxu2 %v9509_v61  ;;  %4670 = vmatpush.bf16.msrb.mxu3 %v9637_v24  ;;  %v9458_v63 = vld [vmem:[%s15481_s7 + $0x670] sm:$0xf0]  ;;  %v10644_v55 = vld [vmem:[%s15481_s7 + $0x764] sm:$0xf]  ;;  %v9333_v18 = vor.u32 %v10580_v29, %v9330_v10  ;;  %v9016_v28 = vld [vmem:[%s15481_s7 + $0x2e8] sm:$0xf] }
 0x49f   : > { %4632 = vmatpush.bf16.msrb.mxu0 %v9237_v48  ;;  %4645 = vmatpush.bf16.msrb.mxu1 %v9365_v8  ;;  %v9586_v15 = vld [vmem:[%s15481_s7 + $0x770] sm:$0xf0]  ;;  %v9461_v11 = vor.u32 %v10612_v59, %v9458_v63  ;;  %v10544_v44 = vld [vmem:[%s15481_s7 + $0x444] sm:$0xf]  ;;  %v10503_v29 = vld [vmem:[%s15481_s7 + $0x2f4] sm:$0xf0] }
 0x4a0   : > { %v9186_v57 = vld [vmem:[%s15481_s7 + $0x450] sm:$0xf0]  ;;  %v10576_v17 = vld [vmem:[%s15481_s7 + $0x544] sm:$0xf]  ;;  %v9589_v47 = vor.u32 %v10644_v55, %v9586_v15  ;;  %v9144_v59 = vld [vmem:[%s15481_s7 + $0x3e8] sm:$0xf] }
 0x4a1   : > { %v9314_v20 = vld [vmem:[%s15481_s7 + $0x550] sm:$0xf0]  ;;  %v10608_v7 = vld [vmem:[%s15481_s7 + $0x644] sm:$0xf]  ;;  %v9189_v19 = vor.u32 %v10544_v44, %v9186_v57  ;;  %v10535_v63 = vld [vmem:[%s15481_s7 + $0x3f4] sm:$0xf0] }
 0x4a2   : > { %4658 = vmatpush.bf16.msrb.mxu2 %v9493_v27  ;;  %4671 = vmatpush.bf16.msrb.mxu3 %v9621_v46  ;;  %v9442_v45 = vld [vmem:[%s15481_s7 + $0x650] sm:$0xf0]  ;;  %v10640_v12 = vld [vmem:[%s15481_s7 + $0x744] sm:$0xf]  ;;  %v9317_v53 = vor.u32 %v10576_v17, %v9314_v20  ;;  %v10435_v44 = vld [vmem:[%s15481_s7 + $0xd4] sm:$0xf0]  ;;  %v9145_v17 = vor.u32 %v10535_v63, %v9144_v59 }
 0x4a3   : > { %4633 = vmatpush.bf16.msrb.mxu0 %v9221_v31  ;;  %4646 = vmatpush.bf16.msrb.mxu1 %v9349_v23  ;;  %v9570_v36 = vld [vmem:[%s15481_s7 + $0x750] sm:$0xf0]  ;;  %v9445_v34 = vor.u32 %v10608_v7, %v9442_v45  ;;  %v10540_v61 = vld [vmem:[%s15481_s7 + $0x424] sm:$0xf]  ;;  %v10439_v31 = vld [vmem:[%s15481_s7 + $0xf4] sm:$0xf0] }
 0x4a4   : > { %v9170_v41 = vld [vmem:[%s15481_s7 + $0x430] sm:$0xf0]  ;;  %v10572_v33 = vld [vmem:[%s15481_s7 + $0x524] sm:$0xf]  ;;  %v9573_v25 = vor.u32 %v10640_v12, %v9570_v36  ;;  %v8888_v23 = vld [vmem:[%s15481_s7 + $0x1e8] sm:$0xf]  ;;  %v8761_v15 = vor.u32 %v10439_v31, %v8760_v37 }
 0x4a5   : > { %v9298_v24 = vld [vmem:[%s15481_s7 + $0x530] sm:$0xf0]  ;;  %v10604_v50 = vld [vmem:[%s15481_s7 + $0x624] sm:$0xf]  ;;  %v9173_v56 = vor.u32 %v10540_v61, %v9170_v41  ;;  %v8872_v57 = vld [vmem:[%s15481_s7 + $0x1c8] sm:$0xf] }
 0x4a6   : > { %4659 = vmatpush.bf16.msrb.mxu2 %v9477_v38  ;;  %4672 = vmatpush.bf16.msrb.mxu3 %v9605_v39  ;;  %v9426_v13 = vld [vmem:[%s15481_s7 + $0x630] sm:$0xf0]  ;;  %v10636_v52 = vld [vmem:[%s15481_s7 + $0x724] sm:$0xf]  ;;  %v9301_v27 = vor.u32 %v10572_v33, %v9298_v24  ;;  %v9000_v20 = vld [vmem:[%s15481_s7 + $0x2c8] sm:$0xf] }
 0x4a7   : > { %4634 = vmatpush.bf16.msrb.mxu0 %v9205_v40  ;;  %4647 = vmatpush.bf16.msrb.mxu1 %v9333_v18  ;;  %v9554_v62 = vld [vmem:[%s15481_s7 + $0x730] sm:$0xf0]  ;;  %v10536_v48 = vld [vmem:[%s15481_s7 + $0x404] sm:$0xf]  ;;  %v9429_v0 = vor.u32 %v10604_v50, %v9426_v13  ;;  %v8889_v40 = vor.u32 %v10471_v16, %v8888_v23  ;;  %v9017_v18 = vor.u32 %v10503_v29, %v9016_v28  ;;  %v10499_v7 = vld [vmem:[%s15481_s7 + $0x2d4] sm:$0xf0] }
 0x4a8   : > { %v9154_v8 = vld [vmem:[%s15481_s7 + $0x410] sm:$0xf0]  ;;  %v10568_v51 = vld [vmem:[%s15481_s7 + $0x504] sm:$0xf]  ;;  %v9557_v32 = vor.u32 %v10636_v52, %v9554_v62  ;;  %v9128_v45 = vld [vmem:[%s15481_s7 + $0x3c8] sm:$0xf] }
 0x4a9   : > { %v9282_v54 = vld [vmem:[%s15481_s7 + $0x510] sm:$0xf0]  ;;  %v10600_v46 = vld [vmem:[%s15481_s7 + $0x604] sm:$0xf]  ;;  %v9157_v38 = vor.u32 %v10536_v48, %v9154_v8  ;;  %v10531_v12 = vld [vmem:[%s15481_s7 + $0x3d4] sm:$0xf0] }
 0x4aa   : > { %4660 = vmatpush.bf16.msrb.mxu2 %v9461_v11  ;;  %4673 = vmatpush.bf16.msrb.mxu3 %v9589_v47  ;;  %v9410_v49 = vld [vmem:[%s15481_s7 + $0x610] sm:$0xf0]  ;;  %v10632_v35 = vld [vmem:[%s15481_s7 + $0x704] sm:$0xf]  ;;  %v9285_v39 = vor.u32 %v10568_v51, %v9282_v54  ;;  %v8744_v11 = vld [vmem:[%s15481_s7 + $0xc8] sm:$0xf]  ;;  %v9129_v33 = vor.u32 %v10531_v12, %v9128_v45 }
 0x4ab   : > { %4635 = vmatpush.bf16.msrb.mxu0 %v9189_v19  ;;  %4648 = vmatpush.bf16.msrb.mxu1 %v9317_v53  ;;  %v9538_v43 = vld [vmem:[%s15481_s7 + $0x710] sm:$0xf0]  ;;  %v9413_v10 = vor.u32 %v10600_v46, %v9410_v49  ;;  %v10467_v47 = vld [vmem:[%s15481_s7 + $0x1d4] sm:$0xf0]  ;;  %v8745_v36 = vor.u32 %v10435_v44, %v8744_v11  ;;  %v9001_v53 = vor.u32 %v10499_v7, %v9000_v20  ;;  %v8856_v41 = vld [vmem:[%s15481_s7 + $0x1a8] sm:$0xf] }
 0x4ac   : > { %v9541_v55 = vor.u32 %v10632_v35, %v9538_v43  ;;  %v8873_v19 = vor.u32 %v10467_v47, %v8872_v57  ;;  %v10431_v61 = vld [vmem:[%s15481_s7 + $0xb4] sm:$0xf0]  ;;  %v8984_v24 = vld [vmem:[%s15481_s7 + $0x2a8] sm:$0xf] }
 0x4ad   : > { %v10495_v50 = vld [vmem:[%s15481_s7 + $0x2b4] sm:$0xf0]  ;;  %v9112_v13 = vld [vmem:[%s15481_s7 + $0x3a8] sm:$0xf] }
 0x4ae   : > { %4661 = vmatpush.bf16.msrb.mxu2 %v9445_v34  ;;  %4674 = vmatpush.bf16.msrb.mxu3 %v9573_v25  ;;  %v8728_v34 = vld [vmem:[%s15481_s7 + $0xa8] sm:$0xf]  ;;  %v10463_v25 = vld [vmem:[%s15481_s7 + $0x1b4] sm:$0xf0]  ;;  %v8985_v48 = vor.u32 %v10495_v50, %v8984_v24 }
 0x4af   : > { %4636 = vmatpush.bf16.msrb.mxu0 %v9173_v56  ;;  %4649 = vmatpush.bf16.msrb.mxu1 %v9301_v27  ;;  %v10527_v52 = vld [vmem:[%s15481_s7 + $0x3b4] sm:$0xf0]  ;;  %v8729_v62 = vor.u32 %v10431_v61, %v8728_v34  ;;  %v8857_v56 = vor.u32 %v10463_v25, %v8856_v41  ;;  %v8712_v8 = vld [vmem:[%s15481_s7 + $0x88] sm:$0xf] }
 0x4b0   : > { %v10427_v27 = vld [vmem:[%s15481_s7 + $0x94] sm:$0xf0]  ;;  %v9113_v51 = vor.u32 %v10527_v52, %v9112_v13  ;;  %v8968_v46 = vld [vmem:[%s15481_s7 + $0x288] sm:$0xf] }
 0x4b1   : > { %v10459_v54 = vld [vmem:[%s15481_s7 + $0x194] sm:$0xf0]  ;;  %v9096_v49 = vld [vmem:[%s15481_s7 + $0x388] sm:$0xf]  ;;  %v8713_v43 = vor.u32 %v10427_v27, %v8712_v8 }
 0x4b2   : > { %4662 = vmatpush.bf16.msrb.mxu2 %v9429_v0  ;;  %4675 = vmatpush.bf16.msrb.mxu3 %v9557_v32  ;;  %v8840_v0 = vld [vmem:[%s15481_s7 + $0x188] sm:$0xf]  ;;  %v10491_v32 = vld [vmem:[%s15481_s7 + $0x294] sm:$0xf0] }
 0x4b3   : > { %4637 = vmatpush.bf16.msrb.mxu0 %v9157_v38  ;;  %4650 = vmatpush.bf16.msrb.mxu1 %v9285_v39  ;;  %v10523_v35 = vld [vmem:[%s15481_s7 + $0x394] sm:$0xf0]  ;;  %v8841_v37 = vor.u32 %v10459_v54, %v8840_v0  ;;  %v8969_v31 = vor.u32 %v10491_v32, %v8968_v46  ;;  %v8696_v23 = vld [vmem:[%s15481_s7 + $0x68] sm:$0xf] }
 0x4b4   : > { %v10423_v38 = vld [vmem:[%s15481_s7 + $0x74] sm:$0xf0]  ;;  %v8824_v16 = vld [vmem:[%s15481_s7 + $0x168] sm:$0xf]  ;;  %v9097_v28 = vor.u32 %v10523_v35, %v9096_v49 }
 0x4b5   : > { %v10455_v29 = vld [vmem:[%s15481_s7 + $0x174] sm:$0xf0]  ;;  %v8952_v39 = vld [vmem:[%s15481_s7 + $0x268] sm:$0xf] }
 0x4b6   : > { %4663 = vmatpush.bf16.msrb.mxu2 %v9413_v10  ;;  %4676 = vmatpush.bf16.msrb.mxu3 %v9541_v55  ;;  %v10487_v10 = vld [vmem:[%s15481_s7 + $0x274] sm:$0xf0]  ;;  %v9080_v59 = vld [vmem:[%s15481_s7 + $0x368] sm:$0xf]  ;;  %v8697_v55 = vor.u32 %v10423_v38, %v8696_v23 }
 0x4b7   : > { %4682 = vmatpush.bf16.msra.mxu0 %v8761_v15  ;;  %4695 = vmatpush.bf16.msra.mxu1 %v8889_v40  ;;  %v10519_v63 = vld [vmem:[%s15481_s7 + $0x374] sm:$0xf0]  ;;  %v8825_v15 = vor.u32 %v10455_v29, %v8824_v16  ;;  %v8953_v40 = vor.u32 %v10487_v10, %v8952_v39  ;;  %v8808_v44 = vld [vmem:[%s15481_s7 + $0x148] sm:$0xf] }
 0x4b8   : > { %4638 = vmatmul.bf16.vlgmr.msrb.gmra.mxu0 %v12828_v22  ;;  %4651 = vmatmul.bf16.vlgmr.msrb.gmra.mxu1 %v12832_v60  ;;  %v10419_v11 = vld [vmem:[%s15481_s7 + $0x54] sm:$0xf0]  ;;  %v9081_v57 = vor.u32 %v10519_v63, %v9080_v59  ;;  %v8936_v47 = vld [vmem:[%s15481_s7 + $0x248] sm:$0xf] }
 0x4b9   : > { %4664 = vmatmul.bf16.vlgmr.msrb.gmra.mxu2 %v12820_v42  ;;  %4677 = vmatmul.bf16.vlgmr.msrb.gmra.mxu3 %v12830_v26  ;;  %v10483_v20 = vld [vmem:[%s15481_s7 + $0x254] sm:$0xf0]  ;;  %v9064_v7 = vld [vmem:[%s15481_s7 + $0x348] sm:$0xf] }
 0x4ba   : > { %4708 = vmatpush.bf16.msra.mxu2 %v9017_v18  ;;  %4721 = vmatpush.bf16.msra.mxu3 %v9145_v17  ;;  %v8680_v18 = vld [vmem:[%s15481_s7 + $0x48] sm:$0xf]  ;;  %v10451_v17 = vld [vmem:[%s15481_s7 + $0x154] sm:$0xf0] }
 0x4bb   : > { %4683 = vmatpush.bf16.msra.mxu0 %v8745_v36  ;;  %4696 = vmatpush.bf16.msra.mxu1 %v8873_v19  ;;  %v10515_v45 = vld [vmem:[%s15481_s7 + $0x354] sm:$0xf0]  ;;  %v8681_v12 = vor.u32 %v10419_v11, %v8680_v18  ;;  %v8809_v36 = vor.u32 %v10451_v17, %v8808_v44  ;;  %v8937_v19 = vor.u32 %v10483_v20, %v8936_v47  ;;  %v8792_v61 = vld [vmem:[%s15481_s7 + $0x128] sm:$0xf] }
 0x4bc   : > { %v10415_v34 = vld [vmem:[%s15481_s7 + $0x34] sm:$0xf0]  ;;  %v9065_v41 = vor.u32 %v10515_v45, %v9064_v7  ;;  %v8920_v25 = vld [vmem:[%s15481_s7 + $0x228] sm:$0xf] }
 0x4bd   : > { %v10479_v24 = vld [vmem:[%s15481_s7 + $0x234] sm:$0xf0]  ;;  %v9048_v50 = vld [vmem:[%s15481_s7 + $0x328] sm:$0xf] }
 0x4be   : > { %4709 = vmatpush.bf16.msra.mxu2 %v9001_v53  ;;  %4722 = vmatpush.bf16.msra.mxu3 %v9129_v33  ;;  %v8664_v53 = vld [vmem:[%s15481_s7 + $0x28] sm:$0xf]  ;;  %v10447_v33 = vld [vmem:[%s15481_s7 + $0x134] sm:$0xf0]  ;;  %v8921_v8 = vor.u32 %v10479_v24, %v8920_v25 }
 0x4bf   : > { %4684 = vmatpush.bf16.msra.mxu0 %v8729_v62  ;;  %4697 = vmatpush.bf16.msra.mxu1 %v8857_v56  ;;  %v10511_v13 = vld [vmem:[%s15481_s7 + $0x334] sm:$0xf0]  ;;  %v8665_v52 = vor.u32 %v10415_v34, %v8664_v53  ;;  %v8648_v62 = vld [vmem:[%s15481_s7 + $0x8] sm:$0xf] }
 0x4c0   : > { %v10411_v56 = vld [vmem:[%s15481_s7 + $0x14] sm:$0xf0]  ;;  %v8776_v27 = vld [vmem:[%s15481_s7 + $0x108] sm:$0xf]  ;;  %v9049_v54 = vor.u32 %v10511_v13, %v9048_v50 }
 0x4c1   : > { %v10443_v0 = vld [vmem:[%s15481_s7 + $0x114] sm:$0xf0]  ;;  %v9032_v32 = vld [vmem:[%s15481_s7 + $0x308] sm:$0xf] }
 0x4c2   : > { %4710 = vmatpush.bf16.msra.mxu2 %v8985_v48  ;;  %4723 = vmatpush.bf16.msra.mxu3 %v9113_v51  ;;  %v8793_v48 = vor.u32 %v10447_v33, %v8792_v61  ;;  %v8904_v51 = vld [vmem:[%s15481_s7 + $0x208] sm:$0xf]  ;;  %v10475_v46 = vld [vmem:[%s15481_s7 + $0x214] sm:$0xf0] }
 0x4c3   : > { %4685 = vmatpush.bf16.msra.mxu0 %v8713_v43  ;;  %4698 = vmatpush.bf16.msra.mxu1 %v8841_v37  ;;  %v10507_v49 = vld [vmem:[%s15481_s7 + $0x314] sm:$0xf0]  ;;  %v9272_v35 = vld [vmem:[%s15481_s7 + $0x4e8] sm:$0xf]  ;;  %v8905_v29 = vor.u32 %v10475_v46, %v8904_v51 }
 0x4c4   : > { %v10567_v43 = vld [vmem:[%s15481_s7 + $0x4f4] sm:$0xf0]  ;;  %v9400_v37 = vld [vmem:[%s15481_s7 + $0x5e8] sm:$0xf]  ;;  %v9033_v59 = vor.u32 %v10507_v49, %v9032_v32 }
 0x4c5   : > { %v10599_v23 = vld [vmem:[%s15481_s7 + $0x5f4] sm:$0xf0]  ;;  %v9528_v38 = vld [vmem:[%s15481_s7 + $0x6e8] sm:$0xf]  ;;  %v9273_v63 = vor.u32 %v10567_v43, %v9272_v35 }
 0x4c6   : > { %4711 = vmatpush.bf16.msra.mxu2 %v8969_v31  ;;  %4724 = vmatpush.bf16.msra.mxu3 %v9097_v28  ;;  %v8649_v31 = vor.u32 %v10411_v56, %v8648_v62  ;;  %v10631_v16 = vld [vmem:[%s15481_s7 + $0x6f4] sm:$0xf0]  ;;  %v8777_v28 = vor.u32 %v10443_v0, %v8776_v27  ;;  %v9656_v39 = vld [vmem:[%s15481_s7 + $0x7e8] sm:$0xf] }
 0x4c7   : > { %4686 = vmatpush.bf16.msra.mxu0 %v8697_v55  ;;  %4699 = vmatpush.bf16.msra.mxu1 %v8825_v15  ;;  %v10663_v10 = vld [vmem:[%s15481_s7 + $0x7f4] sm:$0xf0]  ;;  %v9401_v55 = vor.u32 %v10599_v23, %v9400_v37  ;;  %v9529_v15 = vor.u32 %v10631_v16, %v9528_v38  ;;  %v9384_v11 = vld [vmem:[%s15481_s7 + $0x5c8] sm:$0xf] }
 0x4c8   : > { %v10563_v18 = vld [vmem:[%s15481_s7 + $0x4d4] sm:$0xf0]  ;;  %v9657_v44 = vor.u32 %v10663_v10, %v9656_v39  ;;  %v9512_v17 = vld [vmem:[%s15481_s7 + $0x6c8] sm:$0xf]  ;;  %v13495_v39 = vld [vmem:[%s15330_s8] sm:$0xf] }
 0x4c9   : > { %v10627_v47 = vld [vmem:[%s15481_s7 + $0x6d4] sm:$0xf0]  ;;  %v9640_v20 = vld [vmem:[%s15481_s7 + $0x7c8] sm:$0xf] }
 0x4ca   : > { %4712 = vmatpush.bf16.msra.mxu2 %v8953_v40  ;;  %4725 = vmatpush.bf16.msra.mxu3 %v9081_v57  ;;  %v9256_v40 = vld [vmem:[%s15481_s7 + $0x4c8] sm:$0xf]  ;;  %v10595_v57 = vld [vmem:[%s15481_s7 + $0x5d4] sm:$0xf0] }
 0x4cb   : > { %4687 = vmatpush.bf16.msra.mxu0 %v8681_v12  ;;  %4700 = vmatpush.bf16.msra.mxu1 %v8809_v36  ;;  %v10659_v7 = vld [vmem:[%s15481_s7 + $0x7d4] sm:$0xf0]  ;;  %v9257_v45 = vor.u32 %v10563_v18, %v9256_v40  ;;  %v9385_v12 = vor.u32 %v10595_v57, %v9384_v11  ;;  %v9513_v36 = vor.u32 %v10627_v47, %v9512_v17  ;;  %v9368_v34 = vld [vmem:[%s15481_s7 + $0x5a8] sm:$0xf] }
 0x4cc   : > { %v10559_v53 = vld [vmem:[%s15481_s7 + $0x4b4] sm:$0xf0]  ;;  %v9641_v61 = vor.u32 %v10659_v7, %v9640_v20  ;;  %v9496_v33 = vld [vmem:[%s15481_s7 + $0x6a8] sm:$0xf] }
 0x4cd   : > { %v10623_v25 = vld [vmem:[%s15481_s7 + $0x6b4] sm:$0xf0]  ;;  %v9624_v24 = vld [vmem:[%s15481_s7 + $0x7a8] sm:$0xf] }
 0x4ce   : > { %4713 = vmatpush.bf16.msra.mxu2 %v8937_v19  ;;  %4726 = vmatpush.bf16.msra.mxu3 %v9065_v41  ;;  %v9240_v19 = vld [vmem:[%s15481_s7 + $0x4a8] sm:$0xf]  ;;  %v10591_v41 = vld [vmem:[%s15481_s7 + $0x5b4] sm:$0xf0]  ;;  %v9497_v62 = vor.u32 %v10623_v25, %v9496_v33 }
 0x4cf   : > { %4688 = vmatpush.bf16.msra.mxu0 %v8665_v52  ;;  %4701 = vmatpush.bf16.msra.mxu1 %v8793_v48  ;;  %v10655_v50 = vld [vmem:[%s15481_s7 + $0x7b4] sm:$0xf0]  ;;  %v9241_v13 = vor.u32 %v10559_v53, %v9240_v19  ;;  %v9369_v52 = vor.u32 %v10591_v41, %v9368_v34  ;;  %v9224_v56 = vld [vmem:[%s15481_s7 + $0x488] sm:$0xf] }
 0x4d0   : > { %v10555_v48 = vld [vmem:[%s15481_s7 + $0x494] sm:$0xf0]  ;;  %v9625_v27 = vor.u32 %v10655_v50, %v9624_v24  ;;  %v9480_v51 = vld [vmem:[%s15481_s7 + $0x688] sm:$0xf] }
 0x4d1   : > { %v10587_v0 = vld [vmem:[%s15481_s7 + $0x594] sm:$0xf0]  ;;  %v9608_v46 = vld [vmem:[%s15481_s7 + $0x788] sm:$0xf]  ;;  %v9225_v49 = vor.u32 %v10555_v48, %v9224_v56 }
 0x4d2   : > { %4714 = vmatpush.bf16.msra.mxu2 %v8921_v8  ;;  %4727 = vmatpush.bf16.msra.mxu3 %v9049_v54  ;;  %v9352_v8 = vld [vmem:[%s15481_s7 + $0x588] sm:$0xf]  ;;  %v10619_v54 = vld [vmem:[%s15481_s7 + $0x694] sm:$0xf0] }
 0x4d3   : > { %4689 = vmatpush.bf16.msra.mxu0 %v8649_v31  ;;  %4702 = vmatpush.bf16.msra.mxu1 %v8777_v28  ;;  %v10651_v32 = vld [vmem:[%s15481_s7 + $0x794] sm:$0xf0]  ;;  %v9208_v35 = vld [vmem:[%s15481_s7 + $0x468] sm:$0xf]  ;;  %v9353_v43 = vor.u32 %v10587_v0, %v9352_v8  ;;  %v9481_v37 = vor.u32 %v10619_v54, %v9480_v51 }
 0x4d4   : > { %v10551_v31 = vld [vmem:[%s15481_s7 + $0x474] sm:$0xf0]  ;;  %v9336_v23 = vld [vmem:[%s15481_s7 + $0x568] sm:$0xf]  ;;  %v9609_v16 = vor.u32 %v10651_v32, %v9608_v46 }
 0x4d5   : > { %v10583_v38 = vld [vmem:[%s15481_s7 + $0x574] sm:$0xf0]  ;;  %v9464_v28 = vld [vmem:[%s15481_s7 + $0x668] sm:$0xf] }
 0x4d6   : > { %4715 = vmatpush.bf16.msra.mxu2 %v8905_v29  ;;  %4728 = vmatpush.bf16.msra.mxu3 %v9033_v59  ;;  %v10615_v29 = vld [vmem:[%s15481_s7 + $0x674] sm:$0xf0]  ;;  %v9592_v10 = vld [vmem:[%s15481_s7 + $0x768] sm:$0xf] }
 0x4d7   : > { %4734 = vmatpush.bf16.msrb.mxu0 %v9273_v63  ;;  %4747 = vmatpush.bf16.msrb.mxu1 %v9401_v55  ;;  %v10647_v59 = vld [vmem:[%s15481_s7 + $0x774] sm:$0xf0]  ;;  %v9209_v63 = vor.u32 %v10551_v31, %v9208_v35  ;;  %v9192_v55 = vld [vmem:[%s15481_s7 + $0x448] sm:$0xf]  ;;  %v9465_v40 = vor.u32 %v10615_v29, %v9464_v28  ;;  %v10437_v28 = vld [vmem:[%s15481_s7 + $0xec] sm:$0xf] }
 0x4d8   : > { %4690 = vmatmul.bf16.vlgmr.msra.gmra.mxu0 %v12667_v30  ;;  %4703 = vmatmul.bf16.vlgmr.msra.gmra.mxu1 %v12691_v14  ;;  %v10547_v18 = vld [vmem:[%s15481_s7 + $0x454] sm:$0xf0]  ;;  %v9320_v11 = vld [vmem:[%s15481_s7 + $0x548] sm:$0xf]  ;;  %v9593_v57 = vor.u32 %v10647_v59, %v9592_v10  ;;  %v8762_v29 = vld [vmem:[%s15481_s7 + $0xf8] sm:$0xf0] }
 0x4d9   : > { %4716 = vmatmul.bf16.vlgmr.msra.gmra.mxu2 %v12665_v21  ;;  %4729 = vmatmul.bf16.vlgmr.msra.gmra.mxu3 %v12669_v58  ;;  %v10579_v17 = vld [vmem:[%s15481_s7 + $0x554] sm:$0xf0]  ;;  %v9448_v47 = vld [vmem:[%s15481_s7 + $0x648] sm:$0xf]  ;;  %v10469_v10 = vld [vmem:[%s15481_s7 + $0x1ec] sm:$0xf] }
 0x4da   : > { %4760 = vmatpush.bf16.msrb.mxu2 %v9529_v15  ;;  %4773 = vmatpush.bf16.msrb.mxu3 %v9657_v44  ;;  %v9337_v15 = vor.u32 %v10583_v38, %v9336_v23  ;;  %v4466_v44 = vperm.slane %v13495_v39, 0  ;;  %v10611_v20 = vld [vmem:[%s15481_s7 + $0x654] sm:$0xf0]  ;;  %v9576_v7 = vld [vmem:[%s15481_s7 + $0x748] sm:$0xf]  ;;  %v9321_v19 = vor.u32 %v10579_v17, %v9320_v11 }
 0x4db   : > { %4735 = vmatpush.bf16.msrb.mxu0 %v9257_v45  ;;  %4748 = vmatpush.bf16.msrb.mxu1 %v9385_v12  ;;  %v10643_v45 = vld [vmem:[%s15481_s7 + $0x754] sm:$0xf0]  ;;  %v9193_v12 = vor.u32 %v10547_v18, %v9192_v55  ;;  %v9449_v53 = vor.u32 %v10611_v20, %v9448_v47  ;;  %v9176_v34 = vld [vmem:[%s15481_s7 + $0x428] sm:$0xf]  ;;  %v10501_v55 = vld [vmem:[%s15481_s7 + $0x2ec] sm:$0xf] }
 0x4dc   : > { %v9304_v41 = vld [vmem:[%s15481_s7 + $0x528] sm:$0xf]  ;;  %v9577_v24 = vor.u32 %v10643_v45, %v9576_v7  ;;  %v10575_v50 = vld [vmem:[%s15481_s7 + $0x534] sm:$0xf0]  ;;  %v9146_v17 = vld [vmem:[%s15481_s7 + $0x3f8] sm:$0xf0]  ;;  %v8765_v7 = vor.u32 %v10437_v28, %v8762_v29 }
 0x4dd   : > { %v10639_v56 = vld [vmem:[%s15481_s7 + $0x734] sm:$0xf0]  ;;  %v9305_v51 = vor.u32 %v10575_v50, %v9304_v41  ;;  %v9288_v46 = vld [vmem:[%s15481_s7 + $0x508] sm:$0xf]  ;;  %v10497_v41 = vld [vmem:[%s15481_s7 + $0x2cc] sm:$0xf] }
 0x4de   : > { %4761 = vmatpush.bf16.msrb.mxu2 %v9513_v36  ;;  %4774 = vmatpush.bf16.msrb.mxu3 %v9641_v61  ;;  %v10543_v61 = vld [vmem:[%s15481_s7 + $0x434] sm:$0xf0]  ;;  %v9544_v31 = vld [vmem:[%s15481_s7 + $0x708] sm:$0xf]  ;;  %v8842_v28 = vld [vmem:[%s15481_s7 + $0x198] sm:$0xf0] }
 0x4df   : > { %4736 = vmatpush.bf16.msrb.mxu0 %v9241_v13  ;;  %4749 = vmatpush.bf16.msrb.mxu1 %v9369_v52  ;;  %v9432_v13 = vld [vmem:[%s15481_s7 + $0x628] sm:$0xf]  ;;  %v10607_v52 = vld [vmem:[%s15481_s7 + $0x634] sm:$0xf0]  ;;  %v9177_v8 = vor.u32 %v10543_v61, %v9176_v34  ;;  %v8874_v61 = vld [vmem:[%s15481_s7 + $0x1d8] sm:$0xf0] }
 0x4e0   : > { %v10539_v0 = vld [vmem:[%s15481_s7 + $0x414] sm:$0xf0]  ;;  %v9433_v54 = vor.u32 %v10607_v52, %v9432_v13  ;;  %v10489_v29 = vld [vmem:[%s15481_s7 + $0x28c] sm:$0xf] }
 0x4e1   : > { %v4483_v36 = vpop.f32.mrf.mxu0  ;;  %v10571_v32 = vld [vmem:[%s15481_s7 + $0x514] sm:$0xf0] }
 0x4e2   : > { %4762 = vmatpush.bf16.msrb.mxu2 %v9497_v62  ;;  %4775 = vmatpush.bf16.msrb.mxu3 %v9625_v27  ;;  %v4484_v33 = vadd.f32 %v4483_v36, %v4466_v44  ;;  %v4496_v25 = vpop.f32.mrf.mxu1  ;;  %v9560_v62 = vld [vmem:[%s15481_s7 + $0x728] sm:$0xf]  ;;  %v10635_v23 = vld [vmem:[%s15481_s7 + $0x714] sm:$0xf0]  ;;  %v9289_v11 = vor.u32 %v10571_v32, %v9288_v46  ;;  %v10433_v36 = vld [vmem:[%s15481_s7 + $0xcc] sm:$0xf] }
 0x4e3   : > { %4737 = vmatpush.bf16.msrb.mxu0 %v9225_v49  ;;  %4750 = vmatpush.bf16.msrb.mxu1 %v9353_v43  ;;  %v9160_v27 = vld [vmem:[%s15481_s7 + $0x408] sm:$0xf]  ;;  %v9561_v43 = vor.u32 %v10639_v56, %v9560_v62  ;;  %v9545_v20 = vor.u32 %v10635_v23, %v9544_v31  ;;  %v8986_v46 = vld [vmem:[%s15481_s7 + $0x2b8] sm:$0xf0]  ;;  %v10525_v32 = vld [vmem:[%s15481_s7 + $0x3ac] sm:$0xf] }
 0x4e4   : > { %v4497_v48 = vadd.f32 %v4496_v25, %v4484_v33  ;;  %v9416_v49 = vld [vmem:[%s15481_s7 + $0x608] sm:$0xf]  ;;  %v9161_v59 = vor.u32 %v10539_v0, %v9160_v27  ;;  %v9002_v33 = vld [vmem:[%s15481_s7 + $0x2d8] sm:$0xf0]  ;;  %v10529_v25 = vld [vmem:[%s15481_s7 + $0x3cc] sm:$0xf] }
 0x4e5   : > { %v9005_v56 = vor.u32 %v10497_v41, %v9002_v33  ;;  %v10461_v27 = vld [vmem:[%s15481_s7 + $0x1ac] sm:$0xf]  ;;  %v8714_v23 = vld [vmem:[%s15481_s7 + $0x98] sm:$0xf0] }
 0x4e6   : > { %4763 = vmatpush.bf16.msrb.mxu2 %v9481_v37  ;;  %4776 = vmatpush.bf16.msrb.mxu3 %v9609_v16  ;;  %v10603_v37 = vld [vmem:[%s15481_s7 + $0x614] sm:$0xf0]  ;;  %v10425_v31 = vld [vmem:[%s15481_s7 + $0x8c] sm:$0xf] }
 0x4e7   : > { %4738 = vmatpush.bf16.msrb.mxu0 %v9209_v63  ;;  %4751 = vmatpush.bf16.msrb.mxu1 %v9337_v15  ;;  %v4509_v35 = vpop.f32.mrf.mxu2  ;;  %v8890_v63 = vld [vmem:[%s15481_s7 + $0x1f8] sm:$0xf0]  ;;  %v9417_v44 = vor.u32 %v10603_v37, %v9416_v49  ;;  %v10417_v33 = vld [vmem:[%s15481_s7 + $0x4c] sm:$0xf] }
 0x4e8   : > { %v4510_v38 = vadd.f32 %v4509_v35, %v4497_v48  ;;  %v4522_v16 = vpop.f32.mrf.mxu3  ;;  %v9018_v15 = vld [vmem:[%s15481_s7 + $0x2f8] sm:$0xf0]  ;;  %v8893_v45 = vor.u32 %v10469_v10, %v8890_v63  ;;  %v10429_v48 = vld [vmem:[%s15481_s7 + $0xac] sm:$0xf] }
 0x4e9   : > { %v4485_v18 = vpop.f32.mrf.mxu0  ;;  %v9114_v49 = vld [vmem:[%s15481_s7 + $0x3b8] sm:$0xf0] }
 0x4ea   : > { %4764 = vmatpush.bf16.msrb.mxu2 %v9465_v40  ;;  %4777 = vmatpush.bf16.msrb.mxu3 %v9593_v57  ;;  %v13594_v40 = vadd.f32 %v4522_v16, %v4510_v38  ;;  %v10533_v57 = vld [vmem:[%s15481_s7 + $0x3ec] sm:$0xf]  ;;  %v4498_v47 = vpop.f32.mrf.mxu1  ;;  %v9117_v16 = vor.u32 %v10525_v32, %v9114_v49  ;;  %v8970_v10 = vld [vmem:[%s15481_s7 + $0x298] sm:$0xf0] }
 0x4eb   : > { %4739 = vmatpush.bf16.msrb.mxu0 %v9193_v12  ;;  %4752 = vmatpush.bf16.msrb.mxu1 %v9321_v19  ;;  %v9021_v12 = vor.u32 %v10501_v55, %v9018_v15  ;;  %v8746_v19 = vld [vmem:[%s15481_s7 + $0xd8] sm:$0xf0]  ;;  %v9149_v34 = vor.u32 %v10533_v57, %v9146_v17  ;;  %v10457_v38 = vld [vmem:[%s15481_s7 + $0x18c] sm:$0xf]  ;;  %v8717_v55 = vor.u32 %v10425_v31, %v8714_v23 }
 0x4ec   : > { %v8749_v13 = vor.u32 %v10433_v36, %v8746_v19  ;;  %v9098_v63 = vld [vmem:[%s15481_s7 + $0x398] sm:$0xf0]  ;;  %v8845_v18 = vor.u32 %v10457_v38, %v8842_v28  ;;  %v10453_v17 = vld [vmem:[%s15481_s7 + $0x16c] sm:$0xf] }
 0x4ed   : > { %v8698_v57 = vld [vmem:[%s15481_s7 + $0x78] sm:$0xf0]  ;;  %v10517_v19 = vld [vmem:[%s15481_s7 + $0x36c] sm:$0xf] }
 0x4ee   : > { %4765 = vmatpush.bf16.msrb.mxu2 %v9449_v53  ;;  %4778 = vmatpush.bf16.msrb.mxu3 %v9577_v24  ;;  %v10465_v53 = vld [vmem:[%s15481_s7 + $0x1cc] sm:$0xf]  ;;  %v9130_v24 = vld [vmem:[%s15481_s7 + $0x3d8] sm:$0xf0] }
 0x4ef   : > { %4740 = vmatpush.bf16.msrb.mxu0 %v9177_v8  ;;  %4753 = vmatpush.bf16.msrb.mxu1 %v9305_v51  ;;  %v4511_v50 = vpop.f32.mrf.mxu2  ;;  %v8877_v62 = vor.u32 %v10465_v53, %v8874_v61  ;;  %v8730_v8 = vld [vmem:[%s15481_s7 + $0xb8] sm:$0xf0]  ;;  %v9133_v0 = vor.u32 %v10529_v25, %v9130_v24  ;;  %v10449_v24 = vld [vmem:[%s15481_s7 + $0x14c] sm:$0xf] }
 0x4f0   : > { %v4524_v52 = vpop.f32.mrf.mxu3  ;;  %v8858_v51 = vld [vmem:[%s15481_s7 + $0x1b8] sm:$0xf0]  ;;  %v8733_v35 = vor.u32 %v10429_v48, %v8730_v8 }
 0x4f1   : > { %v8954_v36 = vld [vmem:[%s15481_s7 + $0x278] sm:$0xf0] }
 0x4f2   : > { %4766 = vmatpush.bf16.msrb.mxu2 %v9433_v54  ;;  %4779 = vmatpush.bf16.msrb.mxu3 %v9561_v43  ;;  %v10493_v54 = vld [vmem:[%s15481_s7 + $0x2ac] sm:$0xf]  ;;  %v8861_v43 = vor.u32 %v10461_v27, %v8858_v51  ;;  %v8682_v25 = vld [vmem:[%s15481_s7 + $0x58] sm:$0xf0] }
 0x4f3   : > { %4741 = vmatpush.bf16.msrb.mxu0 %v9161_v59  ;;  %4754 = vmatpush.bf16.msrb.mxu1 %v9289_v11  ;;  %v8989_v37 = vor.u32 %v10493_v54, %v8986_v46  ;;  %v10521_v59 = vld [vmem:[%s15481_s7 + $0x38c] sm:$0xf]  ;;  %v8973_v11 = vor.u32 %v10489_v29, %v8970_v10  ;;  %v8810_v52 = vld [vmem:[%s15481_s7 + $0x158] sm:$0xf0]  ;;  %v8685_v51 = vor.u32 %v10417_v33, %v8682_v25 }
 0x4f4   : > { %v10513_v27 = vld [vmem:[%s15481_s7 + $0x34c] sm:$0xf]  ;;  %v8813_v32 = vor.u32 %v10449_v24, %v8810_v52  ;;  %v8794_v38 = vld [vmem:[%s15481_s7 + $0x138] sm:$0xf0] }
 0x4f5   : > { %v4535_v15 = vpop.f32.mrf.mxu0  ;;  %v8922_v28 = vld [vmem:[%s15481_s7 + $0x238] sm:$0xf0]  ;;  %v10509_v29 = vld [vmem:[%s15481_s7 + $0x32c] sm:$0xf] }
 0x4f6   : > { %4767 = vmatpush.bf16.msrb.mxu2 %v9417_v44  ;;  %4780 = vmatpush.bf16.msrb.mxu3 %v9545_v20  ;;  %v10421_v44 = vld [vmem:[%s15481_s7 + $0x6c] sm:$0xf]  ;;  %v4536_v47 = vadd.f32 %v4535_v15, %v13594_v40  ;;  %v4548_v20 = vpop.f32.mrf.mxu1  ;;  %v9082_v40 = vld [vmem:[%s15481_s7 + $0x378] sm:$0xf0] }
 0x4f7   : > { %4786 = vmatpush.bf16.msra.mxu0 %v8765_v7  ;;  %4799 = vmatpush.bf16.msra.mxu1 %v8893_v45  ;;  %v9101_v7 = vor.u32 %v10521_v59, %v9098_v63  ;;  %v8826_v45 = vld [vmem:[%s15481_s7 + $0x178] sm:$0xf0]  ;;  %v10409_v63 = vld [vmem:[%s15481_s7 + $0xc] sm:$0xf] }
 0x4f8   : > { %4742 = vmatmul.bf16.vlgmr.msrb.gmra.mxu0 %v12828_v22  ;;  %4755 = vmatmul.bf16.vlgmr.msrb.gmra.mxu1 %v12832_v60  ;;  %v4549_v53 = vadd.f32 %v4548_v20, %v4536_v47  ;;  %v8829_v61 = vor.u32 %v10453_v17, %v8826_v45  ;;  %v9050_v10 = vld [vmem:[%s15481_s7 + $0x338] sm:$0xf0]  ;;  %v10661_v24 = vld [vmem:[%s15481_s7 + $0x7ec] sm:$0xf] }
 0x4f9   : > { %4768 = vmatmul.bf16.vlgmr.msrb.gmra.mxu2 %v12820_v42  ;;  %4781 = vmatmul.bf16.vlgmr.msrb.gmra.mxu3 %v12830_v26  ;;  %v9053_v47 = vor.u32 %v10509_v29, %v9050_v10  ;;  %v8906_v20 = vld [vmem:[%s15481_s7 + $0x218] sm:$0xf0]  ;;  %v10621_v10 = vld [vmem:[%s15481_s7 + $0x6ac] sm:$0xf] }
 0x4fa   : > { %4812 = vmatpush.bf16.msra.mxu2 %v9021_v12  ;;  %4825 = vmatpush.bf16.msra.mxu3 %v9149_v34  ;;  %v10485_v12 = vld [vmem:[%s15481_s7 + $0x26c] sm:$0xf]  ;;  %v8701_v34 = vor.u32 %v10421_v44, %v8698_v57  ;;  %v8778_v44 = vld [vmem:[%s15481_s7 + $0x118] sm:$0xf0] }
 0x4fb   : > { %4787 = vmatpush.bf16.msra.mxu0 %v8749_v13  ;;  %4800 = vmatpush.bf16.msra.mxu1 %v8877_v62  ;;  %v8957_v41 = vor.u32 %v10485_v12, %v8954_v36  ;;  %v9085_v13 = vor.u32 %v10517_v19, %v9082_v40  ;;  %v10481_v62 = vld [vmem:[%s15481_s7 + $0x24c] sm:$0xf]  ;;  %v9034_v45 = vld [vmem:[%s15481_s7 + $0x318] sm:$0xf0] }
 0x4fc   : > { %v4561_v50 = vpop.f32.mrf.mxu2  ;;  %v4574_v8 = vpop.f32.mrf.mxu3  ;;  %v10473_v57 = vld [vmem:[%s15481_s7 + $0x20c] sm:$0xf]  ;;  %v9274_v19 = vld [vmem:[%s15481_s7 + $0x4f8] sm:$0xf0] }
 0x4fd   : > { %v4562_v48 = vadd.f32 %v4561_v50, %v4549_v53  ;;  %v4537_v46 = vpop.f32.mrf.mxu0  ;;  %v10565_v36 = vld [vmem:[%s15481_s7 + $0x4ec] sm:$0xf]  ;;  %v8909_v25 = vor.u32 %v10473_v57, %v8906_v20  ;;  %v9658_v50 = vld [vmem:[%s15481_s7 + $0x7f8] sm:$0xf0] }
 0x4fe   : > { %4813 = vmatpush.bf16.msra.mxu2 %v9005_v56  ;;  %4826 = vmatpush.bf16.msra.mxu3 %v9133_v0  ;;  %v8938_v56 = vld [vmem:[%s15481_s7 + $0x258] sm:$0xf0]  ;;  %v4550_v31 = vpop.f32.mrf.mxu1  ;;  %v10597_v40 = vld [vmem:[%s15481_s7 + $0x5ec] sm:$0xf]  ;;  %v9277_v52 = vor.u32 %v10565_v36, %v9274_v19 }
 0x4ff   : > { %4788 = vmatpush.bf16.msra.mxu0 %v8733_v35  ;;  %4801 = vmatpush.bf16.msra.mxu1 %v8861_v43  ;;  %v9066_v0 = vld [vmem:[%s15481_s7 + $0x358] sm:$0xf0]  ;;  %v13727_v54 = vadd.f32 %v4574_v8, %v4562_v48  ;;  %v8941_v49 = vor.u32 %v10481_v62, %v8938_v56  ;;  %v10413_v35 = vld [vmem:[%s15481_s7 + $0x2c] sm:$0xf] }
 0x500   : > { %v8666_v43 = vld [vmem:[%s15481_s7 + $0x38] sm:$0xf0]  ;;  %v9069_v23 = vor.u32 %v10513_v27, %v9066_v0  ;;  %v10561_v48 = vld [vmem:[%s15481_s7 + $0x4cc] sm:$0xf]  ;;  %v9661_v0 = vor.u32 %v10661_v24, %v9658_v50 }
 0x501   : > { %v8669_v59 = vor.u32 %v10413_v35, %v8666_v43  ;;  %v9258_v8 = vld [vmem:[%s15481_s7 + $0x4d8] sm:$0xf0]  ;;  %v10593_v27 = vld [vmem:[%s15481_s7 + $0x5cc] sm:$0xf] }
 0x502   : > { %4814 = vmatpush.bf16.msra.mxu2 %v8989_v37  ;;  %4827 = vmatpush.bf16.msra.mxu3 %v9117_v16  ;;  %v10445_v37 = vld [vmem:[%s15481_s7 + $0x12c] sm:$0xf]  ;;  %v9642_v35 = vld [vmem:[%s15481_s7 + $0x7d8] sm:$0xf0]  ;;  %v9261_v43 = vor.u32 %v10561_v48, %v9258_v8 }
 0x503   : > { %4789 = vmatpush.bf16.msra.mxu0 %v8717_v55  ;;  %4802 = vmatpush.bf16.msra.mxu1 %v8845_v18  ;;  %v10477_v16 = vld [vmem:[%s15481_s7 + $0x22c] sm:$0xf]  ;;  %v8650_v55 = vld [vmem:[%s15481_s7 + $0x18] sm:$0xf0]  ;;  %v8797_v15 = vor.u32 %v10445_v37, %v8794_v38 }
 0x504   : > { %v8925_v18 = vor.u32 %v10477_v16, %v8922_v28  ;;  %v4563_v17 = vpop.f32.mrf.mxu2  ;;  %v4576_v12 = vpop.f32.mrf.mxu3  ;;  %v8653_v53 = vor.u32 %v10409_v63, %v8650_v55  ;;  %v10625_v46 = vld [vmem:[%s15481_s7 + $0x6cc] sm:$0xf]  ;;  %v9242_v38 = vld [vmem:[%s15481_s7 + $0x4b8] sm:$0xf0] }
 0x505   : > { %v10589_v16 = vld [vmem:[%s15481_s7 + $0x5ac] sm:$0xf]  ;;  %v9370_v29 = vld [vmem:[%s15481_s7 + $0x5b8] sm:$0xf0] }
 0x506   : > { %4815 = vmatpush.bf16.msra.mxu2 %v8973_v11  ;;  %4828 = vmatpush.bf16.msra.mxu3 %v9101_v7  ;;  %v10441_v11 = vld [vmem:[%s15481_s7 + $0x10c] sm:$0xf]  ;;  %v9482_v17 = vld [vmem:[%s15481_s7 + $0x698] sm:$0xf0] }
 0x507   : > { %4790 = vmatpush.bf16.msra.mxu0 %v8701_v34  ;;  %4803 = vmatpush.bf16.msra.mxu1 %v8829_v61  ;;  %v10505_v7 = vld [vmem:[%s15481_s7 + $0x30c] sm:$0xf]  ;;  %v9402_v34 = vld [vmem:[%s15481_s7 + $0x5f8] sm:$0xf0]  ;;  %v8781_v33 = vor.u32 %v10441_v11, %v8778_v44 }
 0x508   : > { %v10629_v61 = vld [vmem:[%s15481_s7 + $0x6ec] sm:$0xf]  ;;  %v9405_v62 = vor.u32 %v10597_v40, %v9402_v34  ;;  %v9226_v44 = vld [vmem:[%s15481_s7 + $0x498] sm:$0xf0] }
 0x509   : > { %v10653_v63 = vld [vmem:[%s15481_s7 + $0x7ac] sm:$0xf]  ;;  %v9610_v20 = vld [vmem:[%s15481_s7 + $0x798] sm:$0xf0] }
 0x50a   : > { %4816 = vmatpush.bf16.msra.mxu2 %v8957_v41  ;;  %4829 = vmatpush.bf16.msra.mxu3 %v9085_v13  ;;  %v9530_v41 = vld [vmem:[%s15481_s7 + $0x6f8] sm:$0xf0]  ;;  %v9037_v13 = vor.u32 %v10505_v7, %v9034_v45  ;;  %v10553_v11 = vld [vmem:[%s15481_s7 + $0x48c] sm:$0xf] }
 0x50b   : > { %4791 = vmatpush.bf16.msra.mxu0 %v8685_v51  ;;  %4804 = vmatpush.bf16.msra.mxu1 %v8813_v32  ;;  %v9533_v56 = vor.u32 %v10629_v61, %v9530_v41  ;;  %v9386_v51 = vld [vmem:[%s15481_s7 + $0x5d8] sm:$0xf0]  ;;  %v10617_v57 = vld [vmem:[%s15481_s7 + $0x68c] sm:$0xf]  ;;  %v9229_v7 = vor.u32 %v10553_v11, %v9226_v44  ;;  %v4467_v11 = vperm.slane %v13495_v39, 1 }
 0x50c   : > { %v9514_v32 = vld [vmem:[%s15481_s7 + $0x6d8] sm:$0xf0]  ;;  %v9389_v37 = vor.u32 %v10593_v27, %v9386_v51  ;;  %v9485_v36 = vor.u32 %v10617_v57, %v9482_v17  ;;  %v10549_v19 = vld [vmem:[%s15481_s7 + $0x46c] sm:$0xf] }
 0x50d   : > { %v9517_v31 = vor.u32 %v10625_v46, %v9514_v32  ;;  %v9210_v40 = vld [vmem:[%s15481_s7 + $0x478] sm:$0xf0]  ;;  %v10645_v24 = vld [vmem:[%s15481_s7 + $0x76c] sm:$0xf] }
 0x50e   : > { %4817 = vmatpush.bf16.msra.mxu2 %v8941_v49  ;;  %4830 = vmatpush.bf16.msra.mxu3 %v9069_v23  ;;  %v10657_v49 = vld [vmem:[%s15481_s7 + $0x7cc] sm:$0xf]  ;;  %v9338_v41 = vld [vmem:[%s15481_s7 + $0x578] sm:$0xf0] }
 0x50f   : > { %4792 = vmatpush.bf16.msra.mxu0 %v8669_v59  ;;  %4805 = vmatpush.bf16.msra.mxu1 %v8797_v15  ;;  %v10557_v23 = vld [vmem:[%s15481_s7 + $0x4ac] sm:$0xf]  ;;  %v9645_v28 = vor.u32 %v10657_v49, %v9642_v35  ;;  %v9498_v59 = vld [vmem:[%s15481_s7 + $0x6b8] sm:$0xf0]  ;;  %v9373_v15 = vor.u32 %v10589_v16, %v9370_v29 }
 0x510   : > { %v9245_v55 = vor.u32 %v10557_v23, %v9242_v38  ;;  %v9594_v50 = vld [vmem:[%s15481_s7 + $0x778] sm:$0xf0]  ;;  %v10577_v8 = vld [vmem:[%s15481_s7 + $0x54c] sm:$0xf] }
 0x511   : > { %v9194_v48 = vld [vmem:[%s15481_s7 + $0x458] sm:$0xf0]  ;;  %v10609_v46 = vld [vmem:[%s15481_s7 + $0x64c] sm:$0xf] }
 0x512   : > { %4818 = vmatpush.bf16.msra.mxu2 %v8925_v18  ;;  %4831 = vmatpush.bf16.msra.mxu3 %v9053_v47  ;;  %v9501_v18 = vor.u32 %v10621_v10, %v9498_v59  ;;  %v10649_v47 = vld [vmem:[%s15481_s7 + $0x78c] sm:$0xf]  ;;  %v9322_v51 = vld [vmem:[%s15481_s7 + $0x558] sm:$0xf0] }
 0x513   : > { %4793 = vmatpush.bf16.msra.mxu0 %v8653_v53  ;;  %4806 = vmatpush.bf16.msra.mxu1 %v8781_v33  ;;  %v10581_v53 = vld [vmem:[%s15481_s7 + $0x56c] sm:$0xf]  ;;  %v9613_v61 = vor.u32 %v10649_v47, %v9610_v20  ;;  %v9450_v32 = vld [vmem:[%s15481_s7 + $0x658] sm:$0xf0]  ;;  %v9325_v23 = vor.u32 %v10577_v8, %v9322_v51 }
 0x514   : > { %v10613_v33 = vld [vmem:[%s15481_s7 + $0x66c] sm:$0xf]  ;;  %v9453_v38 = vor.u32 %v10609_v46, %v9450_v32  ;;  %v9162_v57 = vld [vmem:[%s15481_s7 + $0x418] sm:$0xf0]  ;;  %v10693_v46 = vld [vmem:[#allocation7 + $0xe4] sm:$0xf0] }
 0x515   : > { %v13877_v45 = vpop.f32.mrf.mxu0  ;;  %v13888_v34 = vpop.f32.mrf.mxu1  ;;  %v10641_v35 = vld [vmem:[%s15481_s7 + $0x74c] sm:$0xf]  ;;  %v9290_v39 = vld [vmem:[%s15481_s7 + $0x518] sm:$0xf0] }
 0x516   : > { %4819 = vmatpush.bf16.msra.mxu2 %v8909_v25  ;;  %4832 = vmatpush.bf16.msra.mxu3 %v9037_v13  ;;  %v9466_v25 = vld [vmem:[%s15481_s7 + $0x678] sm:$0xf0]  ;;  %v9213_v13 = vor.u32 %v10549_v19, %v9210_v40  ;;  %v10541_v16 = vld [vmem:[%s15481_s7 + $0x42c] sm:$0xf] }
 0x517   : > { %4838 = vmatpush.bf16.msrb.mxu0 %v9277_v52  ;;  %4851 = vmatpush.bf16.msrb.mxu1 %v9405_v62  ;;  %v9341_v52 = vor.u32 %v10581_v53, %v9338_v41  ;;  %v9469_v62 = vor.u32 %v10613_v33, %v9466_v25  ;;  %v10573_v29 = vld [vmem:[%s15481_s7 + $0x52c] sm:$0xf]  ;;  %v9546_v40 = vld [vmem:[%s15481_s7 + $0x718] sm:$0xf0]  ;;  %v4588_v41 = vadd.f32 %v13877_v45, %v4467_v11 }
 0x518   : > { %4794 = vmatmul.bf16.vlgmr.msra.gmra.mxu0 %v12667_v30  ;;  %4807 = vmatmul.bf16.vlgmr.msra.gmra.mxu1 %v12691_v14  ;;  %v10585_v30 = vld [vmem:[%s15481_s7 + $0x58c] sm:$0xf]  ;;  %v9354_v14 = vld [vmem:[%s15481_s7 + $0x598] sm:$0xf0] }
 0x519   : > { %4820 = vmatmul.bf16.vlgmr.msra.gmra.mxu2 %v12665_v21  ;;  %v9626_v21 = vld [vmem:[%s15481_s7 + $0x7b8] sm:$0xf0]  ;;  %4833 = vmatmul.bf16.vlgmr.msra.gmra.mxu3 %v12669_v58  ;;  %v9357_v12 = vor.u32 %v10585_v30, %v9354_v14  ;;  %v10537_v30 = vld [vmem:[%s15481_s7 + $0x40c] sm:$0xf] }
 0x51a   : > { %4864 = vmatpush.bf16.msrb.mxu2 %v9533_v56  ;;  %4877 = vmatpush.bf16.msrb.mxu3 %v9661_v0  ;;  %v9629_v58 = vor.u32 %v10653_v63, %v9626_v21  ;;  %v10545_v56 = vld [vmem:[%s15481_s7 + $0x44c] sm:$0xf]  ;;  %v9597_v0 = vor.u32 %v10645_v24, %v9594_v50  ;;  %v9306_v63 = vld [vmem:[%s15481_s7 + $0x538] sm:$0xf0]  ;;  %v9165_v33 = vor.u32 %v10537_v30, %v9162_v57  ;;  %v10695_v24 = vld [vmem:[#allocation7 + $0xf4] sm:$0xf0] }
 0x51b   : > { %4839 = vmatpush.bf16.msrb.mxu0 %v9261_v43  ;;  %4852 = vmatpush.bf16.msrb.mxu1 %v9389_v37  ;;  %v9578_v43 = vld [vmem:[%s15481_s7 + $0x758] sm:$0xf0]  ;;  %v9197_v37 = vor.u32 %v10545_v56, %v9194_v48  ;;  %v10605_v21 = vld [vmem:[%s15481_s7 + $0x62c] sm:$0xf]  ;;  %v4601_v48 = vadd.f32 %v13888_v34, %v4588_v41  ;;  %v10709_v30 = vld [vmem:[#allocation7 + $0x164] sm:$0xf0] }
 0x51c   : > { %v13914_v27 = vpop.f32.mrf.mxu2  ;;  %v13925_v49 = vpop.f32.mrf.mxu3  ;;  %v9581_v59 = vor.u32 %v10641_v35, %v9578_v43  ;;  %v10569_v17 = vld [vmem:[%s15481_s7 + $0x50c] sm:$0xf]  ;;  %v9720_v53 = vld [vmem:[#allocation7 + $0x70] sm:$0xf] }
 0x51d   : > { %v4602_v10 = vpop.f32.mrf.mxu1  ;;  %v9784_v25 = vld [vmem:[#allocation7 + $0xf0] sm:$0xf]  ;;  %v9293_v50 = vor.u32 %v10569_v17, %v9290_v39  ;;  %v9712_v8 = vld [vmem:[#allocation7 + $0x60] sm:$0xf]  ;;  %v4614_v35 = vadd.f32 %v13914_v27, %v4601_v48  ;;  %v10689_v27 = vld [vmem:[#allocation7 + $0xc4] sm:$0xf0] }
 0x51e   : > { %4865 = vmatpush.bf16.msrb.mxu2 %v9517_v31  ;;  %4878 = vmatpush.bf16.msrb.mxu3 %v9645_v28  ;;  %v4589_v31 = vpop.f32.mrf.mxu0  ;;  %v9178_v28 = vld [vmem:[%s15481_s7 + $0x438] sm:$0xf0]  ;;  %v9785_v56 = vor.u32 %v10695_v24, %v9784_v25  ;;  %v9776_v51 = vld [vmem:[#allocation7 + $0xe0] sm:$0xf]  ;;  %v10705_v48 = vld [vmem:[#allocation7 + $0x144] sm:$0xf0] }
 0x51f   : > { %4840 = vmatpush.bf16.msrb.mxu0 %v9245_v55  ;;  %4853 = vmatpush.bf16.msrb.mxu1 %v9373_v15  ;;  %v9434_v55 = vld [vmem:[%s15481_s7 + $0x638] sm:$0xf0]  ;;  %v10637_v15 = vld [vmem:[%s15481_s7 + $0x72c] sm:$0xf]  ;;  %v9181_v44 = vor.u32 %v10541_v16, %v9178_v28  ;;  %v9777_v32 = vor.u32 %v10693_v46, %v9776_v51  ;;  %v10691_v31 = vld [vmem:[#allocation7 + $0xd4] sm:$0xf0] }
 0x520   : > { %v9437_v14 = vor.u32 %v10605_v21, %v9434_v55  ;;  %v9704_v43 = vld [vmem:[#allocation7 + $0x50] sm:$0xf]  ;;  %v10673_v28 = vld [vmem:[#allocation7 + $0x44] sm:$0xf0]  ;;  %v9680_v39 = vld [vmem:[#allocation7 + $0x20] sm:$0xf] }
 0x521   : > { %v9768_v34 = vld [vmem:[#allocation7 + $0xd0] sm:$0xf]  ;;  %v9664_v46 = vld [vmem:[#allocation7] sm:$0xf] }
 0x522   : > { %4866 = vmatpush.bf16.msrb.mxu2 %v9501_v18  ;;  %4879 = vmatpush.bf16.msrb.mxu3 %v9629_v58  ;;  %v9562_v18 = vld [vmem:[%s15481_s7 + $0x738] sm:$0xf0]  ;;  %v9309_v58 = vor.u32 %v10573_v29, %v9306_v63  ;;  %v9769_v16 = vor.u32 %v10691_v31, %v9768_v34  ;;  %v9760_v29 = vld [vmem:[#allocation7 + $0xc0] sm:$0xf]  ;;  %v9722_v31 = vld [vmem:[#allocation7 + $0x78] sm:$0xf0] }
 0x523   : > { %4841 = vmatpush.bf16.msrb.mxu0 %v9229_v7  ;;  %4854 = vmatpush.bf16.msrb.mxu1 %v9357_v12  ;;  %v9565_v20 = vor.u32 %v10637_v15, %v9562_v18  ;;  %v10601_v7 = vld [vmem:[%s15481_s7 + $0x60c] sm:$0xf]  ;;  %v9418_v12 = vld [vmem:[%s15481_s7 + $0x618] sm:$0xf0]  ;;  %v9761_v21 = vor.u32 %v10689_v27, %v9760_v29 }
 0x524   : > { %v4615_v47 = vpop.f32.mrf.mxu2  ;;  %v4628_v19 = vpop.f32.mrf.mxu3  ;;  %v9848_v10 = vld [vmem:[#allocation7 + $0x170] sm:$0xf] }
 0x525   : > { %v9688_v55 = vld [vmem:[#allocation7 + $0x30] sm:$0xf]  ;;  %v10669_v47 = vld [vmem:[#allocation7 + $0x24] sm:$0xf0] }
 0x526   : > { %4867 = vmatpush.bf16.msrb.mxu2 %v9485_v36  ;;  %4880 = vmatpush.bf16.msrb.mxu3 %v9613_v61  ;;  %v10633_v36 = vld [vmem:[%s15481_s7 + $0x70c] sm:$0xf]  ;;  %v10679_v61 = vld [vmem:[#allocation7 + $0x74] sm:$0xf0]  ;;  %v9752_v15 = vld [vmem:[#allocation7 + $0xb0] sm:$0xf] }
 0x527   : > { %4842 = vmatpush.bf16.msrb.mxu0 %v9213_v13  ;;  %4855 = vmatpush.bf16.msrb.mxu1 %v9341_v52  ;;  %v9421_v13 = vor.u32 %v10601_v7, %v9418_v12  ;;  %v9549_v52 = vor.u32 %v10633_v36, %v9546_v40  ;;  %v10685_v12 = vld [vmem:[#allocation7 + $0xa4] sm:$0xf0]  ;;  %v9832_v19 = vld [vmem:[#allocation7 + $0x150] sm:$0xf]  ;;  %v10707_v40 = vld [vmem:[#allocation7 + $0x154] sm:$0xf0] }
 0x528   : > { %v9672_v24 = vld [vmem:[#allocation7 + $0x10] sm:$0xf] }
 0x52a   : > { %4868 = vmatpush.bf16.msrb.mxu2 %v9469_v62  ;;  %4881 = vmatpush.bf16.msrb.mxu3 %v9597_v0  ;;  %v9721_v62 = vor.u32 %v10679_v61, %v9720_v53  ;;  %v10677_v0 = vld [vmem:[#allocation7 + $0x64] sm:$0xf0]  ;;  %v9833_v53 = vor.u32 %v10707_v40, %v9832_v19  ;;  %v9681_v61 = vor.u32 %v10669_v47, %v9680_v39  ;;  %v9706_v39 = vld [vmem:[#allocation7 + $0x58] sm:$0xf0]  ;;  %v10690_v47 = vld [vmem:[#allocation7 + $0xd4] sm:$0xf] }
 0x52b   : > { %4843 = vmatpush.bf16.msrb.mxu0 %v9197_v37  ;;  %4856 = vmatpush.bf16.msrb.mxu1 %v9325_v23  ;;  %v9713_v45 = vor.u32 %v10677_v0, %v9712_v8  ;;  %v10675_v37 = vld [vmem:[#allocation7 + $0x54] sm:$0xf0]  ;;  %v10710_v19 = vld [vmem:[#allocation7 + $0x174] sm:$0xf]  ;;  %v9850_v40 = vld [vmem:[#allocation7 + $0x178] sm:$0xf0] }
 0x52c   : > { %v9705_v23 = vor.u32 %v10675_v37, %v9704_v43  ;;  %v10681_v43 = vld [vmem:[#allocation7 + $0x84] sm:$0xf0]  ;;  %v10678_v37 = vld [vmem:[#allocation7 + $0x74] sm:$0xf] }
 0x52e   : > { %4869 = vmatpush.bf16.msrb.mxu2 %v9453_v38  ;;  %4882 = vmatpush.bf16.msrb.mxu3 %v9581_v59  ;;  %v4627_v38 = vadd.f32 %v13925_v49, %v4614_v35  ;;  %v10711_v59 = vld [vmem:[#allocation7 + $0x174] sm:$0xf0]  ;;  %v9728_v35 = vld [vmem:[#allocation7 + $0x80] sm:$0xf] }
 0x52f   : > { %4844 = vmatpush.bf16.msrb.mxu0 %v9181_v44  ;;  %4857 = vmatpush.bf16.msrb.mxu1 %v9309_v58  ;;  %v9849_v63 = vor.u32 %v10711_v59, %v9848_v10  ;;  %v10687_v49 = vld [vmem:[#allocation7 + $0xb4] sm:$0xf0]  ;;  %v9840_v44 = vld [vmem:[#allocation7 + $0x160] sm:$0xf]  ;;  %v4890_v59 = vmax.f32 %v13727_v54, 0.0 }
 0x530   : > { %v9841_v58 = vor.u32 %v10709_v30, %v9840_v44  ;;  %v9753_v17 = vor.u32 %v10687_v49, %v9752_v15  ;;  %v10701_v15 = vld [vmem:[#allocation7 + $0x124] sm:$0xf0] }
 0x531   : > { %v13993_v30 = vpack.c.bf16 %v4890_v59, %v4890_v59 }
 0x532   : > { %4870 = vmatpush.bf16.msrb.mxu2 %v9437_v14  ;;  %4883 = vmatpush.bf16.msrb.mxu3 %v9565_v20  ;;  %v9744_v20 = vld [vmem:[#allocation7 + $0xa0] sm:$0xf] }
 0x533   : > { %4845 = vmatpush.bf16.msrb.mxu0 %v9165_v33  ;;  %4858 = vmatpush.bf16.msrb.mxu1 %v9293_v50  ;;  %v9745_v25 = vor.u32 %v10685_v12, %v9744_v20  ;;  %v10667_v50 = vld [vmem:[#allocation7 + $0x14] sm:$0xf0]  ;;  %v9792_v12 = vld [vmem:[#allocation7 + $0x100] sm:$0xf] }
 0x534   : > { %v9673_v51 = vor.u32 %v10667_v50, %v9672_v24  ;;  %v10688_v24 = vld [vmem:[#allocation7 + $0xc4] sm:$0xf]  ;;  %v9762_v50 = vld [vmem:[#allocation7 + $0xc8] sm:$0xf0] }
 0x535   : > { %v4652_v11 = vpop.f32.mrf.mxu1 }
 0x536   : > { %4871 = vmatpush.bf16.msrb.mxu2 %v9421_v13  ;;  %4884 = vmatpush.bf16.msrb.mxu3 %v9549_v52  ;;  %v9736_v13 = vld [vmem:[#allocation7 + $0x90] sm:$0xf] }
 0x537   : > { %5288 = vmatpush.bf16.msra.mxu0 %v9721_v62  ;;  %5301 = vmatpush.bf16.msra.mxu1 %v9785_v56  ;;  %v10683_v62 = vld [vmem:[#allocation7 + $0x94] sm:$0xf0]  ;;  %v9824_v56 = vld [vmem:[#allocation7 + $0x140] sm:$0xf] }
 0x538   : > { %4846 = vmatmul.bf16.vlgmr.msrb.gmra.mxu0 %v12828_v22  ;;  %4859 = vmatmul.bf16.vlgmr.msrb.gmra.mxu1 %v12832_v60  ;;  %v9696_v22 = vld [vmem:[#allocation7 + $0x40] sm:$0xf]  ;;  %v9825_v8 = vor.u32 %v10705_v48, %v9824_v56  ;;  %v10670_v56 = vld [vmem:[#allocation7 + $0x34] sm:$0xf]  ;;  %v9690_v48 = vld [vmem:[#allocation7 + $0x38] sm:$0xf0] }
 0x539   : > { %4872 = vmatmul.bf16.vlgmr.msrb.gmra.mxu2 %v12820_v42  ;;  %4885 = vmatmul.bf16.vlgmr.msrb.gmra.mxu3 %v12830_v26  ;;  %v9697_v60 = vor.u32 %v10673_v28, %v9696_v22  ;;  %v4639_v42 = vpop.f32.mrf.mxu0  ;;  %v10671_v26 = vld [vmem:[#allocation7 + $0x34] sm:$0xf0]  ;;  %v10694_v22 = vld [vmem:[#allocation7 + $0xf4] sm:$0xf]  ;;  %v9786_v28 = vld [vmem:[#allocation7 + $0xf8] sm:$0xf0] }
 0x53a   : > { %v4640_v18 = vadd.f32 %v4639_v42, %v4627_v38  ;;  %5314 = vmatpush.bf16.msra.mxu2 %v9849_v63  ;;  %v9689_v14 = vor.u32 %v10671_v26, %v9688_v55  ;;  %v9816_v38 = vld [vmem:[#allocation7 + $0x130] sm:$0xf]  ;;  %v9729_v63 = vor.u32 %v10681_v43, %v9728_v35  ;;  %v10676_v42 = vld [vmem:[#allocation7 + $0x64] sm:$0xf]  ;;  %v9714_v55 = vld [vmem:[#allocation7 + $0x68] sm:$0xf0]  ;;  %v9693_v43 = vor.u32 %v10670_v56, %v9690_v48 }
 0x53b   : > { %5289 = vmatpush.bf16.msra.mxu0 %v9713_v45  ;;  %5302 = vmatpush.bf16.msra.mxu1 %v9777_v32  ;;  %v10665_v45 = vld [vmem:[#allocation7 + $0x4] sm:$0xf0]  ;;  %v9737_v32 = vor.u32 %v10683_v62, %v9736_v13  ;;  %v9808_v26 = vld [vmem:[#allocation7 + $0x120] sm:$0xf]  ;;  %v9717_v54 = vor.u32 %v10676_v42, %v9714_v55  ;;  %v9853_v13 = vor.u32 %v10710_v19, %v9850_v40  ;;  %v10682_v42 = vld [vmem:[#allocation7 + $0x94] sm:$0xf] }
 0x53c   : > { %v4653_v57 = vadd.f32 %v4652_v11, %v4640_v18  ;;  %v4665_v7 = vpop.f32.mrf.mxu2  ;;  %v4678_v36 = vpop.f32.mrf.mxu3  ;;  %v9665_v10 = vor.u32 %v10665_v45, %v9664_v46  ;;  %v10692_v18 = vld [vmem:[#allocation7 + $0xe4] sm:$0xf]  ;;  %v9778_v11 = vld [vmem:[#allocation7 + $0xe8] sm:$0xf0]  ;;  %v9809_v49 = vor.u32 %v10701_v15, %v9808_v26  ;;  %v9765_v62 = vor.u32 %v10688_v24, %v9762_v50  ;;  %v9738_v55 = vld [vmem:[#allocation7 + $0x98] sm:$0xf0] }
 0x53d   : > { %v4654_v52 = vpop.f32.mrf.mxu1  ;;  %v10708_v45 = vld [vmem:[#allocation7 + $0x164] sm:$0xf] }
 0x53e   : > { %5315 = vmatpush.bf16.msra.mxu2 %v9841_v58  ;;  %v4666_v41 = vadd.f32 %v4665_v7, %v4653_v57  ;;  %v9800_v58 = vld [vmem:[#allocation7 + $0x110] sm:$0xf]  ;;  %v9781_v57 = vor.u32 %v10692_v18, %v9778_v11  ;;  %v9770_v7 = vld [vmem:[#allocation7 + $0xd8] sm:$0xf0]  ;;  %v10704_v15 = vld [vmem:[#allocation7 + $0x144] sm:$0xf] }
 0x53f   : > { %5290 = vmatpush.bf16.msra.mxu0 %v9705_v23  ;;  %5303 = vmatpush.bf16.msra.mxu1 %v9769_v16  ;;  %v10703_v16 = vld [vmem:[#allocation7 + $0x134] sm:$0xf0]  ;;  %v9826_v18 = vld [vmem:[#allocation7 + $0x148] sm:$0xf0]  ;;  %v10700_v40 = vld [vmem:[#allocation7 + $0x124] sm:$0xf] }
 0x540   : > { %v4679_v0 = vadd.f32 %v4678_v36, %v4666_v41  ;;  %v9817_v29 = vor.u32 %v10703_v16, %v9816_v38  ;;  %v10697_v36 = vld [vmem:[#allocation7 + $0x104] sm:$0xf0]  ;;  %v10672_v41 = vld [vmem:[#allocation7 + $0x44] sm:$0xf]  ;;  %v9746_v38 = vld [vmem:[#allocation7 + $0xa8] sm:$0xf0]  ;;  %v9829_v11 = vor.u32 %v10704_v15, %v9826_v18 }
 0x541   : > { %v4641_v33 = vpop.f32.mrf.mxu0  ;;  %v9872_v15 = vld [vmem:[#allocation7 + $0x1a0] sm:$0xf]  ;;  %v10717_v18 = vld [vmem:[#allocation7 + $0x1a4] sm:$0xf0] }
 0x542   : > { %5316 = vmatpush.bf16.msra.mxu2 %v9833_v53  ;;  %v4891_v27 = vmax.f32 %v4679_v0, 0.0  ;;  %v9698_v33 = vld [vmem:[#allocation7 + $0x48] sm:$0xf0] }
 0x543   : > { %5291 = vmatpush.bf16.msra.mxu0 %v9697_v60  ;;  %5304 = vmatpush.bf16.msra.mxu1 %v9761_v21  ;;  %v9725_v60 = vor.u32 %v10678_v37, %v9722_v31  ;;  %v9789_v21 = vor.u32 %v10694_v22, %v9786_v28  ;;  %v9701_v52 = vor.u32 %v10672_v41, %v9698_v33  ;;  %v9682_v31 = vld [vmem:[#allocation7 + $0x28] sm:$0xf0]  ;;  %v10706_v22 = vld [vmem:[#allocation7 + $0x154] sm:$0xf]  ;;  %v9834_v28 = vld [vmem:[#allocation7 + $0x158] sm:$0xf0] }
 0x544   : > { %v4667_v34 = vpop.f32.mrf.mxu2  ;;  %v4680_v23 = vpop.f32.mrf.mxu3  ;;  %v13991_v44 = vpack.c.bf16 %v4891_v27, %v4891_v27  ;;  %v9837_v27 = vor.u32 %v10706_v22, %v9834_v28  ;;  %v9888_v28 = vld [vmem:[#allocation7 + $0x1c0] sm:$0xf] }
 0x545   : > { %v10668_v34 = vld [vmem:[#allocation7 + $0x24] sm:$0xf] }
 0x546   : > { %5317 = vmatpush.bf16.msra.mxu2 %v9825_v8  ;;  %v10686_v8 = vld [vmem:[#allocation7 + $0xb4] sm:$0xf]  ;;  %v10684_v23 = vld [vmem:[#allocation7 + $0xa4] sm:$0xf] }
 0x547   : > { %5292 = vmatpush.bf16.msra.mxu0 %v9689_v14  ;;  %5305 = vmatpush.bf16.msra.mxu1 %v9753_v17  ;;  %v10699_v14 = vld [vmem:[#allocation7 + $0x114] sm:$0xf0]  ;;  %v10674_v17 = vld [vmem:[#allocation7 + $0x54] sm:$0xf]  ;;  %v9749_v59 = vor.u32 %v10684_v23, %v9746_v38 }
 0x548   : > { %v9801_v20 = vor.u32 %v10699_v14, %v9800_v58  ;;  %v9709_v53 = vor.u32 %v10674_v17, %v9706_v39  ;;  %v10664_v14 = vld [vmem:[#allocation7 + $0x4] sm:$0xf]  ;;  %v9666_v17 = vld [vmem:[#allocation7 + $0x8] sm:$0xf0]  ;;  %v10702_v39 = vld [vmem:[#allocation7 + $0x134] sm:$0xf] }
 0x549   : > { %v9669_v33 = vor.u32 %v10664_v14, %v9666_v17  ;;  %v10715_v17 = vld [vmem:[#allocation7 + $0x194] sm:$0xf0] }
 0x54a   : > { %5318 = vmatpush.bf16.msra.mxu2 %v9817_v29 }
 0x54b   : > { %5293 = vmatpush.bf16.msra.mxu0 %v9681_v61  ;;  %5306 = vmatpush.bf16.msra.mxu1 %v9745_v25  ;;  %v9773_v61 = vor.u32 %v10690_v47, %v9770_v7  ;;  %v9793_v25 = vor.u32 %v10697_v36, %v9792_v12  ;;  %v9818_v47 = vld [vmem:[#allocation7 + $0x138] sm:$0xf0]  ;;  %v9730_v7 = vld [vmem:[#allocation7 + $0x88] sm:$0xf0] }
 0x54c   : > { %v9821_v36 = vor.u32 %v10702_v39, %v9818_v47  ;;  %v9856_v47 = vld [vmem:[#allocation7 + $0x180] sm:$0xf] }
 0x54e   : > { %5319 = vmatpush.bf16.msra.mxu2 %v9809_v49 }
 0x54f   : > { %5294 = vmatpush.bf16.msra.mxu0 %v9673_v51  ;;  %5307 = vmatpush.bf16.msra.mxu1 %v9737_v32  ;;  %v9754_v51 = vld [vmem:[#allocation7 + $0xb8] sm:$0xf0]  ;;  %v9842_v32 = vld [vmem:[#allocation7 + $0x168] sm:$0xf0] }
 0x550   : > { %v9845_v35 = vor.u32 %v10708_v45, %v9842_v32  ;;  %v9757_v37 = vor.u32 %v10686_v8, %v9754_v51  ;;  %v10696_v8 = vld [vmem:[#allocation7 + $0x104] sm:$0xf] }
 0x552   : > { %5320 = vmatpush.bf16.msra.mxu2 %v9801_v20  ;;  %v10680_v20 = vld [vmem:[#allocation7 + $0x84] sm:$0xf] }
 0x553   : > { %5295 = vmatpush.bf16.msra.mxu0 %v9665_v10  ;;  %5308 = vmatpush.bf16.msra.mxu1 %v9729_v63  ;;  %v9685_v10 = vor.u32 %v10668_v34, %v9682_v31  ;;  %v10666_v63 = vld [vmem:[#allocation7 + $0x14] sm:$0xf]  ;;  %v9733_v24 = vor.u32 %v10680_v20, %v9730_v7  ;;  %v9896_v34 = vld [vmem:[#allocation7 + $0x1d0] sm:$0xf]  ;;  %v10713_v20 = vld [vmem:[#allocation7 + $0x184] sm:$0xf0] }
 0x554   : > { %v9857_v7 = vor.u32 %v10713_v20, %v9856_v47 }
 0x555   : > { %v4691_v0 = vpop.f32.mrf.mxu0  ;;  %v13997_v46 = vpop.f32.mrf.mxu1 }
 0x556   : > { %5296 = vmatmul.bf16.vlgmr.msra.gmra.mxu0 %v13993_v30  ;;  %5309 = vmatmul.bf16.vlgmr.msra.gmra.mxu1 %v13991_v44 }
 0x557   : > { %5340 = vmatpush.bf16.msrb.mxu0 %v9725_v60  ;;  %5353 = vmatpush.bf16.msrb.mxu1 %v9789_v21  ;;  %v9674_v60 = vld [vmem:[#allocation7 + $0x18] sm:$0xf0] }
 0x558   : > { %5321 = vmatpush.bf16.msra.mxu2 %v9793_v25  ;;  %v9677_v49 = vor.u32 %v10666_v63, %v9674_v60  ;;  %v10727_v25 = vld [vmem:[#allocation7 + $0x1f4] sm:$0xf0] }
 0x559   : > { %v10719_v63 = vld [vmem:[#allocation7 + $0x1b4] sm:$0xf0] }
 0x55b   : > { %5341 = vmatpush.bf16.msrb.mxu0 %v9717_v54  ;;  %5354 = vmatpush.bf16.msrb.mxu1 %v9781_v57  ;;  %v14002_v54 = vld [vmem:[%s15330_s8] sm:$0xf]  ;;  %v9741_v57 = vor.u32 %v10682_v42, %v9738_v55 }
 0x55c   : > { %5366 = vmatpush.bf16.msrb.mxu2 %v9853_v13  ;;  %v4717_v16 = vpop.f32.mrf.mxu2  ;;  %v4730_v29 = vpop.f32.mrf.mxu3  ;;  %v4468_v58 = vperm.slane %v14002_v54, 2 }
 0x55d   : > { %v4693_v21 = vpop.f32.mrf.mxu0  ;;  %v4706_v26 = vpop.f32.mrf.mxu1 }
 0x55e   : > { %v4692_v41 = vadd.f32 %v4691_v0, %v4468_v58  ;;  %v9794_v0 = vld [vmem:[#allocation7 + $0x108] sm:$0xf0]  ;;  %v9873_v58 = vor.u32 %v10717_v18, %v9872_v15 }
 0x55f   : > { %5342 = vmatpush.bf16.msrb.mxu0 %v9709_v53  ;;  %5355 = vmatpush.bf16.msrb.mxu1 %v9773_v61  ;;  %v9810_v53 = vld [vmem:[#allocation7 + $0x128] sm:$0xf0]  ;;  %v9912_v61 = vld [vmem:[#allocation7 + $0x1f0] sm:$0xf]  ;;  %v9797_v45 = vor.u32 %v10696_v8, %v9794_v0 }
 0x560   : > { %5367 = vmatpush.bf16.msrb.mxu2 %v9845_v35  ;;  %v9913_v50 = vor.u32 %v10727_v25, %v9912_v61  ;;  %v9813_v13 = vor.u32 %v10700_v40, %v9810_v53  ;;  %v4705_v56 = vadd.f32 %v13997_v46, %v4692_v41  ;;  %v9904_v35 = vld [vmem:[#allocation7 + $0x1e0] sm:$0xf]  ;;  %v10723_v46 = vld [vmem:[#allocation7 + $0x1d4] sm:$0xf0]  ;;  %v10724_v40 = vld [vmem:[#allocation7 + $0x1e4] sm:$0xf] }
 0x561   : > { %v9897_v22 = vor.u32 %v10723_v46, %v9896_v34  ;;  %v9906_v53 = vld [vmem:[#allocation7 + $0x1e8] sm:$0xf0]  ;;  %v10722_v25 = vld [vmem:[#allocation7 + $0x1d4] sm:$0xf] }
 0x562   : > { %5327 = vmatpush.bf16.msra.mxu3 %v9913_v50  ;;  %v4718_v51 = vadd.f32 %v4717_v16, %v4705_v56  ;;  %v9909_v41 = vor.u32 %v10724_v40, %v9906_v53  ;;  %v9890_v56 = vld [vmem:[#allocation7 + $0x1c8] sm:$0xf0] }
 0x563   : > { %5343 = vmatpush.bf16.msrb.mxu0 %v9701_v52  ;;  %5356 = vmatpush.bf16.msrb.mxu1 %v9765_v62  ;;  %v10698_v52 = vld [vmem:[#allocation7 + $0x114] sm:$0xf]  ;;  %v9802_v62 = vld [vmem:[#allocation7 + $0x118] sm:$0xf0] }
 0x564   : > { %5368 = vmatpush.bf16.msrb.mxu2 %v9837_v27  ;;  %v4719_v12 = vpop.f32.mrf.mxu2  ;;  %v4732_v19 = vpop.f32.mrf.mxu3  ;;  %v9805_v48 = vor.u32 %v10698_v52, %v9802_v62  ;;  %v4731_v32 = vadd.f32 %v4730_v29, %v4718_v51  ;;  %v10721_v27 = vld [vmem:[#allocation7 + $0x1c4] sm:$0xf0]  ;;  %v9880_v29 = vld [vmem:[#allocation7 + $0x1b0] sm:$0xf]  ;;  %v10720_v62 = vld [vmem:[#allocation7 + $0x1c4] sm:$0xf] }
 0x565   : > { %v9881_v55 = vor.u32 %v10719_v63, %v9880_v29  ;;  %v10726_v12 = vld [vmem:[#allocation7 + $0x1f4] sm:$0xf]  ;;  %v9893_v8 = vor.u32 %v10720_v62, %v9890_v56  ;;  %v10733_v62 = vld [vmem:[%s15333_s11 + $0x28] sm:$0xff] }
 0x566   : > { %v10718_v51 = vld [vmem:[#allocation7 + $0x1b4] sm:$0xf] }
 0x567   : > { %5344 = vmatpush.bf16.msrb.mxu0 %v9693_v43  ;;  %5357 = vmatpush.bf16.msrb.mxu1 %v9757_v37  ;;  %v10725_v43 = vld [vmem:[#allocation7 + $0x1e4] sm:$0xf0] }
 0x568   : > { %5369 = vmatpush.bf16.msrb.mxu2 %v9829_v11  ;;  %v9905_v37 = vor.u32 %v10725_v43, %v9904_v35  ;;  %v10716_v43 = vld [vmem:[#allocation7 + $0x1a4] sm:$0xf] }
 0x56a   : > { %5328 = vmatpush.bf16.msra.mxu3 %v9905_v37  ;;  %v9874_v37 = vld [vmem:[#allocation7 + $0x1a8] sm:$0xf0] }
 0x56b   : > { %5345 = vmatpush.bf16.msrb.mxu0 %v9685_v10  ;;  %5358 = vmatpush.bf16.msrb.mxu1 %v9749_v59 }
 0x56c   : > { %5370 = vmatpush.bf16.msrb.mxu2 %v9821_v36  ;;  %v9914_v36 = vld [vmem:[#allocation7 + $0x1f8] sm:$0xf0] }
 0x56d   : > { %v9917_v19 = vor.u32 %v10726_v12, %v9914_v36 }
 0x56e   : > { %5329 = vmatpush.bf16.msra.mxu3 %v9897_v22 }
 0x56f   : > { %5346 = vmatpush.bf16.msrb.mxu0 %v9677_v49  ;;  %5359 = vmatpush.bf16.msrb.mxu1 %v9741_v57  ;;  %v9864_v57 = vld [vmem:[#allocation7 + $0x190] sm:$0xf] }
 0x570   : > { %5371 = vmatpush.bf16.msrb.mxu2 %v9813_v13  ;;  %v9865_v39 = vor.u32 %v10715_v17, %v9864_v57  ;;  %v4962_v57 = vld [vmem:[%s15332_s10] sm:$0x3] }
 0x571   : > { %v5284_v17 = vperm.slane %v4962_v57, 0 }
 0x573   : > { %5347 = vmatpush.bf16.msrb.mxu0 %v9669_v33  ;;  %5360 = vmatpush.bf16.msrb.mxu1 %v9733_v24  ;;  %v9898_v24 = vld [vmem:[#allocation7 + $0x1d8] sm:$0xf0] }
 0x574   : > { %5372 = vmatpush.bf16.msrb.mxu2 %v9805_v48  ;;  %v9901_v50 = vor.u32 %v10722_v25, %v9898_v24  ;;  %v10735_v24 = vld [vmem:[%s15333_s11 + $0x38] sm:$0xff] }
 0x575   : > { %v4743_v31 = vpop.f32.mrf.mxu0  ;;  %v4756_v38 = vpop.f32.mrf.mxu1 }
 0x576   : > { %5348 = vmatmul.bf16.vlgmr.msrb.gmra.mxu0 %v13993_v30  ;;  %5361 = vmatmul.bf16.vlgmr.msrb.gmra.mxu1 %v13991_v44  ;;  %v4744_v23 = vadd.f32 %v4743_v31, %v4731_v32  ;;  %v9889_v44 = vor.u32 %v10721_v27, %v9888_v28  ;;  %v4469_v32 = vperm.slane %v14002_v54, 3  ;;  %v9877_v31 = vor.u32 %v10716_v43, %v9874_v37  ;;  %v10712_v28 = vld [vmem:[#allocation7 + $0x184] sm:$0xf]  ;;  %v9858_v27 = vld [vmem:[#allocation7 + $0x188] sm:$0xf0]  ;;  %v10728_v37 = vld [vmem:[%s15333_s11] sm:$0xff] }
 0x577   : > { %5525 = vmatpush.bf16.msra.mxu0 %v10735_v24  ;;  %v10741_v43 = vld [vmem:[%s15333_s11 + $0x68] sm:$0xff] }
 0x578   : > { %5373 = vmatpush.bf16.msrb.mxu2 %v9797_v45  ;;  %v4757_v30 = vadd.f32 %v4756_v38, %v4744_v23  ;;  %5330 = vmatpush.bf16.msra.mxu3 %v9889_v44  ;;  %v9882_v45 = vld [vmem:[#allocation7 + $0x1b8] sm:$0xf0]  ;;  %v10714_v23 = vld [vmem:[#allocation7 + $0x194] sm:$0xf]  ;;  %v9861_v44 = vor.u32 %v10712_v28, %v9858_v27 }
 0x579   : > { %v9885_v35 = vor.u32 %v10718_v51, %v9882_v45  ;;  %v9866_v38 = vld [vmem:[#allocation7 + $0x198] sm:$0xf0]  ;;  %v10730_v51 = vld [vmem:[%s15333_s11 + $0x10] sm:$0xff] }
 0x57c   : > { %v4769_v16 = vpop.f32.mrf.mxu2  ;;  %v4782_v59 = vpop.f32.mrf.mxu3  ;;  %5331 = vmatpush.bf16.msra.mxu3 %v9881_v55 }
 0x57d   : > { %v4770_v10 = vadd.f32 %v4769_v16, %v4757_v30  ;;  %v4745_v42 = vpop.f32.mrf.mxu0  ;;  %v4758_v21 = vpop.f32.mrf.mxu1  ;;  %v9869_v30 = vor.u32 %v10714_v23, %v9866_v38  ;;  %v10737_v23 = vld [vmem:[%s15333_s11 + $0x48] sm:$0xff]  ;;  %v10736_v38 = vld [vmem:[%s15333_s11 + $0x40] sm:$0xff] }
 0x57f   : > { %v4783_v60 = vadd.f32 %v4782_v59, %v4770_v10 }
 0x580   : > { %5332 = vmatpush.bf16.msra.mxu3 %v9873_v58 }
 0x581   : > { %v4892_v26 = vmax.f32 %v4783_v60, 0.0 }
 0x583   : > { %v4896_v11 = vpack.c.bf16 %v4892_v26, %v4892_v26 }
 0x584   : > { %v4771_v49 = vpop.f32.mrf.mxu2  ;;  %v4784_v14 = vpop.f32.mrf.mxu3  ;;  %5333 = vmatpush.bf16.msra.mxu3 %v9865_v39 }
 0x585   : > { %5322 = vmatmul.bf16.vlgmr.msra.gmra.mxu2 %v4896_v11 }
 0x588   : > { %5334 = vmatpush.bf16.msra.mxu3 %v9857_v7 }
 0x58c   : > { %5379 = vmatpush.bf16.msrb.mxu3 %v9917_v19  ;;  %v5285_v19 = vperm.slane %v4962_v57, 1 }
 0x590   : > { %5380 = vmatpush.bf16.msrb.mxu3 %v9909_v41 }
 0x594   : > { %5381 = vmatpush.bf16.msrb.mxu3 %v9901_v50  ;;  %v10743_v50 = vld [vmem:[%s15333_s11 + $0x78] sm:$0xff] }
 0x595   : > { %5374 = vmatmul.bf16.vlgmr.msrb.gmra.mxu2 %v4896_v11  ;;  %v4795_v61 = vpop.f32.mrf.mxu0  ;;  %v4808_v33 = vpop.f32.mrf.mxu1  ;;  %5538 = vmatpush.bf16.msra.mxu1 %v10743_v50 }
 0x596   : > { %v4796_v22 = vadd.f32 %v4795_v61, %v4469_v32 }
 0x598   : > { %5382 = vmatpush.bf16.msrb.mxu3 %v9893_v8  ;;  %v4809_v16 = vadd.f32 %v4808_v33, %v4796_v22  ;;  %v10731_v8 = vld [vmem:[%s15333_s11 + $0x18] sm:$0xff] }
 0x59c   : > { %v4821_v13 = vpop.f32.mrf.mxu2  ;;  %v4834_v52 = vpop.f32.mrf.mxu3  ;;  %5383 = vmatpush.bf16.msrb.mxu3 %v9885_v35  ;;  %v10729_v35 = vld [vmem:[%s15333_s11 + $0x8] sm:$0xff] }
 0x59d   : > { %v4797_v48 = vpop.f32.mrf.mxu0  ;;  %v4810_v0 = vpop.f32.mrf.mxu1  ;;  %v4822_v10 = vadd.f32 %v4821_v13, %v4809_v16  ;;  %v10734_v13 = vld [vmem:[%s15333_s11 + $0x30] sm:$0xff] }
 0x59e   : > { %5526 = vmatpush.bf16.msra.mxu0 %v10734_v13  ;;  %v10732_v48 = vld [vmem:[%s15333_s11 + $0x20] sm:$0xff] }
 0x59f   : > { %v4835_v54 = vadd.f32 %v4834_v52, %v4822_v10  ;;  %v10742_v52 = vld [vmem:[%s15333_s11 + $0x70] sm:$0xff] }
 0x5a0   : > { %5384 = vmatpush.bf16.msrb.mxu3 %v9877_v31  ;;  %5539 = vmatpush.bf16.msra.mxu1 %v10742_v52  ;;  %v10738_v31 = vld [vmem:[%s15333_s11 + $0x50] sm:$0xff] }
 0x5a2   : > { %5527 = vmatpush.bf16.msra.mxu0 %v10733_v62 }
 0x5a4   : > { %v4823_v34 = vpop.f32.mrf.mxu2  ;;  %v4836_v46 = vpop.f32.mrf.mxu3  ;;  %5385 = vmatpush.bf16.msrb.mxu3 %v9869_v30  ;;  %5540 = vmatpush.bf16.msra.mxu1 %v10741_v43 }
 0x5a5   : > { %v10740_v34 = vld [vmem:[%s15333_s11 + $0x60] sm:$0xff]  ;;  %v10739_v46 = vld [vmem:[%s15333_s11 + $0x58] sm:$0xff] }
 0x5a6   : > { %5528 = vmatpush.bf16.msra.mxu0 %v10732_v48 }
 0x5a8   : > { %5386 = vmatpush.bf16.msrb.mxu3 %v9861_v44  ;;  %5541 = vmatpush.bf16.msra.mxu1 %v10740_v34 }
 0x5aa   : > { %5529 = vmatpush.bf16.msra.mxu0 %v10731_v8 }
 0x5ac   : > { %5542 = vmatpush.bf16.msra.mxu1 %v10739_v46 }
 0x5ae   : > { %5530 = vmatpush.bf16.msra.mxu0 %v10730_v51 }
 0x5b0   : > { %5543 = vmatpush.bf16.msra.mxu1 %v10738_v31 }
 0x5b2   : > { %5531 = vmatpush.bf16.msra.mxu0 %v10729_v35 }
 0x5b4   : > { %5544 = vmatpush.bf16.msra.mxu1 %v10737_v23 }
 0x5b5   : > { %v4847_v59 = vpop.f32.mrf.mxu0  ;;  %v4860_v29 = vpop.f32.mrf.mxu1 }
 0x5b6   : > { %v4848_v63 = vadd.f32 %v4847_v59, %v4835_v54  ;;  %5532 = vmatpush.bf16.msra.mxu0 %v10728_v37 }
 0x5b8   : > { %v4861_v60 = vadd.f32 %v4860_v29, %v4848_v63  ;;  %5545 = vmatpush.bf16.msra.mxu1 %v10736_v38 }
 0x5bc   : > { %v4873_v42 = vpop.f32.mrf.mxu2  ;;  %v4886_v55 = vpop.f32.mrf.mxu3 }
 0x5bd   : > { %v4874_v21 = vadd.f32 %v4873_v42, %v4861_v60  ;;  %v4849_v26 = vpop.f32.mrf.mxu0  ;;  %v4862_v15 = vpop.f32.mrf.mxu1 }
 0x5bf   : > { %v4887_v18 = vadd.f32 %v4886_v55, %v4874_v21  ;;  %v5428_v55 = vld [vmem:[%s15334_s12] sm:$0x1] }
 0x5c1   : > { %v4893_v11 = vmax.f32 %v4887_v18, 0.0 }
 0x5c3   : > { %v4897_v49 = vpack.c.bf16 %v4893_v11, %v4893_v11 }
 0x5c4   : > { %v4875_v58 = vpop.f32.mrf.mxu2  ;;  %v4888_v14 = vpop.f32.mrf.mxu3 }
 0x5c5   : > { %5335 = vmatmul.bf16.vlgmr.msra.gmra.mxu3 %v4897_v49 }
 0x5d3   : > { %v5297_v39 = vpop.f32.mrf.mxu0  ;;  %v5310_v20 = vpop.f32.mrf.mxu1 }
 0x5d4   : > { %v5298_v47 = vadd.f32 %v5297_v39, %v5284_v17 }
 0x5d5   : > { %5387 = vmatmul.bf16.vlgmr.msrb.gmra.mxu3 %v4897_v49 }
 0x5d6   : > { %v5311_v7 = vadd.f32 %v5310_v20, %v5298_v47 }
 0x5db   : > { %v5299_v12 = vpop.f32.mrf.mxu0  ;;  %v5312_v36 = vpop.f32.mrf.mxu1 }
 0x5f3   : > { %v5349_v40 = vpop.f32.mrf.mxu0  ;;  %v5362_v61 = vpop.f32.mrf.mxu1 }
 0x5f4   : > { %v5350_v53 = vadd.f32 %v5349_v40, %v5285_v19 }
 0x5f6   : > { %v5363_v41 = vadd.f32 %v5362_v61, %v5350_v53 }
 0x5fb   : > { %v5351_v33 = vpop.f32.mrf.mxu0  ;;  %v5364_v25 = vpop.f32.mrf.mxu1 }
 0x608   : > { %v5323_v56 = vpop.f32.mrf.mxu2 }
 0x609   : > { %v5324_v22 = vadd.f32 %v5323_v56, %v5311_v7 }
 0x610   : > { %v5325_v0 = vpop.f32.mrf.mxu2 }
 0x618   : > { %v5375_v45 = vpop.f32.mrf.mxu2 }
 0x619   : > { %v5376_v10 = vadd.f32 %v5375_v45, %v5363_v41 }
 0x620   : > { %v5377_v32 = vpop.f32.mrf.mxu2 }
 0x648   : > { %v5336_v30 = vpop.f32.mrf.mxu3 }
 0x649   : > { %v5337_v28 = vadd.f32 %v5336_v30, %v5324_v22 }
 0x64b   : > { %v5392_v27 = vmax.f32 %v5337_v28, 0.0 }
 0x64d   : > { %v5394_v16 = vpack.c.bf16 %v5392_v27, %v5392_v27 }
 0x64f   : > { %5533 = vmatmul.bf16.vlgmr.msra.gmra.mxu0 %v5394_v16 }
 0x650   : > { %v5338_v44 = vpop.f32.mrf.mxu3 }
 0x658   : > { %v5388_v54 = vpop.f32.mrf.mxu3 }
 0x659   : > { %v5389_v59 = vadd.f32 %v5388_v54, %v5376_v10 }
 0x65b   : > { %v5393_v29 = vmax.f32 %v5389_v59, 0.0 }
 0x65d   : > { %v5395_v63 = vpack.c.bf16 %v5393_v29, %v5393_v29 }
 0x65f   : > { %5546 = vmatmul.bf16.vlgmr.msra.gmra.mxu1 %v5395_v63 }
 0x660   : > { %v5390_v60 = vpop.f32.mrf.mxu3 }
 0x6cc   : > { %v5534_v42 = vpop.f32.mrf.mxu0 }
 0x6cd   : > { %v5535_v26 = vadd.f32 %v5534_v42, %v5428_v55 }
 0x6d4   : > { %v5536_v21 = vpop.f32.mrf.mxu0 }
 0x6dc   : > { %v5547_v15 = vpop.f32.mrf.mxu1 }
 0x6dd   : > { %v5548_v18 = vadd.f32 %v5547_v15, %v5535_v26 }
 0x6df   : > { %5551 = vst [vmem:[%s15412_s29] sm:$0x1] %v5548_v18 }
 0x6e0   : > { %5552 = vst [vmem:[#allocation3] sm:$0x1] %v5548_v18 }
 0x6e4   : > { %v5549_v11 = vpop.f32.mrf.mxu1 }
 0x6e5 PF: > { %p9982_p9 = scmp.ne.s32.totalorder %s11293_s2, 1 }
 0x6e6   : > { %s15482_s15 = sld [smem:[#allocation63_spill]] (!%p9982_p9)  ;;  %s11327_s23 = smov (!%p9982_p9), 64  }
 0x6e7   : > { %5556 = sbr.rel (%p9982_p9) target bundleno = 3088 (0xc10), region = 124  ;;  %s15502_s27 = sld [smem:[#allocation65_spill]] (!%p9982_p9) }
 0x6e8   : > { %s15506_s16 = sld [smem:[#allocation64_spill]] (!%p9982_p9)  ;;  %p10335_p10 = scmp.ne.s32.totalorder (!%p9982_p9), %s11289_s24, 3 }
 0x6e9   : > { %s15511_s2 = sld [smem:[#allocation66_spill]] (!%p9982_p9) }
 0x6ea   : > { %s15513_s0 = sld [smem:[#allocation67_spill]] (!%p9982_p9) }
 0x6ec   : > { %v10041_v49 = vld [vmem:[%s15482_s15 + $0x70] sm:$0xf]  ;;  %v10759_v58 = vld [vmem:[%s15482_s15 + $0x74] sm:$0xf0]  ;;  %v11324_v14 = vmov 1   ;;  %v11325_v20 = vmov 0  }
 0x6ed   : > { %10999 = vset.pattern.permute.xlu2 %v11324_v14  ;;  %10998 = vset.pattern.permute.xlu1 %v11324_v14  ;;  %v10042_v57 = vor.u32 %v10759_v58, %v10041_v49  ;;  %v10758_v17 = vld [vmem:[%s15482_s15 + $0x74] sm:$0xf]  ;;  %v10043_v39 = vld [vmem:[%s15482_s15 + $0x78] sm:$0xf0]  ;;  %v10033_v47 = vld [vmem:[%s15482_s15 + $0x60] sm:$0xf]  ;;  %s15503_s30 = smov %s15502_s27 }
 0x6ee   : > { %11000 = vset.pattern.permute.xlu0 %v11325_v20  ;;  %5891 = vperm.xlu2 %10999, %v11586_v5   ;;  %v10046_v7 = vor.u32 %v10758_v17, %v10043_v39  ;;  %v10757_v12 = vld [vmem:[%s15482_s15 + $0x64] sm:$0xf0]  ;;  %v10756_v36 = vld [vmem:[%s15482_s15 + $0x64] sm:$0xf]  ;;  %v10035_v19 = vld [vmem:[%s15482_s15 + $0x68] sm:$0xf0] }
 0x6ef   : > { %5883 = vperm.xlu1 %10998, %v11580_v3   ;;  %5683 = vperm.xlu0 %11000, %v11574_v1   ;;  %v10034_v40 = vor.u32 %v10757_v12, %v10033_v47  ;;  %v10038_v53 = vor.u32 %v10756_v36, %v10035_v19  ;;  %v10025_v61 = vld [vmem:[%s15482_s15 + $0x50] sm:$0xf]  ;;  %v10755_v41 = vld [vmem:[%s15482_s15 + $0x54] sm:$0xf0]  ;;  %v10754_v33 = vld [vmem:[%s15482_s15 + $0x54] sm:$0xf]  ;;  %s15512_s4 = smov %s15511_s2 }
 0x6f0   : > { %5655 = vmatpush.bf16.msra.mxu0 %v10042_v57  ;;  %5668 = vmatpush.bf16.msra.mxu1 %v10046_v7  ;;  %v10027_v25 = vld [vmem:[%s15482_s15 + $0x58] sm:$0xf0]  ;;  %v10026_v24 = vor.u32 %v10755_v41, %v10025_v61  ;;  %v10017_v13 = vld [vmem:[%s15482_s15 + $0x40] sm:$0xf]  ;;  %v10753_v52 = vld [vmem:[%s15482_s15 + $0x44] sm:$0xf0] }
 0x6f1   : > { %v10030_v50 = vor.u32 %v10754_v33, %v10027_v25  ;;  %v10752_v62 = vld [vmem:[%s15482_s15 + $0x44] sm:$0xf]  ;;  %v10019_v56 = vld [vmem:[%s15482_s15 + $0x48] sm:$0xf0]  ;;  %v10018_v48 = vor.u32 %v10753_v52, %v10017_v13  ;;  %v10009_v0 = vld [vmem:[%s15482_s15 + $0x30] sm:$0xf] }
 0x6f2   : > { %v10022_v8 = vor.u32 %v10752_v62, %v10019_v56  ;;  %v10751_v51 = vld [vmem:[%s15482_s15 + $0x34] sm:$0xf0]  ;;  %v10750_v45 = vld [vmem:[%s15482_s15 + $0x34] sm:$0xf]  ;;  %v10011_v32 = vld [vmem:[%s15482_s15 + $0x38] sm:$0xf0] }
 0x6f3   : > { %v10010_v35 = vor.u32 %v10751_v51, %v10009_v0  ;;  %v10014_v43 = vor.u32 %v10750_v45, %v10011_v32  ;;  %v10001_v37 = vld [vmem:[%s15482_s15 + $0x20] sm:$0xf]  ;;  %v11326_v34 = vmov 2   ;;  %v10749_v46 = vld [vmem:[%s15482_s15 + $0x24] sm:$0xf0]  ;;  %v15487_v11 = vld [vmem:[#allocation32_spill] sm:$0xff] }
 0x6f4   : > { %5656 = vmatpush.bf16.msra.mxu0 %v10034_v40  ;;  %5669 = vmatpush.bf16.msra.mxu1 %v10038_v53  ;;  %v10748_v31 = vld [vmem:[%s15482_s15 + $0x24] sm:$0xf]  ;;  %v10003_v23 = vld [vmem:[%s15482_s15 + $0x28] sm:$0xf0]  ;;  %v10002_v38 = vor.u32 %v10749_v46, %v10001_v37  ;;  %v9993_v30 = vld [vmem:[%s15482_s15 + $0x10] sm:$0xf] }
 0x6f5   : > { %v10006_v22 = vor.u32 %v10748_v31, %v10003_v23  ;;  %v10747_v28 = vld [vmem:[%s15482_s15 + $0x14] sm:$0xf0]  ;;  %v10746_v27 = vld [vmem:[%s15482_s15 + $0x14] sm:$0xf]  ;;  %v9995_v16 = vld [vmem:[%s15482_s15 + $0x18] sm:$0xf0] }
 0x6f6   : > { %5895 = vperm.xlu2 %10999, %v11589_v6   ;;  %v9994_v44 = vor.u32 %v10747_v28, %v9993_v30  ;;  %v9998_v10 = vor.u32 %v10746_v27, %v9995_v16  ;;  %v9985_v54 = vld [vmem:[%s15482_s15] sm:$0xf]  ;;  %v10745_v59 = vld [vmem:[%s15482_s15 + $0x4] sm:$0xf0]  ;;  %v10744_v29 = vld [vmem:[%s15482_s15 + $0x4] sm:$0xf] }
 0x6f7   : > { %5887 = vperm.xlu1 %10998, %v11583_v4   ;;  %5703 = vperm.xlu0 %11000, %v11586_v5   ;;  %v9987_v63 = vld [vmem:[%s15482_s15 + $0x8] sm:$0xf0]  ;;  %v9986_v60 = vor.u32 %v10745_v59, %v9985_v54  ;;  %v5557_v42 = vld [vmem:[#allocation3] sm:$0x1]  ;;  %v15484_v26 = vld [vmem:[#allocation29_spill] sm:$0xff]  ;;  %vm6507_vm9 = vcmask 523264  }
 0x6f8   : > { %5657 = vmatpush.bf16.msra.mxu0 %v10026_v24  ;;  %5670 = vmatpush.bf16.msra.mxu1 %v10030_v50  ;;  %v15483_v21 = vld [vmem:[#allocation30_spill] sm:$0xff]  ;;  %v9990_v55 = vor.u32 %v10744_v29, %v9987_v63  ;;  %v5558_v15 = vpack.c.bf16 %v5557_v42, %v5557_v42  ;;  %v15486_v18 = vld [vmem:[#allocation31_spill] sm:$0xff]  ;;  %v15491_v57 = vld [vmem:[#allocation36_spill] sm:$0xff]  ;;  %vm8121_vm10 = vcmask 1042434   ;;  %vm8119_vm11 = vcmask 1040384  }
 0x6f9   : > { %v15489_v49 = vld [vmem:[#allocation34_spill] sm:$0xff]  ;;  %v15490_v58 = vld [vmem:[#allocation35_spill] sm:$0xff]  ;;  %v15492_v7 = vld [vmem:[#allocation37_spill] sm:$0xff]  ;;  %vm8123_vm12 = vcmask 1041408   ;;  %vm8127_vm13 = vcmask 1046534   ;;  %vm8125_vm14 = vcmask 1044484  }
 0x6fa   : > { %v15493_v12 = vld [vmem:[#allocation43_spill] sm:$0xff]  ;;  %v15497_v29 = vld [vmem:[#allocation46_spill] sm:$0xff]  ;;  %vm8129_vm15 = vcmask 1045508   ;;  %vm8131_vm0 = vcmask 1043456  }
 0x6fb   : > { %v15495_v50 = vld [vmem:[#allocation39_spill] sm:$0xff] }
 0x6fc   : > { %5658 = vmatpush.bf16.msra.mxu0 %v10018_v48  ;;  %5671 = vmatpush.bf16.msra.mxu1 %v10022_v8 }
 0x6fe   : > { %11002 = vset.pattern.permute.xlu2 %v11326_v34 }
 0x6ff   : > { %11001 = vset.pattern.permute.xlu1 %v11325_v20  ;;  %5723 = vperm.xlu0 %11000, %v11598_v9  }
 0x700   : > { %6195 = vperm.xlu2 %11002, %v11574_v1   ;;  %5688 = vperm.xlu1 %11001, %v11577_v2  }
 0x701   : > { %5659 = vmatpush.bf16.msra.mxu0 %v10010_v35  ;;  %5672 = vmatpush.bf16.msra.mxu1 %v10014_v43 }
 0x705   : > { %5660 = vmatpush.bf16.msra.mxu0 %v10002_v38  ;;  %5673 = vmatpush.bf16.msra.mxu1 %v10006_v22 }
 0x707   : > { %11019 = vset.pattern.permute.xlu0 %v11324_v14 }
 0x708   : > { %11004 = vset.pattern.permute.xlu2 %v11324_v14  ;;  %11003 = vset.pattern.permute.xlu1 %v11324_v14 }
 0x709   : > { %5875 = vperm.xlu0 %11019, %v11574_v1   ;;  %5661 = vmatpush.bf16.msra.mxu0 %v9994_v44  ;;  %v15485_v1 = vld [vmem:[#allocation42_spill] sm:$0xff]  ;;  %v15496_v44 = vld [vmem:[#allocation44_spill] sm:$0xff] }
 0x70a   : > { %5674 = vmatpush.bf16.msra.mxu1 %v9998_v10  ;;  %5903 = vperm.xlu2 %11004, %v15483_v21  }
 0x70b   : > { %5899 = vperm.xlu1 %11003, %v15484_v26  }
 0x70d   : > { %5662 = vmatpush.bf16.msra.mxu0 %v9986_v60 }
 0x70e   : > { %5675 = vmatpush.bf16.msra.mxu1 %v9990_v55 }
 0x710   : > { %5663 = vmatmul.bf16.vlgmr.msra.gmra.mxu0 %v5558_v15 }
 0x711   : > { %5676 = vmatmul.bf16.vlgmr.msra.gmra.mxu1 %v5558_v15  ;;  %5879 = vperm.xlu0 %11019, %v11577_v2  }
 0x712   : > { %11006 = vset.pattern.permute.xlu2 %v11325_v20 }
 0x713   : > { %11005 = vset.pattern.permute.xlu1 %v11325_v20  ;;  %5698 = vperm.xlu2 %11006, %v11583_v4  }
 0x714   : > { %5693 = vperm.xlu1 %11005, %v11580_v3  }
 0x719   : > { %5955 = vperm.xlu0 %11019, %v15485_v1  }
 0x71b   : > { %11007 = vset.pattern.permute.xlu2 %v11326_v34 }
 0x71c   : > { %11008 = vset.pattern.permute.xlu1 %v11324_v14  ;;  %6203 = vperm.xlu2 %11007, %v11580_v3   ;;  %v15488_v3 = vld [vmem:[#allocation33_spill] sm:$0xff] }
 0x71d   : > { %5907 = vperm.xlu1 %11008, %v11598_v9  }
 0x724   : > { %11009 = vset.pattern.permute.xlu2 %v11324_v14 }
 0x725   : > { %11010 = vset.pattern.permute.xlu1 %v11325_v20  ;;  %5911 = vperm.xlu2 %11009, %v15486_v18  }
 0x726   : > { %5708 = vperm.xlu1 %11010, %v11589_v6  }
 0x72d   : > { %11011 = vset.pattern.permute.xlu2 %v11326_v34 }
 0x72e   : > { %11012 = vset.pattern.permute.xlu1 %v11324_v14  ;;  %6211 = vperm.xlu2 %11011, %v11586_v5  }
 0x72f   : > { %5915 = vperm.xlu1 %11012, %v15487_v11  }
 0x736   : > { %11013 = vset.pattern.permute.xlu2 %v11324_v14 }
 0x737   : > { %11014 = vset.pattern.permute.xlu1 %v11325_v20  ;;  %5919 = vperm.xlu2 %11013, %v15488_v3  }
 0x738   : > { %5713 = vperm.xlu1 %11014, %v15484_v26  }
 0x73f   : > { %11015 = vset.pattern.permute.xlu2 %v11325_v20 }
 0x740   : > { %11017 = vset.pattern.permute.xlu1 %v11324_v14  ;;  %5718 = vperm.xlu2 %11015, %v15483_v21  }
 0x741   : > { %5923 = vperm.xlu1 %11017, %v15489_v49  }
 0x748   : > { %11016 = vset.pattern.permute.xlu2 %v11326_v34  ;;  %v5892_v5 = vpop.permute.xlu2 %5891 }
 0x749   : > { %11020 = vset.pattern.permute.xlu1 %v11325_v20  ;;  %6219 = vperm.xlu2 %11016, %v15484_v26  }
 0x74a   : > { %5728 = vperm.xlu1 %11020, %v15486_v18  }
 0x750   : > { %v5896_v17 = vpop.permute.xlu2 %5895 }
 0x751   : > { %11018 = vset.pattern.permute.xlu2 %v11324_v14 }
 0x752   : > { %11022 = vset.pattern.permute.xlu1 %v11324_v14  ;;  %5927 = vperm.xlu2 %11018, %v15490_v58  }
 0x753   : > { %5931 = vperm.xlu1 %11022, %v15491_v57  }
 0x75a   : > { %11021 = vset.pattern.permute.xlu2 %v11326_v34  ;;  %v14220_v39 = vpop.permute.xlu2 %6195 }
 0x75b   : > { %11024 = vset.pattern.permute.xlu1 %v11325_v20  ;;  %6227 = vperm.xlu2 %11021, %v11598_v9   ;;  %v15494_v9 = vld [vmem:[#allocation38_spill] sm:$0xff] }
 0x75c   : > { %5733 = vperm.xlu1 %11024, %v15487_v11  }
 0x761   : > { %v5884_v47 = vpop.permute.xlu1 %5883  ;;  %v14226_v36 = vpop.permute.xlu0 %5683 }
 0x763   : > { %11023 = vset.pattern.permute.xlu2 %v11324_v14 }
 0x764   : > { %11026 = vset.pattern.permute.xlu1 %v11324_v14  ;;  %5935 = vperm.xlu2 %11023, %v15492_v7   ;;  %v5904_v40 = vpop.permute.xlu2 %5903 }
 0x765   : > { %5959 = vperm.xlu1 %11026, %v15493_v12  }
 0x769   : > { %v5888_v19 = vpop.permute.xlu1 %5887  ;;  %v14231_v53 = vpop.permute.xlu0 %5703 }
 0x76c   : > { %11025 = vset.pattern.permute.xlu2 %v11325_v20 }
 0x76d   : > { %5939 = vperm.xlu1 %11026, %v15494_v9   ;;  %5738 = vperm.xlu2 %11025, %v15488_v3   ;;  %v14235_v41 = vpop.permute.xlu2 %5698 }
 0x771   : > { %v14240_v33 = vpop.permute.xlu0 %5723 }
 0x772   : > { %v14233_v61 = vpop.permute.xlu1 %5688 }
 0x775   : > { %11027 = vset.pattern.permute.xlu2 %v11326_v34  ;;  %11029 = vset.pattern.permute.xlu1 %v11325_v20 }
 0x776   : > { %6235 = vperm.xlu2 %11027, %v15487_v11   ;;  %v14243_v24 = vpop.permute.xlu2 %6203 }
 0x77b   : > { %v5876_v13 = vpop.permute.xlu0 %5875 }
 0x77d   : > { %v5900_v25 = vpop.permute.xlu1 %5899 }
 0x77e   : > { %11028 = vset.pattern.permute.xlu2 %v11324_v14 }
 0x77f   : > { %5943 = vperm.xlu2 %11028, %v15495_v50   ;;  %v5912_v62 = vpop.permute.xlu2 %5911 }
 0x783   : > { %v5880_v0 = vpop.permute.xlu0 %5879 }
 0x786   : > { %v14246_v52 = vpop.permute.xlu1 %5693 }
 0x787   : > { %11030 = vset.pattern.permute.xlu2 %v11325_v20 }
 0x788   : > { %v14256_v43 = vpop.permute.xlu2 %6211 }
 0x78d   : > { %v5664_v56 = vpop.f32.mrf.mxu0 }
 0x78e   : > { %v14249_v48 = vperm.slane %v5664_v56, 0  ;;  %v14251_v8 = vpop.f32.mrf.mxu1  ;;  %v15501_v56 = vld [vmem:[#allocation47_spill] sm:$0xff] }
 0x78f   : > { %v5908_v51 = vpop.permute.xlu1 %5907 }
 0x790   : > { %v6002_v45 = vmul.f32 %v5876_v13, %v14249_v48  ;;  %v6003_v32 = vmul.f32 %v5880_v0, %v14249_v48  ;;  %v6004_v35 = vmul.f32 %v5884_v47, %v14249_v48  ;;  %v6005_v31 = vmul.f32 %v5888_v19, %v14249_v48  ;;  %v15499_v47 = vld [vmem:[#allocation41_spill] sm:$0xff] }
 0x791   : > { %v6008_v23 = vmul.f32 %v5900_v25, %v14249_v48  ;;  %v6006_v22 = vmul.f32 %v5892_v5, %v14249_v48  ;;  %v5920_v30 = vpop.permute.xlu2 %5919  ;;  %v6007_v28 = vmul.f32 %v5896_v17, %v14249_v48  ;;  %v6010_v27 = vmul.f32 %v5908_v51, %v14249_v48  ;;  %v15498_v17 = vld [vmem:[#allocation45_spill] sm:$0xff] }
 0x792   : > { %6068 = vrot.lane.b32.xlu1 %v6003_v32, %s11327_s23  ;;  %6070 = vrot.lane.b32.xlu0 %v6004_v35, %s11327_s23  ;;  %v6009_v54 = vmul.f32 %v5904_v40, %v14249_v48  ;;  %v6011_v42 = vmul.f32 %v5912_v62, %v14249_v48  ;;  %v6013_v26 = vmul.f32 %v5920_v30, %v14249_v48  ;;  %v15500_v40 = vld [vmem:[#allocation40_spill] sm:$0xff]  ;;  %v14325_v62 = vperm.slane %v14251_v8, 0 }
 0x793   : > { %6066 = vrot.lane.b32.xlu2 %v6002_v45, %s11327_s23 }
 0x794   : > { %v6323_v0 = vmul.f32 %v14325_v62, %v14220_v39  ;;  %v6327_v39 = vmul.f32 %v14325_v62, %v14256_v43  ;;  %v10763_v43 = vld [vmem:[%s15502_s27 + $0x18] sm:$0xff] }
 0x795   : > { %v5666_v37 = vpop.f32.mrf.mxu0  ;;  %6560 = vmatpush.bf16.msrb.mxu0 %v10763_v43  ;;  %10841 = vmatpush.bf16.msrb.mxu1 %v10763_v43 }
 0x796   : > { %v5679_v46 = vpop.f32.mrf.mxu1  ;;  %10842 = vmatpush.bf16.msra.mxu2 %v10763_v43  ;;  %10843 = vmatpush.bf16.msra.mxu3 %v10763_v43 }
 0x798   : > { %v14263_v38 = vpop.permute.xlu1 %5708 }
 0x79a   : > { %6072 = vrot.lane.b32.xlu1 %v6005_v31, %s11327_s23  ;;  %6078 = vrot.lane.b32.xlu0 %v6008_v23, %s11327_s23  ;;  %v14274_v10 = vpop.permute.xlu2 %5718  ;;  %v5850_v31 = vmul.f32 %v14249_v48, %v14240_v33 }
 0x79b   : > { %6074 = vrot.lane.b32.xlu2 %v6006_v22, %s11327_s23 }
 0x7a1   : > { %v5916_v16 = vpop.permute.xlu1 %5915 }
 0x7a2   : > { %6076 = vrot.lane.b32.xlu1 %v6007_v28, %s11327_s23  ;;  %5963 = vperm.xlu0 %11019, %v15496_v44   ;;  %v6012_v59 = vmul.f32 %v5916_v16, %v14249_v48 }
 0x7a3   : > { %6082 = vrot.lane.b32.xlu2 %v6010_v27, %s11327_s23  ;;  %v14283_v60 = vpop.permute.xlu2 %6219 }
 0x7aa   : > { %6080 = vrot.lane.b32.xlu1 %v6009_v54, %s11327_s23  ;;  %5971 = vperm.xlu0 %11019, %v15497_v29   ;;  %v14281_v63 = vpop.permute.xlu1 %5713 }
 0x7ab   : > { %6086 = vrot.lane.b32.xlu2 %v6012_v59, %s11327_s23  ;;  %v10762_v59 = vld [vmem:[%s15503_s30 + $0x10] sm:$0xff] }
 0x7ac   : > { %v5928_v15 = vpop.permute.xlu2 %5927  ;;  %6561 = vmatpush.bf16.msrb.mxu0 %v10762_v59  ;;  %10844 = vmatpush.bf16.msrb.mxu1 %v10762_v59 }
 0x7ad   : > { %v6015_v19 = vmul.f32 %v5928_v15, %v14249_v48  ;;  %10845 = vmatpush.bf16.msra.mxu2 %v10762_v59  ;;  %10846 = vmatpush.bf16.msra.mxu3 %v10762_v59 }
 0x7b2   : > { %6084 = vrot.lane.b32.xlu1 %v6011_v42, %s11327_s23  ;;  %11036 = vset.pattern.permute.xlu0 %v11326_v34  ;;  %v6325_v42 = vmul.f32 %v14325_v62, %v14243_v24  ;;  %v10761_v24 = vld [vmem:[%s15503_s30 + $0x8] sm:$0xff] }
 0x7b3   : > { %5748 = vperm.xlu2 %11030, %v15490_v58   ;;  %6199 = vperm.xlu0 %11036, %v11577_v2   ;;  %v5924_v55 = vpop.permute.xlu1 %5923 }
 0x7b4   : > { %v6014_v11 = vmul.f32 %v5924_v55, %v14249_v48  ;;  %6562 = vmatpush.bf16.msrb.mxu0 %v10761_v24  ;;  %10847 = vmatpush.bf16.msrb.mxu1 %v10761_v24 }
 0x7b5   : > { %v6228_v5 = vpop.permute.xlu2 %6227  ;;  %10848 = vmatpush.bf16.msra.mxu2 %v10761_v24  ;;  %10849 = vmatpush.bf16.msra.mxu3 %v10761_v24 }
 0x7b6   : > { %v6331_v22 = vmul.f32 %v14325_v62, %v6228_v5 }
 0x7ba   : > { %6088 = vrot.lane.b32.xlu1 %v6013_v26, %s11327_s23 }
 0x7bb   : > { %6090 = vrot.lane.b32.xlu2 %v6014_v11, %s11327_s23  ;;  %6207 = vperm.xlu0 %11036, %v11583_v4   ;;  %v15504_v11 = vld [vmem:[#allocation49_spill] sm:$0xff] }
 0x7bc   : > { %11032 = vset.pattern.permute.xlu2 %v11326_v34  ;;  %v14304_v4 = vpop.permute.xlu1 %5728 }
 0x7be   : > { %v5936_v2 = vpop.permute.xlu2 %5935 }
 0x7c2   : > { %5743 = vperm.xlu1 %11029, %v15489_v49  }
 0x7c3   : > { %6243 = vperm.xlu2 %11032, %v15489_v49   ;;  %6215 = vperm.xlu0 %11036, %v11589_v6  }
 0x7c5   : > { %v5932_v6 = vpop.permute.xlu1 %5931 }
 0x7c7   : > { %v14308_v49 = vpop.permute.xlu2 %5738 }
 0x7ca   : > { %11031 = vset.pattern.permute.xlu1 %v11324_v14 }
 0x7cb   : > { %5967 = vperm.xlu1 %11031, %v15498_v17   ;;  %11033 = vset.pattern.permute.xlu2 %v11324_v14 }
 0x7cc   : > { %6223 = vperm.xlu0 %11036, %v15483_v21   ;;  %5951 = vperm.xlu2 %11033, %v15499_v47   ;;  %v6016_v21 = vmul.f32 %v5932_v6, %v14249_v48 }
 0x7ce   : > { %v5734_v13 = vpop.permute.xlu1 %5733 }
 0x7d0   : > { %v6236_v25 = vpop.permute.xlu2 %6235 }
 0x7d1   : > { %v6333_v16 = vmul.f32 %v14325_v62, %v6236_v25 }
 0x7d3   : > { %6092 = vrot.lane.b32.xlu1 %v6015_v19, %s11327_s23 }
 0x7d4   : > { %6231 = vperm.xlu0 %11036, %v15486_v18   ;;  %11035 = vset.pattern.permute.xlu2 %v11325_v20 }
 0x7d5   : > { %5758 = vperm.xlu2 %11035, %v15492_v7  }
 0x7d7   : > { %v5960_v51 = vpop.permute.xlu1 %5959 }
 0x7d8   : > { %v6023_v45 = vmul.f32 %v5960_v51, %v14249_v48 }
 0x7d9   : > { %v14321_v18 = vpop.permute.xlu2 %5943 }
 0x7da   : > { %v6019_v25 = vmul.f32 %v14321_v18, %v14249_v48 }
 0x7db   : > { %5947 = vperm.xlu1 %11031, %v15500_v40  }
 0x7dc   : > { %6239 = vperm.xlu0 %11036, %v15488_v3   ;;  %v5842_v3 = vmul.f32 %v14249_v48, %v14226_v36  ;;  %v5846_v36 = vmul.f32 %v14249_v48, %v14231_v53  ;;  %v5956_v53 = vpop.permute.xlu0 %5955 }
 0x7dd   : > { %6094 = vrot.lane.b32.xlu2 %v6016_v21, %s11327_s23  ;;  %v6022_v27 = vmul.f32 %v5956_v53, %v14249_v48  ;;  %v6329_v21 = vmul.f32 %v14325_v62, %v14283_v60 }
 0x7de   : > { %11038 = vset.pattern.permute.xlu2 %v11326_v34 }
 0x7df   : > { %v14350_v46 = vpop.permute.xlu1 %5939 }
 0x7e3   : > { %11034 = vset.pattern.permute.xlu1 %v11325_v20 }
 0x7e4   : > { %6247 = vperm.xlu0 %11036, %v15490_v58   ;;  %5753 = vperm.xlu1 %11034, %v15491_v57  }
 0x7e5   : > { %6251 = vperm.xlu2 %11038, %v15491_v57  }
 0x7ec   : > { %6255 = vperm.xlu0 %11036, %v15492_v7   ;;  %11037 = vset.pattern.permute.xlu1 %v11324_v14  ;;  %v6017_v7 = vmul.f32 %v5936_v2, %v14249_v48  ;;  %v5848_v2 = vmul.f32 %v14249_v48, %v14281_v63  ;;  %v10760_v63 = vld [vmem:[%s15503_s30] sm:$0xff] }
 0x7ed   : > { %5975 = vperm.xlu1 %11037, %v15501_v56   ;;  %11040 = vset.pattern.permute.xlu2 %v11325_v20  ;;  %v6067_v58 = vpop.permute.xlu2 %6066 }
 0x7ee   : > { %v6162_v57 = vadd.f32 %v6067_v58, %v5842_v3  ;;  %5788 = vperm.xlu2 %11040, %v15493_v12   ;;  %6563 = vmatpush.bf16.msrb.mxu0 %v10760_v63 }
 0x7ef   : > { %10850 = vmatpush.bf16.msrb.mxu1 %v10760_v63  ;;  %10851 = vmatpush.bf16.msra.mxu2 %v10760_v63 }
 0x7f0   : > { %v14336_v8 = vadd.f32 %v6323_v0, %v6162_v57  ;;  %10852 = vmatpush.bf16.msra.mxu3 %v10760_v63  ;;  %v15505_v0 = vld [vmem:[#allocation48_spill] sm:$0xff]  ;;  %v6018_v57 = vmul.f32 %v14350_v46, %v14249_v48  ;;  %v5849_v63 = vmul.f32 %v14249_v48, %v14274_v10 }
 0x7f4   : > { %6275 = vperm.xlu0 %11036, %v15485_v1  }
 0x7f5   : > { %6096 = vrot.lane.b32.xlu1 %v6017_v7, %s11327_s23  ;;  %v6075_v32 = vpop.permute.xlu2 %6074 }
 0x7f6   : > { %11039 = vset.pattern.permute.xlu1 %v11325_v20  ;;  %v6166_v35 = vadd.f32 %v6075_v32, %v5846_v36  ;;  %6108 = vrot.lane.b32.xlu2 %v6023_v45, %s11327_s23 }
 0x7f8   : > { %v14348_v37 = vadd.f32 %v6327_v39, %v6166_v35  ;;  %v5843_v39 = vmul.f32 %v14249_v48, %v14233_v61  ;;  %v14425_v35 = vld [vmem:[%s15506_s16] ss:$0 sm:$0xff] }
 0x7fc   : > { %6259 = vperm.xlu0 %11036, %v15494_v9  }
 0x7fd   : > { %5783 = vperm.xlu1 %11039, %v15485_v1   ;;  %v6083_v23 = vpop.permute.xlu2 %6082  ;;  %v5844_v1 = vmul.f32 %v14249_v48, %v14246_v52 }
 0x7fe   : > { %v6170_v30 = vadd.f32 %v6083_v23, %v5850_v31  ;;  %5763 = vperm.xlu2 %11040, %v15494_v9   ;;  %v5852_v9 = vmul.f32 %v14249_v48, %v5734_v13 }
 0x800   : > { %v14361_v28 = vadd.f32 %v6331_v22, %v6170_v30  ;;  %v6391_v22 = vadd.f32 %v14425_v35, %v14336_v8 }
 0x804   : > { %11044 = vset.pattern.permute.xlu0 %v11325_v20  ;;  %v6069_v33 = vpop.permute.xlu1 %6068  ;;  %v6071_v54 = vpop.permute.xlu0 %6070 }
 0x805   : > { %5768 = vperm.xlu0 %11044, %v15495_v50   ;;  %6106 = vrot.lane.b32.xlu1 %v6022_v27, %s11327_s23  ;;  %v6164_v52 = vadd.f32 %v6071_v54, %v5844_v1  ;;  %v6087_v55 = vpop.permute.xlu2 %6086  ;;  %v6163_v53 = vadd.f32 %v6069_v33, %v5843_v39  ;;  %v5845_v27 = vmul.f32 %v14249_v48, %v14235_v41  ;;  %v6423_v1 = vmax.f32 %v6391_v22, 0.0 }
 0x806   : > { %11041 = vset.pattern.permute.xlu1 %v11326_v34  ;;  %v6172_v26 = vadd.f32 %v6087_v55, %v5852_v9  ;;  %11043 = vset.pattern.permute.xlu2 %v11324_v14  ;;  %v5851_v22 = vmul.f32 %v14249_v48, %v14304_v4 }
 0x807   : > { %v14378_v15 = vadd.f32 %v6325_v42, %v6164_v52  ;;  %5983 = vperm.xlu2 %11043, %v15504_v11   ;;  %v15507_v42 = vld [vmem:[#allocation50_spill] sm:$0xff] }
 0x808   : > { %v14381_v5 = vadd.f32 %v6333_v16, %v6172_v26  ;;  %v5847_v26 = vmul.f32 %v14249_v48, %v14263_v38 }
 0x809   : > { %v6393_v59 = vadd.f32 %v14425_v35, %v14378_v15 }
 0x80c   : > { %v6073_v19 = vpop.permute.xlu1 %6072  ;;  %v6079_v6 = vpop.permute.xlu0 %6078 }
 0x80d   : > { %6279 = vperm.xlu1 %11041, %v15493_v12   ;;  %v6168_v13 = vadd.f32 %v6079_v6, %v5848_v2  ;;  %v14393_v3 = vpop.permute.xlu2 %5748  ;;  %v6165_v9 = vadd.f32 %v6073_v19, %v5845_v27 }
 0x80f   : > { %v14398_v58 = vadd.f32 %v6329_v21, %v6168_v13  ;;  %6100 = vrot.lane.b32.xlu2 %v6019_v25, %s11327_s23  ;;  %v6395_v25 = vadd.f32 %v14425_v35, %v14348_v37 }
 0x810   : > { %11046 = vset.pattern.permute.xlu2 %v11325_v20 }
 0x811   : > { %v6397_v37 = vadd.f32 %v14425_v35, %v14398_v58 }
 0x814   : > { %v6077_v12 = vpop.permute.xlu1 %6076  ;;  %v5964_v60 = vpop.permute.xlu0 %5963 }
 0x815   : > { %11042 = vset.pattern.permute.xlu1 %v11324_v14  ;;  %v14403_v18 = vpop.permute.xlu2 %6090  ;;  %v6024_v36 = vmul.f32 %v5964_v60, %v14249_v48  ;;  %v6167_v19 = vadd.f32 %v6077_v12, %v5847_v26  ;;  %v6427_v12 = vmax.f32 %v6395_v25, 0.0 }
 0x816   : > { %5979 = vperm.xlu1 %11042, %v15505_v0  }
 0x817   : > { %5793 = vperm.xlu2 %11046, %v15496_v44  }
 0x81c   : > { %v6081_v51 = vpop.permute.xlu1 %6080  ;;  %v14409_v7 = vpop.permute.xlu0 %5971 }
 0x81d   : > { %v14412_v45 = vpop.permute.xlu2 %6243 }
 0x81e   : > { %6098 = vrot.lane.b32.xlu1 %v6018_v57, %s11327_s23 }
 0x81f   : > { %11045 = vset.pattern.permute.xlu1 %v11326_v34  ;;  %6110 = vrot.lane.b32.xlu2 %v6024_v36, %s11327_s23 }
 0x820   : > { %11049 = vset.pattern.permute.xlu2 %v11326_v34 }
 0x824   : > { %v14418_v32 = vpop.permute.xlu1 %6084 }
 0x825   : > { %v6200_v46 = vpop.permute.xlu0 %6199 }
 0x826   : > { %6263 = vperm.xlu1 %11045, %v15495_v50   ;;  %v6324_v31 = vmul.f32 %v14325_v62, %v6200_v46  ;;  %v14429_v23 = vpop.permute.xlu2 %5951  ;;  %v6169_v46 = vadd.f32 %v6081_v51, %v5849_v63 }
 0x827   : > { %6287 = vperm.xlu2 %11049, %v15498_v17  }
 0x828   : > { %v6356_v30 = vadd.f32 %v6324_v31, %v6163_v53 }
 0x82a   : > { %v6392_v61 = vadd.f32 %v14425_v35, %v6356_v30  ;;  %v6429_v30 = vmax.f32 %v6397_v37, 0.0 }
 0x82c   : > { %v14435_v43 = vpop.permute.xlu1 %6088  ;;  %v6424_v50 = vmax.f32 %v6392_v61, 0.0 }
 0x82d   : > { %v6208_v33 = vpop.permute.xlu0 %6207 }
 0x82e   : > { %11047 = vset.pattern.permute.xlu1 %v11325_v20  ;;  %v6455_v16 = vpack.c.bf16 %v6424_v50, %v6423_v1  ;;  %v6326_v54 = vmul.f32 %v14325_v62, %v6208_v33  ;;  %v6171_v50 = vadd.f32 %v14418_v32, %v5851_v22  ;;  %v5853_v32 = vmul.f32 %v14249_v48, %v14308_v49 }
 0x82f   : > { %5798 = vperm.xlu1 %11047, %v15498_v17   ;;  %11051 = vset.pattern.permute.xlu2 %v11324_v14  ;;  %v14443_v8 = vpop.permute.xlu2 %5758  ;;  %v6425_v17 = vmax.f32 %v6393_v59, 0.0  ;;  %v15508_v59 = vld [vmem:[#allocation51_spill] sm:$0xff]  ;;  %v6401_v49 = vadd.f32 %v14425_v35, %v14381_v5 }
 0x830   : > { %v6358_v41 = vadd.f32 %v6326_v54, %v6165_v9  ;;  %5987 = vperm.xlu2 %11051, %v15507_v42   ;;  %10063 = vmatmul.msk.bf16.vlgmr.msrb.gmra.mxu0 %vm6507_vm9, %v6455_v16  ;;  %v6399_v9 = vadd.f32 %v14425_v35, %v14361_v28 }
 0x832   : > { %v6394_v52 = vadd.f32 %v14425_v35, %v6358_v41  ;;  %v6431_v41 = vmax.f32 %v6399_v9, 0.0 }
 0x834   : > { %v14450_v55 = vpop.permute.xlu1 %5743  ;;  %v6426_v24 = vmax.f32 %v6394_v52, 0.0 }
 0x835   : > { %v6216_v2 = vpop.permute.xlu0 %6215 }
 0x836   : > { %v6328_v6 = vmul.f32 %v14325_v62, %v6216_v2  ;;  %v6456_v15 = vpack.c.bf16 %v6426_v24, %v6425_v17  ;;  %v6021_v17 = vmul.f32 %v14429_v23, %v14249_v48  ;;  %v6173_v2 = vadd.f32 %v14435_v43, %v5853_v32 }
 0x837   : > { %11048 = vset.pattern.permute.xlu1 %v11326_v34  ;;  %v14456_v21 = vpop.permute.xlu2 %6094  ;;  %v6433_v43 = vmax.f32 %v6401_v49, 0.0  ;;  %v10313_v49 = vld [vmem:[#allocation9 + $0x1c8] sm:$0xf] }
 0x838   : > { %6283 = vperm.xlu1 %11048, %v15496_v44   ;;  %v6360_v13 = vadd.f32 %v6328_v6, %v6167_v19  ;;  %11054 = vset.pattern.permute.xlu2 %v11326_v34 }
 0x83a   : > { %v6396_v38 = vadd.f32 %v14425_v35, %v6360_v13 }
 0x83c   : > { %v6428_v60 = vmax.f32 %v6396_v38, 0.0 }
 0x83d   : > { %v5968_v57 = vpop.permute.xlu1 %5967 }
 0x83e   : > { %v6224_v36 = vpop.permute.xlu0 %6223  ;;  %v6025_v39 = vmul.f32 %v5968_v57, %v14249_v48  ;;  %v6457_v53 = vpack.c.bf16 %v6428_v60, %v6427_v12  ;;  %v5854_v60 = vmul.f32 %v14249_v48, %v14450_v55  ;;  %v5855_v57 = vmul.f32 %v14249_v48, %v14393_v3 }
 0x83f   : > { %v6330_v44 = vmul.f32 %v14325_v62, %v6224_v36  ;;  %v14467_v31 = vpop.permute.xlu2 %6251  ;;  %v6335_v55 = vmul.f32 %v14325_v62, %v14412_v45 }
 0x840   : > { %11050 = vset.pattern.permute.xlu1 %v11325_v20  ;;  %6112 = vrot.lane.b32.xlu0 %v6025_v39, %s11327_s23 }
 0x841   : > { %v6362_v10 = vadd.f32 %v6330_v44, %v6169_v46  ;;  %10064 = vmatmul.msk.bf16.gmra.mxu0 %vm6507_vm9, %v6456_v15  ;;  %10065 = vmatmul.msk.bf16.vlgmr.msrb.gmra.mxu1 %vm6507_vm9, %v6457_v53  ;;  %v6174_v46 = vadd.f32 %v14403_v18, %v5854_v60  ;;  %v15509_v18 = vld [vmem:[#allocation52_spill] sm:$0xff]  ;;  %v10812_v60 = vld [vmem:[#allocation9 + $0x184] sm:$0xf] }
 0x842   : > { %5778 = vperm.xlu1 %11050, %v15499_v47  }
 0x843   : > { %v6398_v51 = vadd.f32 %v14425_v35, %v6362_v10  ;;  %v6367_v44 = vadd.f32 %v6335_v55, %v6174_v46  ;;  %v10817_v55 = vld [vmem:[#allocation9 + $0x1a4] sm:$0xf0] }
 0x845   : > { %v6430_v61 = vmax.f32 %v6398_v51, 0.0  ;;  %v6093_v27 = vpop.permute.xlu1 %6092  ;;  %v6403_v45 = vadd.f32 %v14425_v35, %v6367_v44 }
 0x846   : > { %v6232_v1 = vpop.permute.xlu0 %6231  ;;  %v6175_v53 = vadd.f32 %v6093_v27, %v5855_v57  ;;  %v10281_v57 = vld [vmem:[#allocation9 + $0x188] sm:$0xf] }
 0x847   : > { %v6332_v58 = vmul.f32 %v14325_v62, %v6232_v1  ;;  %v6458_v33 = vpack.c.bf16 %v6430_v61, %v6429_v30  ;;  %v5857_v30 = vmul.f32 %v14249_v48, %v14443_v8  ;;  %v6435_v61 = vmax.f32 %v6403_v45, 0.0  ;;  %v10796_v45 = vld [vmem:[#allocation9 + $0x104] sm:$0xf] }
 0x848   : > { %5773 = vperm.xlu0 %11044, %v15500_v40   ;;  %v14484_v54 = vpop.permute.xlu2 %5788 }
 0x849   : > { %v6364_v16 = vadd.f32 %v6332_v58, %v6171_v50  ;;  %v15510_v50 = vld [vmem:[#allocation53_spill] sm:$0xff] }
 0x84a   : > { %11052 = vset.pattern.permute.xlu1 %v11324_v14 }
 0x84b   : > { %v6400_v4 = vadd.f32 %v14425_v35, %v6364_v16  ;;  %5991 = vperm.xlu1 %11052, %v15508_v59  }
 0x84d   : > { %v6432_v52 = vmax.f32 %v6400_v4, 0.0  ;;  %v5948_v26 = vpop.permute.xlu1 %5947 }
 0x84e   : > { %v6240_v24 = vpop.permute.xlu0 %6239  ;;  %v6020_v28 = vmul.f32 %v5948_v26, %v14249_v48 }
 0x84f   : > { %v6334_v19 = vmul.f32 %v14325_v62, %v6240_v24  ;;  %v6459_v6 = vpack.c.bf16 %v6432_v52, %v6431_v41 }
 0x850   : > { %6102 = vrot.lane.b32.xlu2 %v6020_v28, %s11327_s23  ;;  %6104 = vrot.lane.b32.xlu0 %v6021_v17, %s11327_s23  ;;  %v14500_v25 = vpop.permute.xlu2 %6108 }
 0x851   : > { %v6366_v15 = vadd.f32 %v6334_v19, %v6173_v2  ;;  %10066 = vmatmul.msk.bf16.gmra.mxu1 %vm6507_vm9, %v6458_v33  ;;  %10067 = vmatmul.msk.bf16.vlgmr.msra.gmra.mxu2 %vm6507_vm9, %v6459_v6  ;;  %v6337_v33 = vmul.f32 %v14325_v62, %v14467_v31  ;;  %v10820_v19 = vld [vmem:[#allocation9 + $0x1c4] sm:$0xf] }
 0x852   : > { %v10307_v6 = vld [vmem:[#allocation9 + $0x1e0] sm:$0xf0] }
 0x853   : > { %v6402_v23 = vadd.f32 %v14425_v35, %v6366_v15  ;;  %11053 = vset.pattern.permute.xlu1 %v11326_v34  ;;  %v5863_v15 = vmul.f32 %v14249_v48, %v14484_v54 }
 0x854   : > { %6267 = vperm.xlu1 %11053, %v15500_v40   ;;  %v6026_v40 = vmul.f32 %v14409_v7, %v14249_v48 }
 0x855   : > { %v6434_v13 = vmax.f32 %v6402_v23, 0.0 }
 0x856   : > { %v5754_v38 = vpop.permute.xlu1 %5753  ;;  %v6248_v12 = vpop.permute.xlu0 %6247 }
 0x857   : > { %v6460_v63 = vpack.c.bf16 %v6434_v13, %v6433_v43  ;;  %v5856_v22 = vmul.f32 %v14249_v48, %v5754_v38  ;;  %v10310_v43 = vor.u32 %v10820_v19, %v10307_v6  ;;  %v10825_v13 = vld [vmem:[#allocation9 + $0x1e4] sm:$0xf0] }
 0x858   : > { %6271 = vperm.xlu2 %11054, %v15499_v47   ;;  %5803 = vperm.xlu0 %11044, %v15497_v29   ;;  %v14509_v5 = vpop.permute.xlu2 %5763  ;;  %v6336_v47 = vmul.f32 %v14325_v62, %v6248_v12  ;;  %v10314_v12 = vor.u32 %v10825_v13, %v10313_v49  ;;  %v10785_v49 = vld [vmem:[#allocation9 + $0xa4] sm:$0xf0] }
 0x859   : > { %v6176_v9 = vadd.f32 %v14456_v21, %v5856_v22  ;;  %7184 = vmatpush.bf16.msra.mxu0 %v10310_v43 }
 0x85a   : > { %v6368_v3 = vadd.f32 %v6336_v47, %v6175_v53  ;;  %v6183_v47 = vadd.f32 %v14500_v25, %v5863_v15  ;;  %7273 = vmatpush.bf16.msra.mxu1 %v10314_v12  ;;  %v10282_v25 = vor.u32 %v10817_v55, %v10281_v57  ;;  %v10121_v12 = vld [vmem:[#allocation9 + $0x48] sm:$0xf] }
 0x85b   : > { %v6369_v4 = vadd.f32 %v6337_v33, %v6176_v9  ;;  %v10217_v9 = vld [vmem:[#allocation9 + $0x108] sm:$0xf] }
 0x85c   : > { %11055 = vset.pattern.permute.xlu1 %v11325_v20  ;;  %v6404_v37 = vadd.f32 %v14425_v35, %v6368_v3  ;;  %v10804_v3 = vld [vmem:[#allocation9 + $0x144] sm:$0xf] }
 0x85d   : > { %5808 = vperm.xlu1 %11055, %v15501_v56   ;;  %v6405_v52 = vadd.f32 %v14425_v35, %v6369_v4  ;;  %v10788_v4 = vld [vmem:[#allocation9 + $0xc4] sm:$0xf] }
 0x85e   : > { %v6436_v51 = vmax.f32 %v6404_v37, 0.0  ;;  %v6256_v27 = vpop.permute.xlu0 %6255  ;;  %7274 = vmatpush.bf16.msra.mxu1 %v10282_v25  ;;  %v10089_v25 = vld [vmem:[#allocation9 + $0x8] sm:$0xf] }
 0x85f   : > { %v5976_v36 = vpop.permute.xlu1 %5975  ;;  %v6338_v8 = vmul.f32 %v14325_v62, %v6256_v27  ;;  %v6437_v2 = vmax.f32 %v6405_v52, 0.0  ;;  %v10793_v52 = vld [vmem:[#allocation9 + $0xe4] sm:$0xf0] }
 0x860   : > { %v6027_v39 = vmul.f32 %v5976_v36, %v14249_v48  ;;  %6114 = vrot.lane.b32.xlu2 %v6026_v40, %s11327_s23  ;;  %11057 = vset.pattern.permute.xlu0 %v11324_v14  ;;  %v6461_v58 = vpack.c.bf16 %v6436_v51, %v6435_v61  ;;  %v10275_v40 = vld [vmem:[#allocation9 + $0x1a0] sm:$0xf0] }
 0x861   : > { %10068 = vmatmul.msk.bf16.gmra.mxu2 %vm6507_vm9, %v6460_v63  ;;  %v5984_v7 = vpop.permute.xlu2 %5983  ;;  %v10211_v51 = vld [vmem:[#allocation9 + $0x120] sm:$0xf0] }
 0x862   : > { %6116 = vrot.lane.b32.xlu0 %v6027_v39, %s11327_s23  ;;  %v6029_v16 = vmul.f32 %v5984_v7, %v14249_v48  ;;  %v10278_v39 = vor.u32 %v10812_v60, %v10275_v40  ;;  %v10243_v7 = vld [vmem:[#allocation9 + $0x160] sm:$0xf0]  ;;  %v10777_v40 = vld [vmem:[#allocation9 + $0x64] sm:$0xf0] }
 0x863   : > { %v10246_v37 = vor.u32 %v10804_v3, %v10243_v7  ;;  %v10769_v7 = vld [vmem:[#allocation9 + $0x24] sm:$0xf0] }
 0x864   : > { %7185 = vmatpush.bf16.msra.mxu0 %v10278_v39 }
 0x865   : > { %11056 = vset.pattern.permute.xlu1 %v11326_v34 }
 0x866   : > { %6291 = vperm.xlu1 %11056, %v15497_v29   ;;  %v6276_v26 = vpop.permute.xlu0 %6275 }
 0x867   : > { %v6097_v10 = vpop.permute.xlu1 %6096  ;;  %v6343_v28 = vmul.f32 %v14325_v62, %v6276_v26 }
 0x868   : > { %6295 = vperm.xlu2 %11054, %v15501_v56   ;;  %v6177_v29 = vadd.f32 %v6097_v10, %v5857_v30  ;;  %v10809_v10 = vld [vmem:[#allocation9 + $0x164] sm:$0xf0]  ;;  %7186 = vmatpush.bf16.msra.mxu0 %v10246_v37 }
 0x869   : > { %v14537_v1 = vpop.permute.xlu2 %6100 }
 0x86a   : > { %5995 = vperm.xlu0 %11057, %v15509_v18  }
 0x86e   : > { %11058 = vset.pattern.permute.xlu1 %v11324_v14  ;;  %v6370_v14 = vadd.f32 %v6338_v8, %v6177_v29  ;;  %v6260_v61 = vpop.permute.xlu0 %6259 }
 0x86f   : > { %5999 = vperm.xlu1 %11058, %v15510_v50   ;;  %v5784_v56 = vpop.permute.xlu1 %5783  ;;  %v6339_v43 = vmul.f32 %v14325_v62, %v6260_v61  ;;  %v10315_v61 = vld [vmem:[#allocation9 + $0x1e8] sm:$0xf0] }
 0x870   : > { %11059 = vset.pattern.permute.xlu2 %v11325_v20  ;;  %v6406_v31 = vadd.f32 %v14425_v35, %v6370_v14  ;;  %v5862_v32 = vmul.f32 %v14249_v48, %v5784_v56 }
 0x871   : > { %10069 = vmatmul.msk.bf16.gmra.mxu2 %vm6507_vm9, %v6461_v58  ;;  %5813 = vperm.xlu2 %11059, %v15505_v0   ;;  %v14554_v41 = vpop.permute.xlu2 %5793  ;;  %v10214_v58 = vor.u32 %v10796_v45, %v10211_v51 }
 0x872   : > { %6120 = vrot.lane.b32.xlu0 %v6029_v16, %s11327_s23  ;;  %v6438_v24 = vmax.f32 %v6406_v31, 0.0  ;;  %v10801_v16 = vld [vmem:[#allocation9 + $0x124] sm:$0xf0]  ;;  %v10179_v31 = vld [vmem:[#allocation9 + $0xe0] sm:$0xf0] }
 0x873   : > { %11063 = vset.pattern.permute.xlu0 %v11325_v20  ;;  %7187 = vmatpush.bf16.msra.mxu0 %v10214_v58  ;;  %v10218_v14 = vor.u32 %v10801_v16, %v10217_v9  ;;  %v10251_v9 = vld [vmem:[#allocation9 + $0x168] sm:$0xf0] }
 0x874   : > { %v6462_v63 = vpack.c.bf16 %v6438_v24, %v6437_v2  ;;  %v10780_v24 = vld [vmem:[#allocation9 + $0x84] sm:$0xf]  ;;  %v10153_v2 = vld [vmem:[#allocation9 + $0x88] sm:$0xf] }
 0x877   : > { %11060 = vset.pattern.permute.xlu1 %v11325_v20  ;;  %v6107_v21 = vpop.permute.xlu1 %6106  ;;  %v5769_v19 = vpop.permute.xlu0 %5768 }
 0x878   : > { %5818 = vperm.xlu1 %11060, %v15504_v11   ;;  %v6182_v17 = vadd.f32 %v6107_v21, %v5862_v32  ;;  %v10185_v21 = vld [vmem:[#allocation9 + $0xc8] sm:$0xf]  ;;  %v10182_v32 = vor.u32 %v10788_v4, %v10179_v31  ;;  %v5859_v13 = vmul.f32 %v14249_v48, %v5769_v19  ;;  %v5864_v4 = vmul.f32 %v14249_v48, %v14554_v41 }
 0x879   : > { %11062 = vset.pattern.permute.xlu2 %v11326_v34  ;;  %v14569_v46 = vpop.permute.xlu2 %6110 }
 0x87a   : > { %5823 = vperm.xlu0 %11063, %v15507_v42   ;;  %v6375_v23 = vadd.f32 %v6343_v28, %v6182_v17  ;;  %7188 = vmatpush.bf16.msra.mxu0 %v10182_v32  ;;  %v5858_v17 = vmul.f32 %v14249_v48, %v14509_v5  ;;  %v10147_v28 = vld [vmem:[#allocation9 + $0xa0] sm:$0xf0]  ;;  %v6184_v32 = vadd.f32 %v14569_v46, %v5864_v4 }
 0x87b   : > { %v10150_v6 = vor.u32 %v10780_v24, %v10147_v28  ;;  %v10789_v24 = vld [vmem:[#allocation9 + $0xcc] sm:$0xf] }
 0x87c   : > { %v6411_v54 = vadd.f32 %v14425_v35, %v6375_v23  ;;  %v10154_v23 = vor.u32 %v10785_v49, %v10153_v2  ;;  %v10187_v28 = vld [vmem:[#allocation9 + $0xe8] sm:$0xf0] }
 0x87d   : > { %v10190_v19 = vor.u32 %v10789_v24, %v10187_v28 }
 0x87e   : > { %v6443_v22 = vmax.f32 %v6411_v54, 0.0  ;;  %7189 = vmatpush.bf16.msra.mxu0 %v10150_v6  ;;  %v10764_v54 = vld [vmem:[#allocation9 + $0x4] sm:$0xf] }
 0x87f   : > { %v6280_v38 = vpop.permute.xlu1 %6279 }
 0x880   : > { %11061 = vset.pattern.permute.xlu1 %v11326_v34  ;;  %v6344_v36 = vmul.f32 %v14325_v62, %v6280_v38  ;;  %v10772_v38 = vld [vmem:[#allocation9 + $0x44] sm:$0xf] }
 0x881   : > { %6299 = vperm.xlu1 %11061, %v15505_v0   ;;  %10070 = vmatmul.msk.bf16.gmra.mxu2 %vm6507_vm9, %v6462_v63  ;;  %v10249_v0 = vld [vmem:[#allocation9 + $0x148] sm:$0xf]  ;;  %v14580_v8 = vpop.permute.xlu2 %6287  ;;  %v10115_v63 = vld [vmem:[#allocation9 + $0x60] sm:$0xf0] }
 0x882   : > { %v6376_v53 = vadd.f32 %v6344_v36, %v6183_v47  ;;  %11065 = vset.pattern.permute.xlu0 %v11326_v34  ;;  %v10250_v56 = vor.u32 %v10809_v10, %v10249_v0  ;;  %v10118_v60 = vor.u32 %v10772_v38, %v10115_v63  ;;  %v10122_v36 = vor.u32 %v10777_v40, %v10121_v12  ;;  %v10155_v38 = vld [vmem:[#allocation9 + $0xa8] sm:$0xf0] }
 0x883   : > { %6311 = vperm.xlu0 %11065, %v15508_v59   ;;  %v10090_v0 = vor.u32 %v10769_v7, %v10089_v25  ;;  %v10091_v7 = vld [vmem:[#allocation9 + $0x28] sm:$0xf0] }
 0x884   : > { %v6412_v44 = vadd.f32 %v14425_v35, %v6376_v53  ;;  %7275 = vmatpush.bf16.msra.mxu1 %v10250_v56  ;;  %7190 = vmatpush.bf16.msra.mxu0 %v10118_v60  ;;  %v10083_v53 = vld [vmem:[#allocation9 + $0x20] sm:$0xf0]  ;;  %v10283_v56 = vld [vmem:[#allocation9 + $0x1a8] sm:$0xf0] }
 0x885   : > { %v10086_v3 = vor.u32 %v10764_v54, %v10083_v53 }
 0x886   : > { %v6444_v30 = vmax.f32 %v6412_v44, 0.0 }
 0x888   : > { %v5980_v27 = vpop.permute.xlu1 %5979  ;;  %v6465_v29 = vpack.c.bf16 %v6444_v30, %v6443_v22  ;;  %7276 = vmatpush.bf16.msra.mxu1 %v10218_v14  ;;  %7191 = vmatpush.bf16.msra.mxu0 %v10086_v3  ;;  %v10821_v30 = vld [vmem:[#allocation9 + $0x1cc] sm:$0xf] }
 0x889   : > { %11064 = vset.pattern.permute.xlu1 %v11325_v20  ;;  %v6028_v33 = vmul.f32 %v5980_v27, %v14249_v48  ;;  %v10318_v27 = vor.u32 %v10821_v30, %v10315_v61  ;;  %v10765_v3 = vld [vmem:[#allocation9 + $0xc] sm:$0xf] }
 0x88a   : > { %5828 = vperm.xlu1 %11064, %v15508_v59   ;;  %10073 = vmatmul.msk.bf16.vlgmr.msra.gmra.mxu3 %vm6507_vm9, %v6465_v29  ;;  %v10186_v59 = vor.u32 %v10793_v52, %v10185_v21  ;;  %v5988_v5 = vpop.permute.xlu2 %5987  ;;  %v10813_v29 = vld [vmem:[#allocation9 + $0x18c] sm:$0xf] }
 0x88b   : > { %6118 = vrot.lane.b32.xlu2 %v6028_v33, %s11327_s23  ;;  %6315 = vperm.xlu0 %11065, %v15509_v18   ;;  %v6030_v39 = vmul.f32 %v5988_v5, %v14249_v48  ;;  %v10286_v58 = vor.u32 %v10813_v29, %v10283_v56  ;;  %v10805_v33 = vld [vmem:[#allocation9 + $0x14c] sm:$0xf] }
 0x88c   : > { %7277 = vmatpush.bf16.msra.mxu1 %v10186_v59  ;;  %7362 = vmatpush.bf16.msrb.mxu2 %v10318_v27  ;;  %v10254_v14 = vor.u32 %v10805_v33, %v10251_v9  ;;  %v10219_v21 = vld [vmem:[#allocation9 + $0x128] sm:$0xf0] }
 0x890   : > { %v6099_v26 = vpop.permute.xlu1 %6098  ;;  %7278 = vmatpush.bf16.msra.mxu1 %v10154_v23  ;;  %7363 = vmatpush.bf16.msrb.mxu2 %v10286_v58 }
 0x891   : > { %v6178_v15 = vadd.f32 %v6099_v26, %v5858_v17  ;;  %v14604_v17 = vld [vmem:[%s15511_s2] ss:$0 sm:$0xff] }
 0x893   : > { %6303 = vperm.xlu2 %11062, %v15504_v11   ;;  %v6371_v57 = vadd.f32 %v6339_v43, %v6178_v15  ;;  %v6179_v11 = vadd.f32 %v14537_v1, %v5859_v13  ;;  %v10781_v13 = vld [vmem:[#allocation9 + $0x8c] sm:$0xf] }
 0x894   : > { %7279 = vmatpush.bf16.msra.mxu1 %v10122_v36  ;;  %7364 = vmatpush.bf16.msrb.mxu2 %v10254_v14  ;;  %v10158_v12 = vor.u32 %v10781_v13, %v10155_v38  ;;  %v10773_v36 = vld [vmem:[#allocation9 + $0x4c] sm:$0xf] }
 0x895   : > { %v6407_v44 = vadd.f32 %v14425_v35, %v6371_v57 }
 0x897   : > { %v6439_v1 = vmax.f32 %v6407_v44, 0.0 }
 0x898   : > { %v6264_v47 = vpop.permute.xlu1 %6263  ;;  %7280 = vmatpush.bf16.msra.mxu1 %v10090_v0  ;;  %v10094_v0 = vor.u32 %v10765_v3, %v10091_v7 }
 0x899   : > { %v6340_v55 = vmul.f32 %v14325_v62, %v6264_v47 }
 0x89b   : > { %v6372_v37 = vadd.f32 %v6340_v55, %v6179_v11  ;;  %6122 = vrot.lane.b32.xlu2 %v6030_v39, %s11327_s23  ;;  %v10123_v11 = vld [vmem:[#allocation9 + $0x68] sm:$0xf0] }
 0x89c   : > { %v10126_v55 = vor.u32 %v10773_v36, %v10123_v11 }
 0x89d   : > { %v6408_v10 = vadd.f32 %v14425_v35, %v6372_v37 }
 0x89f   : > { %v6440_v45 = vmax.f32 %v6408_v10, 0.0 }
 0x8a1   : > { %v5799_v51 = vpop.permute.xlu1 %5798  ;;  %v6463_v22 = vpack.c.bf16 %v6440_v45, %v6439_v1 }
 0x8a2   : > { %v5865_v41 = vmul.f32 %v14249_v48, %v5799_v51 }
 0x8a3   : > { %6307 = vperm.xlu2 %11062, %v15507_v42   ;;  %10071 = vmatmul.msk.bf16.gmra.mxu2 %vm6507_vm9, %v6463_v22  ;;  %v10797_v42 = vld [vmem:[#allocation9 + $0x10c] sm:$0xf] }
 0x8a4   : > { %v10222_v26 = vor.u32 %v10797_v42, %v10219_v21 }
 0x8a6   : > { %7365 = vmatpush.bf16.msrb.mxu2 %v10222_v26 }
 0x8aa   : > { %v6284_v16 = vpop.permute.xlu1 %6283  ;;  %7366 = vmatpush.bf16.msrb.mxu2 %v10190_v19  ;;  %v6103_v23 = vpop.permute.xlu2 %6102 }
 0x8ab   : > { %11066 = vset.pattern.permute.xlu2 %v11325_v20  ;;  %v6345_v31 = vmul.f32 %v14325_v62, %v6284_v16  ;;  %v6346_v20 = vmul.f32 %v14325_v62, %v14580_v8 }
 0x8ac   : > { %5838 = vperm.xlu2 %11066, %v15510_v50  }
 0x8ad   : > { %v6565_v52 = vpop.f32.mrf.mxu0  ;;  %v6377_v59 = vadd.f32 %v6345_v31, %v6184_v32 }
 0x8ae   : > { %v6566_v49 = vadd.f32 %v14604_v17, %v6565_v52  ;;  %7367 = vmatpush.bf16.msrb.mxu2 %v10158_v12 }
 0x8af   : > { %v6413_v46 = vadd.f32 %v14425_v35, %v6377_v59 }
 0x8b0   : > { %v6645_v40 = vmax.f32 %v6566_v49, 0.0 }
 0x8b1   : > { %v6445_v60 = vmax.f32 %v6413_v46, 0.0 }
 0x8b2   : > { %v6113_v2 = vpop.permute.xlu0 %6112  ;;  %7368 = vmatpush.bf16.msrb.mxu2 %v10126_v55  ;;  %v6272_v10 = vpop.permute.xlu2 %6271 }
 0x8b3   : > { %v6185_v6 = vadd.f32 %v6113_v2, %v5865_v41  ;;  %v6342_v1 = vmul.f32 %v14325_v62, %v6272_v10 }
 0x8b4   : > { %v5779_v15 = vpop.permute.xlu1 %5778 }
 0x8b5   : > { %v6378_v43 = vadd.f32 %v6346_v20, %v6185_v6  ;;  %v6567_v63 = vpop.f32.mrf.mxu0  ;;  %v5861_v45 = vmul.f32 %v14249_v48, %v5779_v15 }
 0x8b6   : > { %v6568_v5 = vadd.f32 %v14604_v17, %v6567_v63  ;;  %7369 = vmatpush.bf16.msrb.mxu2 %v10094_v0 }
 0x8b7   : > { %v6414_v8 = vadd.f32 %v14425_v35, %v6378_v43 }
 0x8b8   : > { %v6646_v47 = vmax.f32 %v6568_v5, 0.0 }
 0x8b9   : > { %v6446_v57 = vmax.f32 %v6414_v8, 0.0 }
 0x8ba   : > { %v5774_v39 = vpop.permute.xlu0 %5773  ;;  %v14613_v54 = vpack.c.bf16 %v6646_v47, %v6645_v40  ;;  %v6115_v14 = vpop.permute.xlu2 %6114 }
 0x8bb   : > { %v6466_v53 = vpack.c.bf16 %v6446_v57, %v6445_v60  ;;  %v5860_v30 = vmul.f32 %v14249_v48, %v5774_v39 }
 0x8bc   : > { %7192 = vmatmul.bf16.vlgmr.msra.gmra.mxu0 %v14613_v54  ;;  %7281 = vmatmul.bf16.vlgmr.msra.gmra.mxu1 %v14613_v54 }
 0x8bd   : > { %v5992_v25 = vpop.permute.xlu1 %5991  ;;  %10074 = vmatmul.msk.bf16.gmra.mxu3 %vm6507_vm9, %v6466_v53  ;;  %v6180_v33 = vadd.f32 %v6103_v23, %v5860_v30 }
 0x8be   : > { %v6031_v44 = vmul.f32 %v5992_v25, %v14249_v48  ;;  %v6570_v37 = vpop.f32.mrf.mxu0  ;;  %v6575_v51 = vpop.f32.mrf.mxu1 }
 0x8bf   : > { %v6571_v27 = vadd.f32 %v14604_v17, %v6570_v37  ;;  %v6576_v46 = vadd.f32 %v14604_v17, %v6575_v51 }
 0x8c0   : > { %6124 = vrot.lane.b32.xlu1 %v6031_v44, %s11327_s23 }
 0x8c1   : > { %v6647_v4 = vmax.f32 %v6571_v27, 0.0  ;;  %v6649_v12 = vmax.f32 %v6576_v46, 0.0 }
 0x8c2   : > { %v6105_v22 = vpop.permute.xlu0 %6104  ;;  %v6296_v28 = vpop.permute.xlu2 %6295 }
 0x8c3   : > { %v6181_v61 = vadd.f32 %v6105_v22, %v5861_v45  ;;  %v6348_v49 = vmul.f32 %v14325_v62, %v6296_v28 }
 0x8c5   : > { %v6374_v29 = vadd.f32 %v6342_v1, %v6181_v61 }
 0x8c6   : > { %v6268_v56 = vpop.permute.xlu1 %6267  ;;  %v6572_v58 = vpop.f32.mrf.mxu0 }
 0x8c7   : > { %v6341_v9 = vmul.f32 %v14325_v62, %v6268_v56  ;;  %v6573_v16 = vadd.f32 %v14604_v17, %v6572_v58  ;;  %v6410_v31 = vadd.f32 %v14425_v35, %v6374_v29  ;;  %v6577_v26 = vpop.f32.mrf.mxu1 }
 0x8c8   : > { %5833 = vperm.xlu1 %11064, %v15509_v18   ;;  %v6578_v2 = vadd.f32 %v14604_v17, %v6577_v26 }
 0x8c9   : > { %v6373_v42 = vadd.f32 %v6341_v9, %v6180_v33  ;;  %v6648_v21 = vmax.f32 %v6573_v16, 0.0  ;;  %v6442_v20 = vmax.f32 %v6410_v31, 0.0  ;;  %v10305_v9 = vld [vmem:[#allocation9 + $0x1c0] sm:$0xf] }
 0x8ca   : > { %v5804_v59 = vpop.permute.xlu0 %5803  ;;  %v6650_v13 = vmax.f32 %v6578_v2, 0.0 }
 0x8cb   : > { %v6409_v32 = vadd.f32 %v14425_v35, %v6373_v42  ;;  %v14629_v52 = vpack.c.bf16 %v6648_v21, %v6647_v4  ;;  %v5866_v15 = vmul.f32 %v14249_v48, %v5804_v59  ;;  %v5814_v36 = vpop.permute.xlu2 %5813 }
 0x8cc   : > { %v14641_v60 = vpack.c.bf16 %v6650_v13, %v6649_v12  ;;  %v5868_v16 = vmul.f32 %v14249_v48, %v5814_v36  ;;  %v10808_v12 = vld [vmem:[#allocation9 + $0x15c] sm:$0xf0]  ;;  %v10323_v36 = vld [vmem:[#allocation9 + $0x1f0] sm:$0xf0] }
 0x8cd   : > { %v6441_v41 = vmax.f32 %v6409_v32, 0.0  ;;  %7197 = vmatmul.bf16.gmra.mxu0 %v14629_v52  ;;  %7286 = vmatmul.bf16.gmra.mxu1 %v14629_v52  ;;  %v6186_v8 = vadd.f32 %v6115_v14, %v5866_v15  ;;  %v10816_v15 = vld [vmem:[#allocation9 + $0x19c] sm:$0xf0] }
 0x8cf   : > { %v5809_v24 = vpop.permute.xlu1 %5808  ;;  %v6464_v18 = vpack.c.bf16 %v6442_v20, %v6441_v41  ;;  %v6580_v43 = vpop.f32.mrf.mxu1 }
 0x8d0   : > { %11067 = vset.pattern.permute.xlu1 %v11326_v34  ;;  %v5867_v19 = vmul.f32 %v14249_v48, %v5809_v24  ;;  %v6581_v10 = vadd.f32 %v14604_v17, %v6580_v43 }
 0x8d1   : > { %10072 = vmatmul.msk.bf16.gmra.mxu2 %vm6507_vm9, %v6464_v18 }
 0x8d2   : > { %v6651_v51 = vmax.f32 %v6581_v10, 0.0 }
 0x8d4   : > { %v6117_v6 = vpop.permute.xlu0 %6116  ;;  %v6585_v63 = vpop.f32.mrf.mxu2 }
 0x8d5   : > { %v6187_v23 = vadd.f32 %v6117_v6, %v5867_v19  ;;  %v6586_v26 = vadd.f32 %v14604_v17, %v6585_v63 }
 0x8d7   : > { %v6380_v38 = vadd.f32 %v6348_v49, %v6187_v23  ;;  %v6582_v25 = vpop.f32.mrf.mxu1  ;;  %v6653_v28 = vmax.f32 %v6586_v26, 0.0  ;;  %v10273_v49 = vld [vmem:[#allocation9 + $0x180] sm:$0xf] }
 0x8d8   : > { %v6292_v34 = vpop.permute.xlu1 %6291  ;;  %v6583_v0 = vadd.f32 %v14604_v17, %v6582_v25  ;;  %v10274_v23 = vor.u32 %v10816_v15, %v10273_v49  ;;  %v10784_v26 = vld [vmem:[#allocation9 + $0x9c] sm:$0xf0]  ;;  %v14704_v49 = vld [vmem:[%s15506_s16] ss:$0 sm:$0xff] }
 0x8d9   : > { %v6347_v5 = vmul.f32 %v14325_v62, %v6292_v34  ;;  %v6416_v40 = vadd.f32 %v14425_v35, %v6380_v38  ;;  %v10241_v34 = vld [vmem:[#allocation9 + $0x140] sm:$0xf] }
 0x8da   : > { %v6652_v45 = vmax.f32 %v6583_v0, 0.0 }
 0x8db   : > { %v6379_v57 = vadd.f32 %v6347_v5, %v6186_v8  ;;  %v6448_v55 = vmax.f32 %v6416_v40, 0.0  ;;  %v10242_v5 = vor.u32 %v10808_v12, %v10241_v34 }
 0x8dc   : > { %v5996_v47 = vpop.permute.xlu0 %5995  ;;  %v6587_v44 = vpop.f32.mrf.mxu2  ;;  %v14656_v30 = vpack.c.bf16 %v6652_v45, %v6651_v51 }
 0x8dd   : > { %v6415_v11 = vadd.f32 %v14425_v35, %v6379_v57  ;;  %v6032_v39 = vmul.f32 %v5996_v47, %v14249_v48  ;;  %7202 = vmatmul.bf16.gmra.mxu0 %v14641_v60  ;;  %7291 = vmatmul.bf16.gmra.mxu1 %v14641_v60  ;;  %v6588_v31 = vadd.f32 %v14604_v17, %v6587_v44  ;;  %v10822_v47 = vld [vmem:[#allocation9 + $0x1d4] sm:$0xf] }
 0x8df   : > { %v6447_v53 = vmax.f32 %v6415_v11, 0.0  ;;  %6126 = vrot.lane.b32.xlu1 %v6032_v39, %s11327_s23  ;;  %v6654_v24 = vmax.f32 %v6588_v31, 0.0  ;;  %v10326_v39 = vor.u32 %v10822_v47, %v10323_v36  ;;  %v10291_v31 = vld [vmem:[#allocation9 + $0x1b0] sm:$0xf0]  ;;  %v10113_v47 = vld [vmem:[#allocation9 + $0x40] sm:$0xf] }
 0x8e0   : > { %v10776_v36 = vld [vmem:[#allocation9 + $0x5c] sm:$0xf0] }
 0x8e1   : > { %v6000_v3 = vpop.permute.xlu1 %5999  ;;  %7370 = vmatmul.bf16.vlgmr.msrb.gmra.mxu2 %v14613_v54  ;;  %v6467_v7 = vpack.c.bf16 %v6448_v55, %v6447_v53  ;;  %v14669_v6 = vpack.c.bf16 %v6654_v24, %v6653_v28  ;;  %7540 = vmatpush.bf16.msrb.mxu0 %v10326_v39 }
 0x8e2   : > { %v6033_v37 = vmul.f32 %v6000_v3, %v14249_v48  ;;  %v10209_v3 = vld [vmem:[#allocation9 + $0x100] sm:$0xf] }
 0x8e3   : > { %10075 = vmatmul.msk.bf16.gmra.mxu3 %vm6507_vm9, %v6467_v7  ;;  %v10800_v7 = vld [vmem:[#allocation9 + $0x11c] sm:$0xf0] }
 0x8e4   : > { %6128 = vrot.lane.b32.xlu2 %v6033_v37, %s11327_s23  ;;  %v6590_v61 = vpop.f32.mrf.mxu2  ;;  %v6121_v58 = vpop.permute.xlu0 %6120  ;;  %v10210_v44 = vor.u32 %v10800_v7, %v10209_v3 }
 0x8e5   : > { %v6119_v1 = vpop.permute.xlu2 %6118  ;;  %v6591_v13 = vadd.f32 %v14604_v17, %v6590_v61  ;;  %v10177_v61 = vld [vmem:[#allocation9 + $0xc0] sm:$0xf] }
 0x8e6   : > { %v6188_v21 = vadd.f32 %v6119_v1, %v5868_v16 }
 0x8e7   : > { %6319 = vperm.xlu1 %11067, %v15510_v50   ;;  %v10824_v50 = vld [vmem:[#allocation9 + $0x1dc] sm:$0xf0]  ;;  %v6655_v63 = vmax.f32 %v6591_v13, 0.0 }
 0x8e8   : > { %v10306_v4 = vor.u32 %v10824_v50, %v10305_v9 }
 0x8ea   : > { %v5819_v22 = vpop.permute.xlu1 %5818  ;;  %7095 = vmatpush.bf16.msrb.mxu3 %v10306_v4  ;;  %v10814_v4 = vld [vmem:[#allocation9 + $0x194] sm:$0xf] }
 0x8eb   : > { %v5869_v27 = vmul.f32 %v14249_v48, %v5819_v22 }
 0x8ec   : > { %v6592_v59 = vpop.f32.mrf.mxu2  ;;  %v5824_v51 = vpop.permute.xlu0 %5823 }
 0x8ed   : > { %7207 = vmatmul.bf16.gmra.mxu0 %v14656_v30  ;;  %7296 = vmatmul.bf16.gmra.mxu1 %v14656_v30  ;;  %v6304_v29 = vpop.permute.xlu2 %6303  ;;  %v6189_v33 = vadd.f32 %v6121_v58, %v5869_v27  ;;  %v10792_v27 = vld [vmem:[#allocation9 + $0xdc] sm:$0xf0]  ;;  %v5870_v16 = vmul.f32 %v14249_v48, %v5824_v51 }
 0x8ee   : > { %v6350_v56 = vmul.f32 %v14325_v62, %v6304_v29  ;;  %7096 = vmatpush.bf16.msrb.mxu3 %v10274_v23 }
 0x8f0   : > { %v6382_v14 = vadd.f32 %v6350_v56, %v6189_v33  ;;  %v10178_v56 = vor.u32 %v10792_v27, %v10177_v61 }
 0x8f1   : > { %7375 = vmatmul.bf16.gmra.mxu2 %v14629_v52 }
 0x8f2   : > { %v6418_v20 = vadd.f32 %v14425_v35, %v6382_v14  ;;  %7097 = vmatpush.bf16.msrb.mxu3 %v10242_v5 }
 0x8f3   : > { %v6300_v42 = vpop.permute.xlu1 %6299 }
 0x8f4   : > { %v6349_v32 = vmul.f32 %v14325_v62, %v6300_v42  ;;  %v6450_v2 = vmax.f32 %v6418_v20, 0.0  ;;  %v6595_v43 = vpop.f32.mrf.mxu2  ;;  %v10145_v42 = vld [vmem:[#allocation9 + $0x80] sm:$0xf] }
 0x8f5   : > { %v6596_v55 = vadd.f32 %v14604_v17, %v6595_v43  ;;  %v6123_v10 = vpop.permute.xlu2 %6122 }
 0x8f6   : > { %v6381_v41 = vadd.f32 %v6349_v32, %v6188_v21  ;;  %7098 = vmatpush.bf16.msrb.mxu3 %v10210_v44  ;;  %v6190_v21 = vadd.f32 %v6123_v10, %v5870_v16  ;;  %v10294_v32 = vor.u32 %v10814_v4, %v10291_v31 }
 0x8f7   : > { %v6657_v25 = vmax.f32 %v6596_v55, 0.0  ;;  %v10114_v55 = vor.u32 %v10776_v36, %v10113_v47 }
 0x8f8   : > { %v6417_v18 = vadd.f32 %v14425_v35, %v6381_v41  ;;  %v6593_v35 = vadd.f32 %v14604_v17, %v6592_v59  ;;  %v6312_v59 = vpop.permute.xlu0 %6311  ;;  %v10146_v41 = vor.u32 %v10784_v26, %v10145_v42  ;;  %7541 = vmatpush.bf16.msrb.mxu0 %v10294_v32  ;;  %v10806_v26 = vld [vmem:[#allocation9 + $0x154] sm:$0xf] }
 0x8fa   : > { %v6449_v19 = vmax.f32 %v6417_v18, 0.0  ;;  %v6656_v38 = vmax.f32 %v6593_v35, 0.0  ;;  %7099 = vmatpush.bf16.msrb.mxu3 %v10178_v56 }
 0x8fc   : > { %v6468_v46 = vpack.c.bf16 %v6450_v2, %v6449_v19  ;;  %v6597_v8 = vpop.f32.mrf.mxu2  ;;  %v14677_v40 = vpack.c.bf16 %v6656_v38, %v6655_v63  ;;  %v5829_v33 = vpop.permute.xlu1 %5828  ;;  %v6352_v2 = vmul.f32 %v14325_v62, %v6312_v59  ;;  %v10259_v59 = vld [vmem:[#allocation9 + $0x170] sm:$0xf0] }
 0x8fd   : > { %7212 = vmatmul.bf16.gmra.mxu0 %v14669_v6  ;;  %7301 = vmatmul.bf16.gmra.mxu1 %v14669_v6  ;;  %v6598_v57 = vadd.f32 %v14604_v17, %v6597_v8  ;;  %v6308_v9 = vpop.permute.xlu2 %6307  ;;  %v5871_v24 = vmul.f32 %v14249_v48, %v5829_v33 }
 0x8fe   : > { %10076 = vmatmul.msk.bf16.gmra.mxu3 %vm6507_vm9, %v6468_v46  ;;  %v6351_v14 = vmul.f32 %v14325_v62, %v6308_v9 }
 0x8ff   : > { %v6658_v53 = vmax.f32 %v6598_v57, 0.0  ;;  %7100 = vmatpush.bf16.msrb.mxu3 %v10146_v41 }
 0x900   : > { %v6383_v18 = vadd.f32 %v6351_v14, %v6190_v21  ;;  %v6316_v21 = vpop.permute.xlu0 %6315 }
 0x901   : > { %7380 = vmatmul.bf16.gmra.mxu2 %v14641_v60  ;;  %v14684_v37 = vpack.c.bf16 %v6658_v53, %v6657_v25 }
 0x902   : > { %v6419_v15 = vadd.f32 %v14704_v49, %v6383_v18  ;;  %v6353_v18 = vmul.f32 %v14325_v62, %v6316_v21 }
 0x903   : > { %7101 = vmatpush.bf16.msrb.mxu3 %v10114_v55 }
 0x904   : > { %v6600_v11 = vpop.f32.mrf.mxu2  ;;  %v6451_v38 = vmax.f32 %v6419_v15, 0.0  ;;  %v10826_v15 = vld [vmem:[#allocation9 + $0x1ec] sm:$0xf0] }
 0x905   : > { %v6601_v45 = vadd.f32 %v14604_v17, %v6600_v11  ;;  %v14718_v11 = vld [vmem:[%s15513_s0] sm:$0xff] }
 0x906   : > { %v14721_v25 = vperm.slane %v14718_v11, 1  ;;  %v14724_v3 = vperm.slane %v14718_v11, 2  ;;  %v5839_v14 = vpop.permute.xlu2 %5838 }
 0x907   : > { %v6659_v58 = vmax.f32 %v6601_v45, 0.0  ;;  %v10768_v45 = vld [vmem:[#allocation9 + $0x1c] sm:$0xf0] }
 0x90c   : > { %v6602_v0 = vpop.f32.mrf.mxu2 }
 0x90d   : > { %7217 = vmatmul.bf16.gmra.mxu0 %v14677_v40  ;;  %7306 = vmatmul.bf16.gmra.mxu1 %v14677_v40  ;;  %v6603_v1 = vadd.f32 %v14604_v17, %v6602_v0 }
 0x90f   : > { %v6660_v29 = vmax.f32 %v6603_v1, 0.0  ;;  %v10081_v1 = vld [vmem:[#allocation9] sm:$0xf] }
 0x910   : > { %v10082_v61 = vor.u32 %v10768_v45, %v10081_v1  ;;  %v10329_v1 = vld [vmem:[#allocation9 + $0x1d8] sm:$0xf] }
 0x911   : > { %7385 = vmatmul.bf16.gmra.mxu2 %v14656_v30  ;;  %v14691_v50 = vpack.c.bf16 %v6660_v29, %v6659_v58  ;;  %v10827_v45 = vld [vmem:[#allocation9 + $0x1f4] sm:$0xf0] }
 0x912   : > { %7102 = vmatpush.bf16.msrb.mxu3 %v10082_v61  ;;  %v10330_v61 = vor.u32 %v10827_v45, %v10329_v1 }
 0x914   : > { %7629 = vmatpush.bf16.msrb.mxu1 %v10330_v61 }
 0x91d   : > { %7222 = vmatmul.bf16.gmra.mxu0 %v14684_v37  ;;  %7311 = vmatmul.bf16.gmra.mxu1 %v14684_v37 }
 0x921   : > { %7390 = vmatmul.bf16.gmra.mxu2 %v14669_v6 }
 0x926   : > { %v6605_v22 = vpop.f32.mrf.mxu2 }
 0x927   : > { %v6606_v23 = vadd.f32 %v14604_v17, %v6605_v22 }
 0x929   : > { %v6661_v63 = vmax.f32 %v6606_v23, 0.0  ;;  %v5873_v23 = vmul.f32 %v14249_v48, %v5839_v14 }
 0x92d   : > { %7227 = vmatmul.bf16.gmra.mxu0 %v14691_v50  ;;  %7316 = vmatmul.bf16.gmra.mxu1 %v14691_v50 }
 0x92e   : > { %v6607_v20 = vpop.f32.mrf.mxu2 }
 0x92f   : > { %v6608_v19 = vadd.f32 %v14604_v17, %v6607_v20 }
 0x931   : > { %7395 = vmatmul.bf16.gmra.mxu2 %v14677_v40  ;;  %v6662_v35 = vmax.f32 %v6608_v19, 0.0 }
 0x932   : > { %v6125_v28 = vpop.permute.xlu1 %6124 }
 0x933   : > { %v6191_v46 = vadd.f32 %v6125_v28, %v5871_v24  ;;  %v14709_v8 = vpack.c.bf16 %v6662_v35, %v6661_v63  ;;  %v10262_v24 = vor.u32 %v10806_v26, %v10259_v59  ;;  %v6615_v28 = vpop.f32.mrf.mxu3  ;;  %v14757_v59 = vperm.slane %v14718_v11, 3 }
 0x935   : > { %v6384_v43 = vadd.f32 %v6352_v2, %v6191_v46  ;;  %7542 = vmatpush.bf16.msrb.mxu0 %v10262_v24  ;;  %v10321_v46 = vld [vmem:[#allocation9 + $0x1d0] sm:$0xf] }
 0x937   : > { %v6420_v13 = vadd.f32 %v14704_v49, %v6384_v43 }
 0x939   : > { %v6452_v34 = vmax.f32 %v6420_v13, 0.0  ;;  %v7193_v12 = vpop.f32.mrf.mxu0  ;;  %v7282_v5 = vpop.f32.mrf.mxu1  ;;  %v10322_v13 = vor.u32 %v10826_v15, %v10321_v46 }
 0x93a   : > { %v5834_v0 = vpop.permute.xlu1 %5833  ;;  %v7194_v10 = vadd.f32 %v7193_v12, %v14721_v25  ;;  %v7283_v51 = vadd.f32 %v7282_v5, %v14724_v3 }
 0x93b   : > { %v6469_v57 = vpack.c.bf16 %v6452_v34, %v6451_v38  ;;  %v5872_v31 = vmul.f32 %v14249_v48, %v5834_v0  ;;  %7451 = vmatpush.bf16.msra.mxu3 %v10322_v13 }
 0x93d   : > { %10077 = vmatmul.msk.bf16.gmra.mxu3 %vm6507_vm9, %v6469_v57  ;;  %7232 = vmatmul.bf16.gmra.mxu0 %v14709_v8 }
 0x93e   : > { %7321 = vmatmul.bf16.gmra.mxu1 %v14709_v8  ;;  %v6129_v2 = vpop.permute.xlu2 %6128 }
 0x93f   : > { %v6193_v63 = vadd.f32 %v6129_v2, %v5873_v23 }
 0x941   : > { %7400 = vmatmul.bf16.gmra.mxu2 %v14684_v37  ;;  %v7195_v39 = vpop.f32.mrf.mxu0  ;;  %v7284_v53 = vpop.f32.mrf.mxu1 }
 0x942   : > { %v7196_v7 = vadd.f32 %v7195_v39, %v14721_v25  ;;  %v7285_v44 = vadd.f32 %v7284_v53, %v14724_v3 }
 0x944   : > { %v7844_v27 = vmax.f32 %v7194_v10, %v7196_v7  ;;  %v7881_v58 = vmax.f32 %v7283_v51, %v7285_v44 }
 0x94a   : > { %v7198_v22 = vpop.f32.mrf.mxu0  ;;  %v7287_v56 = vpop.f32.mrf.mxu1 }
 0x94b   : > { %v7199_v29 = vadd.f32 %v7198_v22, %v14721_v25  ;;  %v7288_v33 = vadd.f32 %v7287_v56, %v14724_v3 }
 0x94d   : > { %v7845_v9 = vmax.f32 %v7844_v27, %v7199_v29  ;;  %v7882_v16 = vmax.f32 %v7881_v58, %v7288_v33  ;;  %v6617_v27 = vpop.f32.mrf.mxu3 }
 0x94e   : > { %v6618_v26 = vadd.f32 %v14604_v17, %v6617_v27 }
 0x950   : > { %v6666_v23 = vmax.f32 %v6618_v26, 0.0 }
 0x951   : > { %7405 = vmatmul.bf16.gmra.mxu2 %v14691_v50  ;;  %v6127_v4 = vpop.permute.xlu1 %6126 }
 0x952   : > { %v7200_v42 = vpop.f32.mrf.mxu0  ;;  %v7289_v32 = vpop.f32.mrf.mxu1  ;;  %v6192_v20 = vadd.f32 %v6127_v4, %v5872_v31  ;;  %v10823_v4 = vld [vmem:[#allocation9 + $0x1dc] sm:$0xf] }
 0x953   : > { %v7201_v19 = vadd.f32 %v7200_v42, %v14721_v25  ;;  %v7290_v35 = vadd.f32 %v7289_v32, %v14724_v3  ;;  %v10331_v31 = vld [vmem:[#allocation9 + $0x1f8] sm:$0xf0] }
 0x954   : > { %v6610_v41 = vpop.f32.mrf.mxu2  ;;  %v6385_v43 = vadd.f32 %v6353_v18, %v6192_v20  ;;  %v14753_v32 = vor.u32 %v10823_v4, %v10331_v31  ;;  %v10297_v31 = vld [vmem:[#allocation9 + $0x198] sm:$0xf] }
 0x955   : > { %v7846_v5 = vmax.f32 %v7845_v9, %v7201_v19  ;;  %v6611_v57 = vadd.f32 %v14604_v17, %v6610_v41  ;;  %v7883_v55 = vmax.f32 %v7882_v16, %v7290_v35  ;;  %v6620_v42 = vpop.f32.mrf.mxu3  ;;  %v6616_v41 = vadd.f32 %v14604_v17, %v6615_v28 }
 0x956   : > { %v6421_v39 = vadd.f32 %v14704_v49, %v6385_v43  ;;  %10853 = vmatpush.bf16.msra.mxu2 %v14753_v32 }
 0x957   : > { %v6663_v51 = vmax.f32 %v6611_v57, 0.0 }
 0x958   : > { %v6453_v29 = vmax.f32 %v6421_v39, 0.0 }
 0x959   : > { %v6320_v38 = vpop.permute.xlu1 %6319 }
 0x95a   : > { %v6354_v34 = vmul.f32 %v14325_v62, %v6320_v38  ;;  %v7203_v12 = vpop.f32.mrf.mxu0  ;;  %v7292_v36 = vpop.f32.mrf.mxu1 }
 0x95b   : > { %v7204_v47 = vadd.f32 %v7203_v12, %v14721_v25  ;;  %v7293_v53 = vadd.f32 %v7292_v36, %v14724_v3  ;;  %v10798_v12 = vld [vmem:[#allocation9 + $0x114] sm:$0xf] }
 0x95c   : > { %v6386_v48 = vadd.f32 %v6354_v34, %v6193_v63  ;;  %v6612_v7 = vpop.f32.mrf.mxu2  ;;  %v6665_v63 = vmax.f32 %v6616_v41, 0.0 }
 0x95d   : > { %v7847_v44 = vmax.f32 %v7846_v5, %v7204_v47  ;;  %v6613_v0 = vadd.f32 %v14604_v17, %v6612_v7  ;;  %v7884_v10 = vmax.f32 %v7883_v55, %v7293_v53  ;;  %v10227_v5 = vld [vmem:[#allocation9 + $0x130] sm:$0xf0]  ;;  %v6622_v47 = vpop.f32.mrf.mxu3 }
 0x95e   : > { %v6422_v62 = vadd.f32 %v14704_v49, %v6386_v48  ;;  %v10230_v28 = vor.u32 %v10798_v12, %v10227_v5  ;;  %v14765_v57 = vpack.c.bf16 %v6666_v23, %v6665_v63  ;;  %v6623_v1 = vadd.f32 %v14604_v17, %v6622_v47 }
 0x95f   : > { %v6664_v22 = vmax.f32 %v6613_v0, 0.0  ;;  %v10818_v0 = vld [vmem:[#allocation9 + $0x1ac] sm:$0xf0] }
 0x960   : > { %v6454_v56 = vmax.f32 %v6422_v62, 0.0  ;;  %7543 = vmatpush.bf16.msrb.mxu0 %v10230_v28 }
 0x961   : > { %v14745_v58 = vpack.c.bf16 %v6664_v22, %v6663_v51  ;;  %7410 = vmatmul.bf16.gmra.mxu2 %v14709_v8  ;;  %v6621_v22 = vadd.f32 %v14604_v17, %v6620_v42 }
 0x962   : > { %v7205_v33 = vpop.f32.mrf.mxu0  ;;  %v6470_v9 = vpack.c.bf16 %v6454_v56, %v6453_v29  ;;  %v7294_v16 = vpop.f32.mrf.mxu1 }
 0x963   : > { %7237 = vmatmul.bf16.gmra.mxu0 %v14745_v58  ;;  %7326 = vmatmul.bf16.gmra.mxu1 %v14745_v58  ;;  %v7206_v14 = vadd.f32 %v7205_v33, %v14721_v25  ;;  %v7295_v21 = vadd.f32 %v7294_v16, %v14724_v3  ;;  %v6668_v16 = vmax.f32 %v6623_v1, 0.0  ;;  %v6667_v26 = vmax.f32 %v6621_v22, 0.0 }
 0x964   : > { %v7371_v49 = vpop.f32.mrf.mxu2  ;;  %10078 = vmatmul.msk.bf16.gmra.mxu3 %vm6507_vm9, %v6470_v9 }
 0x965   : > { %v7848_v24 = vmax.f32 %v7847_v44, %v7206_v14  ;;  %v7885_v19 = vmax.f32 %v7884_v10, %v7295_v21  ;;  %v7372_v43 = vadd.f32 %v7371_v49, %v14757_v59  ;;  %v10289_v44 = vld [vmem:[#allocation9 + $0x190] sm:$0xf]  ;;  %v10819_v21 = vld [vmem:[#allocation9 + $0x1b4] sm:$0xf0] }
 0x966   : > { %v10290_v10 = vor.u32 %v10818_v0, %v10289_v44  ;;  %v6625_v45 = vpop.f32.mrf.mxu3  ;;  %v10298_v41 = vor.u32 %v10819_v21, %v10297_v31 }
 0x967   : > { %v6626_v12 = vadd.f32 %v14604_v17, %v6625_v45 }
 0x968   : > { %7452 = vmatpush.bf16.msra.mxu3 %v10290_v10  ;;  %7630 = vmatpush.bf16.msrb.mxu1 %v10298_v41  ;;  %v10195_v10 = vld [vmem:[#allocation9 + $0xf0] sm:$0xf0] }
 0x969   : > { %v6669_v0 = vmax.f32 %v6626_v12, 0.0 }
 0x96a   : > { %v7208_v20 = vpop.f32.mrf.mxu0  ;;  %v7297_v2 = vpop.f32.mrf.mxu1 }
 0x96b   : > { %v7209_v18 = vadd.f32 %v7208_v20, %v14721_v25  ;;  %v7298_v46 = vadd.f32 %v7297_v2, %v14724_v3 }
 0x96c   : > { %v7373_v15 = vpop.f32.mrf.mxu2 }
 0x96d   : > { %v7849_v35 = vmax.f32 %v7848_v24, %v7209_v18  ;;  %v7374_v13 = vadd.f32 %v7373_v15, %v14757_v59  ;;  %v7886_v38 = vmax.f32 %v7885_v19, %v7298_v46  ;;  %v14779_v24 = vpack.c.bf16 %v6668_v16, %v6667_v26 }
 0x96e   : > { %v6627_v2 = vpop.f32.mrf.mxu3 }
 0x96f   : > { %v7918_v34 = vmax.f32 %v7372_v43, %v7374_v13  ;;  %v10815_v43 = vld [vmem:[#allocation9 + $0x19c] sm:$0xf]  ;;  %v6628_v63 = vadd.f32 %v14604_v17, %v6627_v2 }
 0x971   : > { %7415 = vmatmul.bf16.gmra.mxu2 %v14745_v58 }
 0x972   : > { %v7210_v36 = vpop.f32.mrf.mxu0  ;;  %v7299_v39 = vpop.f32.mrf.mxu1 }
 0x973   : > { %7242 = vmatmul.bf16.gmra.mxu0 %v14765_v57  ;;  %7331 = vmatmul.bf16.gmra.mxu1 %v14765_v57  ;;  %v7211_v53 = vadd.f32 %v7210_v36, %v14721_v25  ;;  %v7300_v62 = vadd.f32 %v7299_v39, %v14724_v3 }
 0x974   : > { %v7376_v55 = vpop.f32.mrf.mxu2  ;;  %7103 = vmatmul.bf16.vlgmr.msrb.gmra.mxu3 %v14613_v54 }
 0x975   : > { %v7377_v48 = vadd.f32 %v7376_v55, %v14757_v59  ;;  %v7850_v61 = vmax.f32 %v7849_v35, %v7211_v53  ;;  %v7887_v56 = vmax.f32 %v7886_v38, %v7300_v62  ;;  %v10299_v35 = vld [vmem:[#allocation9 + $0x1b8] sm:$0xf0]  ;;  %v6670_v53 = vmax.f32 %v6628_v63, 0.0  ;;  %v10790_v62 = vld [vmem:[#allocation9 + $0xd4] sm:$0xf] }
 0x976   : > { %v14788_v38 = vor.u32 %v10815_v43, %v10299_v35  ;;  %v10198_v1 = vor.u32 %v10790_v62, %v10195_v10  ;;  %v10265_v35 = vld [vmem:[#allocation9 + $0x158] sm:$0xf] }
 0x977   : > { %v7919_v7 = vmax.f32 %v7918_v34, %v7377_v48 }
 0x978   : > { %10854 = vmatpush.bf16.msra.mxu2 %v14788_v38  ;;  %7544 = vmatpush.bf16.msrb.mxu0 %v10198_v1 }
 0x97a   : > { %v7213_v51 = vpop.f32.mrf.mxu0  ;;  %v7302_v29 = vpop.f32.mrf.mxu1 }
 0x97b   : > { %v7214_v27 = vadd.f32 %v7213_v51, %v14721_v25  ;;  %v7303_v33 = vadd.f32 %v7302_v29, %v14724_v3  ;;  %v14795_v51 = vpack.c.bf16 %v6670_v53, %v6669_v0  ;;  %v10807_v53 = vld [vmem:[#allocation9 + $0x15c] sm:$0xf] }
 0x97c   : > { %v7378_v9 = vpop.f32.mrf.mxu2 }
 0x97d   : > { %v7851_v49 = vmax.f32 %v7850_v61, %v7214_v27  ;;  %v7379_v14 = vadd.f32 %v7378_v9, %v14757_v59  ;;  %v7888_v4 = vmax.f32 %v7887_v56, %v7303_v33 }
 0x97f   : > { %v7920_v20 = vmax.f32 %v7919_v7, %v7379_v14  ;;  %v10810_v14 = vld [vmem:[#allocation9 + $0x16c] sm:$0xf0] }
 0x981   : > { %7420 = vmatmul.bf16.gmra.mxu2 %v14765_v57  ;;  %v6630_v36 = vpop.f32.mrf.mxu3 }
 0x982   : > { %v7215_v42 = vpop.f32.mrf.mxu0  ;;  %v7304_v18 = vpop.f32.mrf.mxu1 }
 0x983   : > { %7247 = vmatmul.bf16.gmra.mxu0 %v14779_v24  ;;  %7336 = vmatmul.bf16.gmra.mxu1 %v14779_v24  ;;  %v7216_v15 = vadd.f32 %v7215_v42, %v14721_v25  ;;  %v7305_v13 = vadd.f32 %v7304_v18, %v14724_v3 }
 0x984   : > { %v7381_v19 = vpop.f32.mrf.mxu2  ;;  %7108 = vmatmul.bf16.gmra.mxu3 %v14629_v52 }
 0x985   : > { %v7382_v46 = vadd.f32 %v7381_v19, %v14757_v59  ;;  %v7852_v5 = vmax.f32 %v7851_v49, %v7216_v15  ;;  %v7889_v39 = vmax.f32 %v7888_v4, %v7305_v13  ;;  %v10257_v49 = vld [vmem:[#allocation9 + $0x150] sm:$0xf]  ;;  %v10811_v13 = vld [vmem:[#allocation9 + $0x174] sm:$0xf0] }
 0x986   : > { %v10258_v31 = vor.u32 %v10810_v14, %v10257_v49 }
 0x987   : > { %v7921_v23 = vmax.f32 %v7920_v20, %v7382_v46  ;;  %v6631_v20 = vadd.f32 %v14604_v17, %v6630_v36 }
 0x988   : > { %7453 = vmatpush.bf16.msra.mxu3 %v10258_v31 }
 0x989   : > { %v6632_v33 = vpop.f32.mrf.mxu3  ;;  %v6671_v63 = vmax.f32 %v6631_v20, 0.0 }
 0x98a   : > { %v7218_v34 = vpop.f32.mrf.mxu0  ;;  %v7307_v47 = vpop.f32.mrf.mxu1  ;;  %v6633_v21 = vadd.f32 %v14604_v17, %v6632_v33  ;;  %v10782_v33 = vld [vmem:[#allocation9 + $0x94] sm:$0xf] }
 0x98b   : > { %v7219_v28 = vadd.f32 %v7218_v34, %v14721_v25  ;;  %v7308_v55 = vadd.f32 %v7307_v47, %v14724_v3  ;;  %v10266_v34 = vor.u32 %v10811_v13, %v10265_v35 }
 0x98c   : > { %v7383_v48 = vpop.f32.mrf.mxu2  ;;  %v6672_v15 = vmax.f32 %v6633_v21, 0.0 }
 0x98d   : > { %v7853_v7 = vmax.f32 %v7852_v5, %v7219_v28  ;;  %v7890_v44 = vmax.f32 %v7889_v39, %v7308_v55  ;;  %v7384_v45 = vadd.f32 %v7383_v48, %v14757_v59  ;;  %7631 = vmatpush.bf16.msrb.mxu1 %v10266_v34 }
 0x98e   : > { %v14809_v12 = vpack.c.bf16 %v6672_v15, %v6671_v63  ;;  %v10803_v15 = vld [vmem:[#allocation9 + $0x134] sm:$0xf0] }
 0x98f   : > { %v7922_v29 = vmax.f32 %v7921_v23, %v7384_v45 }
 0x991   : > { %7425 = vmatmul.bf16.gmra.mxu2 %v14779_v24 }
 0x992   : > { %v7220_v22 = vpop.f32.mrf.mxu0  ;;  %v7309_v61 = vpop.f32.mrf.mxu1 }
 0x993   : > { %7252 = vmatmul.bf16.gmra.mxu0 %v14795_v51  ;;  %7341 = vmatmul.bf16.gmra.mxu1 %v14795_v51  ;;  %v7221_v9 = vadd.f32 %v7220_v22, %v14721_v25  ;;  %v7310_v4 = vadd.f32 %v7309_v61, %v14724_v3 }
 0x994   : > { %v7386_v27 = vpop.f32.mrf.mxu2  ;;  %7113 = vmatmul.bf16.gmra.mxu3 %v14641_v60 }
 0x995   : > { %v7387_v56 = vadd.f32 %v7386_v27, %v14757_v59  ;;  %v7854_v41 = vmax.f32 %v7853_v7, %v7221_v9  ;;  %v7891_v2 = vmax.f32 %v7890_v44, %v7310_v4  ;;  %v10267_v7 = vld [vmem:[#allocation9 + $0x178] sm:$0xf0]  ;;  %v10163_v9 = vld [vmem:[#allocation9 + $0xb0] sm:$0xf0] }
 0x996   : > { %v14819_v0 = vor.u32 %v10807_v53, %v10267_v7  ;;  %v10166_v49 = vor.u32 %v10782_v33, %v10163_v9  ;;  %v14842_v7 = vld [vmem:[%s15512_s4] ss:$0 sm:$0xff] }
 0x997   : > { %v7923_v16 = vmax.f32 %v7922_v29, %v7387_v56  ;;  %v10774_v9 = vld [vmem:[#allocation9 + $0x54] sm:$0xf] }
 0x998   : > { %10855 = vmatpush.bf16.msra.mxu2 %v14819_v0  ;;  %7545 = vmatpush.bf16.msrb.mxu0 %v10166_v49 }
 0x99a   : > { %v7223_v26 = vpop.f32.mrf.mxu0  ;;  %v7312_v18 = vpop.f32.mrf.mxu1 }
 0x99b   : > { %v7224_v42 = vadd.f32 %v7223_v26, %v14721_v25  ;;  %v7313_v19 = vadd.f32 %v7312_v18, %v14724_v3  ;;  %v10802_v18 = vld [vmem:[#allocation9 + $0x12c] sm:$0xf0] }
 0x99c   : > { %v7388_v46 = vpop.f32.mrf.mxu2 }
 0x99d   : > { %v7855_v23 = vmax.f32 %v7854_v41, %v7224_v42  ;;  %v7892_v43 = vmax.f32 %v7891_v2, %v7313_v19  ;;  %v7389_v5 = vadd.f32 %v7388_v46, %v14757_v59  ;;  %v10225_v42 = vld [vmem:[#allocation9 + $0x110] sm:$0xf]  ;;  %v10233_v2 = vld [vmem:[#allocation9 + $0x118] sm:$0xf] }
 0x99e   : > { %v10226_v46 = vor.u32 %v10802_v18, %v10225_v42 }
 0x99f   : > { %v7924_v36 = vmax.f32 %v7923_v16, %v7389_v5 }
 0x9a0   : > { %7454 = vmatpush.bf16.msra.mxu3 %v10226_v46  ;;  %v10795_v46 = vld [vmem:[#allocation9 + $0xf4] sm:$0xf0] }
 0x9a1   : > { %7430 = vmatmul.bf16.gmra.mxu2 %v14795_v51 }
 0x9a2   : > { %v7225_v17 = vpop.f32.mrf.mxu0  ;;  %v7314_v28 = vpop.f32.mrf.mxu1 }
 0x9a3   : > { %7257 = vmatmul.bf16.gmra.mxu0 %v14809_v12  ;;  %7346 = vmatmul.bf16.gmra.mxu1 %v14809_v12  ;;  %v7226_v55 = vadd.f32 %v7225_v17, %v14721_v25  ;;  %v7315_v44 = vadd.f32 %v7314_v28, %v14724_v3 }
 0x9a4   : > { %v7391_v47 = vpop.f32.mrf.mxu2  ;;  %7118 = vmatmul.bf16.gmra.mxu3 %v14656_v30 }
 0x9a5   : > { %v7392_v39 = vadd.f32 %v7391_v47, %v14757_v59  ;;  %v7856_v10 = vmax.f32 %v7855_v23, %v7226_v55  ;;  %v7893_v22 = vmax.f32 %v7892_v43, %v7315_v44  ;;  %v10234_v23 = vor.u32 %v10803_v15, %v10233_v2  ;;  %v10791_v15 = vld [vmem:[#allocation9 + $0xdc] sm:$0xf] }
 0x9a7   : > { %v7925_v48 = vmax.f32 %v7924_v36, %v7392_v39  ;;  %7632 = vmatpush.bf16.msrb.mxu1 %v10234_v23 }
 0x9aa   : > { %v7228_v62 = vpop.f32.mrf.mxu0  ;;  %v7317_v45 = vpop.f32.mrf.mxu1 }
 0x9ab   : > { %v7229_v1 = vadd.f32 %v7228_v62, %v14721_v25  ;;  %v7318_v61 = vadd.f32 %v7317_v45, %v14724_v3 }
 0x9ac   : > { %v7393_v27 = vpop.f32.mrf.mxu2 }
 0x9ad   : > { %v7857_v29 = vmax.f32 %v7856_v10, %v7229_v1  ;;  %v7894_v56 = vmax.f32 %v7893_v22, %v7318_v61  ;;  %v7394_v16 = vadd.f32 %v7393_v27, %v14757_v59  ;;  %v10799_v10 = vld [vmem:[#allocation9 + $0x11c] sm:$0xf] }
 0x9ae   : > { %v10235_v1 = vld [vmem:[#allocation9 + $0x138] sm:$0xf0] }
 0x9af   : > { %v7926_v21 = vmax.f32 %v7925_v48, %v7394_v16  ;;  %v14845_v22 = vor.u32 %v10799_v10, %v10235_v1  ;;  %v10131_v16 = vld [vmem:[#allocation9 + $0x70] sm:$0xf0] }
 0x9b0   : > { %v10134_v49 = vor.u32 %v10774_v9, %v10131_v16 }
 0x9b1   : > { %7435 = vmatmul.bf16.gmra.mxu2 %v14809_v12 }
 0x9b2   : > { %v7230_v14 = vpop.f32.mrf.mxu0  ;;  %v7319_v4 = vpop.f32.mrf.mxu1  ;;  %10856 = vmatpush.bf16.msra.mxu2 %v14845_v22  ;;  %7546 = vmatpush.bf16.msrb.mxu0 %v10134_v49 }
 0x9b3   : > { %v7231_v20 = vadd.f32 %v7230_v14, %v14721_v25  ;;  %v7320_v19 = vadd.f32 %v7319_v4, %v14724_v3 }
 0x9b4   : > { %v7396_v31 = vpop.f32.mrf.mxu2  ;;  %7123 = vmatmul.bf16.gmra.mxu3 %v14669_v6 }
 0x9b5   : > { %v7397_v26 = vadd.f32 %v7396_v31, %v14757_v59  ;;  %v7858_v35 = vmax.f32 %v7857_v29, %v7231_v20  ;;  %v7895_v34 = vmax.f32 %v7894_v56, %v7320_v19  ;;  %v10193_v20 = vld [vmem:[#allocation9 + $0xd0] sm:$0xf]  ;;  %v10201_v19 = vld [vmem:[#allocation9 + $0xd8] sm:$0xf] }
 0x9b6   : > { %v10202_v23 = vor.u32 %v10795_v46, %v10201_v19 }
 0x9b7   : > { %v7927_v41 = vmax.f32 %v7926_v21, %v7397_v26 }
 0x9b8   : > { %7633 = vmatpush.bf16.msrb.mxu1 %v10202_v23 }
 0x9ba   : > { %v7233_v43 = vpop.f32.mrf.mxu0 }
 0x9bb   : > { %v7234_v13 = vadd.f32 %v7233_v43, %v14721_v25  ;;  %v7322_v63 = vpop.f32.mrf.mxu1  ;;  %v10203_v43 = vld [vmem:[#allocation9 + $0xf8] sm:$0xf0] }
 0x9bc   : > { %v7323_v5 = vadd.f32 %v7322_v63, %v14724_v3  ;;  %v7398_v17 = vpop.f32.mrf.mxu2  ;;  %v10787_v63 = vld [vmem:[#allocation9 + $0xb4] sm:$0xf0] }
 0x9bd   : > { %v14832_v28 = vmax.f32 %v7858_v35, %v7234_v13  ;;  %v7399_v39 = vadd.f32 %v7398_v17, %v14757_v59  ;;  %v14857_v35 = vor.u32 %v10791_v15, %v10203_v43  ;;  %v10169_v13 = vld [vmem:[#allocation9 + $0x98] sm:$0xf] }
 0x9be   : > { %v14834_v47 = vmax.f32 %v7895_v34, %v7323_v5  ;;  %v10783_v34 = vld [vmem:[#allocation9 + $0x9c] sm:$0xf] }
 0x9bf   : > { %v7928_v48 = vmax.f32 %v7927_v41, %v7399_v39  ;;  %v10794_v41 = vld [vmem:[#allocation9 + $0xec] sm:$0xf0]  ;;  %10857 = vmatpush.bf16.msra.mxu2 %v14857_v35  ;;  %v10170_v39 = vor.u32 %v10787_v63, %v10169_v13 }
 0x9c0   : > { %v6635_v36 = vpop.f32.mrf.mxu3  ;;  %v10194_v2 = vor.u32 %v10794_v41, %v10193_v20  ;;  %v10771_v41 = vld [vmem:[#allocation9 + $0x34] sm:$0xf0] }
 0x9c1   : > { %v6636_v44 = vadd.f32 %v14842_v7, %v6635_v36  ;;  %7634 = vmatpush.bf16.msrb.mxu1 %v10170_v39 }
 0x9c2   : > { %v7235_v42 = vpop.f32.mrf.mxu0  ;;  %7455 = vmatpush.bf16.msra.mxu3 %v10194_v2 }
 0x9c3   : > { %v6673_v27 = vmax.f32 %v6636_v44, 0.0  ;;  %v7324_v18 = vpop.f32.mrf.mxu1  ;;  %v7236_v5 = vadd.f32 %v7235_v42, %v14721_v25  ;;  %v10779_v44 = vld [vmem:[#allocation9 + $0x74] sm:$0xf0]  ;;  %v10767_v42 = vld [vmem:[#allocation9 + $0x1c] sm:$0xf] }
 0x9c4   : > { %v7401_v55 = vpop.f32.mrf.mxu2  ;;  %7128 = vmatmul.bf16.gmra.mxu3 %v14677_v40  ;;  %v7325_v17 = vadd.f32 %v7324_v18, %v14724_v3  ;;  %v10107_v18 = vld [vmem:[#allocation9 + $0x38] sm:$0xf0] }
 0x9c5   : > { %v7402_v53 = vadd.f32 %v7401_v55, %v14757_v59  ;;  %v10171_v55 = vld [vmem:[#allocation9 + $0xb8] sm:$0xf0]  ;;  %v7860_v10 = vmax.f32 %v14832_v28, %v7236_v5  ;;  %v10766_v28 = vld [vmem:[#allocation9 + $0x14] sm:$0xf]  ;;  %v14875_v15 = vor.u32 %v10767_v42, %v10107_v18 }
 0x9c6   : > { %v7897_v1 = vmax.f32 %v14834_v47, %v7325_v17  ;;  %v10105_v47 = vld [vmem:[#allocation9 + $0x18] sm:$0xf] }
 0x9c7   : > { %v7929_v62 = vmax.f32 %v7928_v48, %v7402_v53  ;;  %v14862_v48 = vor.u32 %v10783_v34, %v10171_v55  ;;  %v10137_v53 = vld [vmem:[#allocation9 + $0x58] sm:$0xf]  ;;  %v10106_v46 = vor.u32 %v10771_v41, %v10105_v47  ;;  %v14899_v47 = vperm.slane %v14718_v11, 0 }
 0x9c8   : > { %v6637_v45 = vpop.f32.mrf.mxu3 }
 0x9c9   : > { %v6638_v61 = vadd.f32 %v14842_v7, %v6637_v45  ;;  %10858 = vmatpush.bf16.msra.mxu2 %v14862_v48 }
 0x9cb   : > { %v6674_v29 = vmax.f32 %v6638_v61, 0.0 }
 0x9cc   : > { %v7403_v56 = vpop.f32.mrf.mxu2 }
 0x9cd   : > { %v14849_v33 = vpack.c.bf16 %v6674_v29, %v6673_v27  ;;  %v7404_v14 = vadd.f32 %v7403_v56, %v14757_v59  ;;  %v10138_v27 = vor.u32 %v10779_v44, %v10137_v53  ;;  %v10139_v29 = vld [vmem:[#allocation9 + $0x78] sm:$0xf0] }
 0x9cf   : > { %7262 = vmatmul.bf16.gmra.mxu0 %v14849_v33  ;;  %7351 = vmatmul.bf16.gmra.mxu1 %v14849_v33  ;;  %v7930_v31 = vmax.f32 %v7929_v62, %v7404_v14  ;;  %v10775_v62 = vld [vmem:[#allocation9 + $0x5c] sm:$0xf] }
 0x9d0   : > { %7440 = vmatmul.bf16.gmra.mxu2 %v14849_v33  ;;  %v14870_v49 = vor.u32 %v10775_v62, %v10139_v29  ;;  %7635 = vmatpush.bf16.msrb.mxu1 %v10138_v27 }
 0x9d2   : > { %10859 = vmatpush.bf16.msra.mxu2 %v14870_v49 }
 0x9d4   : > { %v7406_v4 = vpop.f32.mrf.mxu2  ;;  %7133 = vmatmul.bf16.gmra.mxu3 %v14684_v37  ;;  %7636 = vmatpush.bf16.msrb.mxu1 %v10106_v46 }
 0x9d5   : > { %v7407_v21 = vadd.f32 %v7406_v4, %v14757_v59 }
 0x9d6   : > { %10860 = vmatpush.bf16.msra.mxu2 %v14875_v15 }
 0x9d7   : > { %v7931_v26 = vmax.f32 %v7930_v31, %v7407_v21  ;;  %v10099_v31 = vld [vmem:[#allocation9 + $0x30] sm:$0xf0] }
 0x9d8   : > { %v10102_v20 = vor.u32 %v10766_v28, %v10099_v31 }
 0x9da   : > { %7547 = vmatpush.bf16.msrb.mxu0 %v10102_v20 }
 0x9dc   : > { %v7408_v36 = vpop.f32.mrf.mxu2 }
 0x9dd   : > { %v7409_v56 = vadd.f32 %v7408_v36, %v14757_v59 }
 0x9de   : > { %7718 = vmatpush.bf16.msra.mxu0 %v14753_v32 }
 0x9df   : > { %v7932_v2 = vmax.f32 %v7931_v26, %v7409_v56 }
 0x9e0   : > { %v7238_v45 = vpop.f32.mrf.mxu0  ;;  %v7327_v61 = vpop.f32.mrf.mxu1 }
 0x9e1   : > { %v7239_v9 = vadd.f32 %v7238_v45, %v14721_v25  ;;  %v7328_v16 = vadd.f32 %v7327_v61, %v14724_v3 }
 0x9e2   : > { %7719 = vmatpush.bf16.msra.mxu0 %v14788_v38 }
 0x9e3   : > { %v7861_v14 = vmax.f32 %v7860_v10, %v7239_v9  ;;  %v7898_v4 = vmax.f32 %v7897_v1, %v7328_v16 }
 0x9e4   : > { %v7411_v21 = vpop.f32.mrf.mxu2  ;;  %7138 = vmatmul.bf16.gmra.mxu3 %v14691_v50 }
 0x9e5   : > { %v7412_v19 = vadd.f32 %v7411_v21, %v14757_v59 }
 0x9e6   : > { %7720 = vmatpush.bf16.msra.mxu0 %v14819_v0 }
 0x9e7   : > { %v7933_v23 = vmax.f32 %v7932_v2, %v7412_v19  ;;  %v6640_v43 = vpop.f32.mrf.mxu3 }
 0x9e8   : > { %v7240_v13 = vpop.f32.mrf.mxu0  ;;  %v7329_v63 = vpop.f32.mrf.mxu1  ;;  %v6641_v17 = vadd.f32 %v14842_v7, %v6640_v43 }
 0x9e9   : > { %v7241_v34 = vadd.f32 %v7240_v13, %v14721_v25  ;;  %v7330_v5 = vadd.f32 %v7329_v63, %v14724_v3 }
 0x9ea   : > { %v6675_v1 = vmax.f32 %v6641_v17, 0.0  ;;  %7721 = vmatpush.bf16.msra.mxu0 %v14845_v22 }
 0x9eb   : > { %v7862_v39 = vmax.f32 %v7861_v14, %v7241_v34  ;;  %v7899_v44 = vmax.f32 %v7898_v4, %v7330_v5  ;;  %v10161_v14 = vld [vmem:[#allocation9 + $0x90] sm:$0xf] }
 0x9ec   : > { %v7413_v26 = vpop.f32.mrf.mxu2  ;;  %v10786_v4 = vld [vmem:[#allocation9 + $0xac] sm:$0xf0] }
 0x9ed   : > { %v7414_v62 = vadd.f32 %v7413_v26, %v14757_v59  ;;  %v10162_v31 = vor.u32 %v10786_v4, %v10161_v14 }
 0x9ee   : > { %7722 = vmatpush.bf16.msra.mxu0 %v14857_v35 }
 0x9ef   : > { %v6642_v36 = vpop.f32.mrf.mxu3  ;;  %7456 = vmatpush.bf16.msra.mxu3 %v10162_v31 }
 0x9f0   : > { %v6643_v55 = vadd.f32 %v14842_v7, %v6642_v36  ;;  %v7243_v32 = vpop.f32.mrf.mxu0  ;;  %v7332_v53 = vpop.f32.mrf.mxu1  ;;  %v7934_v7 = vmax.f32 %v7933_v23, %v7414_v62 }
 0x9f1   : > { %v7244_v38 = vadd.f32 %v7243_v32, %v14721_v25  ;;  %v7333_v10 = vadd.f32 %v7332_v53, %v14724_v3 }
 0x9f2   : > { %v6676_v45 = vmax.f32 %v6643_v55, 0.0  ;;  %7723 = vmatpush.bf16.msra.mxu0 %v14862_v48 }
 0x9f3   : > { %v7863_v61 = vmax.f32 %v7862_v39, %v7244_v38  ;;  %v7900_v27 = vmax.f32 %v7899_v44, %v7333_v10 }
 0x9f4   : > { %v14889_v29 = vpack.c.bf16 %v6676_v45, %v6675_v1  ;;  %v7416_v0 = vpop.f32.mrf.mxu2  ;;  %7143 = vmatmul.bf16.gmra.mxu3 %v14709_v8 }
 0x9f5   : > { %v7417_v56 = vadd.f32 %v7416_v0, %v14757_v59 }
 0x9f6   : > { %7267 = vmatmul.bf16.gmra.mxu0 %v14889_v29  ;;  %7356 = vmatmul.bf16.gmra.mxu1 %v14889_v29 }
 0x9f7   : > { %v7935_v9 = vmax.f32 %v7934_v7, %v7417_v56  ;;  %7445 = vmatmul.bf16.gmra.mxu2 %v14889_v29  ;;  %v7104_v16 = vpop.f32.mrf.mxu3  ;;  %7724 = vmatpush.bf16.msra.mxu0 %v14870_v49 }
 0x9f8   : > { %v7245_v22 = vpop.f32.mrf.mxu0  ;;  %v7334_v28 = vpop.f32.mrf.mxu1  ;;  %v7105_v18 = vadd.f32 %v7104_v16, %v14899_v47 }
 0x9f9   : > { %v7246_v21 = vadd.f32 %v7245_v22, %v14721_v25  ;;  %v7335_v41 = vadd.f32 %v7334_v28, %v14724_v3 }
 0x9fb   : > { %v7864_v35 = vmax.f32 %v7863_v61, %v7246_v21  ;;  %v7901_v23 = vmax.f32 %v7900_v27, %v7335_v41  ;;  %7725 = vmatpush.bf16.msra.mxu0 %v14875_v15  ;;  %v10778_v41 = vld [vmem:[#allocation9 + $0x6c] sm:$0xf0] }
 0x9fc   : > { %v7418_v20 = vpop.f32.mrf.mxu2 }
 0x9fd   : > { %v7419_v48 = vadd.f32 %v7418_v20, %v14757_v59  ;;  %v10129_v20 = vld [vmem:[#allocation9 + $0x50] sm:$0xf] }
 0x9ff   : > { %v7106_v42 = vpop.f32.mrf.mxu3  ;;  %v7936_v26 = vmax.f32 %v7935_v9, %v7419_v48 }
 0xa00   : > { %v7107_v2 = vadd.f32 %v7106_v42, %v14899_v47  ;;  %v7248_v19 = vpop.f32.mrf.mxu0  ;;  %v7337_v46 = vpop.f32.mrf.mxu1 }
 0xa01   : > { %v7249_v11 = vadd.f32 %v7248_v19, %v14721_v25  ;;  %v7338_v43 = vadd.f32 %v7337_v46, %v14724_v3 }
 0xa02   : > { %v7807_v13 = vmax.f32 %v7105_v18, %v7107_v2  ;;  %v10130_v2 = vor.u32 %v10778_v41, %v10129_v20 }
 0xa03   : > { %v7865_v63 = vmax.f32 %v7864_v35, %v7249_v11  ;;  %v7902_v34 = vmax.f32 %v7901_v23, %v7338_v43 }
 0xa04   : > { %v7421_v49 = vpop.f32.mrf.mxu2  ;;  %7148 = vmatmul.bf16.gmra.mxu3 %v14745_v58 }
 0xa05   : > { %v7422_v5 = vadd.f32 %v7421_v49, %v14757_v59  ;;  %7457 = vmatpush.bf16.msra.mxu3 %v10130_v2 }
 0xa06   : > { %7548 = vmatmul.bf16.vlgmr.msrb.gmra.mxu0 %v14613_v54  ;;  %7637 = vmatmul.bf16.vlgmr.msrb.gmra.mxu1 %v14613_v54 }
 0xa07   : > { %v7937_v17 = vmax.f32 %v7936_v26, %v7422_v5  ;;  %7731 = vmatmul.bf16.vlgmr.msra.gmra.mxu2 %v14629_v52  ;;  %v7109_v36 = vpop.f32.mrf.mxu3 }
 0xa08   : > { %v7110_v39 = vadd.f32 %v7109_v36, %v14899_v47  ;;  %v7250_v55 = vpop.f32.mrf.mxu0  ;;  %v7339_v32 = vpop.f32.mrf.mxu1 }
 0xa09   : > { %v7251_v15 = vadd.f32 %v7250_v55, %v14721_v25  ;;  %v7340_v62 = vadd.f32 %v7339_v32, %v14724_v3 }
 0xa0a   : > { %v7808_v53 = vmax.f32 %v7807_v13, %v7110_v39 }
 0xa0b   : > { %v7866_v10 = vmax.f32 %v7865_v63, %v7251_v15  ;;  %v7903_v27 = vmax.f32 %v7902_v34, %v7340_v62 }
 0xa0c   : > { %v7423_v44 = vpop.f32.mrf.mxu2 }
 0xa0d   : > { %v7424_v0 = vadd.f32 %v7423_v44, %v14757_v59 }
 0xa0f   : > { %v7111_v38 = vpop.f32.mrf.mxu3  ;;  %v7938_v22 = vmax.f32 %v7937_v17, %v7424_v0 }
 0xa10   : > { %v7112_v1 = vadd.f32 %v7111_v38, %v14899_v47  ;;  %v7253_v45 = vpop.f32.mrf.mxu0  ;;  %v7342_v61 = vpop.f32.mrf.mxu1 }
 0xa11   : > { %v7254_v7 = vadd.f32 %v7253_v45, %v14721_v25  ;;  %v7343_v56 = vadd.f32 %v7342_v61, %v14724_v3 }
 0xa12   : > { %v7809_v9 = vmax.f32 %v7808_v53, %v7112_v1 }
 0xa13   : > { %v7867_v16 = vmax.f32 %v7866_v10, %v7254_v7  ;;  %v7904_v14 = vmax.f32 %v7903_v27, %v7343_v56 }
 0xa14   : > { %v7426_v4 = vpop.f32.mrf.mxu2  ;;  %7153 = vmatmul.bf16.gmra.mxu3 %v14765_v57 }
 0xa15   : > { %v7427_v28 = vadd.f32 %v7426_v4, %v14757_v59  ;;  %v10097_v4 = vld [vmem:[#allocation9 + $0x10] sm:$0xf] }
 0xa16   : > { %7553 = vmatmul.bf16.gmra.mxu0 %v14629_v52  ;;  %7642 = vmatmul.bf16.gmra.mxu1 %v14629_v52 }
 0xa17   : > { %v7939_v31 = vmax.f32 %v7938_v22, %v7427_v28  ;;  %7736 = vmatmul.bf16.gmra.mxu2 %v14641_v60  ;;  %v7114_v21 = vpop.f32.mrf.mxu3  ;;  %v10770_v22 = vld [vmem:[#allocation9 + $0x2c] sm:$0xf0] }
 0xa18   : > { %v7115_v42 = vadd.f32 %v7114_v21, %v14899_v47  ;;  %v7255_v18 = vpop.f32.mrf.mxu0  ;;  %v7344_v35 = vpop.f32.mrf.mxu1 }
 0xa19   : > { %v7256_v46 = vadd.f32 %v7255_v18, %v14721_v25  ;;  %v7345_v48 = vadd.f32 %v7344_v35, %v14724_v3 }
 0xa1a   : > { %v7810_v19 = vmax.f32 %v7809_v9, %v7115_v42 }
 0xa1b   : > { %v7868_v43 = vmax.f32 %v7867_v16, %v7256_v46  ;;  %v7905_v49 = vmax.f32 %v7904_v14, %v7345_v48 }
 0xa1c   : > { %v7428_v23 = vpop.f32.mrf.mxu2 }
 0xa1d   : > { %v7429_v26 = vadd.f32 %v7428_v23, %v14757_v59 }
 0xa1f   : > { %v7116_v11 = vpop.f32.mrf.mxu3  ;;  %v7940_v53 = vmax.f32 %v7939_v31, %v7429_v26  ;;  %v10098_v31 = vor.u32 %v10770_v22, %v10097_v4 }
 0xa20   : > { %v7117_v13 = vadd.f32 %v7116_v11, %v14899_v47  ;;  %v7258_v63 = vpop.f32.mrf.mxu0  ;;  %v7347_v34 = vpop.f32.mrf.mxu1 }
 0xa21   : > { %v7259_v5 = vadd.f32 %v7258_v63, %v14721_v25  ;;  %v7348_v17 = vadd.f32 %v7347_v34, %v14724_v3  ;;  %7458 = vmatpush.bf16.msra.mxu3 %v10098_v31 }
 0xa22   : > { %v7811_v36 = vmax.f32 %v7810_v19, %v7117_v13 }
 0xa23   : > { %v7869_v39 = vmax.f32 %v7868_v43, %v7259_v5  ;;  %v7906_v55 = vmax.f32 %v7905_v49, %v7348_v17 }
 0xa24   : > { %v7431_v32 = vpop.f32.mrf.mxu2  ;;  %7158 = vmatmul.bf16.gmra.mxu3 %v14779_v24 }
 0xa25   : > { %v7432_v15 = vadd.f32 %v7431_v32, %v14757_v59 }
 0xa26   : > { %7558 = vmatmul.bf16.gmra.mxu0 %v14641_v60  ;;  %7647 = vmatmul.bf16.gmra.mxu1 %v14641_v60 }
 0xa27   : > { %v7941_v44 = vmax.f32 %v7940_v53, %v7432_v15  ;;  %7741 = vmatmul.bf16.gmra.mxu2 %v14656_v30  ;;  %v7119_v62 = vpop.f32.mrf.mxu3 }
 0xa28   : > { %v7120_v38 = vadd.f32 %v7119_v62, %v14899_v47  ;;  %v7260_v18 = vpop.f32.mrf.mxu0  ;;  %v7349_v35 = vpop.f32.mrf.mxu1 }
 0xa29   : > { %v7261_v46 = vadd.f32 %v7260_v18, %v14721_v25  ;;  %v7350_v23 = vadd.f32 %v7349_v35, %v14724_v3 }
 0xa2a   : > { %v7812_v10 = vmax.f32 %v7811_v36, %v7120_v38 }
 0xa2b   : > { %v7870_v63 = vmax.f32 %v7869_v39, %v7261_v46  ;;  %v7907_v34 = vmax.f32 %v7906_v55, %v7350_v23 }
 0xa2c   : > { %v7433_v1 = vpop.f32.mrf.mxu2 }
 0xa2d   : > { %v7434_v27 = vadd.f32 %v7433_v1, %v14757_v59 }
 0xa2f   : > { %v7121_v45 = vpop.f32.mrf.mxu3  ;;  %v7942_v56 = vmax.f32 %v7941_v44, %v7434_v27 }
 0xa30   : > { %v7122_v61 = vadd.f32 %v7121_v45, %v14899_v47 }
 0xa32   : > { %v7813_v0 = vmax.f32 %v7812_v10, %v7122_v61 }
 0xa34   : > { %v7436_v7 = vpop.f32.mrf.mxu2  ;;  %7163 = vmatmul.bf16.gmra.mxu3 %v14795_v51 }
 0xa35   : > { %v7437_v9 = vadd.f32 %v7436_v7, %v14757_v59 }
 0xa36   : > { %7563 = vmatmul.bf16.gmra.mxu0 %v14656_v30  ;;  %7652 = vmatmul.bf16.gmra.mxu1 %v14656_v30 }
 0xa37   : > { %v7943_v16 = vmax.f32 %v7942_v56, %v7437_v9  ;;  %7746 = vmatmul.bf16.gmra.mxu2 %v14669_v6  ;;  %v7124_v14 = vpop.f32.mrf.mxu3 }
 0xa38   : > { %v7125_v28 = vadd.f32 %v7124_v14, %v14899_v47 }
 0xa3a   : > { %v7814_v21 = vmax.f32 %v7813_v0, %v7125_v28 }
 0xa3c   : > { %v7438_v11 = vpop.f32.mrf.mxu2 }
 0xa3d   : > { %v7439_v32 = vadd.f32 %v7438_v11, %v14757_v59 }
 0xa3f   : > { %v7126_v20 = vpop.f32.mrf.mxu3  ;;  %v7944_v62 = vmax.f32 %v7943_v16, %v7439_v32 }
 0xa40   : > { %v7127_v41 = vadd.f32 %v7126_v20, %v14899_v47 }
 0xa42   : > { %v7815_v42 = vmax.f32 %v7814_v21, %v7127_v41 }
 0xa44   : > { %7168 = vmatmul.bf16.gmra.mxu3 %v14809_v12 }
 0xa46   : > { %7568 = vmatmul.bf16.gmra.mxu0 %v14669_v6  ;;  %7657 = vmatmul.bf16.gmra.mxu1 %v14669_v6 }
 0xa47   : > { %7751 = vmatmul.bf16.gmra.mxu2 %v14677_v40  ;;  %v7129_v2 = vpop.f32.mrf.mxu3 }
 0xa48   : > { %v7130_v19 = vadd.f32 %v7129_v2, %v14899_v47 }
 0xa4a   : > { %v7816_v48 = vmax.f32 %v7815_v42, %v7130_v19 }
 0xa4c   : > { %v7263_v43 = vpop.f32.mrf.mxu0  ;;  %v7352_v13 = vpop.f32.mrf.mxu1 }
 0xa4d   : > { %v7264_v49 = vadd.f32 %v7263_v43, %v14721_v25  ;;  %v7353_v26 = vadd.f32 %v7352_v13, %v14724_v3 }
 0xa4f   : > { %v7871_v5 = vmax.f32 %v7870_v63, %v7264_v49  ;;  %v7908_v17 = vmax.f32 %v7907_v34, %v7353_v26  ;;  %v7131_v36 = vpop.f32.mrf.mxu3 }
 0xa50   : > { %v7132_v53 = vadd.f32 %v7131_v36, %v14899_v47 }
 0xa52   : > { %v7817_v15 = vmax.f32 %v7816_v48, %v7132_v53 }
 0xa53   : > { %v7441_v44 = vpop.f32.mrf.mxu2 }
 0xa54   : > { %v7442_v38 = vadd.f32 %v7441_v44, %v14757_v59  ;;  %7173 = vmatmul.bf16.gmra.mxu3 %v14849_v33  ;;  %v7265_v9 = vpop.f32.mrf.mxu0  ;;  %v7354_v16 = vpop.f32.mrf.mxu1 }
 0xa55   : > { %v7266_v4 = vadd.f32 %v7265_v9, %v14721_v25  ;;  %v7355_v22 = vadd.f32 %v7354_v16, %v14724_v3 }
 0xa56   : > { %v7945_v39 = vmax.f32 %v7944_v62, %v7442_v38  ;;  %7573 = vmatmul.bf16.gmra.mxu0 %v14677_v40  ;;  %7662 = vmatmul.bf16.gmra.mxu1 %v14677_v40 }
 0xa57   : > { %7756 = vmatmul.bf16.gmra.mxu2 %v14684_v37  ;;  %v7134_v55 = vpop.f32.mrf.mxu3  ;;  %v7872_v42 = vmax.f32 %v7871_v5, %v7266_v4  ;;  %v7909_v18 = vmax.f32 %v7908_v17, %v7355_v22 }
 0xa58   : > { %v7135_v10 = vadd.f32 %v7134_v55, %v14899_v47 }
 0xa5a   : > { %v7818_v1 = vmax.f32 %v7817_v15, %v7135_v10 }
 0xa5b   : > { %v7443_v31 = vpop.f32.mrf.mxu2 }
 0xa5c   : > { %v7444_v23 = vadd.f32 %v7443_v31, %v14757_v59 }
 0xa5e   : > { %v7946_v63 = vmax.f32 %v7945_v39, %v7444_v23 }
 0xa5f   : > { %v7136_v45 = vpop.f32.mrf.mxu3 }
 0xa60   : > { %v7137_v61 = vadd.f32 %v7136_v45, %v14899_v47 }
 0xa62   : > { %v7819_v27 = vmax.f32 %v7818_v1, %v7137_v61 }
 0xa64   : > { %7178 = vmatmul.bf16.gmra.mxu3 %v14889_v29 }
 0xa66   : > { %7578 = vmatmul.bf16.gmra.mxu0 %v14684_v37  ;;  %7667 = vmatmul.bf16.gmra.mxu1 %v14684_v37 }
 0xa67   : > { %7761 = vmatmul.bf16.gmra.mxu2 %v14691_v50  ;;  %v7139_v0 = vpop.f32.mrf.mxu3 }
 0xa68   : > { %v7140_v7 = vadd.f32 %v7139_v0, %v14899_v47 }
 0xa6a   : > { %v7820_v56 = vmax.f32 %v7819_v27, %v7140_v7  ;;  %v14997_v7 = vld [vmem:[%s15513_s0] sm:$0xff] }
 0xa6b   : > { %v15011_v23 = vperm.slane %v14997_v7, 7 }
 0xa6f   : > { %v7141_v14 = vpop.f32.mrf.mxu3 }
 0xa70   : > { %v7142_v28 = vadd.f32 %v7141_v14, %v14899_v47 }
 0xa72   : > { %v7821_v21 = vmax.f32 %v7820_v56, %v7142_v28 }
 0xa73   : > { %v7268_v20 = vpop.f32.mrf.mxu0  ;;  %v7357_v41 = vpop.f32.mrf.mxu1 }
 0xa74   : > { %v7269_v35 = vadd.f32 %v7268_v20, %v14721_v25  ;;  %v7358_v2 = vadd.f32 %v7357_v41, %v14724_v3  ;;  %7459 = vmatmul.bf16.vlgmr.msra.gmra.mxu3 %v14613_v54 }
 0xa76   : > { %v7873_v19 = vmax.f32 %v7872_v42, %v7269_v35  ;;  %v7910_v46 = vmax.f32 %v7909_v18, %v7358_v2  ;;  %7583 = vmatmul.bf16.gmra.mxu0 %v14691_v50  ;;  %7672 = vmatmul.bf16.gmra.mxu1 %v14691_v50 }
 0xa77   : > { %7766 = vmatmul.bf16.gmra.mxu2 %v14709_v8  ;;  %v7144_v48 = vpop.f32.mrf.mxu3 }
 0xa78   : > { %v7145_v11 = vadd.f32 %v7144_v48, %v14899_v47 }
 0xa7a   : > { %v7822_v43 = vmax.f32 %v7821_v21, %v7145_v11  ;;  %v7446_v13 = vpop.f32.mrf.mxu2 }
 0xa7b   : > { %v7447_v34 = vadd.f32 %v7446_v13, %v14757_v59  ;;  %v7270_v49 = vpop.f32.mrf.mxu0  ;;  %v7359_v26 = vpop.f32.mrf.mxu1 }
 0xa7c   : > { %v7271_v5 = vadd.f32 %v7270_v49, %v14721_v25  ;;  %v7360_v17 = vadd.f32 %v7359_v26, %v14724_v3 }
 0xa7d   : > { %v7947_v36 = vmax.f32 %v7946_v63, %v7447_v34 }
 0xa7e   : > { %v14986_v32 = vmax.f32 %v7873_v19, %v7271_v5  ;;  %v7911_v53 = vmax.f32 %v7910_v46, %v7360_v17 }
 0xa7f   : > { %v7146_v15 = vpop.f32.mrf.mxu3 }
 0xa80   : > { %v7912_v44 = vrot.slane %v7911_v53, 4  ;;  %v7147_v62 = vadd.f32 %v7146_v15, %v14899_v47 }
 0xa82   : > { %v7913_v38 = vmax.f32 %v7911_v53, %v7912_v44  ;;  %v7823_v55 = vmax.f32 %v7822_v43, %v7147_v62  ;;  %v7448_v10 = vpop.f32.mrf.mxu2 }
 0xa83   : > { %v7449_v39 = vadd.f32 %v7448_v10, %v14757_v59  ;;  %v7549_v1 = vpop.f32.mrf.mxu0  ;;  %v7638_v45 = vpop.f32.mrf.mxu1  ;;  %v15000_v59 = vperm.slane %v14997_v7, 5 }
 0xa84   : > { %v7914_v61 = vrot.slane %v7913_v38, 2  ;;  %7464 = vmatmul.bf16.gmra.mxu3 %v14629_v52  ;;  %v15003_v52 = vperm.slane %v14997_v7, 6 }
 0xa85   : > { %v7948_v25 = vmax.f32 %v7947_v36, %v7449_v39  ;;  %v7550_v21 = vadd.f32 %v7549_v1, %v15000_v59 }
 0xa86   : > { %7588 = vmatmul.bf16.gmra.mxu0 %v14709_v8  ;;  %7677 = vmatmul.bf16.gmra.mxu1 %v14709_v8  ;;  %v7915_v3 = vmax.f32 %v7913_v38, %v7914_v61  ;;  %v7639_v20 = vadd.f32 %v7638_v45, %v15003_v52 }
 0xa87   : > { %v7949_v27 = vrot.slane %v7948_v25, 4  ;;  %7771 = vmatmul.bf16.gmra.mxu2 %v14745_v58  ;;  %v7149_v0 = vpop.f32.mrf.mxu3 }
 0xa88   : > { %v7150_v56 = vadd.f32 %v7149_v0, %v14899_v47  ;;  %v7916_v4 = vrot.slane %v7915_v3, 1 }
 0xa89   : > { %v7950_v9 = vmax.f32 %v7948_v25, %v7949_v27 }
 0xa8a   : > { %v7824_v16 = vmax.f32 %v7823_v55, %v7150_v56  ;;  %v7732_v14 = vpop.f32.mrf.mxu2  ;;  %v7917_v19 = vmax.f32 %v7915_v3, %v7916_v4 }
 0xa8b   : > { %v7951_v22 = vrot.slane %v7950_v9, 2  ;;  %v7551_v28 = vpop.f32.mrf.mxu0  ;;  %v7640_v31 = vpop.f32.mrf.mxu1  ;;  %v7733_v26 = vadd.f32 %v7732_v14, %v15011_v23 }
 0xa8c   : > { %v7552_v41 = vadd.f32 %v7551_v28, %v15000_v59  ;;  %v7641_v42 = vadd.f32 %v7640_v31, %v15003_v52  ;;  %v8113_v34 = vrot.slane %v7917_v19, 6 }
 0xa8d   : > { %v7952_v18 = vmax.f32 %v7950_v9, %v7951_v22 }
 0xa8e   : > { %v7992_v35 = vmax.f32 %v7550_v21, %v7552_v41  ;;  %v8029_v2 = vmax.f32 %v7639_v20, %v7641_v42 }
 0xa8f   : > { %v7953_v46 = vrot.slane %v7952_v18, 1  ;;  %v7151_v48 = vpop.f32.mrf.mxu3 }
 0xa90   : > { %v7152_v11 = vadd.f32 %v7151_v48, %v14899_v47 }
 0xa91   : > { %v7954_v43 = vmax.f32 %v7952_v18, %v7953_v46 }
 0xa92   : > { %v7825_v13 = vmax.f32 %v7824_v16, %v7152_v11  ;;  %v7734_v63 = vpop.f32.mrf.mxu2 }
 0xa93   : > { %v8114_v49 = vrot.slane %v7954_v43, 5  ;;  %v7735_v5 = vadd.f32 %v7734_v63, %v15011_v23  ;;  %v7554_v17 = vpop.f32.mrf.mxu0  ;;  %v7643_v36 = vpop.f32.mrf.mxu1 }
 0xa94   : > { %v7555_v53 = vadd.f32 %v7554_v17, %v15000_v59  ;;  %v7644_v15 = vadd.f32 %v7643_v36, %v15003_v52  ;;  %7469 = vmatmul.bf16.gmra.mxu3 %v14641_v60 }
 0xa95   : > { %v15019_v44 = vsel %vm8121_vm10, %v8113_v34, %v8114_v49  ;;  %v8067_v62 = vmax.f32 %v7735_v5, %v7733_v26 }
 0xa96   : > { %v7993_v38 = vmax.f32 %v7992_v35, %v7555_v53  ;;  %v8030_v55 = vmax.f32 %v8029_v2, %v7644_v15  ;;  %7593 = vmatmul.bf16.gmra.mxu0 %v14745_v58  ;;  %7682 = vmatmul.bf16.gmra.mxu1 %v14745_v58 }
 0xa97   : > { %7776 = vmatmul.bf16.gmra.mxu2 %v14765_v57  ;;  %v7154_v10 = vpop.f32.mrf.mxu3 }
 0xa98   : > { %v7155_v39 = vadd.f32 %v7154_v10, %v14899_v47 }
 0xa9a   : > { %v7826_v1 = vmax.f32 %v7825_v13, %v7155_v39  ;;  %v7737_v45 = vpop.f32.mrf.mxu2 }
 0xa9b   : > { %v7738_v61 = vadd.f32 %v7737_v45, %v15011_v23  ;;  %v7556_v25 = vpop.f32.mrf.mxu0  ;;  %v7645_v60 = vpop.f32.mrf.mxu1 }
 0xa9c   : > { %v7557_v3 = vadd.f32 %v7556_v25, %v15000_v59  ;;  %v7646_v27 = vadd.f32 %v7645_v60, %v15003_v52 }
 0xa9d   : > { %v8068_v0 = vmax.f32 %v8067_v62, %v7738_v61 }
 0xa9e   : > { %v7994_v56 = vmax.f32 %v7993_v38, %v7557_v3  ;;  %v8031_v9 = vmax.f32 %v8030_v55, %v7646_v27 }
 0xa9f   : > { %v7156_v16 = vpop.f32.mrf.mxu3 }
 0xaa0   : > { %v7157_v14 = vadd.f32 %v7156_v16, %v14899_v47 }
 0xaa2   : > { %v7827_v4 = vmax.f32 %v7826_v1, %v7157_v14  ;;  %v7739_v22 = vpop.f32.mrf.mxu2 }
 0xaa3   : > { %v7740_v28 = vadd.f32 %v7739_v22, %v15011_v23  ;;  %v7559_v31 = vpop.f32.mrf.mxu0  ;;  %v7648_v21 = vpop.f32.mrf.mxu1 }
 0xaa4   : > { %v7560_v20 = vadd.f32 %v7559_v31, %v15000_v59  ;;  %v7649_v41 = vadd.f32 %v7648_v21, %v15003_v52  ;;  %7474 = vmatmul.bf16.gmra.mxu3 %v14656_v30 }
 0xaa5   : > { %v8069_v42 = vmax.f32 %v8068_v0, %v7740_v28 }
 0xaa6   : > { %v7995_v18 = vmax.f32 %v7994_v56, %v7560_v20  ;;  %v8032_v35 = vmax.f32 %v8031_v9, %v7649_v41  ;;  %7598 = vmatmul.bf16.gmra.mxu0 %v14765_v57  ;;  %7687 = vmatmul.bf16.gmra.mxu1 %v14765_v57 }
 0xaa7   : > { %7781 = vmatmul.bf16.gmra.mxu2 %v14779_v24  ;;  %v7159_v2 = vpop.f32.mrf.mxu3 }
 0xaa8   : > { %v7160_v19 = vadd.f32 %v7159_v2, %v14899_v47 }
 0xaaa   : > { %v7828_v46 = vmax.f32 %v7827_v4, %v7160_v19  ;;  %v7742_v48 = vpop.f32.mrf.mxu2 }
 0xaab   : > { %v7743_v11 = vadd.f32 %v7742_v48, %v15011_v23  ;;  %v7561_v43 = vpop.f32.mrf.mxu0  ;;  %v7650_v13 = vpop.f32.mrf.mxu1 }
 0xaac   : > { %v7562_v30 = vadd.f32 %v7561_v43, %v15000_v59  ;;  %v7651_v63 = vadd.f32 %v7650_v13, %v15003_v52 }
 0xaad   : > { %v8070_v34 = vmax.f32 %v8069_v42, %v7743_v11 }
 0xaae   : > { %v7996_v49 = vmax.f32 %v7995_v18, %v7562_v30  ;;  %v8033_v26 = vmax.f32 %v8032_v35, %v7651_v63 }
 0xaaf   : > { %v7161_v5 = vpop.f32.mrf.mxu3 }
 0xab0   : > { %v7162_v17 = vadd.f32 %v7161_v5, %v14899_v47 }
 0xab2   : > { %v7829_v36 = vmax.f32 %v7828_v46, %v7162_v17  ;;  %v7744_v53 = vpop.f32.mrf.mxu2 }
 0xab3   : > { %v7745_v15 = vadd.f32 %v7744_v53, %v15011_v23  ;;  %v7564_v62 = vpop.f32.mrf.mxu0  ;;  %v7653_v38 = vpop.f32.mrf.mxu1 }
 0xab4   : > { %v7565_v55 = vadd.f32 %v7564_v62, %v15000_v59  ;;  %v7654_v10 = vadd.f32 %v7653_v38, %v15003_v52  ;;  %7479 = vmatmul.bf16.gmra.mxu3 %v14669_v6 }
 0xab5   : > { %v8071_v39 = vmax.f32 %v8070_v34, %v7745_v15 }
 0xab6   : > { %v7997_v1 = vmax.f32 %v7996_v49, %v7565_v55  ;;  %v8034_v45 = vmax.f32 %v8033_v26, %v7654_v10  ;;  %7603 = vmatmul.bf16.gmra.mxu0 %v14779_v24  ;;  %7692 = vmatmul.bf16.gmra.mxu1 %v14779_v24 }
 0xab7   : > { %7786 = vmatmul.bf16.gmra.mxu2 %v14795_v51  ;;  %v7164_v61 = vpop.f32.mrf.mxu3 }
 0xab8   : > { %v7165_v25 = vadd.f32 %v7164_v61, %v14899_v47 }
 0xaba   : > { %v7830_v60 = vmax.f32 %v7829_v36, %v7165_v25  ;;  %v7747_v3 = vpop.f32.mrf.mxu2 }
 0xabb   : > { %v7748_v27 = vadd.f32 %v7747_v3, %v15011_v23  ;;  %v7566_v0 = vpop.f32.mrf.mxu0  ;;  %v7655_v56 = vpop.f32.mrf.mxu1 }
 0xabc   : > { %v7567_v6 = vadd.f32 %v7566_v0, %v15000_v59  ;;  %v7656_v9 = vadd.f32 %v7655_v56, %v15003_v52 }
 0xabd   : > { %v8072_v16 = vmax.f32 %v8071_v39, %v7748_v27 }
 0xabe   : > { %v7998_v14 = vmax.f32 %v7997_v1, %v7567_v6  ;;  %v8035_v4 = vmax.f32 %v8034_v45, %v7656_v9 }
 0xabf   : > { %v7166_v22 = vpop.f32.mrf.mxu3 }
 0xac0   : > { %v7167_v28 = vadd.f32 %v7166_v22, %v14899_v47 }
 0xac2   : > { %v7831_v31 = vmax.f32 %v7830_v60, %v7167_v28  ;;  %v7749_v21 = vpop.f32.mrf.mxu2 }
 0xac3   : > { %v7750_v20 = vadd.f32 %v7749_v21, %v15011_v23  ;;  %v7569_v41 = vpop.f32.mrf.mxu0  ;;  %v7658_v42 = vpop.f32.mrf.mxu1 }
 0xac4   : > { %v7570_v18 = vadd.f32 %v7569_v41, %v15000_v59  ;;  %v7659_v35 = vadd.f32 %v7658_v42, %v15003_v52  ;;  %7484 = vmatmul.bf16.gmra.mxu3 %v14677_v40 }
 0xac5   : > { %v8073_v2 = vmax.f32 %v8072_v16, %v7750_v20 }
 0xac6   : > { %v7999_v19 = vmax.f32 %v7998_v14, %v7570_v18  ;;  %v8036_v46 = vmax.f32 %v8035_v4, %v7659_v35  ;;  %7608 = vmatmul.bf16.gmra.mxu0 %v14795_v51  ;;  %7697 = vmatmul.bf16.gmra.mxu1 %v14795_v51 }
 0xac7   : > { %7791 = vmatmul.bf16.gmra.mxu2 %v14809_v12  ;;  %v7169_v48 = vpop.f32.mrf.mxu3 }
 0xac8   : > { %v7170_v11 = vadd.f32 %v7169_v48, %v14899_v47 }
 0xaca   : > { %v7832_v43 = vmax.f32 %v7831_v31, %v7170_v11  ;;  %v7752_v13 = vpop.f32.mrf.mxu2 }
 0xacb   : > { %v7753_v30 = vadd.f32 %v7752_v13, %v15011_v23  ;;  %v7571_v63 = vpop.f32.mrf.mxu0  ;;  %v7660_v34 = vpop.f32.mrf.mxu1 }
 0xacc   : > { %v7572_v40 = vadd.f32 %v7571_v63, %v15000_v59  ;;  %v7661_v49 = vadd.f32 %v7660_v34, %v15003_v52 }
 0xacd   : > { %v8074_v26 = vmax.f32 %v8073_v2, %v7753_v30 }
 0xace   : > { %v8000_v5 = vmax.f32 %v7999_v19, %v7572_v40  ;;  %v8037_v17 = vmax.f32 %v8036_v46, %v7661_v49  ;;  %v7875_v19 = vrot.slane %v14986_v32, 4 }
 0xacf   : > { %v7171_v36 = vpop.f32.mrf.mxu3 }
 0xad0   : > { %v7172_v53 = vadd.f32 %v7171_v36, %v14899_v47  ;;  %v7876_v30 = vmax.f32 %v14986_v32, %v7875_v19 }
 0xad2   : > { %v7833_v15 = vmax.f32 %v7832_v43, %v7172_v53  ;;  %v7754_v62 = vpop.f32.mrf.mxu2 }
 0xad3   : > { %v7755_v38 = vadd.f32 %v7754_v62, %v15011_v23  ;;  %v7574_v55 = vpop.f32.mrf.mxu0  ;;  %v7663_v10 = vpop.f32.mrf.mxu1 }
 0xad4   : > { %v7575_v39 = vadd.f32 %v7574_v55, %v15000_v59  ;;  %v7664_v1 = vadd.f32 %v7663_v10, %v15003_v52  ;;  %7489 = vmatmul.bf16.gmra.mxu3 %v14684_v37 }
 0xad5   : > { %v8075_v45 = vmax.f32 %v8074_v26, %v7755_v38 }
 0xad6   : > { %v8001_v61 = vmax.f32 %v8000_v5, %v7575_v39  ;;  %v8038_v25 = vmax.f32 %v8037_v17, %v7664_v1  ;;  %7613 = vmatmul.bf16.gmra.mxu0 %v14809_v12  ;;  %7702 = vmatmul.bf16.gmra.mxu1 %v14809_v12  ;;  %v7877_v17 = vrot.slane %v7876_v30, 2 }
 0xad7   : > { %7796 = vmatmul.bf16.gmra.mxu2 %v14849_v33  ;;  %v7174_v60 = vpop.f32.mrf.mxu3 }
 0xad8   : > { %v7175_v3 = vadd.f32 %v7174_v60, %v14899_v47  ;;  %v7878_v55 = vmax.f32 %v7876_v30, %v7877_v17 }
 0xada   : > { %v7834_v27 = vmax.f32 %v7833_v15, %v7175_v3  ;;  %v7757_v0 = vpop.f32.mrf.mxu2  ;;  %v7879_v3 = vrot.slane %v7878_v55, 1 }
 0xadb   : > { %v7758_v56 = vadd.f32 %v7757_v0, %v15011_v23  ;;  %v7576_v6 = vpop.f32.mrf.mxu0  ;;  %v7665_v9 = vpop.f32.mrf.mxu1 }
 0xadc   : > { %v7577_v37 = vadd.f32 %v7576_v6, %v15000_v59  ;;  %v7666_v16 = vadd.f32 %v7665_v9, %v15003_v52 }
 0xadd   : > { %v8076_v14 = vmax.f32 %v8075_v45, %v7758_v56 }
 0xade   : > { %v8002_v4 = vmax.f32 %v8001_v61, %v7577_v37  ;;  %v8039_v22 = vmax.f32 %v8038_v25, %v7666_v16  ;;  %v7880_v37 = vmax.f32 %v7878_v55, %v7879_v3 }
 0xadf   : > { %v7176_v28 = vpop.f32.mrf.mxu3 }
 0xae0   : > { %v7177_v31 = vadd.f32 %v7176_v28, %v14899_v47 }
 0xae2   : > { %v7835_v21 = vmax.f32 %v7834_v27, %v7177_v31  ;;  %v7759_v20 = vpop.f32.mrf.mxu2 }
 0xae3   : > { %v7760_v41 = vadd.f32 %v7759_v20, %v15011_v23  ;;  %v7579_v42 = vpop.f32.mrf.mxu0  ;;  %v7668_v18 = vpop.f32.mrf.mxu1 }
 0xae4   : > { %v7580_v35 = vadd.f32 %v7579_v42, %v15000_v59  ;;  %v7669_v2 = vadd.f32 %v7668_v18, %v15003_v52  ;;  %7494 = vmatmul.bf16.gmra.mxu3 %v14691_v50 }
 0xae5   : > { %v8077_v46 = vmax.f32 %v8076_v14, %v7760_v41  ;;  %v8112_v41 = vrot.slane %v7880_v37, 7 }
 0xae6   : > { %v8003_v48 = vmax.f32 %v8002_v4, %v7580_v35  ;;  %v8040_v11 = vmax.f32 %v8039_v22, %v7669_v2  ;;  %7618 = vmatmul.bf16.gmra.mxu0 %v14849_v33  ;;  %7707 = vmatmul.bf16.gmra.mxu1 %v14849_v33 }
 0xae7   : > { %7801 = vmatmul.bf16.gmra.mxu2 %v14889_v29  ;;  %v7179_v43 = vpop.f32.mrf.mxu3 }
 0xae8   : > { %v7180_v13 = vadd.f32 %v7179_v43, %v14899_v47 }
 0xaea   : > { %v7836_v63 = vmax.f32 %v7835_v21, %v7180_v13  ;;  %v7762_v34 = vpop.f32.mrf.mxu2 }
 0xaeb   : > { %v7763_v50 = vadd.f32 %v7762_v34, %v15011_v23  ;;  %v7581_v40 = vpop.f32.mrf.mxu0  ;;  %v7670_v49 = vpop.f32.mrf.mxu1 }
 0xaec   : > { %v7582_v26 = vadd.f32 %v7581_v40, %v15000_v59  ;;  %v7671_v5 = vadd.f32 %v7670_v49, %v15003_v52 }
 0xaed   : > { %v8078_v36 = vmax.f32 %v8077_v46, %v7763_v50 }
 0xaee   : > { %v8004_v53 = vmax.f32 %v8003_v48, %v7582_v26  ;;  %v8041_v15 = vmax.f32 %v8040_v11, %v7671_v5 }
 0xaef   : > { %v7181_v62 = vpop.f32.mrf.mxu3 }
 0xaf0   : > { %v7182_v38 = vadd.f32 %v7181_v62, %v14899_v47 }
 0xaf2   : > { %v7837_v10 = vmax.f32 %v7836_v63, %v7182_v38  ;;  %v7764_v32 = vpop.f32.mrf.mxu2 }
 0xaf3   : > { %v7765_v39 = vadd.f32 %v7764_v32, %v15011_v23  ;;  %v7584_v1 = vpop.f32.mrf.mxu0  ;;  %v7673_v45 = vpop.f32.mrf.mxu1 }
 0xaf4   : > { %v7838_v61 = vrot.slane %v7837_v10, 4  ;;  %v7585_v25 = vadd.f32 %v7584_v1, %v15000_v59  ;;  %v7674_v60 = vadd.f32 %v7673_v45, %v15003_v52  ;;  %7499 = vmatmul.bf16.gmra.mxu3 %v14709_v8  ;;  %v15099_v8 = vperm.slane %v14997_v7, 4 }
 0xaf5   : > { %v8079_v27 = vmax.f32 %v8078_v36, %v7765_v39 }
 0xaf6   : > { %v7839_v0 = vmax.f32 %v7837_v10, %v7838_v61  ;;  %v8005_v56 = vmax.f32 %v8004_v53, %v7585_v25  ;;  %v8042_v6 = vmax.f32 %v8041_v15, %v7674_v60  ;;  %7623 = vmatmul.bf16.gmra.mxu0 %v14889_v29  ;;  %7712 = vmatmul.bf16.gmra.mxu1 %v14889_v29 }
 0xaf7   : > { %v7460_v47 = vpop.f32.mrf.mxu3 }
 0xaf8   : > { %v7840_v9 = vrot.slane %v7839_v0, 2  ;;  %v7461_v48 = vadd.f32 %v7460_v47, %v15099_v8 }
 0xafa   : > { %v7841_v16 = vmax.f32 %v7839_v0, %v7840_v9  ;;  %v7767_v14 = vpop.f32.mrf.mxu2 }
 0xafb   : > { %v7768_v4 = vadd.f32 %v7767_v14, %v15011_v23  ;;  %v7586_v22 = vpop.f32.mrf.mxu0  ;;  %v7675_v28 = vpop.f32.mrf.mxu1 }
 0xafc   : > { %v7842_v31 = vrot.slane %v7841_v16, 1  ;;  %v7587_v21 = vadd.f32 %v7586_v22, %v15000_v59  ;;  %v7676_v20 = vadd.f32 %v7675_v28, %v15003_v52 }
 0xafd   : > { %v8080_v42 = vmax.f32 %v8079_v27, %v7768_v4 }
 0xafe   : > { %v7843_v18 = vmax.f32 %v7841_v16, %v7842_v31  ;;  %v8006_v35 = vmax.f32 %v8005_v56, %v7587_v21  ;;  %v8043_v2 = vmax.f32 %v8042_v6, %v7676_v20 }
 0xaff   : > { %v7462_v19 = vpop.f32.mrf.mxu3 }
 0xb00   : > { %v8120_v46 = vsel %vm8119_vm11, %v7843_v18, %v8112_v41  ;;  %v7463_v11 = vadd.f32 %v7462_v19, %v15099_v8 }
 0xb01   : > { %v15106_v7 = vsel %vm8123_vm12, %v8120_v46, %v15019_v44 }
 0xb02   : > { %v7955_v43 = vmax.f32 %v7461_v48, %v7463_v11  ;;  %v7769_v13 = vpop.f32.mrf.mxu2 }
 0xb03   : > { %v7770_v30 = vadd.f32 %v7769_v13, %v15011_v23  ;;  %v7589_v63 = vpop.f32.mrf.mxu0  ;;  %v7678_v34 = vpop.f32.mrf.mxu1 }
 0xb04   : > { %v7590_v50 = vadd.f32 %v7589_v63, %v15000_v59  ;;  %v7679_v40 = vadd.f32 %v7678_v34, %v15003_v52  ;;  %7504 = vmatmul.bf16.gmra.mxu3 %v14745_v58 }
 0xb05   : > { %v8081_v49 = vmax.f32 %v8080_v42, %v7770_v30 }
 0xb06   : > { %v8007_v26 = vmax.f32 %v8006_v35, %v7590_v50  ;;  %v8044_v5 = vmax.f32 %v8043_v2, %v7679_v40  ;;  %7726 = vmatmul.bf16.vlgmr.msra.gmra.mxu0 %v14613_v54 }
 0xb07   : > { %v7465_v17 = vpop.f32.mrf.mxu3 }
 0xb08   : > { %v7466_v44 = vadd.f32 %v7465_v17, %v15099_v8 }
 0xb0a   : > { %v7956_v36 = vmax.f32 %v7955_v43, %v7466_v44  ;;  %v7772_v53 = vpop.f32.mrf.mxu2 }
 0xb0b   : > { %v7773_v15 = vadd.f32 %v7772_v53, %v15011_v23  ;;  %v7591_v62 = vpop.f32.mrf.mxu0  ;;  %v7680_v38 = vpop.f32.mrf.mxu1 }
 0xb0c   : > { %v7592_v55 = vadd.f32 %v7591_v62, %v15000_v59  ;;  %v7681_v10 = vadd.f32 %v7680_v38, %v15003_v52 }
 0xb0d   : > { %v8082_v32 = vmax.f32 %v8081_v49, %v7773_v15 }
 0xb0e   : > { %v8008_v58 = vmax.f32 %v8007_v26, %v7592_v55  ;;  %v8045_v39 = vmax.f32 %v8044_v5, %v7681_v10 }
 0xb0f   : > { %v7467_v1 = vpop.f32.mrf.mxu3 }
 0xb10   : > { %v7468_v45 = vadd.f32 %v7467_v1, %v15099_v8 }
 0xb12   : > { %v7957_v54 = vmax.f32 %v7956_v36, %v7468_v45  ;;  %v7774_v61 = vpop.f32.mrf.mxu2 }
 0xb13   : > { %v7775_v25 = vadd.f32 %v7774_v61, %v15011_v23  ;;  %v7594_v60 = vpop.f32.mrf.mxu0  ;;  %v7683_v3 = vpop.f32.mrf.mxu1 }
 0xb14   : > { %v7595_v27 = vadd.f32 %v7594_v60, %v15000_v59  ;;  %v7684_v0 = vadd.f32 %v7683_v3, %v15003_v52  ;;  %7509 = vmatmul.bf16.gmra.mxu3 %v14765_v57 }
 0xb15   : > { %v8083_v56 = vmax.f32 %v8082_v32, %v7775_v25 }
 0xb16   : > { %v8009_v6 = vmax.f32 %v8008_v58, %v7595_v27  ;;  %v8046_v47 = vmax.f32 %v8045_v39, %v7684_v0 }
 0xb17   : > { %v7470_v9 = vpop.f32.mrf.mxu3 }
 0xb18   : > { %v7471_v37 = vadd.f32 %v7470_v9, %v15099_v8 }
 0xb1a   : > { %v7958_v16 = vmax.f32 %v7957_v54, %v7471_v37  ;;  %v7777_v14 = vpop.f32.mrf.mxu2 }
 0xb1b   : > { %v7778_v4 = vadd.f32 %v7777_v14, %v15011_v23  ;;  %v7596_v22 = vpop.f32.mrf.mxu0  ;;  %v7685_v28 = vpop.f32.mrf.mxu1 }
 0xb1c   : > { %v7597_v31 = vadd.f32 %v7596_v22, %v15000_v59  ;;  %v7686_v21 = vadd.f32 %v7685_v28, %v15003_v52 }
 0xb1d   : > { %v15126_v20 = vmax.f32 %v8083_v56, %v7778_v4 }
 0xb1e   : > { %v8010_v41 = vmax.f32 %v8009_v6, %v7597_v31  ;;  %v8047_v57 = vmax.f32 %v8046_v47, %v7686_v21 }
 0xb1f   : > { %v7472_v42 = vpop.f32.mrf.mxu3 }
 0xb20   : > { %v7473_v18 = vadd.f32 %v7472_v42, %v15099_v8 }
 0xb22   : > { %v7959_v35 = vmax.f32 %v7958_v16, %v7473_v18  ;;  %v15129_v2 = vpop.f32.mrf.mxu2 }
 0xb23   : > { %v7599_v19 = vpop.f32.mrf.mxu0  ;;  %v7688_v46 = vpop.f32.mrf.mxu1 }
 0xb24   : > { %v7600_v48 = vadd.f32 %v7599_v19, %v15000_v59  ;;  %v7689_v11 = vadd.f32 %v7688_v46, %v15003_v52  ;;  %7514 = vmatmul.bf16.gmra.mxu3 %v14779_v24 }
 0xb26   : > { %v8011_v43 = vmax.f32 %v8010_v41, %v7600_v48  ;;  %v15134_v13 = vmax.f32 %v8047_v57, %v7689_v11 }
 0xb27   : > { %v7475_v30 = vpop.f32.mrf.mxu3 }
 0xb28   : > { %v7476_v63 = vadd.f32 %v7475_v30, %v15099_v8 }
 0xb2a   : > { %v7960_v34 = vmax.f32 %v7959_v35, %v7476_v63  ;;  %v15137_v49 = vpop.f32.mrf.mxu2 }
 0xb2b   : > { %v7601_v50 = vpop.f32.mrf.mxu0  ;;  %v7690_v40 = vpop.f32.mrf.mxu1 }
 0xb2c   : > { %v7602_v26 = vadd.f32 %v7601_v50, %v15000_v59  ;;  %v7691_v30 = vadd.f32 %v7690_v40, %v15003_v52 }
 0xb2e   : > { %v8012_v5 = vmax.f32 %v8011_v43, %v7602_v26 }
 0xb2f   : > { %v7477_v17 = vpop.f32.mrf.mxu3 }
 0xb30   : > { %v7478_v44 = vadd.f32 %v7477_v17, %v15099_v8 }
 0xb32   : > { %v7961_v36 = vmax.f32 %v7960_v34, %v7478_v44  ;;  %v15143_v62 = vpop.f32.mrf.mxu2 }
 0xb33   : > { %v7604_v53 = vpop.f32.mrf.mxu0  ;;  %v7693_v24 = vpop.f32.mrf.mxu1 }
 0xb34   : > { %v7605_v15 = vadd.f32 %v7604_v53, %v15000_v59  ;;  %7519 = vmatmul.bf16.gmra.mxu3 %v14795_v51  ;;  %v7694_v26 = vadd.f32 %v7693_v24, %v15003_v52 }
 0xb36   : > { %v15145_v38 = vmax.f32 %v8012_v5, %v7605_v15  ;;  %v8049_v5 = vmax.f32 %v15134_v13, %v7691_v30  ;;  %v7780_v13 = vadd.f32 %v15129_v2, %v15011_v23 }
 0xb37   : > { %v7480_v55 = vpop.f32.mrf.mxu3 }
 0xb38   : > { %v7481_v10 = vadd.f32 %v7480_v55, %v15099_v8 }
 0xb3a   : > { %v7962_v32 = vmax.f32 %v7961_v36, %v7481_v10  ;;  %v15153_v61 = vpop.f32.mrf.mxu2  ;;  %v8050_v36 = vmax.f32 %v8049_v5, %v7694_v26 }
 0xb3b   : > { %v7606_v58 = vpop.f32.mrf.mxu0  ;;  %v7695_v39 = vpop.f32.mrf.mxu1 }
 0xb3c   : > { %v15149_v1 = vadd.f32 %v7606_v58, %v15000_v59  ;;  %v7696_v17 = vadd.f32 %v7695_v39, %v15003_v52 }
 0xb3e   : > { %v8014_v45 = vmax.f32 %v15145_v38, %v15149_v1  ;;  %v8051_v15 = vmax.f32 %v8050_v36, %v7696_v17 }
 0xb3f   : > { %v7482_v54 = vpop.f32.mrf.mxu3 }
 0xb40   : > { %v7483_v51 = vadd.f32 %v7482_v54, %v15099_v8 }
 0xb42   : > { %v7963_v25 = vmax.f32 %v7962_v32, %v7483_v51  ;;  %v15160_v56 = vpop.f32.mrf.mxu2 }
 0xb43   : > { %v15156_v60 = vpop.f32.mrf.mxu0  ;;  %v7698_v3 = vpop.f32.mrf.mxu1 }
 0xb44   : > { %7524 = vmatmul.bf16.gmra.mxu3 %v14809_v12 }
 0xb47   : > { %v7485_v27 = vpop.f32.mrf.mxu3 }
 0xb48   : > { %v7486_v0 = vadd.f32 %v7485_v27, %v15099_v8 }
 0xb4a   : > { %v7964_v6 = vmax.f32 %v7963_v25, %v7486_v0  ;;  %v7792_v28 = vpop.f32.mrf.mxu2 }
 0xb4b   : > { %v15162_v47 = vpop.f32.mrf.mxu0  ;;  %v7700_v9 = vpop.f32.mrf.mxu1 }
 0xb4c   : > { %v7701_v55 = vadd.f32 %v7700_v9, %v15003_v52  ;;  %v8085_v9 = vmax.f32 %v15126_v20, %v7780_v13  ;;  %v7790_v20 = vadd.f32 %v15160_v56, %v15011_v23 }
 0xb4f   : > { %v7487_v37 = vpop.f32.mrf.mxu3 }
 0xb50   : > { %v7488_v16 = vadd.f32 %v7487_v37, %v15099_v8  ;;  %v7785_v37 = vadd.f32 %v15143_v62, %v15011_v23 }
 0xb52   : > { %v7965_v14 = vmax.f32 %v7964_v6, %v7488_v16  ;;  %v7794_v42 = vpop.f32.mrf.mxu2 }
 0xb53   : > { %v15165_v4 = vpop.f32.mrf.mxu0  ;;  %v7703_v22 = vpop.f32.mrf.mxu1 }
 0xb54   : > { %7529 = vmatmul.bf16.gmra.mxu3 %v14849_v33  ;;  %v7704_v24 = vadd.f32 %v7703_v22, %v15003_v52 }
 0xb57   : > { %v7490_v12 = vpop.f32.mrf.mxu3 }
 0xb58   : > { %v7491_v31 = vadd.f32 %v7490_v12, %v15099_v8 }
 0xb5a   : > { %v7966_v21 = vmax.f32 %v7965_v14, %v7491_v31  ;;  %v7797_v43 = vpop.f32.mrf.mxu2 }
 0xb5b   : > { %v15169_v41 = vpop.f32.mrf.mxu0  ;;  %v7705_v57 = vpop.f32.mrf.mxu1  ;;  %v7798_v36 = vadd.f32 %v7797_v43, %v15011_v23 }
 0xb5c   : > { %v7706_v51 = vadd.f32 %v7705_v57, %v15003_v52 }
 0xb5f   : > { %v7492_v18 = vpop.f32.mrf.mxu3 }
 0xb60   : > { %v7493_v35 = vadd.f32 %v7492_v18, %v15099_v8 }
 0xb62   : > { %v7967_v19 = vmax.f32 %v7966_v21, %v7493_v35  ;;  %v7799_v40 = vpop.f32.mrf.mxu2 }
 0xb63   : > { %v15172_v46 = vpop.f32.mrf.mxu0  ;;  %v7708_v48 = vpop.f32.mrf.mxu1 }
 0xb64   : > { %7534 = vmatmul.bf16.gmra.mxu3 %v14889_v29  ;;  %v7699_v29 = vadd.f32 %v7698_v3, %v15003_v52  ;;  %v7783_v3 = vadd.f32 %v15137_v49, %v15011_v23  ;;  %v7709_v0 = vadd.f32 %v7708_v48, %v15003_v52  ;;  %v7788_v49 = vadd.f32 %v15153_v61, %v15011_v23 }
 0xb65   : > { %v7795_v61 = vadd.f32 %v7794_v42, %v15011_v23 }
 0xb66   : > { %v8052_v54 = vmax.f32 %v8051_v15, %v7699_v29  ;;  %v8086_v31 = vmax.f32 %v8085_v9, %v7783_v3  ;;  %v7800_v29 = vadd.f32 %v7799_v40, %v15011_v23 }
 0xb67   : > { %v7495_v11 = vpop.f32.mrf.mxu3 }
 0xb68   : > { %v7496_v33 = vadd.f32 %v7495_v11, %v15099_v8  ;;  %v8053_v39 = vmax.f32 %v8052_v54, %v7701_v55  ;;  %v8087_v35 = vmax.f32 %v8086_v31, %v7785_v37 }
 0xb6a   : > { %v7968_v63 = vmax.f32 %v7967_v19, %v7496_v33  ;;  %v8054_v27 = vmax.f32 %v8053_v39, %v7704_v24  ;;  %v7802_v18 = vpop.f32.mrf.mxu2  ;;  %v8088_v11 = vmax.f32 %v8087_v35, %v7788_v49  ;;  %v7793_v33 = vadd.f32 %v7792_v28, %v15011_v23 }
 0xb6b   : > { %v15177_v34 = vpop.f32.mrf.mxu0  ;;  %v7710_v50 = vpop.f32.mrf.mxu1  ;;  %v7803_v28 = vadd.f32 %v7802_v18, %v15011_v23 }
 0xb6c   : > { %v8055_v16 = vmax.f32 %v8054_v27, %v7706_v51  ;;  %v7711_v2 = vadd.f32 %v7710_v50, %v15003_v52  ;;  %v8089_v50 = vmax.f32 %v8088_v11, %v7790_v20 }
 0xb6e   : > { %v8056_v21 = vmax.f32 %v8055_v16, %v7709_v0 }
 0xb6f   : > { %v7497_v44 = vpop.f32.mrf.mxu3 }
 0xb70   : > { %v7498_v53 = vadd.f32 %v7497_v44, %v15099_v8  ;;  %v8057_v62 = vmax.f32 %v8056_v21, %v7711_v2  ;;  %v8090_v44 = vmax.f32 %v8089_v50, %v7793_v33 }
 0xb72   : > { %v7969_v10 = vmax.f32 %v7968_v63, %v7498_v53  ;;  %v8091_v56 = vmax.f32 %v8090_v44, %v7795_v61  ;;  %v7804_v53 = vpop.f32.mrf.mxu2  ;;  %v7615_v44 = vadd.f32 %v15165_v4, %v15000_v59 }
 0xb73   : > { %v15185_v32 = vpop.f32.mrf.mxu0  ;;  %v7713_v58 = vpop.f32.mrf.mxu1  ;;  %v7805_v42 = vadd.f32 %v7804_v53, %v15011_v23  ;;  %v7620_v53 = vadd.f32 %v15172_v46, %v15000_v59 }
 0xb74   : > { %v7714_v57 = vadd.f32 %v7713_v58, %v15003_v52  ;;  %v8092_v55 = vmax.f32 %v8091_v56, %v7798_v36 }
 0xb76   : > { %v8058_v30 = vmax.f32 %v8057_v62, %v7714_v57  ;;  %v8093_v58 = vmax.f32 %v8092_v55, %v7800_v29  ;;  %v7617_v29 = vadd.f32 %v15169_v41, %v15000_v59 }
 0xb77   : > { %v7500_v25 = vpop.f32.mrf.mxu3 }
 0xb78   : > { %v7501_v6 = vadd.f32 %v7500_v25, %v15099_v8  ;;  %v8094_v39 = vmax.f32 %v8093_v58, %v7803_v28 }
 0xb7a   : > { %v7970_v14 = vmax.f32 %v7969_v10, %v7501_v6  ;;  %v8095_v40 = vmax.f32 %v8094_v39, %v7805_v42 }
 0xb7b   : > { %v15199_v22 = vpop.f32.mrf.mxu0  ;;  %v7715_v12 = vpop.f32.mrf.mxu1 }
 0xb7c   : > { %v7716_v19 = vadd.f32 %v7715_v12, %v15003_v52  ;;  %v7627_v46 = vadd.f32 %v15199_v22, %v15000_v59 }
 0xb7e   : > { %v8059_v26 = vmax.f32 %v8058_v30, %v7716_v19 }
 0xb7f   : > { %v7502_v48 = vpop.f32.mrf.mxu3 }
 0xb80   : > { %v7503_v63 = vadd.f32 %v7502_v48, %v15099_v8  ;;  %v8060_v52 = vrot.slane %v8059_v26, 4 }
 0xb82   : > { %v7971_v5 = vmax.f32 %v7970_v14, %v7503_v63  ;;  %v8061_v54 = vmax.f32 %v8059_v26, %v8060_v52  ;;  %v7610_v26 = vadd.f32 %v15156_v60, %v15000_v59 }
 0xb83   : > { %v7727_v17 = vpop.f32.mrf.mxu0 }
 0xb84   : > { %v7728_v43 = vadd.f32 %v7727_v17, %v15011_v23  ;;  %v8062_v25 = vrot.slane %v8061_v54, 2  ;;  %v8015_v17 = vmax.f32 %v8014_v45, %v7610_v26  ;;  %v7625_v45 = vadd.f32 %v15185_v32, %v15000_v59 }
 0xb86   : > { %v8063_v9 = vmax.f32 %v8061_v54, %v8062_v25 }
 0xb87   : > { %v7505_v15 = vpop.f32.mrf.mxu3 }
 0xb88   : > { %v7506_v10 = vadd.f32 %v7505_v15, %v15099_v8  ;;  %v8064_v14 = vrot.slane %v8063_v9, 1 }
 0xb8a   : > { %v7972_v24 = vmax.f32 %v7971_v5, %v7506_v10  ;;  %v8065_v57 = vmax.f32 %v8063_v9, %v8064_v14  ;;  %v7612_v5 = vadd.f32 %v15162_v47, %v15000_v59  ;;  %v7622_v47 = vadd.f32 %v15177_v34, %v15000_v59 }
 0xb8b   : > { %v7729_v13 = vpop.f32.mrf.mxu0 }
 0xb8c   : > { %v7730_v51 = vadd.f32 %v7729_v13, %v15011_v23  ;;  %v8117_v20 = vrot.slane %v8065_v57, 2  ;;  %v8016_v56 = vmax.f32 %v8015_v17, %v7612_v5 }
 0xb8e   : > { %v8066_v3 = vmax.f32 %v7728_v43, %v7730_v51  ;;  %v8017_v52 = vmax.f32 %v8016_v56, %v7615_v44 }
 0xb8f   : > { %v7507_v27 = vpop.f32.mrf.mxu3 }
 0xb90   : > { %v8096_v0 = vmax.f32 %v8095_v40, %v8066_v3  ;;  %v7508_v6 = vadd.f32 %v7507_v27, %v15099_v8  ;;  %v8018_v15 = vmax.f32 %v8017_v52, %v7617_v29 }
 0xb92   : > { %v7973_v37 = vmax.f32 %v7972_v24, %v7508_v6  ;;  %v8097_v16 = vrot.slane %v8096_v0, 4  ;;  %v8019_v1 = vmax.f32 %v8018_v15, %v7620_v53 }
 0xb94   : > { %v8098_v2 = vmax.f32 %v8096_v0, %v8097_v16  ;;  %v8020_v28 = vmax.f32 %v8019_v1, %v7622_v47 }
 0xb96   : > { %v8099_v12 = vrot.slane %v8098_v2, 2  ;;  %v8021_v42 = vmax.f32 %v8020_v28, %v7625_v45 }
 0xb97   : > { %v7510_v31 = vpop.f32.mrf.mxu3 }
 0xb98   : > { %v7511_v49 = vadd.f32 %v7510_v31, %v15099_v8  ;;  %v8100_v21 = vmax.f32 %v8098_v2, %v8099_v12  ;;  %v8022_v24 = vmax.f32 %v8021_v42, %v7627_v46 }
 0xb9a   : > { %v7974_v18 = vmax.f32 %v7973_v37, %v7511_v49  ;;  %v8101_v23 = vrot.slane %v8100_v21, 1  ;;  %v8023_v40 = vrot.slane %v8022_v24, 4 }
 0xb9c   : > { %v8102_v35 = vmax.f32 %v8100_v21, %v8101_v23  ;;  %v8024_v27 = vmax.f32 %v8022_v24, %v8023_v40 }
 0xb9e   : > { %v8118_v62 = vrot.slane %v8102_v35, 1  ;;  %v8025_v16 = vrot.slane %v8024_v27, 2 }
 0xb9f   : > { %v7512_v19 = vpop.f32.mrf.mxu3 }
 0xba0   : > { %v15219_v48 = vsel %vm8127_vm13, %v8117_v20, %v8118_v62  ;;  %v7513_v60 = vadd.f32 %v7512_v19, %v15099_v8  ;;  %v8026_v31 = vmax.f32 %v8024_v27, %v8025_v16 }
 0xba2   : > { %v7975_v4 = vmax.f32 %v7974_v18, %v7513_v60  ;;  %v8027_v57 = vrot.slane %v8026_v31, 1 }
 0xba4   : > { %v8028_v35 = vmax.f32 %v8026_v31, %v8027_v57 }
 0xba6   : > { %v8116_v19 = vrot.slane %v8028_v35, 3 }
 0xba7   : > { %v7515_v11 = vpop.f32.mrf.mxu3 }
 0xba8   : > { %v7516_v38 = vadd.f32 %v7515_v11, %v15099_v8 }
 0xbaa   : > { %v7976_v10 = vmax.f32 %v7975_v4, %v7516_v38 }
 0xbaf   : > { %v7517_v33 = vpop.f32.mrf.mxu3 }
 0xbb0   : > { %v7518_v55 = vadd.f32 %v7517_v33, %v15099_v8  ;;  %v8103_v33 = vld [vmem:[#allocation2] sm:$0xff] }
 0xbb2   : > { %v7977_v54 = vmax.f32 %v7976_v10, %v7518_v55 }
 0xbb7   : > { %v7520_v30 = vpop.f32.mrf.mxu3 }
 0xbb8   : > { %v7521_v58 = vadd.f32 %v7520_v30, %v15099_v8 }
 0xbba   : > { %v7978_v13 = vmax.f32 %v7977_v54, %v7521_v58 }
 0xbbf   : > { %v7522_v63 = vpop.f32.mrf.mxu3 }
 0xbc0   : > { %v7523_v34 = vadd.f32 %v7522_v63, %v15099_v8 }
 0xbc2   : > { %v7979_v32 = vmax.f32 %v7978_v13, %v7523_v34 }
 0xbc7   : > { %v7525_v50 = vpop.f32.mrf.mxu3 }
 0xbc8   : > { %v7526_v39 = vadd.f32 %v7525_v50, %v15099_v8 }
 0xbca   : > { %v7980_v25 = vmax.f32 %v7979_v32, %v7526_v39 }
 0xbcf   : > { %v7527_v61 = vpop.f32.mrf.mxu3 }
 0xbd0   : > { %v7528_v43 = vadd.f32 %v7527_v61, %v15099_v8 }
 0xbd2   : > { %v7981_v59 = vmax.f32 %v7980_v25, %v7528_v43 }
 0xbd7   : > { %v7530_v36 = vpop.f32.mrf.mxu3 }
 0xbd8   : > { %v7531_v3 = vadd.f32 %v7530_v36, %v15099_v8 }
 0xbda   : > { %v7982_v0 = vmax.f32 %v7981_v59, %v7531_v3 }
 0xbdf   : > { %v7532_v41 = vpop.f32.mrf.mxu3 }
 0xbe0   : > { %v7533_v22 = vadd.f32 %v7532_v41, %v15099_v8 }
 0xbe2   : > { %v7983_v9 = vmax.f32 %v7982_v0, %v7533_v22 }
 0xbe7   : > { %v7535_v51 = vpop.f32.mrf.mxu3 }
 0xbe8   : > { %v7536_v6 = vadd.f32 %v7535_v51, %v15099_v8 }
 0xbea   : > { %v7984_v2 = vmax.f32 %v7983_v9, %v7536_v6 }
 0xbef   : > { %v7537_v37 = vpop.f32.mrf.mxu3 }
 0xbf0   : > { %v7538_v14 = vadd.f32 %v7537_v37, %v15099_v8 }
 0xbf2   : > { %v7985_v12 = vmax.f32 %v7984_v2, %v7538_v14 }
 0xbf4   : > { %v7986_v49 = vrot.slane %v7985_v12, 4 }
 0xbf6   : > { %v7987_v21 = vmax.f32 %v7985_v12, %v7986_v49 }
 0xbf8   : > { %v7988_v18 = vrot.slane %v7987_v21, 2 }
 0xbfa   : > { %v7989_v23 = vmax.f32 %v7987_v21, %v7988_v18 }
 0xbfc   : > { %v7990_v20 = vrot.slane %v7989_v23, 1 }
 0xbfe   : > { %v7991_v62 = vmax.f32 %v7989_v23, %v7990_v20 }
 0xc00   : > { %v8115_v11 = vrot.slane %v7991_v62, 4 }
 0xc02   : > { %v8126_v30 = vsel %vm8125_vm14, %v8115_v11, %v8116_v19 }
 0xc03   : > { %v8130_v63 = vsel %vm8129_vm15, %v8126_v30, %v15219_v48  ;;  %8139 = sbr.rel (%p10335_p10) target bundleno = 3088 (0xc10), region = 128 }
 0xc04   : > { %v8132_v8 = vsel %vm8131_vm0, %v15106_v7, %v8130_v63 }
 0xc05   : > { %v8134_v50 = vmax.f32 %v8103_v33, %v8132_v8 }
 0xc07   : > { %8135 = vst [vmem:[#allocation2] sm:$0xff] %v8134_v50 }
 0xc0e   : > { %v8140_v61 = vld [vmem:[#allocation2] sm:$0xff] }
 0xc0f   : > { %8141 = vst [vmem:[%s11569_s21] sm:$0xff] %v8140_v61 }
 0xc10 PF: > { %s10337_s3 = sshll.u32 %s11297_s25, 3  ;;  %s15515_s27 = sld [smem:[#allocation68_spill]] }
 0xc11   : > { %s8159_s26 = sshll.u32 %s11569_s21, 4  ;;  %s8143_s24 = scalar_lea.sflag [#allocation6], %s11558_s9  ;;  %s8160_s26 = int_to_ptr.vmem [resolvable:$true] %s8159_s26 }
 0xc16   : > { %s15516_s20 = smov %s15515_s27  ;;  %s8157_s28 = scalar_lea.hbm %s15515_s27, %s10337_s3 }
 0xc17   : > { %s8161_s1 = sshll.u32 %s8157_s28, 4  ;;  %s11183_s4 = scalar_lea.hbm %s15516_s20, 16  ;;  %s8162_s1 = int_to_ptr.hbm [resolvable:$true] %s8161_s1 }
 0xc18   : > { %s11177_s13 = sshra.s32 %s8162_s1, 4  ;;  %s11178_s13 = int_to_ptr.hbm [resolvable:$true] %s11177_s13 }
 0xc19   : > { %s11179_s14 = scalar_lea.hbm %s11178_s13, 8  ;;  %p11184_p0 = scmp.lt.s32.totalorder %s11178_s13, %s15516_s20 }
 0xc1a   : > { %p11180_p11 = scmp.ne.s32.totalorder %s11178_s13, %s11179_s14  ;;  %p11185_p1 = scmp.lt.s32.totalorder %s11183_s4, %s11179_s14 }
 0xc1c   : > { %p11181_p12 = pnand %p11180_p11, %p11496_p6  ;;  %p11186_p2 = por %p11185_p1, %p11184_p0 }
 0xc1e   : > { %p11182_p13 = pneg %p11181_p12 }
 0xc20   : > { %p11187_p3 = pnand %p11186_p2, %p11182_p13 }
 0xc22   : > { %11190 = shalt.err (!%p11187_p3)
}
 0xc23   : > { %10873 = dma.vmem_to_hbm [thread:$0]  (%p11496_p6), %s8160_s26, 128, %s8162_s1, %s8143_s24  }
 0xc24   : > { %s15517_s2 = sld [smem:[#allocation69_spill]]  ;;  %s15519_s0 = scalar_lea.vmem [#allocation11], %s11558_s9 }
 0xc25   : > { %s8172_s23 = sshll.u32 %s15519_s0, 4  ;;  %s8148_s6 = scalar_lea.sflag [#allocation12], %s11558_s9  ;;  %s8173_s23 = int_to_ptr.vmem [resolvable:$true] %s8172_s23 }
 0xc2a   : > { %s15518_s7 = smov %s15517_s2  ;;  %s8170_s29 = scalar_lea.hbm %s15517_s2, %s11297_s25 }
 0xc2b   : > { %s8174_s5 = sshll.u32 %s8170_s29, 4  ;;  %s11211_s26 = scalar_lea.hbm %s15518_s7, 2  ;;  %s8175_s5 = int_to_ptr.hbm [resolvable:$true] %s8174_s5 }
 0xc2c   : > { %s11205_s4 = sshra.s32 %s8175_s5, 4  ;;  %s11206_s4 = int_to_ptr.hbm [resolvable:$true] %s11205_s4 }
 0xc2d   : > { %s11207_s27 = scalar_lea.hbm %s11206_s4, 1  ;;  %p11212_p9 = scmp.lt.s32.totalorder %s11206_s4, %s15518_s7 }
 0xc2e   : > { %p11208_p4 = scmp.ne.s32.totalorder %s11206_s4, %s11207_s27  ;;  %p11213_p10 = scmp.lt.s32.totalorder %s11211_s26, %s11207_s27 }
 0xc30   : > { %p11209_p5 = pnand %p11208_p4, %p11496_p6  ;;  %p11214_p11 = por %p11213_p10, %p11212_p9 }
 0xc32   : > { %p11210_p7 = pneg %p11209_p5 }
 0xc34   : > { %p11215_p12 = pnand %p11214_p11, %p11210_p7 }
 0xc36   : > { %11218 = shalt.err (!%p11215_p12)
}
 0xc37   : > { %10874 = dma.vmem_to_hbm [thread:$0]  (%p11496_p6), %s8173_s23, 16, %s8175_s5, %s8148_s6  }
 0xc38 PF: > { %s15520_s25 = sld [smem:[#allocation22_spill]] }
 0xc39   : > { %s15521_s9 = sld [smem:[#allocation17_spill]] }
 0xc3e   : > { %p10900_p13 = scmp.ge.s32.totalorder %s15520_s25, 2 }
 0xc3f   : > { %s8186_s21 = sand.u32 1, %s15521_s9  }
 0xc40   : > { %p10888_p0 = pnand %p10900_p13, %p11504_p8  ;;  %s8187_s3 = scalar_lea.sflag [#allocation6], %s8186_s21 }
 0xc42   : > { %p10889_p1 = pneg %p10888_p0 }
 0xc44   : > { %11268 = dma.done.wait (%p10889_p1), %s8187_s3, 128  }
 0xc45   : > { %11270 = vsyncadd (%p10889_p1), %s8187_s3, 4294967168  ;;  %s8197_s2 = scalar_lea.sflag [#allocation12], %s8186_s21 }
 0xc46   : > { %11272 = dma.done.wait (%p10889_p1), %s8197_s2, 16  }
 0xc47   : > { %11274 = vsyncadd (%p10889_p1), %s8197_s2, 4294967280  ;;  %s39_s28 = sadd.s32 1, %s15520_s25   ;;  %s15523_s18 = sld [smem:[#allocation18_spill]] }
 0xc48   : > { %p36_p2 = scmp.ge.s32.totalorder %s39_s28, 18   ;;  %s15524_s23 = sld [smem:[#allocation28_spill]] }
 0xc49   : > { %s15525_s24 = sld [smem:[#allocation19_spill]]  ;;  %s15531_s1 = smov %s11281_s22 }
 0xc4a   : > { %s15526_s2 = sld [smem:[#allocation20_spill]]  ;;  %38 = sbr.rel (!%p36_p2) target bundleno = 27 (0x1b), region = 181 }
 0xc4b   : > { %s15527_s25 = sld [smem:[#allocation21_spill]] }
 0xc4c   : > { %s15528_s3 = sld [smem:[#allocation23_spill]] }
 0xc4d   : > { %s15529_s26 = sld [smem:[#allocation25_spill]]  ;;  %s15532_s22 = smov %s15523_s18 }
 0xc4e   : > { %s15530_s27 = sld [smem:[#allocation27_spill]] }
 0xc4f   :  { %8202 = vsyncpa [#allocation5], 1 }
 0xc50   :  { %8204 = vsyncpa [#allocation5 + $0x1], 1 }
 0xc51   :  { %8205 = vsyncpa [#allocation8], 1 }
 0xc52   :  { %8206 = vsyncpa [#allocation6], 1 }
 0xc53   :  { %8208 = vsyncpa [#allocation6 + $0x1], 1 }
 0xc54   :  { %8209 = vsyncpa [#allocation12], 1 }
 0xc55   :  { %8211 = vsyncpa [#allocation12 + $0x1], 1 }

</bundles_post_ra>
